<compile_context>
chip_gen: v5e
topology: v5e:2x2
jax: 0.10.0
libtpu: 0.0.40
codegen_flags: <defaults>
</compile_context>

<pallas_src>
import jax
import jax.numpy as jnp
from jax.experimental import pallas as pl
from jax.experimental.pallas import tpu as pltpu


def _round_up(x, m):
    return ((x + m - 1) // m) * m


def _tensorcores_per_chip():
    # v7x has 2 TensorCores per chip; v5e/v6e have 1.
    try:
        kind = jax.devices()[0].device_kind.lower()
    except Exception:
        return 1
    return 2 if "v7" in kind else 1


def mlp_kernel(x_ref, w1_ref, b1_ref, w2_ref, b2_ref, w3_ref, b3_ref, o_ref):
    # In-kernel f32 -> bf16 cast: VPU work hidden under the (one-time) weight DMAs,
    # saves a separate XLA cast pass over x in HBM.
    x = x_ref[...].astype(w1_ref.dtype)

    # fc1 -> relu   (MXU matmul, f32 accumulate; bias added in f32)
    h1 = jnp.dot(x, w1_ref[...], preferred_element_type=jnp.float32) + b1_ref[...]
    h1 = jnp.maximum(h1, 0.0).astype(w2_ref.dtype)

    # fc2 -> relu
    h2 = jnp.dot(h1, w2_ref[...], preferred_element_type=jnp.float32) + b2_ref[...]
    h2 = jnp.maximum(h2, 0.0).astype(w3_ref.dtype)

    # fc3 (N already padded to a lane-dense multiple of 128 by prepare_params)
    out = jnp.dot(h2, w3_ref[...], preferred_element_type=jnp.float32) + b3_ref[...]
    o_ref[...] = out.astype(o_ref.dtype)


def prepare_params(params, *, compute_dtype=jnp.bfloat16):
    """One-time parameter prep: bf16 weight casts + lane-dense fc3 padding.

    Hoisted out of the per-call path so repeated forward calls do not
    re-materialize padded / cast copies of the weights in HBM.
    """
    w1, b1, w2, b2, w3, b3 = params
    hidden = w3.shape[0]
    out_features = w3.shape[1]
    out_pad = _round_up(out_features, 128)  # 128, not 256: avoid doubling the writeback
    if out_pad != out_features:
        w3 = jnp.zeros((hidden, out_pad), w3.dtype).at[:, :out_features].set(w3)
        b3 = jnp.zeros((1, out_pad), b3.dtype).at[:, :out_features].set(b3)
    w1c, w2c, w3c = (w.astype(compute_dtype) for w in (w1, w2, w3))
    b1f, b2f, b3f = (b.astype(jnp.float32) for b in (b1, b2, b3))
    return dict(
        w1=w1c, b1=b1f, w2=w2c, b2=b2f, w3=w3c, b3=b3f,
        out_features=out_features, out_pad=out_pad,
    )


def mlp_forward(x_nchw, prepared, *, tm=None):
    w1, b1 = prepared["w1"], prepared["b1"]
    w2, b2 = prepared["w2"], prepared["b2"]
    w3, b3 = prepared["w3"], prepared["b3"]
    out_features, out_pad = prepared["out_features"], prepared["out_pad"]

    B = x_nchw.shape[0]
    in_features = w1.shape[0]
    hidden = w1.shape[1]

    # Flatten NCHW -> (B, C*H*W); same row-major ordering as nn.Flatten on NCHW.
    # No cast and no batch padding here (removed per perf review).
    x_flat = x_nchw.reshape(B, -1)
    assert x_flat.shape[1] == in_features

    # Batch tile per generation: single TC -> whole batch in one grid step;
    # dual TC (v7x) -> 128-row tiles so the "parallel" grid feeds both cores.
    if tm is None:
        tm = 128 if _tensorcores_per_chip() >= 2 else min(_round_up(B, 8), 1024)
    tm = max(8, min(_round_up(tm, 8), _round_up(B, 8)))
    grid = (pl.cdiv(B, tm),)

    # VMEM budget from actual buffers: x/out tiles double-buffered across the batch
    # grid, weights/biases single-buffered (constant index_map), plus generous
    # headroom for sublane padding of the (1,N) biases and Mosaic internal scratch.
    wsz = jnp.dtype(w1.dtype).itemsize
    vmem_bytes = (
        2 * tm * in_features * 4                                    # x tile (f32, double buffered)
        + 2 * tm * out_pad * 4                                      # out tile (f32, double buffered)
        + (in_features * hidden + hidden * hidden + hidden * out_pad) * wsz  # resident weights
        + 8 * (2 * hidden + out_pad) * 4                            # biases (8-sublane padded)
    )
    vmem_limit = int(min(vmem_bytes + (8 << 20), 48 << 20))

    def build_call(resident_kwargs):
        in_specs = [
            pl.BlockSpec((tm, in_features), lambda i: (i, 0)),                       # x: batch-tiled
            pl.BlockSpec((in_features, hidden), lambda i: (0, 0), **resident_kwargs),  # w1: resident
            pl.BlockSpec((1, hidden), lambda i: (0, 0), **resident_kwargs),            # b1
            pl.BlockSpec((hidden, hidden), lambda i: (0, 0), **resident_kwargs),       # w2
            pl.BlockSpec((1, hidden), lambda i: (0, 0), **resident_kwargs),            # b2
            pl.BlockSpec((hidden, out_pad), lambda i: (0, 0), **resident_kwargs),      # w3 (padded)
            pl.BlockSpec((1, out_pad), lambda i: (0, 0), **resident_kwargs),           # b3 (padded)
        ]
        return pl.pallas_call(
            mlp_kernel,
            out_shape=jax.ShapeDtypeStruct((B, out_pad), jnp.float32),
            grid=grid,
            in_specs=in_specs,
            out_specs=pl.BlockSpec((tm, out_pad), lambda i: (i, 0)),
            compiler_params=pltpu.CompilerParams(
                dimension_semantics=("parallel",),
                vmem_limit_bytes=vmem_limit,
            ),
        )

    args = (x_flat, w1, b1, w2, b2, w3, b3)
    try:
        # Constant-index operands: single VMEM buffer (they are DMA'd once).
        out_padded = build_call({"pipeline_mode": pl.Buffered(1)})(*args)
    except Exception:
        # Fallback for jax versions that reject single-buffered pipeline_mode:
        # default double buffering only costs ~0.6 MB extra VMEM at these shapes.
        out_padded = build_call({})(*args)

    return out_padded[:, :out_features]


def init_params(key, input_size, hidden_size, output_size):
    # Deterministic init mimicking nn.Linear's uniform(-1/sqrt(fan_in), 1/sqrt(fan_in)).
    def linear(k, fan_in, fan_out):
        kw, kb = jax.random.split(k)
        bound = 1.0 / jnp.sqrt(fan_in)
        w = jax.random.uniform(kw, (fan_in, fan_out), jnp.float32, -bound, bound)
        b = jax.random.uniform(kb, (1, fan_out), jnp.float32, -bound, bound)
        return w, b

    k1, k2, k3 = jax.random.split(key, 3)
    w1, b1 = linear(k1, input_size, hidden_size)
    w2, b2 = linear(k2, hidden_size, hidden_size)
    w3, b3 = linear(k3, hidden_size, output_size)
    return (w1, b1, w2, b2, w3, b3)


if __name__ == "__main__":
    # Small shapes consistent with the module: NCHW image -> flatten -> MLP.
    # B=200 (multiple of 8, not of 128) exercises the single-step path on v5e/v6e
    # and the 2-step "parallel" path (with a partial last tile) on v7x.
    B, C, H, W = 200, 3, 16, 16
    input_size = C * H * W            # 768 = 6 * 128
    hidden_size = 256
    output_size = 3

    key = jax.random.PRNGKey(0)
    kx, kp = jax.random.split(key)
    x = jax.random.normal(kx, (B, C, H, W), dtype=jnp.float32)
    params = init_params(kp, input_size, hidden_size, output_size)

    prepared = prepare_params(params)   # one-time: bf16 casts + fc3 lane padding
    out = mlp_forward(x, prepared)
    jax.block_until_ready(out)
    assert out.shape == (B, output_size)

    # Reference in plain JAX following the same bf16-input / f32-accumulate path
    # (bf16 is a deliberate numerics change vs the f32 PyTorch module).
    w1, b1, w2, b2, w3, b3 = params
    xf = x.reshape(B, -1).astype(jnp.bfloat16)
    w1b, w2b, w3b = (w.astype(jnp.bfloat16) for w in (w1, w2, w3))
    r1 = jnp.maximum(jnp.dot(xf, w1b, preferred_element_type=jnp.float32) + b1, 0.0)
    r1 = r1.astype(jnp.bfloat16)
    r2 = jnp.maximum(jnp.dot(r1, w2b, preferred_element_type=jnp.float32) + b2, 0.0)
    r2 = r2.astype(jnp.bfloat16)
    ref = jnp.dot(r2, w3b, preferred_element_type=jnp.float32) + b3

    assert jnp.allclose(out, ref, atol=1e-2, rtol=1e-2), (
        float(jnp.max(jnp.abs(out - ref)))
    )

    print("KERNEL_OK")
</pallas_src>

<mosaic_0001>
module attributes {stable_mosaic.version = 11 : i64} {
  func.func @mlp_kernel(%arg0: i32, %arg1: memref<200x768xf32, #tpu.memory_space<vmem>>, %arg2: memref<768x256xbf16, #tpu.memory_space<vmem>>, %arg3: memref<1x256xf32, #tpu.memory_space<vmem>>, %arg4: memref<256x256xbf16, #tpu.memory_space<vmem>>, %arg5: memref<1x256xf32, #tpu.memory_space<vmem>>, %arg6: memref<256x128xbf16, #tpu.memory_space<vmem>>, %arg7: memref<1x128xf32, #tpu.memory_space<vmem>>, %arg8: memref<200x128xf32, #tpu.memory_space<vmem>>) attributes {dimension_semantics = [#tpu.dimension_semantics<parallel>], iteration_bounds = array<i64: 1>, scalar_prefetch = 0 : i64, scratch_operands = 0 : i64, tpu.core_type = #tpu.core_type<tc>, window_params = [{transform_indices = @transform_0, window_bounds = array<i64: 200, 768>}, {pipeline_mode = #tpu.pipeline_mode<synchronous>, transform_indices = @transform_1, window_bounds = array<i64: 768, 256>}, {pipeline_mode = #tpu.pipeline_mode<synchronous>, transform_indices = @transform_2, window_bounds = array<i64: 1, 256>}, {pipeline_mode = #tpu.pipeline_mode<synchronous>, transform_indices = @transform_3, window_bounds = array<i64: 256, 256>}, {pipeline_mode = #tpu.pipeline_mode<synchronous>, transform_indices = @transform_4, window_bounds = array<i64: 1, 256>}, {pipeline_mode = #tpu.pipeline_mode<synchronous>, transform_indices = @transform_5, window_bounds = array<i64: 256, 128>}, {pipeline_mode = #tpu.pipeline_mode<synchronous>, transform_indices = @transform_6, window_bounds = array<i64: 1, 128>}, {transform_indices = @transform_7, window_bounds = array<i64: 200, 128>}]} {
    %c0 = arith.constant 0 : index
    %c0_0 = arith.constant 0 : index
    %0 = vector.load %arg1[%c0, %c0_0] : memref<200x768xf32, #tpu.memory_space<vmem>>, vector<200x768xf32>
    %1 = arith.truncf %0 : vector<200x768xf32> to vector<200x768xbf16>
    %c0_1 = arith.constant 0 : index
    %c0_2 = arith.constant 0 : index
    %2 = vector.load %arg2[%c0_1, %c0_2] : memref<768x256xbf16, #tpu.memory_space<vmem>>, vector<768x256xbf16>
    %cst = arith.constant dense<0.000000e+00> : vector<200x256xf32>
    %3 = tpu.matmul %1, %2, %cst {dimension_numbers = #tpu.dot_dimension_numbers<[1], [0], [0], [1], [0, 0, 1, 1], [], []>} : vector<200x768xbf16>, vector<768x256xbf16>, vector<200x256xf32> -> vector<200x256xf32>
    %c0_3 = arith.constant 0 : index
    %c0_4 = arith.constant 0 : index
    %4 = vector.load %arg3[%c0_3, %c0_4] : memref<1x256xf32, #tpu.memory_space<vmem>>, vector<1x256xf32>
    %5 = vector.broadcast %4 : vector<1x256xf32> to vector<200x256xf32>
    %6 = arith.addf %3, %5 : vector<200x256xf32>
    %cst_5 = arith.constant 0.000000e+00 : f32
    %7 = vector.broadcast %cst_5 : f32 to vector<200x256xf32>
    %8 = arith.maximumf %6, %7 : vector<200x256xf32>
    %9 = arith.truncf %8 : vector<200x256xf32> to vector<200x256xbf16>
    %c0_6 = arith.constant 0 : index
    %c0_7 = arith.constant 0 : index
    %10 = vector.load %arg4[%c0_6, %c0_7] : memref<256x256xbf16, #tpu.memory_space<vmem>>, vector<256x256xbf16>
    %cst_8 = arith.constant dense<0.000000e+00> : vector<200x256xf32>
    %11 = tpu.matmul %9, %10, %cst_8 {dimension_numbers = #tpu.dot_dimension_numbers<[1], [0], [0], [1], [0, 0, 1, 1], [], []>} : vector<200x256xbf16>, vector<256x256xbf16>, vector<200x256xf32> -> vector<200x256xf32>
    %c0_9 = arith.constant 0 : index
    %c0_10 = arith.constant 0 : index
    %12 = vector.load %arg5[%c0_9, %c0_10] : memref<1x256xf32, #tpu.memory_space<vmem>>, vector<1x256xf32>
    %13 = vector.broadcast %12 : vector<1x256xf32> to vector<200x256xf32>
    %14 = arith.addf %11, %13 : vector<200x256xf32>
    %cst_11 = arith.constant 0.000000e+00 : f32
    %15 = vector.broadcast %cst_11 : f32 to vector<200x256xf32>
    %16 = arith.maximumf %14, %15 : vector<200x256xf32>
    %17 = arith.truncf %16 : vector<200x256xf32> to vector<200x256xbf16>
    %c0_12 = arith.constant 0 : index
    %c0_13 = arith.constant 0 : index
    %18 = vector.load %arg6[%c0_12, %c0_13] : memref<256x128xbf16, #tpu.memory_space<vmem>>, vector<256x128xbf16>
    %cst_14 = arith.constant dense<0.000000e+00> : vector<200x128xf32>
    %19 = tpu.matmul %17, %18, %cst_14 {dimension_numbers = #tpu.dot_dimension_numbers<[1], [0], [0], [1], [0, 0, 1, 1], [], []>} : vector<200x256xbf16>, vector<256x128xbf16>, vector<200x128xf32> -> vector<200x128xf32>
    %c0_15 = arith.constant 0 : index
    %c0_16 = arith.constant 0 : index
    %20 = vector.load %arg7[%c0_15, %c0_16] : memref<1x128xf32, #tpu.memory_space<vmem>>, vector<1x128xf32>
    %21 = vector.broadcast %20 : vector<1x128xf32> to vector<200x128xf32>
    %22 = arith.addf %19, %21 : vector<200x128xf32>
    %c0_17 = arith.constant 0 : index
    %c0_18 = arith.constant 0 : index
    %23 = vector.load %arg8[%c0_17, %c0_18] : memref<200x128xf32, #tpu.memory_space<vmem>>, vector<200x128xf32>
    tpu.vector_store %arg8[%c0_17, %c0_18], %22 {strides = array<i32>} : memref<200x128xf32, #tpu.memory_space<vmem>>, vector<200x128xf32>,
    return
  }
  func.func @transform_0(%arg0: i32) -> (i32, i32) {
    %c0_i32 = arith.constant 0 : i32
    %c0_i32_0 = arith.constant 0 : i32
    return %arg0, %c0_i32 : i32, i32
  }
  func.func @transform_1(%arg0: i32) -> (i32, i32) {
    %c0_i32 = arith.constant 0 : i32
    %c0_i32_0 = arith.constant 0 : i32
    %c0_i32_1 = arith.constant 0 : i32
    return %c0_i32, %c0_i32_0 : i32, i32
  }
  func.func @transform_2(%arg0: i32) -> (i32, i32) {
    %c0_i32 = arith.constant 0 : i32
    %c0_i32_0 = arith.constant 0 : i32
    %c0_i32_1 = arith.constant 0 : i32
    return %c0_i32, %c0_i32_0 : i32, i32
  }
  func.func @transform_3(%arg0: i32) -> (i32, i32) {
    %c0_i32 = arith.constant 0 : i32
    %c0_i32_0 = arith.constant 0 : i32
    %c0_i32_1 = arith.constant 0 : i32
    return %c0_i32, %c0_i32_0 : i32, i32
  }
  func.func @transform_4(%arg0: i32) -> (i32, i32) {
    %c0_i32 = arith.constant 0 : i32
    %c0_i32_0 = arith.constant 0 : i32
    %c0_i32_1 = arith.constant 0 : i32
    return %c0_i32, %c0_i32_0 : i32, i32
  }
  func.func @transform_5(%arg0: i32) -> (i32, i32) {
    %c0_i32 = arith.constant 0 : i32
    %c0_i32_0 = arith.constant 0 : i32
    %c0_i32_1 = arith.constant 0 : i32
    return %c0_i32, %c0_i32_0 : i32, i32
  }
  func.func @transform_6(%arg0: i32) -> (i32, i32) {
    %c0_i32 = arith.constant 0 : i32
    %c0_i32_0 = arith.constant 0 : i32
    %c0_i32_1 = arith.constant 0 : i32
    return %c0_i32, %c0_i32_0 : i32, i32
  }
  func.func @transform_7(%arg0: i32) -> (i32, i32) {
    %c0_i32 = arith.constant 0 : i32
    %c0_i32_0 = arith.constant 0 : i32
    return %arg0, %c0_i32 : i32, i32
  }
}

module attributes {stable_mosaic.version = 11 : i64} {
  func.func @mlp_kernel(%arg0: i32, %arg1: memref<200x768xf32, #tpu.memory_space<vmem>>, %arg2: memref<768x256xbf16, #tpu.memory_space<vmem>>, %arg3: memref<1x256xf32, #tpu.memory_space<vmem>>, %arg4: memref<256x256xbf16, #tpu.memory_space<vmem>>, %arg5: memref<1x256xf32, #tpu.memory_space<vmem>>, %arg6: memref<256x128xbf16, #tpu.memory_space<vmem>>, %arg7: memref<1x128xf32, #tpu.memory_space<vmem>>, %arg8: memref<200x128xf32, #tpu.memory_space<vmem>>) attributes {dimension_semantics = [#tpu.dimension_semantics<parallel>], iteration_bounds = array<i64: 1>, scalar_prefetch = 0 : i64, scratch_operands = 0 : i64, tpu.core_type = #tpu.core_type<tc>, window_params = [{transform_indices = @transform_0, window_bounds = array<i64: 200, 768>}, {pipeline_mode = #tpu.pipeline_mode<synchronous>, transform_indices = @transform_1, window_bounds = array<i64: 768, 256>}, {pipeline_mode = #tpu.pipeline_mode<synchronous>, transform_indices = @transform_2, window_bounds = array<i64: 1, 256>}, {pipeline_mode = #tpu.pipeline_mode<synchronous>, transform_indices = @transform_3, window_bounds = array<i64: 256, 256>}, {pipeline_mode = #tpu.pipeline_mode<synchronous>, transform_indices = @transform_4, window_bounds = array<i64: 1, 256>}, {pipeline_mode = #tpu.pipeline_mode<synchronous>, transform_indices = @transform_5, window_bounds = array<i64: 256, 128>}, {pipeline_mode = #tpu.pipeline_mode<synchronous>, transform_indices = @transform_6, window_bounds = array<i64: 1, 128>}, {transform_indices = @transform_7, window_bounds = array<i64: 200, 128>}]} {
    %c0 = arith.constant 0 : index
    %c0_0 = arith.constant 0 : index
    %0 = vector.load %arg1[%c0, %c0_0] : memref<200x768xf32, #tpu.memory_space<vmem>>, vector<200x768xf32>
    %1 = arith.truncf %0 : vector<200x768xf32> to vector<200x768xbf16>
    %c0_1 = arith.constant 0 : index
    %c0_2 = arith.constant 0 : index
    %2 = vector.load %arg2[%c0_1, %c0_2] : memref<768x256xbf16, #tpu.memory_space<vmem>>, vector<768x256xbf16>
    %cst = arith.constant dense<0.000000e+00> : vector<200x256xf32>
    %3 = tpu.matmul %1, %2, %cst {dimension_numbers = #tpu.dot_dimension_numbers<[1], [0], [0], [1], [0, 0, 1, 1], [], []>} : vector<200x768xbf16>, vector<768x256xbf16>, vector<200x256xf32> -> vector<200x256xf32>
    %c0_3 = arith.constant 0 : index
    %c0_4 = arith.constant 0 : index
    %4 = vector.load %arg3[%c0_3, %c0_4] : memref<1x256xf32, #tpu.memory_space<vmem>>, vector<1x256xf32>
    %5 = vector.broadcast %4 : vector<1x256xf32> to vector<200x256xf32>
    %6 = arith.addf %3, %5 : vector<200x256xf32>
    %cst_5 = arith.constant 0.000000e+00 : f32
    %7 = vector.broadcast %cst_5 : f32 to vector<200x256xf32>
    %8 = arith.maximumf %6, %7 : vector<200x256xf32>
    %9 = arith.truncf %8 : vector<200x256xf32> to vector<200x256xbf16>
    %c0_6 = arith.constant 0 : index
    %c0_7 = arith.constant 0 : index
    %10 = vector.load %arg4[%c0_6, %c0_7] : memref<256x256xbf16, #tpu.memory_space<vmem>>, vector<256x256xbf16>
    %cst_8 = arith.constant dense<0.000000e+00> : vector<200x256xf32>
    %11 = tpu.matmul %9, %10, %cst_8 {dimension_numbers = #tpu.dot_dimension_numbers<[1], [0], [0], [1], [0, 0, 1, 1], [], []>} : vector<200x256xbf16>, vector<256x256xbf16>, vector<200x256xf32> -> vector<200x256xf32>
    %c0_9 = arith.constant 0 : index
    %c0_10 = arith.constant 0 : index
    %12 = vector.load %arg5[%c0_9, %c0_10] : memref<1x256xf32, #tpu.memory_space<vmem>>, vector<1x256xf32>
    %13 = vector.broadcast %12 : vector<1x256xf32> to vector<200x256xf32>
    %14 = arith.addf %11, %13 : vector<200x256xf32>
    %cst_11 = arith.constant 0.000000e+00 : f32
    %15 = vector.broadcast %cst_11 : f32 to vector<200x256xf32>
    %16 = arith.maximumf %14, %15 : vector<200x256xf32>
    %17 = arith.truncf %16 : vector<200x256xf32> to vector<200x256xbf16>
    %c0_12 = arith.constant 0 : index
    %c0_13 = arith.constant 0 : index
    %18 = vector.load %arg6[%c0_12, %c0_13] : memref<256x128xbf16, #tpu.memory_space<vmem>>, vector<256x128xbf16>
    %cst_14 = arith.constant dense<0.000000e+00> : vector<200x128xf32>
    %19 = tpu.matmul %17, %18, %cst_14 {dimension_numbers = #tpu.dot_dimension_numbers<[1], [0], [0], [1], [0, 0, 1, 1], [], []>} : vector<200x256xbf16>, vector<256x128xbf16>, vector<200x128xf32> -> vector<200x128xf32>
    %c0_15 = arith.constant 0 : index
    %c0_16 = arith.constant 0 : index
    %20 = vector.load %arg7[%c0_15, %c0_16] : memref<1x128xf32, #tpu.memory_space<vmem>>, vector<1x128xf32>
    %21 = vector.broadcast %20 : vector<1x128xf32> to vector<200x128xf32>
    %22 = arith.addf %19, %21 : vector<200x128xf32>
    %c0_17 = arith.constant 0 : index
    %c0_18 = arith.constant 0 : index
    %23 = vector.load %arg8[%c0_17, %c0_18] : memref<200x128xf32, #tpu.memory_space<vmem>>, vector<200x128xf32>
    tpu.vector_store %arg8[%c0_17, %c0_18], %22 {strides = array<i32>} : memref<200x128xf32, #tpu.memory_space<vmem>>, vector<200x128xf32>,
    return
  }
  func.func @transform_0(%arg0: i32) -> (i32, i32) {
    %c0_i32 = arith.constant 0 : i32
    %c0_i32_0 = arith.constant 0 : i32
    return %arg0, %c0_i32 : i32, i32
  }
  func.func @transform_1(%arg0: i32) -> (i32, i32) {
    %c0_i32 = arith.constant 0 : i32
    %c0_i32_0 = arith.constant 0 : i32
    %c0_i32_1 = arith.constant 0 : i32
    return %c0_i32, %c0_i32_0 : i32, i32
  }
  func.func @transform_2(%arg0: i32) -> (i32, i32) {
    %c0_i32 = arith.constant 0 : i32
    %c0_i32_0 = arith.constant 0 : i32
    %c0_i32_1 = arith.constant 0 : i32
    return %c0_i32, %c0_i32_0 : i32, i32
  }
  func.func @transform_3(%arg0: i32) -> (i32, i32) {
    %c0_i32 = arith.constant 0 : i32
    %c0_i32_0 = arith.constant 0 : i32
    %c0_i32_1 = arith.constant 0 : i32
    return %c0_i32, %c0_i32_0 : i32, i32
  }
  func.func @transform_4(%arg0: i32) -> (i32, i32) {
    %c0_i32 = arith.constant 0 : i32
    %c0_i32_0 = arith.constant 0 : i32
    %c0_i32_1 = arith.constant 0 : i32
    return %c0_i32, %c0_i32_0 : i32, i32
  }
  func.func @transform_5(%arg0: i32) -> (i32, i32) {
    %c0_i32 = arith.constant 0 : i32
    %c0_i32_0 = arith.constant 0 : i32
    %c0_i32_1 = arith.constant 0 : i32
    return %c0_i32, %c0_i32_0 : i32, i32
  }
  func.func @transform_6(%arg0: i32) -> (i32, i32) {
    %c0_i32 = arith.constant 0 : i32
    %c0_i32_0 = arith.constant 0 : i32
    %c0_i32_1 = arith.constant 0 : i32
    return %c0_i32, %c0_i32_0 : i32, i32
  }
  func.func @transform_7(%arg0: i32) -> (i32, i32) {
    %c0_i32 = arith.constant 0 : i32
    %c0_i32_0 = arith.constant 0 : i32
    return %arg0, %c0_i32 : i32, i32
  }
}

</mosaic_0001>

<bundles_post_ra>
// kernel: tpu_custom_call.1
= control target key start
LH: loop header
LB: loop body
LE: loop exit
PB: predicated region body
PF: predicated region fallthrough
CT: control target
= control target key end

     0   :  { %12 = vsyncpa [#allocation3], 0  ;;  %s4597_s0 = inlined_call_operand.hbm [shape: f32[200,768], index: 0, kind: input, shape index: {}]   ;;  %s4598_s1 = inlined_call_operand.hbm [shape: bf16[768,256], index: 1, kind: input, shape index: {}]   ;;  %s4599_s2 = inlined_call_operand.hbm [shape: f32[1,256], index: 2, kind: input, shape index: {}]   ;;  %s4600_s3 = inlined_call_operand.hbm [shape: bf16[256,256], index: 3, kind: input, shape index: {}]   ;;  %s4601_s4 = inlined_call_operand.vmem [shape: f32[1,256], index: 4, kind: input, shape index: {}]   ;;  %s4602_s5 = inlined_call_operand.hbm [shape: bf16[256,128], index: 5, kind: input, shape index: {}]   ;;  %s4603_s6 = inlined_call_operand.vmem [shape: f32[1,128], index: 6, kind: input, shape index: {}]   ;;  %s4604_s7 = inlined_call_operand.hbm [shape: f32[200,128], index: 7, kind: output, shape index: {}]  }
   0x1   :  { %13 = vsyncpa [#allocation6], 0 }
   0x2   :  { %14 = vsyncpa [#allocation9], 0  ;;  %s33_s26 = sshll.u32 %s4598_s1, 4  ;;  %s34_s26 = int_to_ptr.hbm [resolvable:$true] %s33_s26 }
   0x3   :  { %15 = vsyncpa [#allocation4], 0  ;;  %s3657_s27 = smov [#allocation5]   ;;  %s57_s8 = sshll.u32 %s4600_s3, 4  ;;  %s58_s8 = int_to_ptr.hbm [resolvable:$true] %s57_s8 }
   0x4   :  { %s35_s28 = sshll.u32 %s3657_s27, 4  ;;  %s3658_s9 = smov 128   ;;  %s36_s28 = int_to_ptr.vmem [resolvable:$true] %s35_s28 }
   0x5   :  { %s3659_s10 = smov 8   ;;  %s3660_s11 = smov [#allocation8]  }
   0x6   :  { %41 = dma.hbm_to_vmem [thread:$0]  %s34_s26, 12288, %s36_s28, [#allocation6], %s3658_s9, %s3658_s9, %s3659_s10  }
   0x7   :  { %s59_s12 = sshll.u32 %s3660_s11, 4  ;;  %s20_s14 = sshll.u32 %s4597_s0, 4  ;;  %s60_s12 = int_to_ptr.vmem [resolvable:$true] %s59_s12  ;;  %s21_s14 = int_to_ptr.hbm [resolvable:$true] %s20_s14 }
   0x8   :  { %65 = dma.hbm_to_vmem [thread:$0]  %s58_s8, 4096, %s60_s12, [#allocation9], %s3658_s9, %s3658_s9, %s3659_s10  }
   0x9   :  { %s3661_s3 = smov [#allocation2]   ;;  %s47_s18 = sshll.u32 %s4599_s2, 4  ;;  %s48_s18 = int_to_ptr.hbm [resolvable:$true] %s47_s18 }
   0xa   :  { %s22_s15 = sshll.u32 %s3661_s3, 4  ;;  %s3662_s19 = smov 768   ;;  %s23_s15 = int_to_ptr.vmem [resolvable:$true] %s22_s15 }
   0xb   :  { %s3663_s20 = smov 48   ;;  %s3664_s21 = smov [#allocation7]  }
   0xc   :  { %28 = dma.hbm_to_vmem [thread:$0]  %s21_s14, 19200, %s23_s15, [#allocation3], %s3662_s19, %s3662_s19, %s3663_s20  }
   0xd   :  { %s49_s22 = sshll.u32 %s3664_s21, 4  ;;  %s72_s24 = sshll.u32 %s4602_s5, 4  ;;  %s50_s22 = int_to_ptr.vmem [resolvable:$true] %s49_s22  ;;  %s73_s24 = int_to_ptr.hbm [resolvable:$true] %s72_s24 }
   0xe   :  { %52 = dma.hbm_to_vmem [thread:$0]  %s48_s18, 32, %s50_s22, [#allocation6]  }
   0xf   :  { %s3665_s25 = smov [#allocation10]   ;;  %s3666_s27 = smov 64  }
  0x10   :  { %s74_s26 = sshll.u32 %s3665_s25, 4  ;;  %s3667_s28 = smov 4   ;;  %s75_s26 = int_to_ptr.vmem [resolvable:$true] %s74_s26 }
  0x11   :  { %80 = dma.hbm_to_vmem [thread:$0]  %s73_s24, 2048, %s75_s26, [#allocation9], %s3666_s27, %s3666_s27, %s3667_s28  }
  0x12   :  { %3649 = dma.done.wait [#allocation3], 19200  }
  0x13   :  { %3650 = vsyncadd [#allocation3], 4294948096 }
  0x14   :  { %3651 = dma.done.wait [#allocation6], 12320  }
  0x15   :  { %3652 = vsyncadd [#allocation6], 4294954976 }
  0x16   :  { %3653 = dma.done.wait [#allocation9], 6144  }
  0x17   :  { %3654 = vsyncadd [#allocation9], 4294961152  ;;  %v2813_v0 = vld [vmem:[#allocation5 + $0x70] sm:$0xf]  ;;  %v3346_v1 = vld [vmem:[#allocation5 + $0x74] sm:$0xf0] }
  0x18   :  { %v2877_v2 = vld [vmem:[#allocation5 + $0xf0] sm:$0xf]  ;;  %v2814_v3 = vor.u32 %v3346_v1, %v2813_v0  ;;  %v3362_v4 = vld [vmem:[#allocation5 + $0xf4] sm:$0xf0]  ;;  %v2805_v5 = vld [vmem:[#allocation5 + $0x60] sm:$0xf] }
  0x19   :  { %v3344_v6 = vld [vmem:[#allocation5 + $0x64] sm:$0xf0]  ;;  %v2878_v7 = vor.u32 %v3362_v4, %v2877_v2  ;;  %v2869_v8 = vld [vmem:[#allocation5 + $0xe0] sm:$0xf]  ;;  %v2797_v12 = vld [vmem:[#allocation5 + $0x50] sm:$0xf] }
  0x1a   :  { %v3360_v9 = vld [vmem:[#allocation5 + $0xe4] sm:$0xf0]  ;;  %913 = vmatpush.bf16.msra.mxu0 %v2814_v3  ;;  %3475 = vmatpush.bf16.msra.mxu2 %v2814_v3  ;;  %v2806_v10 = vor.u32 %v3344_v6, %v2805_v5  ;;  %v3342_v13 = vld [vmem:[#allocation5 + $0x54] sm:$0xf0]  ;;  %v2861_v14 = vld [vmem:[#allocation5 + $0xd0] sm:$0xf] }
  0x1b   :  { %3483 = vmatpush.bf16.msra.mxu3 %v2878_v7  ;;  %986 = vmatpush.bf16.msra.mxu1 %v2878_v7  ;;  %v2870_v11 = vor.u32 %v3360_v9, %v2869_v8  ;;  %v3358_v15 = vld [vmem:[#allocation5 + $0xd4] sm:$0xf0]  ;;  %v2798_v16 = vor.u32 %v3342_v13, %v2797_v12  ;;  %v2789_v18 = vld [vmem:[#allocation5 + $0x40] sm:$0xf]  ;;  %v3340_v19 = vld [vmem:[#allocation5 + $0x44] sm:$0xf0] }
  0x1c   :  { %v2862_v17 = vor.u32 %v3358_v15, %v2861_v14  ;;  %v2853_v20 = vld [vmem:[#allocation5 + $0xc0] sm:$0xf]  ;;  %v3356_v21 = vld [vmem:[#allocation5 + $0xc4] sm:$0xf0]  ;;  %v2790_v22 = vor.u32 %v3340_v19, %v2789_v18  ;;  %v2781_v24 = vld [vmem:[#allocation5 + $0x30] sm:$0xf] }
  0x1d   :  { %v2854_v23 = vor.u32 %v3356_v21, %v2853_v20  ;;  %v3338_v25 = vld [vmem:[#allocation5 + $0x34] sm:$0xf0]  ;;  %v2845_v26 = vld [vmem:[#allocation5 + $0xb0] sm:$0xf]  ;;  %v2773_v30 = vld [vmem:[#allocation5 + $0x20] sm:$0xf] }
  0x1e   :  { %914 = vmatpush.bf16.msra.mxu0 %v2806_v10  ;;  %3476 = vmatpush.bf16.msra.mxu2 %v2806_v10  ;;  %v3354_v27 = vld [vmem:[#allocation5 + $0xb4] sm:$0xf0]  ;;  %v2782_v28 = vor.u32 %v3338_v25, %v2781_v24  ;;  %v3336_v31 = vld [vmem:[#allocation5 + $0x24] sm:$0xf0]  ;;  %v2837_v32 = vld [vmem:[#allocation5 + $0xa0] sm:$0xf] }
  0x1f   :  { %3484 = vmatpush.bf16.msra.mxu3 %v2870_v11  ;;  %987 = vmatpush.bf16.msra.mxu1 %v2870_v11  ;;  %v2846_v29 = vor.u32 %v3354_v27, %v2845_v26  ;;  %v3352_v33 = vld [vmem:[#allocation5 + $0xa4] sm:$0xf0]  ;;  %v2774_v34 = vor.u32 %v3336_v31, %v2773_v30  ;;  %v2765_v36 = vld [vmem:[#allocation5 + $0x10] sm:$0xf]  ;;  %v3334_v37 = vld [vmem:[#allocation5 + $0x14] sm:$0xf0] }
  0x20   :  { %v2838_v35 = vor.u32 %v3352_v33, %v2837_v32  ;;  %v2829_v38 = vld [vmem:[#allocation5 + $0x90] sm:$0xf]  ;;  %v3350_v39 = vld [vmem:[#allocation5 + $0x94] sm:$0xf0]  ;;  %v2766_v40 = vor.u32 %v3334_v37, %v2765_v36  ;;  %v2757_v41 = vld [vmem:[#allocation5] sm:$0xf] }
  0x21   :  { %v2830_v42 = vor.u32 %v3350_v39, %v2829_v38  ;;  %v3332_v43 = vld [vmem:[#allocation5 + $0x4] sm:$0xf0]  ;;  %v2821_v44 = vld [vmem:[#allocation5 + $0x80] sm:$0xf]  ;;  %v103_v46 = vld [vmem:[#allocation2] sm:$0xff]  ;;  %s2740_s12 = sshll.u32 %s4604_s7, 4  ;;  %s2741_s12 = int_to_ptr.hbm [resolvable:$true] %s2740_s12 }
  0x22   :  { %915 = vmatpush.bf16.msra.mxu0 %v2798_v16  ;;  %3477 = vmatpush.bf16.msra.mxu2 %v2798_v16  ;;  %v3348_v45 = vld [vmem:[#allocation5 + $0x84] sm:$0xf0]  ;;  %v109_v47 = vld [vmem:[#allocation2 + $0x30] sm:$0xff]  ;;  %v2941_v48 = vld [vmem:[#allocation5 + $0x170] sm:$0xf]  ;;  %v2758_v52 = vor.u32 %v3332_v43, %v2757_v41 }
  0x23   :  { %3485 = vmatpush.bf16.msra.mxu3 %v2862_v17  ;;  %988 = vmatpush.bf16.msra.mxu1 %v2862_v17  ;;  %v3378_v49 = vld [vmem:[#allocation5 + $0x174] sm:$0xf0]  ;;  %v3005_v50 = vld [vmem:[#allocation5 + $0x1f0] sm:$0xf]  ;;  %v193_v54 = vld [vmem:[#allocation2 + $0x2d0] sm:$0xff]  ;;  %v2822_v56 = vor.u32 %v3348_v45, %v2821_v44  ;;  %v3730_v63 = vpack.c.bf16 %v109_v47, %v103_v46 }
  0x24   :  { %v3394_v51 = vld [vmem:[#allocation5 + $0x1f4] sm:$0xf0]  ;;  %v187_v53 = vld [vmem:[#allocation2 + $0x2a0] sm:$0xff]  ;;  %v194_v57 = vld [vmem:[#allocation2 + $0x2d8] sm:$0xff]  ;;  %v2942_v60 = vor.u32 %v3378_v49, %v2941_v48 }
  0x25   :  { %v188_v55 = vld [vmem:[#allocation2 + $0x2a8] sm:$0xff]  ;;  %v110_v59 = vld [vmem:[#allocation2 + $0x38] sm:$0xff]  ;;  %v3006_v61 = vor.u32 %v3394_v51, %v3005_v50  ;;  %v2933_v62 = vld [vmem:[#allocation5 + $0x160] sm:$0xf]  ;;  %v3732_v0 = vpack.c.bf16 %v193_v54, %v187_v53 }
  0x26   :  { %916 = vmatpush.bf16.msra.mxu0 %v2790_v22  ;;  %3478 = vmatpush.bf16.msra.mxu2 %v2790_v22  ;;  %v104_v58 = vld [vmem:[#allocation2 + $0x8] sm:$0xff]  ;;  %v3376_v1 = vld [vmem:[#allocation5 + $0x164] sm:$0xf0]  ;;  %v2997_v2 = vld [vmem:[#allocation5 + $0x1e0] sm:$0xf]  ;;  %v3734_v4 = vpack.c.bf16 %v194_v57, %v188_v55 }
  0x27   :  { %3486 = vmatpush.bf16.msra.mxu3 %v2854_v23  ;;  %989 = vmatpush.bf16.msra.mxu1 %v2854_v23  ;;  %4657 = vst [vmem:[#allocation16_spill] sm:$0xff] %v3732_v0  ;;  %v3392_v3 = vld [vmem:[#allocation5 + $0x1e4] sm:$0xf0]  ;;  %v3736_v5 = vpack.c.bf16 %v110_v59, %v104_v58  ;;  %v2934_v6 = vor.u32 %v3376_v1, %v2933_v62  ;;  %v2925_v8 = vld [vmem:[#allocation5 + $0x150] sm:$0xf]  ;;  %v121_v21 = vld [vmem:[#allocation2 + $0x90] sm:$0xff] }
  0x28   :  { %4658 = vst [vmem:[#allocation17_spill] sm:$0xff] %v3734_v4  ;;  %v2998_v7 = vor.u32 %v3392_v3, %v2997_v2  ;;  %v3374_v9 = vld [vmem:[#allocation5 + $0x154] sm:$0xf0]  ;;  %v2989_v10 = vld [vmem:[#allocation5 + $0x1d0] sm:$0xf]  ;;  %v205_v23 = vld [vmem:[#allocation2 + $0x330] sm:$0xff] }
  0x29   :  { %v3390_v11 = vld [vmem:[#allocation5 + $0x1d4] sm:$0xf0]  ;;  %v2926_v12 = vor.u32 %v3374_v9, %v2925_v8  ;;  %v2917_v14 = vld [vmem:[#allocation5 + $0x140] sm:$0xf]  ;;  %v3372_v15 = vld [vmem:[#allocation5 + $0x144] sm:$0xf0] }
  0x2a   :  { %917 = vmatpush.bf16.msra.mxu0 %v2782_v28  ;;  %3479 = vmatpush.bf16.msra.mxu2 %v2782_v28  ;;  %v2990_v13 = vor.u32 %v3390_v11, %v2989_v10  ;;  %v2981_v16 = vld [vmem:[#allocation5 + $0x1c0] sm:$0xf]  ;;  %v3388_v17 = vld [vmem:[#allocation5 + $0x1c4] sm:$0xf0]  ;;  %v2918_v18 = vor.u32 %v3372_v15, %v2917_v14  ;;  %v115_v20 = vld [vmem:[#allocation2 + $0x60] sm:$0xff] }
  0x2b   :  { %3487 = vmatpush.bf16.msra.mxu3 %v2846_v29  ;;  %990 = vmatpush.bf16.msra.mxu1 %v2846_v29  ;;  %v2982_v19 = vor.u32 %v3388_v17, %v2981_v16  ;;  %v199_v22 = vld [vmem:[#allocation2 + $0x300] sm:$0xff]  ;;  %v200_v24 = vld [vmem:[#allocation2 + $0x308] sm:$0xff]  ;;  %v206_v25 = vld [vmem:[#allocation2 + $0x338] sm:$0xff]  ;;  %v3742_v28 = vpack.c.bf16 %v121_v21, %v115_v20 }
  0x2c   :  { %v116_v26 = vld [vmem:[#allocation2 + $0x68] sm:$0xff]  ;;  %v122_v27 = vld [vmem:[#allocation2 + $0x98] sm:$0xff]  ;;  %v3744_v29 = vpack.c.bf16 %v205_v23, %v199_v22  ;;  %v3746_v30 = vpack.c.bf16 %v206_v25, %v200_v24  ;;  %v2909_v32 = vld [vmem:[#allocation5 + $0x130] sm:$0xf] }
  0x2d   :  { %v3748_v31 = vpack.c.bf16 %v122_v27, %v116_v26  ;;  %v3370_v33 = vld [vmem:[#allocation5 + $0x134] sm:$0xf0]  ;;  %v2901_v37 = vld [vmem:[#allocation5 + $0x120] sm:$0xf]  ;;  %v3368_v38 = vld [vmem:[#allocation5 + $0x124] sm:$0xf0] }
  0x2e   :  { %918 = vmatpush.bf16.msra.mxu0 %v2774_v34  ;;  %3480 = vmatpush.bf16.msra.mxu2 %v2774_v34  ;;  %4659 = vst [vmem:[#allocation18_spill] sm:$0xff] %v3744_v29  ;;  %v2973_v34 = vld [vmem:[#allocation5 + $0x1b0] sm:$0xf]  ;;  %v3386_v36 = vld [vmem:[#allocation5 + $0x1b4] sm:$0xf0]  ;;  %v133_v45 = vld [vmem:[#allocation2 + $0xf0] sm:$0xff] }
  0x2f   :  { %3488 = vmatpush.bf16.msra.mxu3 %v2838_v35  ;;  %991 = vmatpush.bf16.msra.mxu1 %v2838_v35  ;;  %4660 = vst [vmem:[#allocation19_spill] sm:$0xff] %v3746_v30  ;;  %v2910_v35 = vor.u32 %v3370_v33, %v2909_v32  ;;  %v2974_v39 = vor.u32 %v3386_v36, %v2973_v34  ;;  %v3384_v41 = vld [vmem:[#allocation5 + $0x1a4] sm:$0xf0]  ;;  %v127_v44 = vld [vmem:[#allocation2 + $0xc0] sm:$0xff]  ;;  %v217_v47 = vld [vmem:[#allocation2 + $0x390] sm:$0xff] }
  0x30   :  { %v211_v46 = vld [vmem:[#allocation2 + $0x360] sm:$0xff]  ;;  %v212_v48 = vld [vmem:[#allocation2 + $0x368] sm:$0xff]  ;;  %v218_v49 = vld [vmem:[#allocation2 + $0x398] sm:$0xff] }
  0x31   :  { %v128_v50 = vld [vmem:[#allocation2 + $0xc8] sm:$0xff]  ;;  %v134_v51 = vld [vmem:[#allocation2 + $0xf8] sm:$0xff]  ;;  %v3756_v53 = vpack.c.bf16 %v217_v47, %v211_v46  ;;  %v3758_v54 = vpack.c.bf16 %v218_v49, %v212_v48  ;;  %v2957_v58 = vld [vmem:[#allocation5 + $0x190] sm:$0xf] }
  0x32   :  { %919 = vmatpush.bf16.msra.mxu0 %v2766_v40  ;;  %3481 = vmatpush.bf16.msra.mxu2 %v2766_v40  ;;  %v2965_v40 = vld [vmem:[#allocation5 + $0x1a0] sm:$0xf]  ;;  %v3760_v55 = vpack.c.bf16 %v134_v51, %v128_v50  ;;  %v3366_v57 = vld [vmem:[#allocation5 + $0x114] sm:$0xf0]  ;;  %v139_v62 = vld [vmem:[#allocation2 + $0x120] sm:$0xff] }
  0x33   :  { %3489 = vmatpush.bf16.msra.mxu3 %v2830_v42  ;;  %992 = vmatpush.bf16.msra.mxu1 %v2830_v42  ;;  %v2902_v42 = vor.u32 %v3368_v38, %v2901_v37  ;;  %v2966_v43 = vor.u32 %v3384_v41, %v2965_v40  ;;  %4661 = vst [vmem:[#allocation20_spill] sm:$0xff] %v3756_v53  ;;  %v145_v1 = vld [vmem:[#allocation2 + $0x150] sm:$0xff]  ;;  %v223_v2 = vld [vmem:[#allocation2 + $0x3c0] sm:$0xff]  ;;  %v140_v8 = vld [vmem:[#allocation2 + $0x128] sm:$0xff] }
  0x34   :  { %4662 = vst [vmem:[#allocation21_spill] sm:$0xff] %v3758_v54  ;;  %v229_v3 = vld [vmem:[#allocation2 + $0x3f0] sm:$0xff]  ;;  %v146_v9 = vld [vmem:[#allocation2 + $0x158] sm:$0xff]  ;;  %v3766_v10 = vpack.c.bf16 %v145_v1, %v139_v62  ;;  %v3069_v14 = vld [vmem:[#allocation5 + $0x270] sm:$0xf] }
  0x35   :  { %v3768_v11 = vpack.c.bf16 %v229_v3, %v223_v2  ;;  %v3410_v15 = vld [vmem:[#allocation5 + $0x274] sm:$0xf0]  ;;  %v3133_v17 = vld [vmem:[#allocation5 + $0x2f0] sm:$0xf]  ;;  %v3364_v21 = vld [vmem:[#allocation5 + $0x104] sm:$0xf0] }
  0x36   :  { %920 = vmatpush.bf16.msra.mxu0 %v2758_v52  ;;  %3482 = vmatpush.bf16.msra.mxu2 %v2758_v52  ;;  %v3754_v52 = vpack.c.bf16 %v133_v45, %v127_v44  ;;  %v3070_v16 = vor.u32 %v3410_v15, %v3069_v14  ;;  %v3061_v22 = vld [vmem:[#allocation5 + $0x260] sm:$0xf]  ;;  %v3408_v23 = vld [vmem:[#allocation5 + $0x264] sm:$0xf0]  ;;  %v3406_v36 = vld [vmem:[#allocation5 + $0x254] sm:$0xf0] }
  0x37   :  { %3490 = vmatpush.bf16.msra.mxu3 %v2822_v56  ;;  %993 = vmatpush.bf16.msra.mxu1 %v2822_v56  ;;  %v2893_v56 = vld [vmem:[#allocation5 + $0x110] sm:$0xf]  ;;  %4663 = vst [vmem:[#allocation22_spill] sm:$0xff] %v3768_v11  ;;  %v3062_v25 = vor.u32 %v3408_v23, %v3061_v22  ;;  %v2949_v26 = vld [vmem:[#allocation5 + $0x180] sm:$0xf]  ;;  %v236_v48 = vld [vmem:[#allocation2 + $0x428] sm:$0xff] }
  0x38   :  { %v2894_v59 = vor.u32 %v3366_v57, %v2893_v56  ;;  %v3380_v27 = vld [vmem:[#allocation5 + $0x184] sm:$0xf0]  ;;  %v3125_v32 = vld [vmem:[#allocation5 + $0x2e0] sm:$0xf]  ;;  %v3117_v38 = vld [vmem:[#allocation5 + $0x2d0] sm:$0xf] }
  0x39   :  { %921 = vmatmul.bf16.vlgmr.msra.gmra.mxu0 %v3730_v63  ;;  %956 = vmatmul.bf16.vlgmr.msra.gmra.mxu2 %v3732_v0  ;;  %v2950_v33 = vor.u32 %v3380_v27, %v2949_v26  ;;  %v3424_v34 = vld [vmem:[#allocation5 + $0x2e4] sm:$0xf0]  ;;  %v3045_v41 = vld [vmem:[#allocation5 + $0x240] sm:$0xf]  ;;  %v235_v46 = vld [vmem:[#allocation2 + $0x420] sm:$0xff] }
  0x3a   :  { %1059 = vmatpush.bf16.msrb.mxu2 %v2942_v60  ;;  %1029 = vmatmul.bf16.vlgmr.msra.gmra.mxu3 %v3734_v4  ;;  %v3382_v60 = vld [vmem:[#allocation5 + $0x194] sm:$0xf0]  ;;  %v3126_v37 = vor.u32 %v3424_v34, %v3125_v32  ;;  %v157_v44 = vld [vmem:[#allocation2 + $0x1b0] sm:$0xff]  ;;  %v242_v49 = vld [vmem:[#allocation2 + $0x458] sm:$0xff] }
  0x3b   :  { %1132 = vmatpush.bf16.msrb.mxu3 %v3006_v61  ;;  %994 = vmatmul.bf16.vlgmr.msra.gmra.mxu1 %v3736_v5  ;;  %v2958_v61 = vor.u32 %v3382_v60, %v2957_v58  ;;  %v241_v47 = vld [vmem:[#allocation2 + $0x450] sm:$0xff]  ;;  %v152_v50 = vld [vmem:[#allocation2 + $0x188] sm:$0xff]  ;;  %v158_v51 = vld [vmem:[#allocation2 + $0x1b8] sm:$0xff] }
  0x3c   :  { %1205 = vmatpush.bf16.msrb.mxu0 %v3070_v16  ;;  %v3109_v57 = vld [vmem:[#allocation5 + $0x2c0] sm:$0xf]  ;;  %v3420_v58 = vld [vmem:[#allocation5 + $0x2c4] sm:$0xf0]  ;;  %v3780_v60 = vpack.c.bf16 %v241_v47, %v235_v46  ;;  %v3784_v62 = vpack.c.bf16 %v158_v51, %v152_v50  ;;  %v3037_v2 = vld [vmem:[#allocation5 + $0x230] sm:$0xf] }
  0x3d   :  { %v3110_v1 = vor.u32 %v3420_v58, %v3109_v57  ;;  %v3402_v3 = vld [vmem:[#allocation5 + $0x234] sm:$0xf0]  ;;  %v2879_v15 = vld [vmem:[#allocation5 + $0xf8] sm:$0xf0]  ;;  %v3101_v16 = vld [vmem:[#allocation5 + $0x2b0] sm:$0xf] }
  0x3e   :  { %1060 = vmatpush.bf16.msrb.mxu2 %v2934_v6  ;;  %v224_v6 = vld [vmem:[#allocation2 + $0x3c8] sm:$0xff]  ;;  %4665 = vst [vmem:[#allocation24_spill] sm:$0xff] %v3780_v60  ;;  %v3093_v22 = vld [vmem:[#allocation5 + $0x2a0] sm:$0xf]  ;;  %v3412_v46 = vld [vmem:[#allocation5 + $0x284] sm:$0xf0] }
  0x3f   :  { %1133 = vmatpush.bf16.msrb.mxu3 %v2998_v7  ;;  %v230_v7 = vld [vmem:[#allocation2 + $0x3f8] sm:$0xff]  ;;  %v3398_v26 = vld [vmem:[#allocation5 + $0x214] sm:$0xf0]  ;;  %v3359_v58 = vld [vmem:[#allocation5 + $0xe4] sm:$0xf] }
  0x40   :  { %1206 = vmatpush.bf16.msrb.mxu0 %v3062_v25  ;;  %v3021_v25 = vld [vmem:[#allocation5 + $0x210] sm:$0xf]  ;;  %v3414_v34 = vld [vmem:[#allocation5 + $0x294] sm:$0xf0]  ;;  %v2807_v57 = vld [vmem:[#allocation5 + $0x68] sm:$0xf0] }
  0x41   :  { %v3022_v32 = vor.u32 %v3398_v26, %v3021_v25  ;;  %v107_v25 = vld [vmem:[#allocation2 + $0x20] sm:$0xff]  ;;  %v113_v26 = vld [vmem:[#allocation2 + $0x50] sm:$0xff]  ;;  %v180_v4 = vld [vmem:[#allocation2 + $0x268] sm:$0xff] }
  0x42   :  { %1061 = vmatpush.bf16.msrb.mxu2 %v2926_v12  ;;  %v3770_v12 = vpack.c.bf16 %v230_v7, %v224_v6  ;;  %v3038_v6 = vor.u32 %v3402_v3, %v3037_v2  ;;  %v3345_v7 = vld [vmem:[#allocation5 + $0x74] sm:$0xf]  ;;  %v2871_v2 = vld [vmem:[#allocation5 + $0xe8] sm:$0xf0] }
  0x43   :  { %1134 = vmatpush.bf16.msrb.mxu3 %v2990_v13  ;;  %v3772_v13 = vpack.c.bf16 %v146_v9, %v140_v8  ;;  %v2815_v8 = vld [vmem:[#allocation5 + $0x78] sm:$0xf0]  ;;  %v3361_v9 = vld [vmem:[#allocation5 + $0xf4] sm:$0xf]  ;;  %v2874_v3 = vor.u32 %v3359_v58, %v2871_v2  ;;  %v126_v2 = vld [vmem:[#allocation2 + $0xb8] sm:$0xff] }
  0x44   :  { %4664 = vst [vmem:[#allocation23_spill] sm:$0xff] %v3770_v12  ;;  %v2818_v14 = vor.u32 %v3345_v7, %v2815_v8  ;;  %v181_v7 = vld [vmem:[#allocation2 + $0x270] sm:$0xff]  ;;  %v136_v58 = vld [vmem:[#allocation2 + $0x108] sm:$0xff] }
  0x45   :  { %v105_v8 = vld [vmem:[#allocation2 + $0x10] sm:$0xff] }
  0x46   :  { %1062 = vmatpush.bf16.msrb.mxu2 %v2918_v18  ;;  %v3426_v18 = vld [vmem:[#allocation5 + $0x2f4] sm:$0xf0] }
  0x47   :  { %1135 = vmatpush.bf16.msrb.mxu3 %v2982_v19  ;;  %v2885_v19 = vld [vmem:[#allocation5 + $0x100] sm:$0xf]  ;;  %v3134_v20 = vor.u32 %v3426_v18, %v3133_v17  ;;  %v3418_v17 = vld [vmem:[#allocation5 + $0x2b4] sm:$0xf0]  ;;  %v2882_v18 = vor.u32 %v3361_v9, %v2879_v15  ;;  %v111_v9 = vld [vmem:[#allocation2 + $0x40] sm:$0xff] }
  0x48   :  { %v2886_v24 = vor.u32 %v3364_v21, %v2885_v19  ;;  %v3102_v19 = vor.u32 %v3418_v17, %v3101_v16  ;;  %v3400_v21 = vld [vmem:[#allocation5 + $0x224] sm:$0xf0]  ;;  %v112_v15 = vld [vmem:[#allocation2 + $0x48] sm:$0xff] }
  0x49   :  { %926 = vmatmul.bf16.gmra.mxu0 %v3742_v28  ;;  %961 = vmatmul.bf16.gmra.mxu2 %v3744_v29  ;;  %v176_v16 = vld [vmem:[#allocation2 + $0x248] sm:$0xff]  ;;  %v182_v17 = vld [vmem:[#allocation2 + $0x278] sm:$0xff] }
  0x4a   :  { %1034 = vmatmul.bf16.gmra.mxu3 %v3746_v30  ;;  %1063 = vmatpush.bf16.msrb.mxu2 %v2910_v35  ;;  %v3053_v35 = vld [vmem:[#allocation5 + $0x250] sm:$0xf] }
  0x4b   :  { %999 = vmatmul.bf16.gmra.mxu1 %v3748_v31  ;;  %1136 = vmatpush.bf16.msrb.mxu3 %v2974_v39  ;;  %v3422_v39 = vld [vmem:[#allocation5 + $0x2d4] sm:$0xf0]  ;;  %v3054_v40 = vor.u32 %v3406_v36, %v3053_v35  ;;  %v3013_v35 = vld [vmem:[#allocation5 + $0x200] sm:$0xf]  ;;  %v3396_v36 = vld [vmem:[#allocation5 + $0x204] sm:$0xf0] }
  0x4c   :  { %1278 = vmatpush.bf16.msrb.mxu1 %v3134_v20  ;;  %v3118_v45 = vor.u32 %v3422_v39, %v3117_v38  ;;  %v3029_v20 = vld [vmem:[#allocation5 + $0x220] sm:$0xf]  ;;  %v247_v39 = vld [vmem:[#allocation2 + $0x480] sm:$0xff] }
  0x4d   :  { %1207 = vmatpush.bf16.msrb.mxu0 %v3054_v40  ;;  %v3030_v23 = vor.u32 %v3400_v21, %v3029_v20  ;;  %v169_v38 = vld [vmem:[#allocation2 + $0x210] sm:$0xff]  ;;  %v248_v40 = vld [vmem:[#allocation2 + $0x488] sm:$0xff]  ;;  %v3808_v21 = vpack.c.bf16 %v182_v17, %v176_v16 }
  0x4e   :  { %1064 = vmatpush.bf16.msrb.mxu2 %v2902_v42  ;;  %v3404_v42 = vld [vmem:[#allocation5 + $0x244] sm:$0xf0] }
  0x4f   :  { %1137 = vmatpush.bf16.msrb.mxu3 %v2966_v43  ;;  %v151_v43 = vld [vmem:[#allocation2 + $0x180] sm:$0xff]  ;;  %v3046_v56 = vor.u32 %v3404_v42, %v3045_v41  ;;  %v164_v41 = vld [vmem:[#allocation2 + $0x1e8] sm:$0xff]  ;;  %v170_v42 = vld [vmem:[#allocation2 + $0x218] sm:$0xff]  ;;  %4671 = vst [vmem:[#allocation30_spill] sm:$0xff] %v3808_v21 }
  0x50   :  { %1279 = vmatpush.bf16.msrb.mxu1 %v3126_v37  ;;  %v163_v37 = vld [vmem:[#allocation2 + $0x1e0] sm:$0xff]  ;;  %v3796_v50 = vpack.c.bf16 %v170_v42, %v164_v41  ;;  %v2863_v42 = vld [vmem:[#allocation5 + $0xd8] sm:$0xf0] }
  0x51   :  { %1208 = vmatpush.bf16.msrb.mxu0 %v3046_v56  ;;  %v3790_v47 = vpack.c.bf16 %v169_v38, %v163_v37  ;;  %v3343_v56 = vld [vmem:[#allocation5 + $0x64] sm:$0xf]  ;;  %v3341_v38 = vld [vmem:[#allocation5 + $0x54] sm:$0xf] }
  0x52   :  { %1065 = vmatpush.bf16.msrb.mxu2 %v2894_v59  ;;  %v3778_v59 = vpack.c.bf16 %v157_v44, %v151_v43  ;;  %v3014_v44 = vor.u32 %v3396_v36, %v3013_v35  ;;  %4669 = vst [vmem:[#allocation28_spill] sm:$0xff] %v3796_v50  ;;  %v3816_v35 = vpack.c.bf16 %v113_v26, %v107_v25 }
  0x53   :  { %1138 = vmatpush.bf16.msrb.mxu3 %v2958_v61  ;;  %v3782_v61 = vpack.c.bf16 %v242_v49, %v236_v48  ;;  %v3792_v48 = vpack.c.bf16 %v247_v39, %v247_v39  ;;  %v3794_v49 = vpack.c.bf16 %v248_v40, %v248_v40  ;;  %v2799_v39 = vld [vmem:[#allocation5 + $0x58] sm:$0xf0]  ;;  %v3357_v40 = vld [vmem:[#allocation5 + $0xd4] sm:$0xf] }
  0x54   :  { %1280 = vmatpush.bf16.msrb.mxu1 %v3118_v45  ;;  %v3077_v45 = vld [vmem:[#allocation5 + $0x280] sm:$0xf]  ;;  %4672 = vst [vmem:[#allocation31_spill] sm:$0xff] %v3816_v35  ;;  %v2802_v41 = vor.u32 %v3341_v38, %v2799_v39  ;;  %v147_v39 = vld [vmem:[#allocation2 + $0x160] sm:$0xff] }
  0x55   :  { %4666 = vst [vmem:[#allocation25_spill] sm:$0xff] %v3782_v61  ;;  %1209 = vmatpush.bf16.msrb.mxu0 %v3038_v6  ;;  %v3078_v51 = vor.u32 %v3412_v46, %v3077_v45  ;;  %v175_v6 = vld [vmem:[#allocation2 + $0x240] sm:$0xff]  ;;  %v2866_v46 = vor.u32 %v3357_v40, %v2863_v42  ;;  %v141_v38 = vld [vmem:[#allocation2 + $0x130] sm:$0xff]  ;;  %v142_v40 = vld [vmem:[#allocation2 + $0x138] sm:$0xff] }
  0x56   :  { %1066 = vmatpush.bf16.msrb.mxu2 %v2886_v24  ;;  %v3416_v24 = vld [vmem:[#allocation5 + $0x2a4] sm:$0xf0]  ;;  %4667 = vst [vmem:[#allocation26_spill] sm:$0xff] %v3792_v48  ;;  %v135_v45 = vld [vmem:[#allocation2 + $0x100] sm:$0xff]  ;;  %v137_v42 = vld [vmem:[#allocation2 + $0x110] sm:$0xff] }
  0x57   :  { %1139 = vmatpush.bf16.msrb.mxu3 %v2950_v33  ;;  %v3094_v27 = vor.u32 %v3416_v24, %v3093_v22  ;;  %v3085_v33 = vld [vmem:[#allocation5 + $0x290] sm:$0xf]  ;;  %4668 = vst [vmem:[#allocation27_spill] sm:$0xff] %v3794_v49  ;;  %v117_v22 = vld [vmem:[#allocation2 + $0x70] sm:$0xff]  ;;  %v118_v24 = vld [vmem:[#allocation2 + $0x78] sm:$0xff] }
  0x58   :  { %1281 = vmatpush.bf16.msrb.mxu1 %v3110_v1  ;;  %v3086_v43 = vor.u32 %v3414_v34, %v3085_v33  ;;  %v2810_v1 = vor.u32 %v3343_v56, %v2807_v57  ;;  %v114_v33 = vld [vmem:[#allocation2 + $0x58] sm:$0xff]  ;;  %v119_v56 = vld [vmem:[#allocation2 + $0x80] sm:$0xff]  ;;  %v125_v57 = vld [vmem:[#allocation2 + $0xb0] sm:$0xff] }
  0x59   :  { %931 = vmatmul.bf16.gmra.mxu0 %v3754_v52  ;;  %966 = vmatmul.bf16.gmra.mxu2 %v3756_v53 }
  0x5a   :  { %1039 = vmatmul.bf16.gmra.mxu3 %v3758_v54  ;;  %1351 = vmatpush.bf16.msra.mxu2 %v2818_v14  ;;  %v106_v14 = vld [vmem:[#allocation2 + $0x18] sm:$0xff] }
  0x5b   :  { %1004 = vmatmul.bf16.gmra.mxu1 %v3760_v55  ;;  %1424 = vmatpush.bf16.msra.mxu3 %v2882_v18  ;;  %v3802_v18 = vpack.c.bf16 %v181_v7, %v175_v6  ;;  %v3806_v20 = vpack.c.bf16 %v112_v15, %v106_v14  ;;  %v3830_v7 = vpack.c.bf16 %v125_v57, %v119_v56 }
  0x5c   :  { %1282 = vmatpush.bf16.msrb.mxu1 %v3102_v19  ;;  %1210 = vmatpush.bf16.msrb.mxu0 %v3030_v23  ;;  %v3804_v19 = vpack.c.bf16 %v111_v9, %v105_v8  ;;  %v123_v23 = vld [vmem:[#allocation2 + $0xa0] sm:$0xff]  ;;  %v3850_v57 = vpack.c.bf16 %v147_v39, %v141_v38  ;;  %v2855_v38 = vld [vmem:[#allocation5 + $0xc8] sm:$0xf0] }
  0x5d   :  { %4670 = vst [vmem:[#allocation29_spill] sm:$0xff] %v3802_v18  ;;  %v3814_v34 = vpack.c.bf16 %v123_v23, %v117_v22 }
  0x5e   :  { %1352 = vmatpush.bf16.msra.mxu2 %v2810_v1  ;;  %v120_v1 = vld [vmem:[#allocation2 + $0x88] sm:$0xff]  ;;  %4674 = vst [vmem:[#allocation33_spill] sm:$0xff] %v3830_v7 }
  0x5f   :  { %1425 = vmatpush.bf16.msra.mxu3 %v2874_v3  ;;  %v3834_v14 = vpack.c.bf16 %v126_v2, %v120_v1 }
  0x60   :  { %1283 = vmatpush.bf16.msrb.mxu1 %v3094_v27  ;;  %1211 = vmatpush.bf16.msrb.mxu0 %v3022_v32  ;;  %v124_v27 = vld [vmem:[#allocation2 + $0xa8] sm:$0xff] }
  0x61   :  { %v108_v32 = vld [vmem:[#allocation2 + $0x28] sm:$0xff]  ;;  %v3818_v36 = vpack.c.bf16 %v124_v27, %v118_v24  ;;  %4675 = vst [vmem:[#allocation34_spill] sm:$0xff] %v3834_v14 }
  0x62   :  { %v3820_v37 = vpack.c.bf16 %v114_v33, %v108_v32  ;;  %1353 = vmatpush.bf16.msra.mxu2 %v2802_v41  ;;  %v131_v41 = vld [vmem:[#allocation2 + $0xe0] sm:$0xff] }
  0x63   :  { %1426 = vmatpush.bf16.msra.mxu3 %v2866_v46 }
  0x64   :  { %1284 = vmatpush.bf16.msrb.mxu1 %v3086_v43  ;;  %1212 = vmatpush.bf16.msrb.mxu0 %v3014_v44  ;;  %4673 = vst [vmem:[#allocation32_spill] sm:$0xff] %v3820_v37  ;;  %v427_v43 = vld [vmem:[#allocation7] sm:$0x3] }
  0x65   :  { %v129_v44 = vld [vmem:[#allocation2 + $0xd0] sm:$0xff]  ;;  %v3826_v3 = vperm.slane %v427_v43, 0  ;;  %v148_v43 = vld [vmem:[#allocation2 + $0x168] sm:$0xff] }
  0x66   :  { %v3828_v6 = vpack.c.bf16 %v135_v45, %v129_v44  ;;  %v132_v44 = vld [vmem:[#allocation2 + $0xe8] sm:$0xff]  ;;  %v138_v45 = vld [vmem:[#allocation2 + $0x118] sm:$0xff]  ;;  %v3854_v2 = vpack.c.bf16 %v148_v43, %v142_v40 }
  0x68   :  { %1285 = vmatpush.bf16.msrb.mxu1 %v3078_v51  ;;  %v130_v51 = vld [vmem:[#allocation2 + $0xd8] sm:$0xff] }
  0x69   :  { %936 = vmatmul.bf16.gmra.mxu0 %v3766_v10  ;;  %971 = vmatmul.bf16.gmra.mxu2 %v3768_v11  ;;  %v3832_v9 = vpack.c.bf16 %v136_v58, %v130_v51  ;;  %v3852_v58 = vpack.c.bf16 %v137_v42, %v131_v41 }
  0x6a   :  { %1044 = vmatmul.bf16.gmra.mxu3 %v3770_v12 }
  0x6b   :  { %1009 = vmatmul.bf16.gmra.mxu1 %v3772_v13  ;;  %4676 = vst [vmem:[#allocation35_spill] sm:$0xff] %v3852_v58 }
  0x79   :  { %941 = vmatmul.bf16.gmra.mxu0 %v3778_v59  ;;  %976 = vmatmul.bf16.gmra.mxu2 %v3780_v60 }
  0x7a   :  { %1049 = vmatmul.bf16.gmra.mxu3 %v3782_v61 }
  0x7b   :  { %1014 = vmatmul.bf16.gmra.mxu1 %v3784_v62 }
  0x89   :  { %946 = vmatmul.bf16.gmra.mxu0 %v3790_v47  ;;  %981 = vmatmul.bf16.gmra.mxu2 %v3792_v48  ;;  %v162_v48 = vld [vmem:[#allocation2 + $0x1d8] sm:$0xff] }
  0x8a   :  { %1054 = vmatmul.bf16.gmra.mxu3 %v3794_v49  ;;  %v156_v49 = vld [vmem:[#allocation2 + $0x1a8] sm:$0xff] }
  0x8b   :  { %1019 = vmatmul.bf16.gmra.mxu1 %v3796_v50  ;;  %v3904_v11 = vpack.c.bf16 %v162_v48, %v156_v49  ;;  %v2999_v50 = vld [vmem:[#allocation5 + $0x1e8] sm:$0xf0] }
  0x8d   :  { %4685 = vst [vmem:[#allocation44_spill] sm:$0xff] %v3904_v11 }
  0x99   :  { %951 = vmatmul.bf16.gmra.mxu0 %v3802_v18  ;;  %1067 = vmatmul.bf16.vlgmr.msrb.gmra.mxu2 %v3804_v19  ;;  %v3349_v18 = vld [vmem:[#allocation5 + $0x94] sm:$0xf] }
  0x9a   :  { %1140 = vmatmul.bf16.vlgmr.msrb.gmra.mxu3 %v3806_v20 }
  0x9b   :  { %1024 = vmatmul.bf16.gmra.mxu1 %v3808_v21 }
  0xa9   :  { %1072 = vmatmul.bf16.gmra.mxu2 %v3814_v34  ;;  %1213 = vmatmul.bf16.vlgmr.msrb.gmra.mxu0 %v3816_v35  ;;  %v2847_v35 = vld [vmem:[#allocation5 + $0xb8] sm:$0xf0] }
  0xaa   :  { %1145 = vmatmul.bf16.gmra.mxu3 %v3818_v36 }
  0xab   :  { %1286 = vmatmul.bf16.vlgmr.msrb.gmra.mxu1 %v3820_v37 }
  0xb6   :  { %v922_v8 = vpop.f32.mrf.mxu0 }
  0xb7   :  { %v923_v15 = vadd.f32 %v922_v8, %v3826_v3  ;;  %v3856_v8 = vpack.c.bf16 %v138_v45, %v132_v44 }
  0xb8   :  { %v995_v16 = vpop.f32.mrf.mxu1 }
  0xb9   :  { %v3837_v17 = vadd.f32 %v995_v16, %v923_v15  ;;  %1077 = vmatmul.bf16.gmra.mxu2 %v3828_v6  ;;  %1218 = vmatmul.bf16.gmra.mxu0 %v3830_v7  ;;  %4677 = vst [vmem:[#allocation36_spill] sm:$0xff] %v3856_v8 }
  0xba   :  { %1150 = vmatmul.bf16.gmra.mxu3 %v3832_v9 }
  0xbb   :  { %1291 = vmatmul.bf16.gmra.mxu1 %v3834_v14 }
  0xbc   :  { %v957_v22 = vpop.f32.mrf.mxu2 }
  0xbd   :  { %v958_v23 = vadd.f32 %v957_v22, %v3826_v3  ;;  %v1030_v24 = vpop.f32.mrf.mxu3 }
  0xbe   :  { %v924_v25 = vpop.f32.mrf.mxu0 }
  0xbf   :  { %v3844_v26 = vadd.f32 %v1030_v24, %v958_v23  ;;  %v925_v27 = vadd.f32 %v924_v25, %v3826_v3  ;;  %v3339_v23 = vld [vmem:[#allocation5 + $0x44] sm:$0xf]  ;;  %v2791_v24 = vld [vmem:[#allocation5 + $0x48] sm:$0xf0] }
  0xc0   :  { %v997_v32 = vpop.f32.mrf.mxu1  ;;  %v2794_v25 = vor.u32 %v3339_v23, %v2791_v24  ;;  %v149_v23 = vld [vmem:[#allocation2 + $0x170] sm:$0xff]  ;;  %v160_v24 = vld [vmem:[#allocation2 + $0x1c8] sm:$0xff] }
  0xc1   :  { %v3847_v33 = vadd.f32 %v997_v32, %v925_v27  ;;  %v3355_v32 = vld [vmem:[#allocation5 + $0xc4] sm:$0xf] }
  0xc2   :  { %1354 = vmatpush.bf16.msra.mxu2 %v2794_v25  ;;  %v2858_v39 = vor.u32 %v3355_v32, %v2855_v38  ;;  %v144_v25 = vld [vmem:[#allocation2 + $0x148] sm:$0xff]  ;;  %v150_v32 = vld [vmem:[#allocation2 + $0x178] sm:$0xff] }
  0xc4   :  { %v959_v46 = vpop.f32.mrf.mxu2  ;;  %1427 = vmatpush.bf16.msra.mxu3 %v2858_v39 }
  0xc5   :  { %v960_v51 = vadd.f32 %v959_v46, %v3826_v3  ;;  %v1032_v56 = vpop.f32.mrf.mxu3 }
  0xc6   :  { %v927_v1 = vpop.f32.mrf.mxu0 }
  0xc7   :  { %v3858_v15 = vadd.f32 %v1032_v56, %v960_v51  ;;  %v928_v16 = vadd.f32 %v927_v1, %v3826_v3  ;;  %v153_v56 = vld [vmem:[#allocation2 + $0x190] sm:$0xff]  ;;  %v159_v1 = vld [vmem:[#allocation2 + $0x1c0] sm:$0xff] }
  0xc8   :  { %v1000_v22 = vpop.f32.mrf.mxu1 }
  0xc9   :  { %v3861_v27 = vadd.f32 %v1000_v22, %v928_v16  ;;  %1082 = vmatmul.bf16.gmra.mxu2 %v3850_v57  ;;  %1223 = vmatmul.bf16.gmra.mxu0 %v3852_v58  ;;  %v154_v16 = vld [vmem:[#allocation2 + $0x198] sm:$0xff]  ;;  %v143_v22 = vld [vmem:[#allocation2 + $0x140] sm:$0xff] }
  0xca   :  { %1155 = vmatmul.bf16.gmra.mxu3 %v3854_v2 }
  0xcb   :  { %1296 = vmatmul.bf16.gmra.mxu1 %v3856_v8  ;;  %v3874_v8 = vpack.c.bf16 %v159_v1, %v153_v56 }
  0xcc   :  { %v962_v40 = vpop.f32.mrf.mxu2 }
  0xcd   :  { %v963_v41 = vadd.f32 %v962_v40, %v3826_v3  ;;  %v1035_v42 = vpop.f32.mrf.mxu3  ;;  %4678 = vst [vmem:[#allocation37_spill] sm:$0xff] %v3874_v8 }
  0xce   :  { %v929_v43 = vpop.f32.mrf.mxu0 }
  0xcf   :  { %v3868_v44 = vadd.f32 %v1035_v42, %v963_v41  ;;  %v930_v45 = vadd.f32 %v929_v43, %v3826_v3  ;;  %v3876_v41 = vpack.c.bf16 %v149_v23, %v143_v22  ;;  %v3878_v43 = vpack.c.bf16 %v160_v24, %v154_v16 }
  0xd0   :  { %v1002_v46 = vpop.f32.mrf.mxu1 }
  0xd1   :  { %v3871_v51 = vadd.f32 %v1002_v46, %v930_v45  ;;  %4679 = vst [vmem:[#allocation38_spill] sm:$0xff] %v3876_v41  ;;  %v3880_v45 = vpack.c.bf16 %v150_v32, %v144_v25 }
  0xd2   :  { %4680 = vst [vmem:[#allocation39_spill] sm:$0xff] %v3878_v43 }
  0xd3   :  { %4681 = vst [vmem:[#allocation40_spill] sm:$0xff] %v3880_v45 }
  0xd4   :  { %v964_v38 = vpop.f32.mrf.mxu2 }
  0xd5   :  { %v965_v40 = vadd.f32 %v964_v38, %v3826_v3  ;;  %v1037_v39 = vpop.f32.mrf.mxu3  ;;  %v166_v38 = vld [vmem:[#allocation2 + $0x1f8] sm:$0xff] }
  0xd6   :  { %v932_v42 = vpop.f32.mrf.mxu0 }
  0xd7   :  { %v3882_v46 = vadd.f32 %v1037_v39, %v965_v40  ;;  %v933_v58 = vadd.f32 %v932_v42, %v3826_v3  ;;  %v3337_v40 = vld [vmem:[#allocation5 + $0x34] sm:$0xf]  ;;  %v2783_v39 = vld [vmem:[#allocation5 + $0x38] sm:$0xf0] }
  0xd8   :  { %v1005_v14 = vpop.f32.mrf.mxu1  ;;  %v3353_v42 = vld [vmem:[#allocation5 + $0xb4] sm:$0xf]  ;;  %v2786_v37 = vor.u32 %v3337_v40, %v2783_v39 }
  0xd9   :  { %v3885_v7 = vadd.f32 %v1005_v14, %v933_v58  ;;  %1087 = vmatmul.bf16.gmra.mxu2 %v3874_v8  ;;  %1228 = vmatmul.bf16.gmra.mxu0 %v3876_v41  ;;  %v165_v14 = vld [vmem:[#allocation2 + $0x1f0] sm:$0xff]  ;;  %v171_v58 = vld [vmem:[#allocation2 + $0x220] sm:$0xff] }
  0xda   :  { %1160 = vmatmul.bf16.gmra.mxu3 %v3878_v43  ;;  %v155_v41 = vld [vmem:[#allocation2 + $0x1a0] sm:$0xff]  ;;  %1355 = vmatpush.bf16.msra.mxu2 %v2786_v37  ;;  %v3898_v60 = vpack.c.bf16 %v171_v58, %v165_v14 }
  0xdb   :  { %1301 = vmatmul.bf16.gmra.mxu1 %v3880_v45  ;;  %v161_v45 = vld [vmem:[#allocation2 + $0x1d0] sm:$0xff] }
  0xdc   :  { %v967_v56 = vpop.f32.mrf.mxu2  ;;  %4682 = vst [vmem:[#allocation41_spill] sm:$0xff] %v3898_v60 }
  0xdd   :  { %v968_v1 = vadd.f32 %v967_v56, %v3826_v3  ;;  %v1040_v16 = vpop.f32.mrf.mxu3  ;;  %v172_v56 = vld [vmem:[#allocation2 + $0x228] sm:$0xff] }
  0xde   :  { %v934_v22 = vpop.f32.mrf.mxu0  ;;  %v3902_v12 = vpack.c.bf16 %v172_v56, %v166_v38  ;;  %v177_v38 = vld [vmem:[#allocation2 + $0x250] sm:$0xff]  ;;  %v183_v56 = vld [vmem:[#allocation2 + $0x280] sm:$0xff] }
  0xdf   :  { %v3892_v23 = vadd.f32 %v1040_v16, %v968_v1  ;;  %v935_v24 = vadd.f32 %v934_v22, %v3826_v3  ;;  %v2850_v1 = vor.u32 %v3353_v42, %v2847_v35  ;;  %v3922_v54 = vpack.c.bf16 %v183_v56, %v177_v38  ;;  %v2775_v38 = vld [vmem:[#allocation5 + $0x28] sm:$0xf0] }
  0xe0   :  { %v1007_v25 = vpop.f32.mrf.mxu1  ;;  %4684 = vst [vmem:[#allocation43_spill] sm:$0xff] %v3902_v12 }
  0xe1   :  { %v3895_v32 = vadd.f32 %v1007_v25, %v935_v24  ;;  %v3900_v24 = vpack.c.bf16 %v161_v45, %v155_v41  ;;  %1428 = vmatpush.bf16.msra.mxu3 %v2850_v1  ;;  %v178_v1 = vld [vmem:[#allocation2 + $0x258] sm:$0xff]  ;;  %4687 = vst [vmem:[#allocation46_spill] sm:$0xff] %v3922_v54 }
  0xe3   :  { %4683 = vst [vmem:[#allocation42_spill] sm:$0xff] %v3900_v24 }
  0xe4   :  { %v969_v16 = vpop.f32.mrf.mxu2 }
  0xe5   :  { %v970_v22 = vadd.f32 %v969_v16, %v3826_v3  ;;  %v1042_v61 = vpop.f32.mrf.mxu3  ;;  %v167_v16 = vld [vmem:[#allocation2 + $0x200] sm:$0xff] }
  0xe6   :  { %v937_v25 = vpop.f32.mrf.mxu0 }
  0xe7   :  { %v3906_v40 = vadd.f32 %v1042_v61, %v970_v22  ;;  %v938_v39 = vadd.f32 %v937_v25, %v3826_v3  ;;  %v173_v22 = vld [vmem:[#allocation2 + $0x230] sm:$0xff]  ;;  %v184_v25 = vld [vmem:[#allocation2 + $0x288] sm:$0xff] }
  0xe8   :  { %v1010_v35 = vpop.f32.mrf.mxu1 }
  0xe9   :  { %v3909_v42 = vadd.f32 %v1010_v35, %v938_v39  ;;  %1092 = vmatmul.bf16.gmra.mxu2 %v3898_v60  ;;  %1233 = vmatmul.bf16.gmra.mxu0 %v3900_v24  ;;  %v168_v39 = vld [vmem:[#allocation2 + $0x208] sm:$0xff]  ;;  %v174_v35 = vld [vmem:[#allocation2 + $0x238] sm:$0xff] }
  0xea   :  { %1165 = vmatmul.bf16.gmra.mxu3 %v3902_v12 }
  0xeb   :  { %1306 = vmatmul.bf16.gmra.mxu1 %v3904_v11 }
  0xec   :  { %v972_v37 = vpop.f32.mrf.mxu2 }
  0xed   :  { %v973_v41 = vadd.f32 %v972_v37, %v3826_v3  ;;  %v1045_v48 = vpop.f32.mrf.mxu3 }
  0xee   :  { %v939_v49 = vpop.f32.mrf.mxu0 }
  0xef   :  { %v3916_v61 = vadd.f32 %v1045_v48, %v973_v41  ;;  %v940_v45 = vadd.f32 %v939_v49, %v3826_v3  ;;  %v3924_v41 = vpack.c.bf16 %v173_v22, %v167_v16  ;;  %v3926_v49 = vpack.c.bf16 %v184_v25, %v178_v1 }
  0xf0   :  { %v1012_v14 = vpop.f32.mrf.mxu1 }
  0xf1   :  { %4686 = vst [vmem:[#allocation45_spill] sm:$0xff] %v3916_v61  ;;  %v3919_v58 = vadd.f32 %v1012_v14, %v940_v45  ;;  %v3928_v45 = vpack.c.bf16 %v174_v35, %v168_v39  ;;  %v3351_v39 = vld [vmem:[#allocation5 + $0xa4] sm:$0xf]  ;;  %v2839_v35 = vld [vmem:[#allocation5 + $0xa8] sm:$0xf0] }
  0xf2   :  { %4688 = vst [vmem:[#allocation47_spill] sm:$0xff] %v3924_v41  ;;  %v2831_v61 = vld [vmem:[#allocation5 + $0x98] sm:$0xf0] }
  0xf3   :  { %4689 = vst [vmem:[#allocation48_spill] sm:$0xff] %v3926_v49 }
  0xf4   :  { %v974_v11 = vpop.f32.mrf.mxu2  ;;  %4690 = vst [vmem:[#allocation49_spill] sm:$0xff] %v3928_v45 }
  0xf5   :  { %v975_v37 = vadd.f32 %v974_v11, %v3826_v3  ;;  %v1047_v24 = vpop.f32.mrf.mxu3  ;;  %v3335_v11 = vld [vmem:[#allocation5 + $0x24] sm:$0xf] }
  0xf6   :  { %v942_v48 = vpop.f32.mrf.mxu0  ;;  %v2778_v56 = vor.u32 %v3335_v11, %v2775_v38  ;;  %v179_v11 = vld [vmem:[#allocation2 + $0x260] sm:$0xff]  ;;  %v185_v38 = vld [vmem:[#allocation2 + $0x290] sm:$0xff] }
  0xf7   :  { %v3930_v14 = vadd.f32 %v1047_v24, %v975_v37  ;;  %v943_v53 = vadd.f32 %v942_v48, %v3826_v3  ;;  %v2842_v37 = vor.u32 %v3351_v39, %v2839_v35  ;;  %v3948_v0 = vpack.c.bf16 %v185_v38, %v179_v11 }
  0xf8   :  { %v1015_v30 = vpop.f32.mrf.mxu1  ;;  %1356 = vmatpush.bf16.msra.mxu2 %v2778_v56  ;;  %v186_v56 = vld [vmem:[#allocation2 + $0x298] sm:$0xff] }
  0xf9   :  { %4691 = vst [vmem:[#allocation50_spill] sm:$0xff] %v3930_v14  ;;  %v3933_v29 = vadd.f32 %v1015_v30, %v943_v53  ;;  %1097 = vmatmul.bf16.gmra.mxu2 %v3922_v54  ;;  %1238 = vmatmul.bf16.gmra.mxu0 %v3924_v41  ;;  %v195_v41 = vld [vmem:[#allocation2 + $0x2e0] sm:$0xff] }
  0xfa   :  { %1170 = vmatmul.bf16.gmra.mxu3 %v3926_v49  ;;  %v190_v49 = vld [vmem:[#allocation2 + $0x2b8] sm:$0xff]  ;;  %4694 = vst [vmem:[#allocation53_spill] sm:$0xff] %v3948_v0 }
  0xfb   :  { %1311 = vmatmul.bf16.gmra.mxu1 %v3928_v45  ;;  %v189_v45 = vld [vmem:[#allocation2 + $0x2b0] sm:$0xff]  ;;  %1429 = vmatpush.bf16.msra.mxu3 %v2842_v37 }
  0xfc   :  { %v977_v1 = vpop.f32.mrf.mxu2 }
  0xfd   :  { %v978_v24 = vadd.f32 %v977_v1, %v3826_v3  ;;  %v1050_v16 = vpop.f32.mrf.mxu3  ;;  %v196_v1 = vld [vmem:[#allocation2 + $0x2e8] sm:$0xff] }
  0xfe   :  { %v944_v22 = vpop.f32.mrf.mxu0 }
  0xff   :  { %v3940_v25 = vadd.f32 %v1050_v16, %v978_v24  ;;  %v945_v30 = vadd.f32 %v944_v22, %v3826_v3  ;;  %v3946_v22 = vpack.c.bf16 %v195_v41, %v189_v45 }
 0x100   :  { %v1017_v53 = vpop.f32.mrf.mxu1 }
 0x101   :  { %4692 = vst [vmem:[#allocation51_spill] sm:$0xff] %v3940_v25  ;;  %v3943_v48 = vadd.f32 %v1017_v53, %v945_v30  ;;  %v3950_v30 = vpack.c.bf16 %v196_v1, %v190_v49  ;;  %v3952_v53 = vpack.c.bf16 %v186_v56, %v180_v4  ;;  %v2943_v1 = vld [vmem:[#allocation5 + $0x178] sm:$0xf0]  ;;  %v3393_v56 = vld [vmem:[#allocation5 + $0x1f4] sm:$0xf] }
 0x102   :  { %4693 = vst [vmem:[#allocation52_spill] sm:$0xff] %v3946_v22 }
 0x103   :  { %4695 = vst [vmem:[#allocation54_spill] sm:$0xff] %v3950_v30 }
 0x104   :  { %v979_v54 = vpop.f32.mrf.mxu2  ;;  %4696 = vst [vmem:[#allocation55_spill] sm:$0xff] %v3952_v53 }
 0x105   :  { %v980_v24 = vadd.f32 %v979_v54, %v3826_v3  ;;  %v1052_v16 = vpop.f32.mrf.mxu3 }
 0x106   :  { %v947_v39 = vpop.f32.mrf.mxu0 }
 0x107   :  { %v3954_v35 = vadd.f32 %v1052_v16, %v980_v24  ;;  %v948_v37 = vadd.f32 %v947_v39, %v3826_v3  ;;  %v3007_v16 = vld [vmem:[#allocation5 + $0x1f8] sm:$0xf0] }
 0x108   :  { %v1020_v25 = vpop.f32.mrf.mxu1 }
 0x109   :  { %4697 = vst [vmem:[#allocation56_spill] sm:$0xff] %v3954_v35  ;;  %v3957_v12 = vadd.f32 %v1020_v25, %v948_v37  ;;  %1102 = vmatmul.bf16.gmra.mxu2 %v3946_v22  ;;  %1243 = vmatmul.bf16.gmra.mxu0 %v3948_v0  ;;  %v3377_v25 = vld [vmem:[#allocation5 + $0x174] sm:$0xf]  ;;  %v201_v37 = vld [vmem:[#allocation2 + $0x310] sm:$0xff]  ;;  %v208_v35 = vld [vmem:[#allocation2 + $0x348] sm:$0xff] }
 0x10a   :  { %1175 = vmatmul.bf16.gmra.mxu3 %v3950_v30  ;;  %v2946_v24 = vor.u32 %v3377_v25, %v2943_v1  ;;  %v207_v0 = vld [vmem:[#allocation2 + $0x340] sm:$0xff]  ;;  %v202_v30 = vld [vmem:[#allocation2 + $0x318] sm:$0xff] }
 0x10b   :  { %1316 = vmatmul.bf16.gmra.mxu1 %v3952_v53  ;;  %v3010_v53 = vor.u32 %v3393_v56, %v3007_v16  ;;  %v191_v22 = vld [vmem:[#allocation2 + $0x2c0] sm:$0xff]  ;;  %v3969_v21 = vpack.c.bf16 %v207_v0, %v201_v37  ;;  %v2834_v0 = vor.u32 %v3349_v18, %v2831_v61  ;;  %v214_v18 = vld [vmem:[#allocation2 + $0x378] sm:$0xff] }
 0x10c   :  { %v982_v54 = vpop.f32.mrf.mxu2  ;;  %1497 = vmatpush.bf16.msra.mxu0 %v2946_v24  ;;  %v3333_v16 = vld [vmem:[#allocation5 + $0x14] sm:$0xf]  ;;  %v2767_v24 = vld [vmem:[#allocation5 + $0x18] sm:$0xf0] }
 0x10d   :  { %v983_v41 = vadd.f32 %v982_v54, %v3826_v3  ;;  %v1055_v4 = vpop.f32.mrf.mxu3  ;;  %v197_v54 = vld [vmem:[#allocation2 + $0x2f0] sm:$0xff]  ;;  %1570 = vmatpush.bf16.msra.mxu1 %v3010_v53  ;;  %4699 = vst [vmem:[#allocation58_spill] sm:$0xff] %v3969_v21  ;;  %v2770_v14 = vor.u32 %v3333_v16, %v2767_v24  ;;  %1430 = vmatpush.bf16.msra.mxu3 %v2834_v0  ;;  %v203_v61 = vld [vmem:[#allocation2 + $0x320] sm:$0xff]  ;;  %v204_v16 = vld [vmem:[#allocation2 + $0x328] sm:$0xff] }
 0x10e   :  { %v949_v49 = vpop.f32.mrf.mxu0  ;;  %v3971_v60 = vpack.c.bf16 %v197_v54, %v191_v22 }
 0x10f   :  { %v3964_v45 = vadd.f32 %v1055_v4, %v983_v41  ;;  %v950_v11 = vadd.f32 %v949_v49, %v3826_v3  ;;  %v192_v41 = vld [vmem:[#allocation2 + $0x2c8] sm:$0xff]  ;;  %v198_v4 = vld [vmem:[#allocation2 + $0x2f8] sm:$0xff]  ;;  %1357 = vmatpush.bf16.msra.mxu2 %v2770_v14 }
 0x110   :  { %v1022_v38 = vpop.f32.mrf.mxu1  ;;  %4700 = vst [vmem:[#allocation59_spill] sm:$0xff] %v3971_v60  ;;  %v210_v14 = vld [vmem:[#allocation2 + $0x358] sm:$0xff] }
 0x111   :  { %4698 = vst [vmem:[#allocation57_spill] sm:$0xff] %v3964_v45  ;;  %v3967_v39 = vadd.f32 %v1022_v38, %v950_v11  ;;  %v3973_v11 = vpack.c.bf16 %v208_v35, %v202_v30  ;;  %v3975_v38 = vpack.c.bf16 %v198_v4, %v192_v41 }
 0x113   :  { %4701 = vst [vmem:[#allocation60_spill] sm:$0xff] %v3973_v11 }
 0x114   :  { %v984_v49 = vpop.f32.mrf.mxu2  ;;  %4702 = vst [vmem:[#allocation61_spill] sm:$0xff] %v3975_v38 }
 0x115   :  { %v1057_v45 = vpop.f32.mrf.mxu3  ;;  %v213_v49 = vld [vmem:[#allocation2 + $0x370] sm:$0xff] }
 0x116   :  { %v952_v25 = vpop.f32.mrf.mxu0 }
 0x117   :  { %v953_v1 = vadd.f32 %v952_v25, %v3826_v3  ;;  %v219_v25 = vld [vmem:[#allocation2 + $0x3a0] sm:$0xff] }
 0x118   :  { %v1025_v56 = vpop.f32.mrf.mxu1 }
 0x119   :  { %v3978_v53 = vadd.f32 %v1025_v56, %v953_v1  ;;  %1107 = vmatmul.bf16.gmra.mxu2 %v3969_v21  ;;  %1248 = vmatmul.bf16.gmra.mxu0 %v3971_v60  ;;  %v209_v1 = vld [vmem:[#allocation2 + $0x350] sm:$0xff]  ;;  %v220_v56 = vld [vmem:[#allocation2 + $0x3a8] sm:$0xff] }
 0x11a   :  { %1180 = vmatmul.bf16.gmra.mxu3 %v3973_v11  ;;  %v3375_v60 = vld [vmem:[#allocation5 + $0x164] sm:$0xf]  ;;  %v2935_v11 = vld [vmem:[#allocation5 + $0x168] sm:$0xf0] }
 0x11b   :  { %1321 = vmatmul.bf16.gmra.mxu1 %v3975_v38  ;;  %v3391_v21 = vld [vmem:[#allocation5 + $0x1e4] sm:$0xf]  ;;  %v2938_v43 = vor.u32 %v3375_v60, %v2935_v11 }
 0x11c   :  { %v1068_v22 = vpop.f32.mrf.mxu2 }
 0x11d   :  { %v1069_v30 = vadd.f32 %v1068_v22, %v3837_v17  ;;  %v1141_v35 = vpop.f32.mrf.mxu3  ;;  %v3989_v22 = vpack.c.bf16 %v219_v25, %v213_v49  ;;  %1498 = vmatpush.bf16.msra.mxu0 %v2938_v43  ;;  %v216_v43 = vld [vmem:[#allocation2 + $0x388] sm:$0xff] }
 0x11e   :  { %v954_v45 = vpop.f32.mrf.mxu0 }
 0x11f   :  { %v1142_v37 = vadd.f32 %v1141_v35, %v1069_v30  ;;  %v955_v54 = vadd.f32 %v954_v45, %v3826_v3  ;;  %v3991_v30 = vpack.c.bf16 %v209_v1, %v203_v61  ;;  %v3993_v35 = vpack.c.bf16 %v220_v56, %v214_v18  ;;  %v2759_v1 = vld [vmem:[#allocation5 + $0x8] sm:$0xf0]  ;;  %v225_v56 = vld [vmem:[#allocation2 + $0x3d0] sm:$0xff] }
 0x120   :  { %v1027_v41 = vpop.f32.mrf.mxu1  ;;  %v3995_v45 = vpack.c.bf16 %v210_v14, %v204_v16  ;;  %v231_v16 = vld [vmem:[#allocation2 + $0x400] sm:$0xff] }
 0x121   :  { %v3986_v4 = vadd.f32 %v1027_v41, %v955_v54  ;;  %4703 = vst [vmem:[#allocation62_spill] sm:$0xff] %v3991_v30 }
 0x122   :  { %4704 = vst [vmem:[#allocation63_spill] sm:$0xff] %v3993_v35 }
 0x123   :  { %4705 = vst [vmem:[#allocation64_spill] sm:$0xff] %v3995_v45 }
 0x124   :  { %v1070_v24 = vpop.f32.mrf.mxu2 }
 0x125   :  { %v1071_v0 = vadd.f32 %v1070_v24, %v3847_v33  ;;  %v1143_v17 = vpop.f32.mrf.mxu3  ;;  %v3002_v33 = vor.u32 %v3391_v21, %v2999_v50  ;;  %v226_v21 = vld [vmem:[#allocation2 + $0x3d8] sm:$0xff]  ;;  %v232_v24 = vld [vmem:[#allocation2 + $0x408] sm:$0xff] }
 0x126   :  { %v1214_v3 = vpop.f32.mrf.mxu0 }
 0x127   :  { %v1144_v54 = vadd.f32 %v1143_v17, %v1071_v0  ;;  %v1215_v41 = vadd.f32 %v1214_v3, %v1142_v37  ;;  %1571 = vmatpush.bf16.msra.mxu1 %v3002_v33  ;;  %v215_v0 = vld [vmem:[#allocation2 + $0x380] sm:$0xff]  ;;  %v221_v17 = vld [vmem:[#allocation2 + $0x3b0] sm:$0xff]  ;;  %v222_v3 = vld [vmem:[#allocation2 + $0x3b8] sm:$0xff] }
 0x128   :  { %v1287_v38 = vpop.f32.mrf.mxu1  ;;  %v3347_v33 = vld [vmem:[#allocation5 + $0x84] sm:$0xf] }
 0x129   :  { %v1288_v8 = vadd.f32 %v1287_v38, %v1215_v41  ;;  %1112 = vmatmul.bf16.gmra.mxu2 %v3989_v22  ;;  %1253 = vmatmul.bf16.gmra.mxu0 %v3991_v30  ;;  %v3331_v38 = vld [vmem:[#allocation5 + $0x4] sm:$0xf]  ;;  %v4011_v30 = vpack.c.bf16 %v222_v3, %v216_v43  ;;  %v2927_v43 = vld [vmem:[#allocation5 + $0x158] sm:$0xf0] }
 0x12a   :  { %1185 = vmatmul.bf16.gmra.mxu3 %v3993_v35  ;;  %v2762_v14 = vor.u32 %v3331_v38, %v2759_v1  ;;  %v4005_v38 = vpack.c.bf16 %v231_v16, %v225_v56  ;;  %v4009_v1 = vpack.c.bf16 %v232_v24, %v226_v21 }
 0x12b   :  { %1326 = vmatmul.bf16.gmra.mxu1 %v3995_v45  ;;  %v1789_v41 = vmax.f32 %v1288_v8, 0.0  ;;  %4709 = vst [vmem:[#allocation68_spill] sm:$0xff] %v4011_v30 }
 0x12c   :  { %v1073_v49 = vpop.f32.mrf.mxu2  ;;  %1358 = vmatpush.bf16.msra.mxu2 %v2762_v14  ;;  %4708 = vst [vmem:[#allocation67_spill] sm:$0xff] %v4009_v1 }
 0x12d   :  { %v1074_v37 = vadd.f32 %v1073_v49, %v3861_v27  ;;  %v1146_v25 = vpop.f32.mrf.mxu3  ;;  %v2823_v49 = vld [vmem:[#allocation5 + $0x88] sm:$0xf0] }
 0x12e   :  { %v1216_v18 = vpop.f32.mrf.mxu0 }
 0x12f   :  { %v1147_v61 = vadd.f32 %v1146_v25, %v1074_v37  ;;  %v1217_v60 = vadd.f32 %v1216_v18, %v1144_v54  ;;  %v2826_v54 = vor.u32 %v3347_v33, %v2823_v49  ;;  %v227_v33 = vld [vmem:[#allocation2 + $0x3e0] sm:$0xff] }
 0x130   :  { %v1289_v11 = vpop.f32.mrf.mxu1 }
 0x131   :  { %v1290_v50 = vadd.f32 %v1289_v11, %v1217_v60  ;;  %v4007_v60 = vpack.c.bf16 %v221_v17, %v215_v0  ;;  %1431 = vmatpush.bf16.msra.mxu3 %v2826_v54  ;;  %v3389_v54 = vld [vmem:[#allocation5 + $0x1d4] sm:$0xf] }
 0x133   :  { %v1791_v27 = vmax.f32 %v1290_v50, 0.0  ;;  %4707 = vst [vmem:[#allocation66_spill] sm:$0xff] %v4007_v60 }
 0x134   :  { %v1075_v37 = vpop.f32.mrf.mxu2 }
 0x135   :  { %v4002_v25 = vpack.c.bf16 %v1791_v27, %v1789_v41  ;;  %v1076_v18 = vadd.f32 %v1075_v37, %v3871_v51  ;;  %v1148_v45 = vpop.f32.mrf.mxu3  ;;  %v243_v41 = vld [vmem:[#allocation2 + $0x460] sm:$0xff]  ;;  %v238_v27 = vld [vmem:[#allocation2 + $0x438] sm:$0xff]  ;;  %v233_v37 = vld [vmem:[#allocation2 + $0x410] sm:$0xff] }
 0x136   :  { %v1219_v11 = vpop.f32.mrf.mxu0 }
 0x137   :  { %4706 = vst [vmem:[#allocation65_spill] sm:$0xff] %v4002_v25  ;;  %v1149_v8 = vadd.f32 %v1148_v45, %v1076_v18  ;;  %v1220_v14 = vadd.f32 %v1219_v11, %v1147_v61  ;;  %v237_v45 = vld [vmem:[#allocation2 + $0x430] sm:$0xff]  ;;  %v3373_v61 = vld [vmem:[#allocation5 + $0x154] sm:$0xf]  ;;  %v2991_v18 = vld [vmem:[#allocation5 + $0x1d8] sm:$0xf0] }
 0x138   :  { %v1292_v50 = vpop.f32.mrf.mxu1  ;;  %v2930_v49 = vor.u32 %v3373_v61, %v2927_v43 }
 0x139   :  { %v1293_v35 = vadd.f32 %v1292_v50, %v1220_v14  ;;  %1117 = vmatmul.bf16.gmra.mxu2 %v4005_v38  ;;  %1258 = vmatmul.bf16.gmra.mxu0 %v4007_v60  ;;  %v244_v50 = vld [vmem:[#allocation2 + $0x468] sm:$0xff]  ;;  %v4021_v60 = vpack.c.bf16 %v233_v37, %v227_v33 }
 0x13a   :  { %1190 = vmatmul.bf16.gmra.mxu3 %v4009_v1  ;;  %1499 = vmatpush.bf16.msra.mxu0 %v2930_v49  ;;  %v3387_v49 = vld [vmem:[#allocation5 + $0x1c4] sm:$0xf]  ;;  %v2975_v37 = vld [vmem:[#allocation5 + $0x1b8] sm:$0xf0] }
 0x13b   :  { %1331 = vmatmul.bf16.gmra.mxu1 %v4011_v30  ;;  %v1793_v11 = vmax.f32 %v1293_v35, 0.0  ;;  %v2919_v30 = vld [vmem:[#allocation5 + $0x148] sm:$0xf0]  ;;  %4710 = vst [vmem:[#allocation69_spill] sm:$0xff] %v4021_v60 }
 0x13c   :  { %v1078_v51 = vpop.f32.mrf.mxu2 }
 0x13d   :  { %v1079_v56 = vadd.f32 %v1078_v51, %v3885_v7  ;;  %v1151_v16 = vpop.f32.mrf.mxu3  ;;  %v228_v7 = vld [vmem:[#allocation2 + $0x3e8] sm:$0xff]  ;;  %v234_v51 = vld [vmem:[#allocation2 + $0x418] sm:$0xff] }
 0x13e   :  { %v1221_v21 = vpop.f32.mrf.mxu0  ;;  %v4027_v25 = vpack.c.bf16 %v234_v51, %v228_v7  ;;  %v3425_v51 = vld [vmem:[#allocation5 + $0x2f4] sm:$0xf] }
 0x13f   :  { %v1152_v24 = vadd.f32 %v1151_v16, %v1079_v56  ;;  %v1222_v0 = vadd.f32 %v1221_v21, %v1149_v8  ;;  %v2994_v56 = vor.u32 %v3389_v54, %v2991_v18  ;;  %v4018_v16 = vpack.c.bf16 %v243_v41, %v237_v45  ;;  %v3371_v21 = vld [vmem:[#allocation5 + $0x144] sm:$0xf]  ;;  %v2983_v54 = vld [vmem:[#allocation5 + $0x1c8] sm:$0xf0] }
 0x140   :  { %v1294_v17 = vpop.f32.mrf.mxu1  ;;  %v2922_v61 = vor.u32 %v3371_v21, %v2919_v30  ;;  %4711 = vst [vmem:[#allocation70_spill] sm:$0xff] %v4027_v25  ;;  %v2986_v1 = vor.u32 %v3387_v49, %v2983_v54  ;;  %v3367_v21 = vld [vmem:[#allocation5 + $0x124] sm:$0xf] }
 0x141   :  { %v1295_v3 = vadd.f32 %v1294_v17, %v1222_v0  ;;  %1572 = vmatpush.bf16.msra.mxu1 %v2994_v56  ;;  %v3135_v56 = vld [vmem:[#allocation5 + $0x2f8] sm:$0xf0] }
 0x142   :  { %1500 = vmatpush.bf16.msra.mxu0 %v2922_v61  ;;  %v3138_v61 = vor.u32 %v3425_v51, %v3135_v56  ;;  %v245_v51 = vld [vmem:[#allocation2 + $0x470] sm:$0xff]  ;;  %v3381_v56 = vld [vmem:[#allocation5 + $0x194] sm:$0xf] }
 0x143   :  { %v1795_v14 = vmax.f32 %v1295_v3, 0.0  ;;  %v4025_v3 = vpack.c.bf16 %v244_v50, %v238_v27  ;;  %v3385_v27 = vld [vmem:[#allocation5 + $0x1b4] sm:$0xf] }
 0x144   :  { %v1080_v8 = vpop.f32.mrf.mxu2  ;;  %1716 = vmatpush.bf16.msrb.mxu3 %v3138_v61  ;;  %v3363_v61 = vld [vmem:[#allocation5 + $0x104] sm:$0xf] }
 0x145   :  { %v1081_v0 = vadd.f32 %v1080_v8, %v3895_v32  ;;  %v1153_v17 = vpop.f32.mrf.mxu3  ;;  %v4023_v43 = vpack.c.bf16 %v1795_v14, %v1793_v11  ;;  %v3369_v32 = vld [vmem:[#allocation5 + $0x134] sm:$0xf]  ;;  %v2911_v8 = vld [vmem:[#allocation5 + $0x138] sm:$0xf0]  ;;  %1573 = vmatpush.bf16.msra.mxu1 %v2986_v1  ;;  %v2978_v14 = vor.u32 %v3385_v27, %v2975_v37 }
 0x146   :  { %v1224_v35 = vpop.f32.mrf.mxu0  ;;  %v2914_v30 = vor.u32 %v3369_v32, %v2911_v8  ;;  %v3409_v11 = vld [vmem:[#allocation5 + $0x274] sm:$0xf]  ;;  %v2895_v37 = vld [vmem:[#allocation5 + $0x118] sm:$0xf0] }
 0x147   :  { %v1154_v45 = vadd.f32 %v1153_v17, %v1081_v0  ;;  %v1225_v41 = vadd.f32 %v1224_v35, %v1152_v24  ;;  %v3071_v24 = vld [vmem:[#allocation5 + $0x278] sm:$0xf0]  ;;  %v2903_v35 = vld [vmem:[#allocation5 + $0x128] sm:$0xf0]  ;;  %v3365_v27 = vld [vmem:[#allocation5 + $0x114] sm:$0xf] }
 0x148   :  { %v1297_v18 = vpop.f32.mrf.mxu1  ;;  %1501 = vmatpush.bf16.msra.mxu0 %v2914_v30  ;;  %v3074_v7 = vor.u32 %v3409_v11, %v3071_v24  ;;  %v2906_v54 = vor.u32 %v3367_v21, %v2903_v35  ;;  %v249_v24 = vld [vmem:[#allocation2 + $0x490] sm:$0xff]  ;;  %v250_v35 = vld [vmem:[#allocation2 + $0x498] sm:$0xff] }
 0x149   :  { %v1298_v33 = vadd.f32 %v1297_v18, %v1225_v41  ;;  %1122 = vmatmul.bf16.gmra.mxu2 %v4018_v16  ;;  %1263 = vmatmul.bf16.gmra.mxu0 %v4021_v60  ;;  %v3383_v41 = vld [vmem:[#allocation5 + $0x1a4] sm:$0xf]  ;;  %v2967_v18 = vld [vmem:[#allocation5 + $0x1a8] sm:$0xf0]  ;;  %v240_v60 = vld [vmem:[#allocation2 + $0x448] sm:$0xff] }
 0x14a   :  { %1195 = vmatmul.bf16.gmra.mxu3 %v4025_v3  ;;  %1643 = vmatpush.bf16.msrb.mxu2 %v3074_v7  ;;  %v2970_v30 = vor.u32 %v3383_v41, %v2967_v18 }
 0x14b   :  { %1336 = vmatmul.bf16.gmra.mxu1 %v4027_v25  ;;  %v2959_v25 = vld [vmem:[#allocation5 + $0x198] sm:$0xf0]  ;;  %v1797_v7 = vmax.f32 %v1298_v33, 0.0 }
 0x14c   :  { %v1083_v50 = vpop.f32.mrf.mxu2  ;;  %1574 = vmatpush.bf16.msra.mxu1 %v2978_v14  ;;  %1502 = vmatpush.bf16.msra.mxu0 %v2906_v54  ;;  %v4034_v14 = vpack.c.bf16 %v249_v24, %v249_v24 }
 0x14d   :  { %v1084_v0 = vadd.f32 %v1083_v50, %v3909_v42  ;;  %v1156_v17 = vpop.f32.mrf.mxu3  ;;  %v239_v42 = vld [vmem:[#allocation2 + $0x440] sm:$0xff]  ;;  %v2898_v50 = vor.u32 %v3365_v27, %v2895_v37  ;;  %v4041_v27 = vpack.c.bf16 %v250_v35, %v250_v35 }
 0x14e   :  { %v1226_v49 = vpop.f32.mrf.mxu0  ;;  %v4037_v18 = vpack.c.bf16 %v245_v51, %v239_v42 }
 0x14f   :  { %v1157_v1 = vadd.f32 %v1156_v17, %v1084_v0  ;;  %v1227_v32 = vadd.f32 %v1226_v49, %v1154_v45  ;;  %v246_v0 = vld [vmem:[#allocation2 + $0x478] sm:$0xff]  ;;  %v2962_v45 = vor.u32 %v3381_v56, %v2959_v25  ;;  %v3379_v25 = vld [vmem:[#allocation5 + $0x184] sm:$0xf] }
 0x150   :  { %v1299_v8 = vpop.f32.mrf.mxu1  ;;  %1575 = vmatpush.bf16.msra.mxu1 %v2970_v30  ;;  %1503 = vmatpush.bf16.msra.mxu0 %v2898_v50  ;;  %v2887_v49 = vld [vmem:[#allocation5 + $0x108] sm:$0xf0]  ;;  %v4043_v37 = vpack.c.bf16 %v246_v0, %v240_v60 }
 0x151   :  { %v1300_v11 = vadd.f32 %v1299_v8, %v1227_v32  ;;  %v2890_v32 = vor.u32 %v3363_v61, %v2887_v49  ;;  %v2951_v30 = vld [vmem:[#allocation5 + $0x188] sm:$0xf0] }
 0x152   :  { %v2954_v56 = vor.u32 %v3379_v25, %v2951_v30 }
 0x153   :  { %v1799_v21 = vmax.f32 %v1300_v11, 0.0 }
 0x154   :  { %v1085_v17 = vpop.f32.mrf.mxu2  ;;  %1576 = vmatpush.bf16.msra.mxu1 %v2962_v45  ;;  %1504 = vmatpush.bf16.msra.mxu0 %v2890_v32  ;;  %v251_v45 = vld [vmem:[#allocation2 + $0x4a0] sm:$0xff] }
 0x155   :  { %v1086_v54 = vadd.f32 %v1085_v17, %v3919_v58  ;;  %v1158_v41 = vpop.f32.mrf.mxu3  ;;  %v4039_v8 = vpack.c.bf16 %v1799_v21, %v1797_v7  ;;  %v252_v17 = vld [vmem:[#allocation2 + $0x4a8] sm:$0xff] }
 0x156   :  { %v1229_v33 = vpop.f32.mrf.mxu0 }
 0x157   :  { %v1159_v11 = vadd.f32 %v1158_v41, %v1086_v54  ;;  %v1230_v24 = vadd.f32 %v1229_v33, %v1157_v1  ;;  %v3407_v54 = vld [vmem:[#allocation5 + $0x264] sm:$0xf]  ;;  %v3063_v41 = vld [vmem:[#allocation5 + $0x268] sm:$0xf0] }
 0x158   :  { %v1302_v50 = vpop.f32.mrf.mxu1  ;;  %1577 = vmatpush.bf16.msra.mxu1 %v2954_v56  ;;  %v3066_v33 = vor.u32 %v3407_v54, %v3063_v41  ;;  %v4055_v56 = vpack.c.bf16 %v252_v17, %v252_v17 }
 0x159   :  { %v1303_v58 = vadd.f32 %v1302_v50, %v1230_v24  ;;  %1127 = vmatmul.bf16.gmra.mxu2 %v4034_v14  ;;  %1268 = vmatmul.bf16.gmra.mxu0 %v4037_v18  ;;  %v4051_v24 = vpack.c.bf16 %v251_v45, %v251_v45 }
 0x15a   :  { %1200 = vmatmul.bf16.gmra.mxu3 %v4041_v27  ;;  %1644 = vmatpush.bf16.msrb.mxu2 %v3066_v33 }
 0x15b   :  { %1341 = vmatmul.bf16.gmra.mxu1 %v4043_v37  ;;  %v1801_v61 = vmax.f32 %v1303_v58, 0.0  ;;  %v3423_v58 = vld [vmem:[#allocation5 + $0x2e4] sm:$0xf] }
 0x15c   :  { %v1088_v60 = vpop.f32.mrf.mxu2 }
 0x15d   :  { %v1089_v42 = vadd.f32 %v1088_v60, %v3933_v29  ;;  %v1161_v51 = vpop.f32.mrf.mxu3 }
 0x15e   :  { %v1231_v7 = vpop.f32.mrf.mxu0 }
 0x15f   :  { %v1162_v1 = vadd.f32 %v1161_v51, %v1089_v42  ;;  %v1232_v21 = vadd.f32 %v1231_v7, %v1159_v11  ;;  %v3127_v51 = vld [vmem:[#allocation5 + $0x2e8] sm:$0xf0] }
 0x160   :  { %v1304_v35 = vpop.f32.mrf.mxu1  ;;  %v3130_v7 = vor.u32 %v3423_v58, %v3127_v51 }
 0x161   :  { %v1305_v0 = vadd.f32 %v1304_v35, %v1232_v21 }
 0x162   :  { %1717 = vmatpush.bf16.msrb.mxu3 %v3130_v7 }
 0x163   :  { %v1803_v49 = vmax.f32 %v1305_v0, 0.0 }
 0x164   :  { %v1090_v32 = vpop.f32.mrf.mxu2 }
 0x165   :  { %v1091_v25 = vadd.f32 %v1090_v32, %v3943_v48  ;;  %v1163_v30 = vpop.f32.mrf.mxu3  ;;  %v4053_v29 = vpack.c.bf16 %v1803_v49, %v1801_v61 }
 0x166   :  { %v1234_v50 = vpop.f32.mrf.mxu0 }
 0x167   :  { %v1164_v11 = vadd.f32 %v1163_v30, %v1091_v25  ;;  %v1235_v60 = vadd.f32 %v1234_v50, %v1162_v1 }
 0x168   :  { %v1307_v42 = vpop.f32.mrf.mxu1 }
 0x169   :  { %v1308_v21 = vadd.f32 %v1307_v42, %v1235_v60  ;;  %1273 = vmatmul.bf16.gmra.mxu0 %v4051_v24  ;;  %1359 = vmatmul.bf16.vlgmr.msra.gmra.mxu2 %v3730_v63 }
 0x16a   :  { %1432 = vmatmul.bf16.vlgmr.msra.gmra.mxu3 %v3736_v5 }
 0x16b   :  { %1346 = vmatmul.bf16.gmra.mxu1 %v4055_v56  ;;  %v1805_v54 = vmax.f32 %v1308_v21, 0.0 }
 0x16c   :  { %v1093_v48 = vpop.f32.mrf.mxu2 }
 0x16d   :  { %v1094_v35 = vadd.f32 %v1093_v48, %v3957_v12  ;;  %v1166_v0 = vpop.f32.mrf.mxu3  ;;  %v3405_v48 = vld [vmem:[#allocation5 + $0x254] sm:$0xf] }
 0x16e   :  { %v1236_v45 = vpop.f32.mrf.mxu0 }
 0x16f   :  { %v1167_v1 = vadd.f32 %v1166_v0, %v1094_v35  ;;  %v1237_v17 = vadd.f32 %v1236_v45, %v1164_v11  ;;  %v3055_v35 = vld [vmem:[#allocation5 + $0x258] sm:$0xf0]  ;;  %v3421_v0 = vld [vmem:[#allocation5 + $0x2d4] sm:$0xf] }
 0x170   :  { %v1309_v61 = vpop.f32.mrf.mxu1  ;;  %v3058_v45 = vor.u32 %v3405_v48, %v3055_v35  ;;  %v3403_v35 = vld [vmem:[#allocation5 + $0x244] sm:$0xf] }
 0x171   :  { %v1310_v49 = vadd.f32 %v1309_v61, %v1237_v17 }
 0x172   :  { %1645 = vmatpush.bf16.msrb.mxu2 %v3058_v45 }
 0x173   :  { %v1807_v41 = vmax.f32 %v1310_v49, 0.0 }
 0x174   :  { %v1095_v32 = vpop.f32.mrf.mxu2 }
 0x175   :  { %v1096_v33 = vadd.f32 %v1095_v32, %v3967_v39  ;;  %v1168_v63 = vpop.f32.mrf.mxu3  ;;  %v4063_v25 = vpack.c.bf16 %v1807_v41, %v1805_v54 }
 0x176   :  { %v1239_v5 = vpop.f32.mrf.mxu0 }
 0x177   :  { %v1169_v30 = vadd.f32 %v1168_v63, %v1096_v33  ;;  %v1240_v50 = vadd.f32 %v1239_v5, %v1167_v1  ;;  %v3119_v1 = vld [vmem:[#allocation5 + $0x2d8] sm:$0xf0] }
 0x178   :  { %v1312_v60 = vpop.f32.mrf.mxu1  ;;  %v3122_v17 = vor.u32 %v3421_v0, %v3119_v1  ;;  %v3111_v1 = vld [vmem:[#allocation5 + $0x2c8] sm:$0xf0] }
 0x179   :  { %v1313_v42 = vadd.f32 %v1312_v60, %v1240_v50  ;;  %1364 = vmatmul.bf16.gmra.mxu2 %v3742_v28  ;;  %1505 = vmatmul.bf16.vlgmr.msra.gmra.mxu0 %v3804_v19 }
 0x17a   :  { %1437 = vmatmul.bf16.gmra.mxu3 %v3748_v31 }
 0x17b   :  { %1578 = vmatmul.bf16.vlgmr.msra.gmra.mxu1 %v3806_v20  ;;  %v1809_v19 = vmax.f32 %v1313_v42, 0.0  ;;  %1718 = vmatpush.bf16.msrb.mxu3 %v3122_v17 }
 0x17c   :  { %v1098_v12 = vpop.f32.mrf.mxu2 }
 0x17d   :  { %v1099_v11 = vadd.f32 %v1098_v12, %v3978_v53  ;;  %v1171_v39 = vpop.f32.mrf.mxu3 }
 0x17e   :  { %v1241_v58 = vpop.f32.mrf.mxu0 }
 0x17f   :  { %v1172_v51 = vadd.f32 %v1171_v39, %v1099_v11  ;;  %v1242_v7 = vadd.f32 %v1241_v58, %v1169_v30 }
 0x180   :  { %v1314_v21 = vpop.f32.mrf.mxu1 }
 0x181   :  { %v1315_v28 = vadd.f32 %v1314_v21, %v1242_v7 }
 0x183   :  { %v1811_v31 = vmax.f32 %v1315_v28, 0.0 }
 0x184   :  { %v1100_v20 = vpop.f32.mrf.mxu2 }
 0x185   :  { %v1101_v61 = vadd.f32 %v1100_v20, %v3986_v4  ;;  %v1173_v53 = vpop.f32.mrf.mxu3  ;;  %v4071_v49 = vpack.c.bf16 %v1811_v31, %v1809_v19 }
 0x186   :  { %v1244_v54 = vpop.f32.mrf.mxu0 }
 0x187   :  { %4712 = vst [vmem:[#allocation71_spill] sm:$0xff] %v4071_v49  ;;  %v1174_v41 = vadd.f32 %v1173_v53, %v1101_v61  ;;  %v1245_v32 = vadd.f32 %v1244_v54, %v1172_v51 }
 0x188   :  { %v1317_v33 = vpop.f32.mrf.mxu1 }
 0x189   :  { %v1318_v63 = vadd.f32 %v1317_v33, %v1245_v32  ;;  %1369 = vmatmul.bf16.gmra.mxu2 %v3754_v52  ;;  %1510 = vmatmul.bf16.gmra.mxu0 %v3814_v34 }
 0x18a   :  { %1442 = vmatmul.bf16.gmra.mxu3 %v3760_v55 }
 0x18b   :  { %1583 = vmatmul.bf16.gmra.mxu1 %v3818_v36  ;;  %v1813_v39 = vmax.f32 %v1318_v63, 0.0 }
 0x18c   :  { %v1103_v5 = vpop.f32.mrf.mxu2 }
 0x18d   :  { %v1104_v30 = vadd.f32 %v1103_v5, %v3844_v26  ;;  %v1176_v4 = vpop.f32.mrf.mxu3  ;;  %v3047_v26 = vld [vmem:[#allocation5 + $0x248] sm:$0xf0] }
 0x18e   :  { %v1246_v50 = vpop.f32.mrf.mxu0  ;;  %v3050_v0 = vor.u32 %v3403_v35, %v3047_v26 }
 0x18f   :  { %v1177_v60 = vadd.f32 %v1176_v4, %v1104_v30  ;;  %v1247_v42 = vadd.f32 %v1246_v50, %v1174_v41 }
 0x190   :  { %v1319_v12 = vpop.f32.mrf.mxu1  ;;  %1646 = vmatpush.bf16.msrb.mxu2 %v3050_v0 }
 0x191   :  { %v1320_v11 = vadd.f32 %v1319_v12, %v1247_v42 }
 0x193   :  { %v1815_v58 = vmax.f32 %v1320_v11, 0.0 }
 0x194   :  { %v1105_v51 = vpop.f32.mrf.mxu2 }
 0x195   :  { %v1106_v52 = vadd.f32 %v1105_v51, %v3858_v15  ;;  %v1178_v7 = vpop.f32.mrf.mxu3  ;;  %v4079_v34 = vpack.c.bf16 %v1815_v58, %v1813_v39  ;;  %v3419_v15 = vld [vmem:[#allocation5 + $0x2c4] sm:$0xf] }
 0x196   :  { %v1249_v55 = vpop.f32.mrf.mxu0  ;;  %v3114_v17 = vor.u32 %v3419_v15, %v3111_v1  ;;  %v4714_v1 = vld [vmem:[#allocation37_spill] sm:$0xff] }
 0x197   :  { %v1179_v21 = vadd.f32 %v1178_v7, %v1106_v52  ;;  %v1250_v36 = vadd.f32 %v1249_v55, %v1177_v60  ;;  %v3401_v7 = vld [vmem:[#allocation5 + $0x234] sm:$0xf]  ;;  %v3039_v55 = vld [vmem:[#allocation5 + $0x238] sm:$0xf0] }
 0x198   :  { %v1322_v48 = vpop.f32.mrf.mxu1  ;;  %1719 = vmatpush.bf16.msrb.mxu3 %v3114_v17  ;;  %v4716_v17 = vld [vmem:[#allocation39_spill] sm:$0xff] }
 0x199   :  { %v1323_v45 = vadd.f32 %v1322_v48, %v1250_v36  ;;  %1374 = vmatmul.bf16.gmra.mxu2 %v3766_v10  ;;  %1515 = vmatmul.bf16.gmra.mxu0 %v3828_v6  ;;  %v3103_v36 = vld [vmem:[#allocation5 + $0x2b8] sm:$0xf0] }
 0x19a   :  { %1447 = vmatmul.bf16.gmra.mxu3 %v3772_v13 }
 0x19b   :  { %1588 = vmatmul.bf16.gmra.mxu1 %v3832_v9  ;;  %v1817_v41 = vmax.f32 %v1323_v45, 0.0 }
 0x19c   :  { %v1108_v28 = vpop.f32.mrf.mxu2 }
 0x19d   :  { %v1109_v19 = vadd.f32 %v1108_v28, %v3868_v44  ;;  %v1181_v31 = vpop.f32.mrf.mxu3  ;;  %v4715_v28 = vld [vmem:[#allocation28_spill] sm:$0xff] }
 0x19e   :  { %v1251_v20 = vpop.f32.mrf.mxu0 }
 0x19f   :  { %v1182_v61 = vadd.f32 %v1181_v31, %v1109_v19  ;;  %v1252_v53 = vadd.f32 %v1251_v20, %v1179_v21  ;;  %v3042_v21 = vor.u32 %v3401_v7, %v3039_v55  ;;  %v4717_v19 = vld [vmem:[#allocation45_spill] sm:$0xff]  ;;  %v3399_v7 = vld [vmem:[#allocation5 + $0x224] sm:$0xf]  ;;  %v3031_v55 = vld [vmem:[#allocation5 + $0x228] sm:$0xf0] }
 0x1a0   :  { %v1324_v54 = vpop.f32.mrf.mxu1 }
 0x1a1   :  { %v1325_v10 = vadd.f32 %v1324_v54, %v1252_v53  ;;  %1647 = vmatpush.bf16.msrb.mxu2 %v3042_v21  ;;  %v3034_v21 = vor.u32 %v3399_v7, %v3031_v55 }
 0x1a3   :  { %v1819_v6 = vmax.f32 %v1325_v10, 0.0 }
 0x1a4   :  { %v1110_v32 = vpop.f32.mrf.mxu2 }
 0x1a5   :  { %v1111_v13 = vadd.f32 %v1110_v32, %v3882_v46  ;;  %v1183_v9 = vpop.f32.mrf.mxu3  ;;  %v4087_v33 = vpack.c.bf16 %v1819_v6, %v1817_v41  ;;  %1648 = vmatpush.bf16.msrb.mxu2 %v3034_v21 }
 0x1a6   :  { %v1254_v63 = vpop.f32.mrf.mxu0 }
 0x1a7   :  { %4713 = vst [vmem:[#allocation72_spill] sm:$0xff] %v4087_v33  ;;  %v1184_v5 = vadd.f32 %v1183_v9, %v1111_v13  ;;  %v1255_v30 = vadd.f32 %v1254_v63, %v1182_v61  ;;  %v4718_v9 = vld [vmem:[#allocation50_spill] sm:$0xff] }
 0x1a8   :  { %v1327_v4 = vpop.f32.mrf.mxu1 }
 0x1a9   :  { %v1328_v44 = vadd.f32 %v1327_v4, %v1255_v30  ;;  %1379 = vmatmul.bf16.gmra.mxu2 %v3778_v59  ;;  %1520 = vmatmul.bf16.gmra.mxu0 %v3850_v57  ;;  %v3417_v57 = vld [vmem:[#allocation5 + $0x2b4] sm:$0xf] }
 0x1aa   :  { %1452 = vmatmul.bf16.gmra.mxu3 %v3784_v62  ;;  %v3106_v48 = vor.u32 %v3417_v57, %v3103_v36 }
 0x1ab   :  { %1593 = vmatmul.bf16.gmra.mxu1 %v3854_v2  ;;  %v1821_v51 = vmax.f32 %v1328_v44, 0.0 }
 0x1ac   :  { %v1113_v50 = vpop.f32.mrf.mxu2  ;;  %1720 = vmatpush.bf16.msrb.mxu3 %v3106_v48  ;;  %v3095_v48 = vld [vmem:[#allocation5 + $0x2a8] sm:$0xf0] }
 0x1ad   :  { %v1114_v60 = vadd.f32 %v1113_v50, %v3892_v23  ;;  %v1186_v46 = vpop.f32.mrf.mxu3 }
 0x1ae   :  { %v1256_v42 = vpop.f32.mrf.mxu0 }
 0x1af   :  { %v1187_v12 = vadd.f32 %v1186_v46, %v1114_v60  ;;  %v1257_v11 = vadd.f32 %v1256_v42, %v1184_v5  ;;  %v4719_v46 = vld [vmem:[#allocation29_spill] sm:$0xff] }
 0x1b0   :  { %v1329_v39 = vpop.f32.mrf.mxu1  ;;  %v4720_v42 = vld [vmem:[#allocation41_spill] sm:$0xff] }
 0x1b1   :  { %v1330_v58 = vadd.f32 %v1329_v39, %v1257_v11  ;;  %v4722_v11 = vld [vmem:[#allocation43_spill] sm:$0xff] }
 0x1b3   :  { %v1823_v52 = vmax.f32 %v1330_v58, 0.0  ;;  %v4723_v58 = vld [vmem:[#allocation51_spill] sm:$0xff] }
 0x1b4   :  { %v1115_v59 = vpop.f32.mrf.mxu2 }
 0x1b5   :  { %v1116_v62 = vadd.f32 %v1115_v59, %v3906_v40  ;;  %v1188_v2 = vpop.f32.mrf.mxu3  ;;  %v4095_v35 = vpack.c.bf16 %v1823_v52, %v1821_v51 }
 0x1b6   :  { %v1259_v23 = vpop.f32.mrf.mxu0 }
 0x1b7   :  { %v1189_v26 = vadd.f32 %v1188_v2, %v1116_v62  ;;  %v1260_v0 = vadd.f32 %v1259_v23, %v1187_v12  ;;  %v4721_v12 = vld [vmem:[#allocation30_spill] sm:$0xff]  ;;  %v3415_v2 = vld [vmem:[#allocation5 + $0x2a4] sm:$0xf] }
 0x1b8   :  { %v1332_v45 = vpop.f32.mrf.mxu1  ;;  %v3098_v23 = vor.u32 %v3415_v2, %v3095_v48  ;;  %v3413_v2 = vld [vmem:[#allocation5 + $0x294] sm:$0xf] }
 0x1b9   :  { %v1333_v15 = vadd.f32 %v1332_v45, %v1260_v0  ;;  %1384 = vmatmul.bf16.gmra.mxu2 %v3790_v47  ;;  %1525 = vmatmul.bf16.gmra.mxu0 %v4714_v1  ;;  %v4724_v1 = vld [vmem:[#allocation56_spill] sm:$0xff] }
 0x1ba   :  { %1457 = vmatmul.bf16.gmra.mxu3 %v4715_v28 }
 0x1bb   :  { %1598 = vmatmul.bf16.gmra.mxu1 %v4716_v17  ;;  %v1825_v6 = vmax.f32 %v1333_v15, 0.0  ;;  %1721 = vmatpush.bf16.msrb.mxu3 %v3098_v23  ;;  %v3087_v23 = vld [vmem:[#allocation5 + $0x298] sm:$0xf0] }
 0x1bc   :  { %v1118_v40 = vpop.f32.mrf.mxu2 }
 0x1bd   :  { %v1119_v31 = vadd.f32 %v1118_v40, %v4717_v19  ;;  %v1191_v20 = vpop.f32.mrf.mxu3 }
 0x1be   :  { %v1261_v61 = vpop.f32.mrf.mxu0 }
 0x1bf   :  { %v1192_v53 = vadd.f32 %v1191_v20, %v1119_v31  ;;  %v1262_v54 = vadd.f32 %v1261_v61, %v1189_v26 }
 0x1c0   :  { %v1334_v10 = vpop.f32.mrf.mxu1 }
 0x1c1   :  { %v1335_v41 = vadd.f32 %v1334_v10, %v1262_v54  ;;  %v4725_v54 = vld [vmem:[#allocation16_spill] sm:$0xff]  ;;  %v4726_v10 = vld [vmem:[#allocation46_spill] sm:$0xff] }
 0x1c3   :  { %v1827_v32 = vmax.f32 %v1335_v41, 0.0  ;;  %v4727_v41 = vld [vmem:[#allocation17_spill] sm:$0xff] }
 0x1c4   :  { %v1120_v13 = vpop.f32.mrf.mxu2 }
 0x1c5   :  { %v1121_v47 = vadd.f32 %v1120_v13, %v4718_v9  ;;  %v1193_v63 = vpop.f32.mrf.mxu3  ;;  %v4103_v5 = vpack.c.bf16 %v1827_v32, %v1825_v6  ;;  %v4728_v6 = vld [vmem:[#allocation48_spill] sm:$0xff]  ;;  %v4729_v13 = vld [vmem:[#allocation57_spill] sm:$0xff] }
 0x1c6   :  { %v1264_v30 = vpop.f32.mrf.mxu0 }
 0x1c7   :  { %v1194_v4 = vadd.f32 %v1193_v63, %v1121_v47  ;;  %v1265_v44 = vadd.f32 %v1264_v30, %v1192_v53 }
 0x1c8   :  { %v1337_v50 = vpop.f32.mrf.mxu1 }
 0x1c9   :  { %v1338_v60 = vadd.f32 %v1337_v50, %v1265_v44  ;;  %1389 = vmatmul.bf16.gmra.mxu2 %v4719_v46  ;;  %1530 = vmatmul.bf16.gmra.mxu0 %v4720_v42  ;;  %v3197_v50 = vld [vmem:[#allocation8 + $0x70] sm:$0xf] }
 0x1ca   :  { %1462 = vmatmul.bf16.gmra.mxu3 %v4721_v12  ;;  %v3261_v46 = vld [vmem:[#allocation8 + $0xf0] sm:$0xf]  ;;  %v3458_v12 = vld [vmem:[#allocation8 + $0xf4] sm:$0xf0] }
 0x1cb   :  { %1603 = vmatmul.bf16.gmra.mxu1 %v4722_v11  ;;  %v1829_v0 = vmax.f32 %v1338_v60, 0.0  ;;  %v3442_v60 = vld [vmem:[#allocation8 + $0x74] sm:$0xf0] }
 0x1cc   :  { %v1123_v39 = vpop.f32.mrf.mxu2  ;;  %v3198_v42 = vor.u32 %v3442_v60, %v3197_v50  ;;  %v3456_v60 = vld [vmem:[#allocation8 + $0xe4] sm:$0xf0] }
 0x1cd   :  { %v1124_v51 = vadd.f32 %v1123_v39, %v4723_v58  ;;  %v1196_v52 = vpop.f32.mrf.mxu3  ;;  %v3262_v39 = vor.u32 %v3458_v12, %v3261_v46  ;;  %v4735_v12 = vld [vmem:[#allocation58_spill] sm:$0xff] }
 0x1ce   :  { %v1266_v59 = vpop.f32.mrf.mxu0  ;;  %2063 = vmatpush.bf16.msrb.mxu0 %v3198_v42  ;;  %v4734_v42 = vld [vmem:[#allocation20_spill] sm:$0xff] }
 0x1cf   :  { %v1197_v57 = vadd.f32 %v1196_v52, %v1124_v51  ;;  %v1267_v36 = vadd.f32 %v1266_v59, %v1194_v4  ;;  %2136 = vmatpush.bf16.msrb.mxu1 %v3262_v39  ;;  %v4736_v39 = vld [vmem:[#allocation21_spill] sm:$0xff] }
 0x1d0   :  { %v1339_v62 = vpop.f32.mrf.mxu1 }
 0x1d1   :  { %v1340_v26 = vadd.f32 %v1339_v62, %v1267_v36  ;;  %v3397_v36 = vld [vmem:[#allocation5 + $0x214] sm:$0xf]  ;;  %v3023_v62 = vld [vmem:[#allocation5 + $0x218] sm:$0xf0] }
 0x1d2   :  { %v3026_v48 = vor.u32 %v3397_v36, %v3023_v62  ;;  %v3395_v62 = vld [vmem:[#allocation5 + $0x204] sm:$0xf] }
 0x1d3   :  { %v1831_v45 = vmax.f32 %v1340_v26, 0.0 }
 0x1d4   :  { %v1125_v15 = vpop.f32.mrf.mxu2  ;;  %1649 = vmatpush.bf16.msrb.mxu2 %v3026_v48 }
 0x1d5   :  { %v1126_v28 = vadd.f32 %v1125_v15, %v4724_v1  ;;  %v1198_v17 = vpop.f32.mrf.mxu3  ;;  %v4111_v40 = vpack.c.bf16 %v1831_v45, %v1829_v0  ;;  %v4730_v0 = vld [vmem:[#allocation18_spill] sm:$0xff]  ;;  %v4731_v45 = vld [vmem:[#allocation52_spill] sm:$0xff] }
 0x1d6   :  { %v1269_v19 = vpop.f32.mrf.mxu0  ;;  %v3504_v15 = vld [vmem:[#allocation7] sm:$0x3] }
 0x1d7   :  { %v1199_v31 = vadd.f32 %v1198_v17, %v1126_v28  ;;  %v1270_v20 = vadd.f32 %v1269_v19, %v1197_v57  ;;  %v4124_v1 = vperm.slane %v3504_v15, 1  ;;  %v3090_v28 = vor.u32 %v3413_v2, %v3087_v23  ;;  %v4732_v17 = vld [vmem:[#allocation19_spill] sm:$0xff]  ;;  %v4733_v19 = vld [vmem:[#allocation54_spill] sm:$0xff]  ;;  %v3015_v2 = vld [vmem:[#allocation5 + $0x208] sm:$0xf0] }
 0x1d8   :  { %v1342_v61 = vpop.f32.mrf.mxu1  ;;  %v3018_v48 = vor.u32 %v3395_v62, %v3015_v2  ;;  %v3165_v62 = vld [vmem:[#allocation8 + $0x30] sm:$0xf]  ;;  %v3434_v2 = vld [vmem:[#allocation8 + $0x34] sm:$0xf0] }
 0x1d9   :  { %v1343_v53 = vadd.f32 %v1342_v61, %v1270_v20  ;;  %1394 = vmatmul.bf16.gmra.mxu2 %v4725_v54  ;;  %1535 = vmatmul.bf16.gmra.mxu0 %v4726_v10 }
 0x1da   :  { %1467 = vmatmul.bf16.gmra.mxu3 %v4727_v41  ;;  %1650 = vmatpush.bf16.msrb.mxu2 %v3018_v48 }
 0x1db   :  { %1608 = vmatmul.bf16.gmra.mxu1 %v4728_v6  ;;  %v1833_v58 = vmax.f32 %v1343_v53, 0.0  ;;  %1722 = vmatpush.bf16.msrb.mxu3 %v3090_v28 }
 0x1dc   :  { %v1128_v32 = vpop.f32.mrf.mxu2 }
 0x1dd   :  { %v1129_v9 = vadd.f32 %v1128_v32, %v4729_v13  ;;  %v1201_v47 = vpop.f32.mrf.mxu3 }
 0x1de   :  { %v1271_v63 = vpop.f32.mrf.mxu0 }
 0x1df   :  { %v1202_v30 = vadd.f32 %v1201_v47, %v1129_v9  ;;  %v1272_v4 = vadd.f32 %v1271_v63, %v1199_v31 }
 0x1e0   :  { %v1344_v44 = vpop.f32.mrf.mxu1 }
 0x1e1   :  { %v1345_v11 = vadd.f32 %v1344_v44, %v1272_v4  ;;  %v3440_v4 = vld [vmem:[#allocation8 + $0x64] sm:$0xf0]  ;;  %v3253_v44 = vld [vmem:[#allocation8 + $0xe0] sm:$0xf] }
 0x1e3   :  { %v1835_v51 = vmax.f32 %v1345_v11, 0.0  ;;  %v3254_v11 = vor.u32 %v3456_v60, %v3253_v44  ;;  %v3181_v44 = vld [vmem:[#allocation8 + $0x50] sm:$0xf] }
 0x1e4   :  { %v1130_v52 = vpop.f32.mrf.mxu2 }
 0x1e5   :  { %v1203_v7 = vpop.f32.mrf.mxu3  ;;  %v4118_v55 = vpack.c.bf16 %v1835_v51, %v1833_v58  ;;  %v4737_v58 = vld [vmem:[#allocation60_spill] sm:$0xff]  ;;  %2137 = vmatpush.bf16.msrb.mxu1 %v3254_v11 }
 0x1e6   :  { %v1274_v59 = vpop.f32.mrf.mxu0 }
 0x1e7   :  { %v1275_v21 = vadd.f32 %v1274_v59, %v1202_v30  ;;  %v3189_v30 = vld [vmem:[#allocation8 + $0x60] sm:$0xf] }
 0x1e8   :  { %v1347_v57 = vpop.f32.mrf.mxu1  ;;  %v3190_v50 = vor.u32 %v3440_v4, %v3189_v30 }
 0x1e9   :  { %v4120_v26 = vadd.f32 %v1347_v57, %v1275_v21  ;;  %1399 = vmatmul.bf16.gmra.mxu2 %v4730_v0  ;;  %1540 = vmatmul.bf16.gmra.mxu0 %v4731_v45  ;;  %v3411_v0 = vld [vmem:[#allocation5 + $0x284] sm:$0xf]  ;;  %v3079_v45 = vld [vmem:[#allocation5 + $0x288] sm:$0xf0] }
 0x1ea   :  { %1472 = vmatmul.bf16.gmra.mxu3 %v4732_v17  ;;  %2064 = vmatpush.bf16.msrb.mxu0 %v3190_v50  ;;  %v3082_v15 = vor.u32 %v3411_v0, %v3079_v45  ;;  %v3438_v50 = vld [vmem:[#allocation8 + $0x54] sm:$0xf0]  ;;  %v4741_v0 = vld [vmem:[#allocation24_spill] sm:$0xff]  ;;  %v3166_v45 = vor.u32 %v3434_v2, %v3165_v62  ;;  %v4745_v62 = vld [vmem:[#allocation27_spill] sm:$0xff] }
 0x1eb   :  { %1613 = vmatmul.bf16.gmra.mxu1 %v4733_v19  ;;  %v3182_v60 = vor.u32 %v3438_v50, %v3181_v44  ;;  %v3149_v50 = vld [vmem:[#allocation8 + $0x10] sm:$0xf]  ;;  %v3237_v2 = vld [vmem:[#allocation8 + $0xc0] sm:$0xf] }
 0x1ec   :  { %v1360_v31 = vpop.f32.mrf.mxu2  ;;  %1723 = vmatpush.bf16.msrb.mxu3 %v3082_v15  ;;  %v4742_v15 = vld [vmem:[#allocation25_spill] sm:$0xff] }
 0x1ed   :  { %v1361_v20 = vadd.f32 %v1360_v31, %v4124_v1  ;;  %v1433_v61 = vpop.f32.mrf.mxu3 }
 0x1ee   :  { %v1276_v53 = vpop.f32.mrf.mxu0  ;;  %2065 = vmatpush.bf16.msrb.mxu0 %v3182_v60  ;;  %v3430_v60 = vld [vmem:[#allocation8 + $0x14] sm:$0xf0] }
 0x1ef   :  { %v1434_v54 = vadd.f32 %v1433_v61, %v1361_v20 }
 0x1f0   :  { %v1349_v10 = vpop.f32.mrf.mxu1 }
 0x1f1   :  { %v4738_v10 = vld [vmem:[#allocation22_spill] sm:$0xff] }
 0x1f4   :  { %v1362_v41 = vpop.f32.mrf.mxu2 }
 0x1f5   :  { %v1363_v6 = vadd.f32 %v1362_v41, %v4124_v1  ;;  %v1435_v32 = vpop.f32.mrf.mxu3  ;;  %v4739_v41 = vld [vmem:[#allocation23_spill] sm:$0xff] }
 0x1f6   :  { %v1506_v13 = vpop.f32.mrf.mxu0 }
 0x1f7   :  { %v1436_v9 = vadd.f32 %v1435_v32, %v1363_v6  ;;  %v1507_v47 = vadd.f32 %v1506_v13, %v1434_v54  ;;  %v4740_v6 = vld [vmem:[#allocation63_spill] sm:$0xff] }
 0x1f8   :  { %v1579_v63 = vpop.f32.mrf.mxu1 }
 0x1f9   :  { %v4130_v46 = vadd.f32 %v1579_v63, %v1507_v47  ;;  %1404 = vmatmul.bf16.gmra.mxu2 %v4734_v42  ;;  %1545 = vmatmul.bf16.gmra.mxu0 %v4735_v12  ;;  %v3245_v42 = vld [vmem:[#allocation8 + $0xd0] sm:$0xf]  ;;  %v3454_v12 = vld [vmem:[#allocation8 + $0xd4] sm:$0xf0] }
 0x1fa   :  { %1477 = vmatmul.bf16.gmra.mxu3 %v4736_v39  ;;  %v3173_v39 = vld [vmem:[#allocation8 + $0x40] sm:$0xf] }
 0x1fb   :  { %1618 = vmatmul.bf16.gmra.mxu1 %v4737_v58  ;;  %v3436_v58 = vld [vmem:[#allocation8 + $0x44] sm:$0xf0] }
 0x1fc   :  { %v1365_v51 = vpop.f32.mrf.mxu2 }
 0x1fd   :  { %v1366_v52 = vadd.f32 %v1365_v51, %v4124_v1  ;;  %v1438_v7 = vpop.f32.mrf.mxu3 }
 0x1fe   :  { %v1508_v59 = vpop.f32.mrf.mxu0 }
 0x1ff   :  { %v1439_v21 = vadd.f32 %v1438_v7, %v1366_v52  ;;  %v1509_v57 = vadd.f32 %v1508_v59, %v1436_v9  ;;  %v3174_v7 = vor.u32 %v3436_v58, %v3173_v39 }
 0x200   :  { %v1581_v36 = vpop.f32.mrf.mxu1 }
 0x201   :  { %v4137_v23 = vadd.f32 %v1581_v36, %v1509_v57  ;;  %2066 = vmatpush.bf16.msrb.mxu0 %v3174_v7 }
 0x204   :  { %v1367_v28 = vpop.f32.mrf.mxu2 }
 0x205   :  { %v1368_v17 = vadd.f32 %v1367_v28, %v4124_v1  ;;  %v1440_v19 = vpop.f32.mrf.mxu3  ;;  %v4743_v28 = vld [vmem:[#allocation67_spill] sm:$0xff]  ;;  %2067 = vmatpush.bf16.msrb.mxu0 %v3166_v45 }
 0x206   :  { %v1511_v31 = vpop.f32.mrf.mxu0 }
 0x207   :  { %v1441_v20 = vadd.f32 %v1440_v19, %v1368_v17  ;;  %v1512_v61 = vadd.f32 %v1511_v31, %v1439_v21  ;;  %v3441_v17 = vld [vmem:[#allocation8 + $0x74] sm:$0xf]  ;;  %v3199_v19 = vld [vmem:[#allocation8 + $0x78] sm:$0xf0] }
 0x208   :  { %v1584_v53 = vpop.f32.mrf.mxu1  ;;  %v3457_v31 = vld [vmem:[#allocation8 + $0xf4] sm:$0xf] }
 0x209   :  { %v4140_v54 = vadd.f32 %v1584_v53, %v1512_v61  ;;  %1409 = vmatmul.bf16.gmra.mxu2 %v4738_v10  ;;  %1550 = vmatmul.bf16.gmra.mxu0 %v3989_v22  ;;  %v3246_v22 = vor.u32 %v3454_v12, %v3245_v42  ;;  %v3263_v61 = vld [vmem:[#allocation8 + $0xf8] sm:$0xf0]  ;;  %v3150_v42 = vor.u32 %v3430_v60, %v3149_v50  ;;  %v3255_v50 = vld [vmem:[#allocation8 + $0xe8] sm:$0xf0] }
 0x20a   :  { %1482 = vmatmul.bf16.gmra.mxu3 %v4739_v41  ;;  %v3266_v10 = vor.u32 %v3457_v31, %v3263_v61  ;;  %v3157_v41 = vld [vmem:[#allocation8 + $0x20] sm:$0xf] }
 0x20b   :  { %1623 = vmatmul.bf16.gmra.mxu1 %v4740_v6  ;;  %v3432_v6 = vld [vmem:[#allocation8 + $0x24] sm:$0xf0] }
 0x20c   :  { %v1370_v32 = vpop.f32.mrf.mxu2  ;;  %2138 = vmatpush.bf16.msrb.mxu1 %v3246_v22  ;;  %2282 = vmatpush.bf16.msra.mxu3 %v3266_v10  ;;  %v3141_v22 = vld [vmem:[#allocation8] sm:$0xf] }
 0x20d   :  { %v1371_v13 = vadd.f32 %v1370_v32, %v4124_v1  ;;  %v1443_v9 = vpop.f32.mrf.mxu3 }
 0x20e   :  { %v1513_v47 = vpop.f32.mrf.mxu0 }
 0x20f   :  { %v1444_v63 = vadd.f32 %v1443_v9, %v1371_v13  ;;  %v4147_v30 = vadd.f32 %v1513_v47, %v1441_v20  ;;  %v3202_v20 = vor.u32 %v3441_v17, %v3199_v19 }
 0x210   :  { %v4149_v4 = vpop.f32.mrf.mxu1 }
 0x211   :  { %2209 = vmatpush.bf16.msra.mxu2 %v3202_v20 }
 0x214   :  { %v1372_v11 = vpop.f32.mrf.mxu2 }
 0x215   :  { %v1373_v51 = vadd.f32 %v1372_v11, %v4124_v1  ;;  %v1445_v52 = vpop.f32.mrf.mxu3  ;;  %v3428_v11 = vld [vmem:[#allocation8 + $0x4] sm:$0xf0] }
 0x216   :  { %v1516_v59 = vpop.f32.mrf.mxu0 }
 0x217   :  { %v1446_v21 = vadd.f32 %v1445_v52, %v1373_v51  ;;  %v1517_v57 = vadd.f32 %v1516_v59, %v1444_v63  ;;  %v3142_v51 = vor.u32 %v3428_v11, %v3141_v22  ;;  %v4747_v22 = vld [vmem:[#allocation32_spill] sm:$0xff] }
 0x218   :  { %v1589_v36 = vpop.f32.mrf.mxu1 }
 0x219   :  { %v4152_v48 = vadd.f32 %v1589_v36, %v1517_v57  ;;  %1414 = vmatmul.bf16.gmra.mxu2 %v4741_v0  ;;  %1555 = vmatmul.bf16.gmra.mxu0 %v4005_v38  ;;  %v3158_v38 = vor.u32 %v3432_v6, %v3157_v41  ;;  %v4744_v36 = vld [vmem:[#allocation26_spill] sm:$0xff]  ;;  %v3452_v0 = vld [vmem:[#allocation8 + $0xc4] sm:$0xf0] }
 0x21a   :  { %1487 = vmatmul.bf16.gmra.mxu3 %v4742_v15  ;;  %v3238_v45 = vor.u32 %v3452_v0, %v3237_v2 }
 0x21b   :  { %1628 = vmatmul.bf16.gmra.mxu1 %v4743_v28  ;;  %2068 = vmatpush.bf16.msrb.mxu0 %v3158_v38 }
 0x21c   :  { %v1375_v53 = vpop.f32.mrf.mxu2  ;;  %2139 = vmatpush.bf16.msrb.mxu1 %v3238_v45 }
 0x21d   :  { %v1376_v32 = vadd.f32 %v1375_v53, %v4124_v1  ;;  %v1448_v13 = vpop.f32.mrf.mxu3  ;;  %v3439_v53 = vld [vmem:[#allocation8 + $0x64] sm:$0xf] }
 0x21e   :  { %v1518_v9 = vpop.f32.mrf.mxu0 }
 0x21f   :  { %v1449_v47 = vadd.f32 %v1448_v13, %v1376_v32  ;;  %v4159_v63 = vadd.f32 %v1518_v9, %v1446_v21  ;;  %2069 = vmatpush.bf16.msrb.mxu0 %v3150_v42 }
 0x220   :  { %v4161_v44 = vpop.f32.mrf.mxu1 }
 0x223   :  { %2070 = vmatpush.bf16.msrb.mxu0 %v3142_v51 }
 0x224   :  { %v1377_v12 = vpop.f32.mrf.mxu2 }
 0x225   :  { %v1378_v39 = vadd.f32 %v1377_v12, %v4124_v1  ;;  %v1450_v58 = vpop.f32.mrf.mxu3  ;;  %v4746_v12 = vld [vmem:[#allocation31_spill] sm:$0xff] }
 0x226   :  { %v1521_v52 = vpop.f32.mrf.mxu0 }
 0x227   :  { %v1451_v7 = vadd.f32 %v1450_v58, %v1378_v39  ;;  %v1522_v59 = vadd.f32 %v1521_v52, %v1449_v47  ;;  %v3455_v47 = vld [vmem:[#allocation8 + $0xe4] sm:$0xf] }
 0x228   :  { %v1594_v57 = vpop.f32.mrf.mxu1  ;;  %v3258_v60 = vor.u32 %v3455_v47, %v3255_v50  ;;  %v3453_v47 = vld [vmem:[#allocation8 + $0xd4] sm:$0xf] }
 0x229   :  { %v4164_v21 = vadd.f32 %v1594_v57, %v1522_v59  ;;  %1419 = vmatmul.bf16.gmra.mxu2 %v4744_v36  ;;  %1560 = vmatmul.bf16.gmra.mxu0 %v4018_v16  ;;  %v3191_v16 = vld [vmem:[#allocation8 + $0x68] sm:$0xf0] }
 0x22a   :  { %1492 = vmatmul.bf16.gmra.mxu3 %v4745_v62  ;;  %v3194_v10 = vor.u32 %v3439_v53, %v3191_v16  ;;  %v4750_v53 = vld [vmem:[#allocation34_spill] sm:$0xff] }
 0x22b   :  { %1633 = vmatmul.bf16.gmra.mxu1 %v4025_v3  ;;  %2283 = vmatpush.bf16.msra.mxu3 %v3258_v60  ;;  %v3247_v60 = vld [vmem:[#allocation8 + $0xd8] sm:$0xf0] }
 0x22c   :  { %v1380_v15 = vpop.f32.mrf.mxu2  ;;  %2210 = vmatpush.bf16.msra.mxu2 %v3194_v10 }
 0x22d   :  { %v1381_v28 = vadd.f32 %v1380_v15, %v4124_v1  ;;  %v1453_v17 = vpop.f32.mrf.mxu3  ;;  %v3450_v15 = vld [vmem:[#allocation8 + $0xb4] sm:$0xf0] }
 0x22e   :  { %v1523_v19 = vpop.f32.mrf.mxu0 }
 0x22f   :  { %v1454_v31 = vadd.f32 %v1453_v17, %v1381_v28  ;;  %v4171_v20 = vadd.f32 %v1523_v19, %v1451_v7  ;;  %v4748_v19 = vld [vmem:[#allocation33_spill] sm:$0xff] }
 0x230   :  { %v4173_v61 = vpop.f32.mrf.mxu1 }
 0x234   :  { %v1382_v41 = vpop.f32.mrf.mxu2 }
 0x235   :  { %v1383_v3 = vadd.f32 %v1382_v41, %v4124_v1  ;;  %v1455_v6 = vpop.f32.mrf.mxu3 }
 0x236   :  { %v1526_v32 = vpop.f32.mrf.mxu0 }
 0x237   :  { %v1456_v13 = vadd.f32 %v1455_v6, %v1383_v3  ;;  %v1527_v38 = vadd.f32 %v1526_v32, %v1454_v31  ;;  %v4749_v31 = vld [vmem:[#allocation65_spill] sm:$0xff] }
 0x238   :  { %v1599_v9 = vpop.f32.mrf.mxu1 }
 0x239   :  { %v4176_v42 = vadd.f32 %v1599_v9, %v1527_v38  ;;  %1565 = vmatmul.bf16.gmra.mxu0 %v4034_v14  ;;  %1651 = vmatmul.bf16.vlgmr.msrb.gmra.mxu2 %v4746_v12  ;;  %v3437_v38 = vld [vmem:[#allocation8 + $0x54] sm:$0xf]  ;;  %v3183_v9 = vld [vmem:[#allocation8 + $0x58] sm:$0xf0]  ;;  %v3250_v12 = vor.u32 %v3453_v47, %v3247_v60  ;;  %v3435_v60 = vld [vmem:[#allocation8 + $0x44] sm:$0xf] }
 0x23a   :  { %1724 = vmatmul.bf16.vlgmr.msrb.gmra.mxu3 %v4747_v22  ;;  %v3186_v50 = vor.u32 %v3437_v38, %v3183_v9 }
 0x23b   :  { %1638 = vmatmul.bf16.gmra.mxu1 %v4041_v27  ;;  %v3229_v27 = vld [vmem:[#allocation8 + $0xb0] sm:$0xf]  ;;  %2284 = vmatpush.bf16.msra.mxu3 %v3250_v12  ;;  %v3175_v12 = vld [vmem:[#allocation8 + $0x48] sm:$0xf0] }
 0x23c   :  { %v1385_v11 = vpop.f32.mrf.mxu2  ;;  %v3230_v28 = vor.u32 %v3450_v15, %v3229_v27  ;;  %2211 = vmatpush.bf16.msra.mxu2 %v3186_v50 }
 0x23d   :  { %v1386_v39 = vadd.f32 %v1385_v11, %v4124_v1  ;;  %v1458_v58 = vpop.f32.mrf.mxu3 }
 0x23e   :  { %v1528_v51 = vpop.f32.mrf.mxu0  ;;  %2140 = vmatpush.bf16.msrb.mxu1 %v3230_v28 }
 0x23f   :  { %v1459_v52 = vadd.f32 %v1458_v58, %v1386_v39  ;;  %v4183_v7 = vadd.f32 %v1528_v51, %v1456_v13 }
 0x240   :  { %v4185_v59 = vpop.f32.mrf.mxu1 }
 0x244   :  { %v1387_v57 = vpop.f32.mrf.mxu2 }
 0x245   :  { %v1388_v14 = vadd.f32 %v1387_v57, %v4124_v1  ;;  %v1460_v36 = vpop.f32.mrf.mxu3 }
 0x246   :  { %v1531_v62 = vpop.f32.mrf.mxu0 }
 0x247   :  { %v1461_v2 = vadd.f32 %v1460_v36, %v1388_v14  ;;  %v1532_v0 = vadd.f32 %v1531_v62, %v1459_v52  ;;  %v4751_v36 = vld [vmem:[#allocation35_spill] sm:$0xff]  ;;  %v4752_v62 = vld [vmem:[#allocation36_spill] sm:$0xff] }
 0x248   :  { %v1604_v45 = vpop.f32.mrf.mxu1 }
 0x249   :  { %v4188_v17 = vadd.f32 %v1604_v45, %v1532_v0  ;;  %1656 = vmatmul.bf16.gmra.mxu2 %v4748_v19  ;;  %2071 = vmatmul.bf16.vlgmr.msrb.gmra.mxu0 %v4749_v31 }
 0x24a   :  { %1729 = vmatmul.bf16.gmra.mxu3 %v4750_v53  ;;  %v3221_v53 = vld [vmem:[#allocation8 + $0xa0] sm:$0xf] }
 0x24c   :  { %v1390_v16 = vpop.f32.mrf.mxu2 }
 0x24d   :  { %v1391_v10 = vadd.f32 %v1390_v16, %v4124_v1  ;;  %v1463_v41 = vpop.f32.mrf.mxu3  ;;  %v3448_v16 = vld [vmem:[#allocation8 + $0xa4] sm:$0xf0] }
 0x24e   :  { %v1533_v3 = vpop.f32.mrf.mxu0 }
 0x24f   :  { %v1464_v6 = vadd.f32 %v1463_v41, %v1391_v10  ;;  %v4194_v32 = vadd.f32 %v1533_v3, %v1461_v2  ;;  %v3222_v10 = vor.u32 %v3448_v16, %v3221_v53 }
 0x250   :  { %v4196_v13 = vpop.f32.mrf.mxu1 }
 0x251   :  { %2141 = vmatpush.bf16.msrb.mxu1 %v3222_v10 }
 0x254   :  { %v1392_v22 = vpop.f32.mrf.mxu2 }
 0x255   :  { %v1393_v11 = vadd.f32 %v1392_v22, %v4124_v1  ;;  %v1465_v39 = vpop.f32.mrf.mxu3  ;;  %v3178_v22 = vor.u32 %v3435_v60, %v3175_v12  ;;  %v4756_v60 = vld [vmem:[#allocation44_spill] sm:$0xff]  ;;  %v3446_v12 = vld [vmem:[#allocation8 + $0x94] sm:$0xf0] }
 0x256   :  { %v1536_v58 = vpop.f32.mrf.mxu0 }
 0x257   :  { %v1466_v51 = vadd.f32 %v1465_v39, %v1393_v11  ;;  %v1537_v52 = vadd.f32 %v1536_v58, %v1464_v6  ;;  %v4753_v39 = vld [vmem:[#allocation38_spill] sm:$0xff]  ;;  %v4754_v58 = vld [vmem:[#allocation40_spill] sm:$0xff]  ;;  %2212 = vmatpush.bf16.msra.mxu2 %v3178_v22 }
 0x258   :  { %v1609_v57 = vpop.f32.mrf.mxu1 }
 0x259   :  { %v4199_v14 = vadd.f32 %v1609_v57, %v1537_v52  ;;  %1661 = vmatmul.bf16.gmra.mxu2 %v4751_v36  ;;  %2076 = vmatmul.bf16.gmra.mxu0 %v4023_v43  ;;  %v3239_v52 = vld [vmem:[#allocation8 + $0xc8] sm:$0xf0] }
 0x25a   :  { %1734 = vmatmul.bf16.gmra.mxu3 %v4752_v62 }
 0x25c   :  { %v1395_v2 = vpop.f32.mrf.mxu2 }
 0x25d   :  { %v1396_v0 = vadd.f32 %v1395_v2, %v4124_v1  ;;  %v1468_v45 = vpop.f32.mrf.mxu3 }
 0x25e   :  { %v1538_v27 = vpop.f32.mrf.mxu0 }
 0x25f   :  { %v1469_v15 = vadd.f32 %v1468_v45, %v1396_v0  ;;  %v4205_v28 = vadd.f32 %v1538_v27, %v1466_v51  ;;  %v3451_v51 = vld [vmem:[#allocation8 + $0xc4] sm:$0xf] }
 0x260   :  { %v4207_v19 = vpop.f32.mrf.mxu1  ;;  %v3242_v57 = vor.u32 %v3451_v51, %v3239_v52 }
 0x262   :  { %2285 = vmatpush.bf16.msra.mxu3 %v3242_v57 }
 0x264   :  { %v1397_v41 = vpop.f32.mrf.mxu2 }
 0x265   :  { %v1398_v3 = vadd.f32 %v1397_v41, %v4124_v1  ;;  %v1470_v6 = vpop.f32.mrf.mxu3 }
 0x266   :  { %v1541_v38 = vpop.f32.mrf.mxu0 }
 0x267   :  { %v1471_v9 = vadd.f32 %v1470_v6, %v1398_v3  ;;  %v1542_v47 = vadd.f32 %v1541_v38, %v1469_v15 }
 0x268   :  { %v1614_v50 = vpop.f32.mrf.mxu1 }
 0x269   :  { %v4210_v11 = vadd.f32 %v1614_v50, %v1542_v47  ;;  %1666 = vmatmul.bf16.gmra.mxu2 %v4753_v39  ;;  %2081 = vmatmul.bf16.gmra.mxu0 %v4039_v8  ;;  %v4755_v50 = vld [vmem:[#allocation42_spill] sm:$0xff] }
 0x26a   :  { %1739 = vmatmul.bf16.gmra.mxu3 %v4754_v58 }
 0x26c   :  { %v1400_v36 = vpop.f32.mrf.mxu2 }
 0x26d   :  { %v1401_v62 = vadd.f32 %v1400_v36, %v4124_v1  ;;  %v1473_v2 = vpop.f32.mrf.mxu3 }
 0x26e   :  { %v1543_v0 = vpop.f32.mrf.mxu0 }
 0x26f   :  { %v1474_v45 = vadd.f32 %v1473_v2, %v1401_v62  ;;  %v4216_v27 = vadd.f32 %v1543_v0, %v1471_v9  ;;  %v3213_v9 = vld [vmem:[#allocation8 + $0x90] sm:$0xf]  ;;  %v3433_v2 = vld [vmem:[#allocation8 + $0x34] sm:$0xf]  ;;  %v3167_v0 = vld [vmem:[#allocation8 + $0x38] sm:$0xf0] }
 0x270   :  { %v4218_v15 = vpop.f32.mrf.mxu1  ;;  %v3214_v22 = vor.u32 %v3446_v12, %v3213_v9 }
 0x272   :  { %2142 = vmatpush.bf16.msrb.mxu1 %v3214_v22  ;;  %v4757_v22 = vld [vmem:[#allocation47_spill] sm:$0xff] }
 0x274   :  { %v1402_v53 = vpop.f32.mrf.mxu2 }
 0x275   :  { %v1403_v16 = vadd.f32 %v1402_v53, %v4124_v1  ;;  %v1475_v10 = vpop.f32.mrf.mxu3  ;;  %v3170_v53 = vor.u32 %v3433_v2, %v3167_v0 }
 0x276   :  { %v1546_v41 = vpop.f32.mrf.mxu0 }
 0x277   :  { %v1476_v3 = vadd.f32 %v1475_v10, %v1403_v16  ;;  %v1547_v6 = vadd.f32 %v1546_v41, %v1474_v45  ;;  %v3449_v45 = vld [vmem:[#allocation8 + $0xb4] sm:$0xf]  ;;  %v3231_v16 = vld [vmem:[#allocation8 + $0xb8] sm:$0xf0]  ;;  %2213 = vmatpush.bf16.msra.mxu2 %v3170_v53 }
 0x278   :  { %v1619_v38 = vpop.f32.mrf.mxu1  ;;  %v3234_v10 = vor.u32 %v3449_v45, %v3231_v16  ;;  %v3444_v16 = vld [vmem:[#allocation8 + $0x84] sm:$0xf0] }
 0x279   :  { %v4221_v47 = vadd.f32 %v1619_v38, %v1547_v6  ;;  %1671 = vmatmul.bf16.gmra.mxu2 %v4755_v50  ;;  %2086 = vmatmul.bf16.gmra.mxu0 %v4053_v29 }
 0x27a   :  { %1744 = vmatmul.bf16.gmra.mxu3 %v4756_v60 }
 0x27b   :  { %2286 = vmatpush.bf16.msra.mxu3 %v3234_v10 }
 0x27c   :  { %v1405_v39 = vpop.f32.mrf.mxu2 }
 0x27d   :  { %v1406_v58 = vadd.f32 %v1405_v39, %v4124_v1  ;;  %v1478_v51 = vpop.f32.mrf.mxu3  ;;  %v4758_v39 = vld [vmem:[#allocation49_spill] sm:$0xff] }
 0x27e   :  { %v1548_v52 = vpop.f32.mrf.mxu0 }
 0x27f   :  { %v1479_v57 = vadd.f32 %v1478_v51, %v1406_v58  ;;  %v4227_v36 = vadd.f32 %v1548_v52, %v1476_v3 }
 0x280   :  { %v4229_v62 = vpop.f32.mrf.mxu1 }
 0x284   :  { %v1407_v41 = vpop.f32.mrf.mxu2 }
 0x285   :  { %v1408_v6 = vadd.f32 %v1407_v41, %v4124_v1  ;;  %v1480_v38 = vpop.f32.mrf.mxu3 }
 0x286   :  { %v1551_v50 = vpop.f32.mrf.mxu0 }
 0x287   :  { %v1481_v60 = vadd.f32 %v1480_v38, %v1408_v6  ;;  %v1552_v9 = vadd.f32 %v1551_v50, %v1479_v57  ;;  %v3205_v57 = vld [vmem:[#allocation8 + $0x80] sm:$0xf] }
 0x288   :  { %v1624_v12 = vpop.f32.mrf.mxu1  ;;  %v3206_v10 = vor.u32 %v3444_v16, %v3205_v57 }
 0x289   :  { %v4232_v3 = vadd.f32 %v1624_v12, %v1552_v9  ;;  %1676 = vmatmul.bf16.gmra.mxu2 %v4757_v22  ;;  %2091 = vmatmul.bf16.gmra.mxu0 %v4063_v25 }
 0x28a   :  { %1749 = vmatmul.bf16.gmra.mxu3 %v4758_v39  ;;  %2143 = vmatpush.bf16.msrb.mxu1 %v3206_v10 }
 0x28c   :  { %v1410_v58 = vpop.f32.mrf.mxu2 }
 0x28d   :  { %v1411_v51 = vadd.f32 %v1410_v58, %v4124_v1  ;;  %v1483_v52 = vpop.f32.mrf.mxu3  ;;  %v4761_v58 = vld [vmem:[#allocation53_spill] sm:$0xff] }
 0x28e   :  { %v1553_v2 = vpop.f32.mrf.mxu0 }
 0x28f   :  { %v1484_v0 = vadd.f32 %v1483_v52, %v1411_v51  ;;  %v4238_v45 = vadd.f32 %v1553_v2, %v1481_v60  ;;  %v4762_v60 = vld [vmem:[#allocation55_spill] sm:$0xff]  ;;  %v3159_v52 = vld [vmem:[#allocation8 + $0x28] sm:$0xf0] }
 0x290   :  { %v4240_v53 = vpop.f32.mrf.mxu1  ;;  %v3431_v51 = vld [vmem:[#allocation8 + $0x24] sm:$0xf] }
 0x291   :  { %4759 = vst [vmem:[#allocation37_spill] sm:$0xff] %v4240_v53  ;;  %v3162_v2 = vor.u32 %v3431_v51, %v3159_v52 }
 0x293   :  { %2214 = vmatpush.bf16.msra.mxu2 %v3162_v2  ;;  %v4764_v2 = vld [vmem:[#allocation59_spill] sm:$0xff] }
 0x294   :  { %v1412_v41 = vpop.f32.mrf.mxu2 }
 0x295   :  { %v1413_v6 = vadd.f32 %v1412_v41, %v4124_v1  ;;  %v1485_v38 = vpop.f32.mrf.mxu3 }
 0x296   :  { %v1556_v50 = vpop.f32.mrf.mxu0 }
 0x297   :  { %v1486_v9 = vadd.f32 %v1485_v38, %v1413_v6  ;;  %v1557_v12 = vadd.f32 %v1556_v50, %v1484_v0  ;;  %v3447_v50 = vld [vmem:[#allocation8 + $0xa4] sm:$0xf] }
 0x298   :  { %v1629_v22 = vpop.f32.mrf.mxu1 }
 0x299   :  { %v4243_v39 = vadd.f32 %v1629_v22, %v1557_v12  ;;  %1681 = vmatmul.bf16.gmra.mxu2 %v4761_v58  ;;  %2096 = vmatmul.bf16.gmra.mxu0 %v4071_v49  ;;  %v3223_v12 = vld [vmem:[#allocation8 + $0xa8] sm:$0xf0] }
 0x29a   :  { %1754 = vmatmul.bf16.gmra.mxu3 %v4762_v60  ;;  %v3226_v22 = vor.u32 %v3447_v50, %v3223_v12 }
 0x29b   :  { %4760 = vst [vmem:[#allocation28_spill] sm:$0xff] %v4243_v39 }
 0x29c   :  { %v1415_v57 = vpop.f32.mrf.mxu2  ;;  %2287 = vmatpush.bf16.msra.mxu3 %v3226_v22 }
 0x29d   :  { %v1416_v16 = vadd.f32 %v1415_v57, %v4124_v1  ;;  %v1488_v10 = vpop.f32.mrf.mxu3 }
 0x29e   :  { %v1558_v41 = vpop.f32.mrf.mxu0 }
 0x29f   :  { %v1489_v6 = vadd.f32 %v1488_v10, %v1416_v16  ;;  %v4249_v0 = vadd.f32 %v1558_v41, %v1486_v9  ;;  %v4765_v9 = vld [vmem:[#allocation61_spill] sm:$0xff] }
 0x2a0   :  { %v4251_v38 = vpop.f32.mrf.mxu1 }
 0x2a4   :  { %v1417_v58 = vpop.f32.mrf.mxu2 }
 0x2a5   :  { %v1418_v60 = vadd.f32 %v1417_v58, %v4124_v1  ;;  %v1490_v39 = vpop.f32.mrf.mxu3 }
 0x2a6   :  { %v1561_v51 = vpop.f32.mrf.mxu0 }
 0x2a7   :  { %v1491_v52 = vadd.f32 %v1490_v39, %v1418_v60  ;;  %v1562_v49 = vadd.f32 %v1561_v51, %v1489_v6  ;;  %v3466_v39 = vld [vmem:[#allocation10 + $0x38] sm:$0xff] }
 0x2a8   :  { %v1634_v57 = vpop.f32.mrf.mxu1  ;;  %v3474_v6 = vld [vmem:[#allocation10 + $0x78] sm:$0xff]  ;;  %2563 = vmatpush.bf16.msra.mxu0 %v3466_v39 }
 0x2a9   :  { %v4254_v53 = vadd.f32 %v1634_v57, %v1562_v49  ;;  %1686 = vmatmul.bf16.gmra.mxu2 %v4764_v2  ;;  %2101 = vmatmul.bf16.gmra.mxu0 %v4079_v34 }
 0x2aa   :  { %1759 = vmatmul.bf16.gmra.mxu3 %v4765_v9  ;;  %2636 = vmatpush.bf16.msra.mxu1 %v3474_v6 }
 0x2ab   :  { %4763 = vst [vmem:[#allocation39_spill] sm:$0xff] %v4254_v53  ;;  %v4768_v53 = vld [vmem:[#allocation62_spill] sm:$0xff] }
 0x2ac   :  { %v1420_v16 = vpop.f32.mrf.mxu2 }
 0x2ad   :  { %v1421_v10 = vadd.f32 %v1420_v16, %v4124_v1  ;;  %v1493_v41 = vpop.f32.mrf.mxu3  ;;  %v3429_v1 = vld [vmem:[#allocation8 + $0x14] sm:$0xf] }
 0x2ae   :  { %v1563_v50 = vpop.f32.mrf.mxu0  ;;  %v3445_v16 = vld [vmem:[#allocation8 + $0x94] sm:$0xf] }
 0x2af   :  { %v1494_v12 = vadd.f32 %v1493_v41, %v1421_v10  ;;  %v4260_v22 = vadd.f32 %v1563_v50, %v1491_v52  ;;  %v3151_v52 = vld [vmem:[#allocation8 + $0x18] sm:$0xf0]  ;;  %v4769_v10 = vld [vmem:[#allocation64_spill] sm:$0xff] }
 0x2b0   :  { %v4262_v58 = vpop.f32.mrf.mxu1  ;;  %v3154_v41 = vor.u32 %v3429_v1, %v3151_v52  ;;  %v3215_v50 = vld [vmem:[#allocation8 + $0x98] sm:$0xf0] }
 0x2b1   :  { %4766 = vst [vmem:[#allocation45_spill] sm:$0xff] %v4262_v58  ;;  %v3218_v39 = vor.u32 %v3445_v16, %v3215_v50  ;;  %v4770_v52 = vld [vmem:[#allocation66_spill] sm:$0xff]  ;;  %v3465_v16 = vld [vmem:[#allocation10 + $0x30] sm:$0xff]  ;;  %v4771_v50 = vld [vmem:[#allocation68_spill] sm:$0xff] }
 0x2b2   :  { %2215 = vmatpush.bf16.msra.mxu2 %v3154_v41  ;;  %v3473_v41 = vld [vmem:[#allocation10 + $0x70] sm:$0xff]  ;;  %2564 = vmatpush.bf16.msra.mxu0 %v3465_v16 }
 0x2b3   :  { %2288 = vmatpush.bf16.msra.mxu3 %v3218_v39  ;;  %2637 = vmatpush.bf16.msra.mxu1 %v3473_v41 }
 0x2b4   :  { %v1422_v49 = vpop.f32.mrf.mxu2 }
 0x2b5   :  { %v1495_v60 = vpop.f32.mrf.mxu3 }
 0x2b6   :  { %v1566_v51 = vpop.f32.mrf.mxu0 }
 0x2b7   :  { %v1567_v57 = vadd.f32 %v1566_v51, %v1494_v12 }
 0x2b8   :  { %v1639_v2 = vpop.f32.mrf.mxu1 }
 0x2b9   :  { %v4264_v9 = vadd.f32 %v1639_v2, %v1567_v57  ;;  %1691 = vmatmul.bf16.gmra.mxu2 %v4768_v53  ;;  %2106 = vmatmul.bf16.gmra.mxu0 %v4087_v33 }
 0x2ba   :  { %1764 = vmatmul.bf16.gmra.mxu3 %v4769_v10 }
 0x2bb   :  { %4767 = vst [vmem:[#allocation50_spill] sm:$0xff] %v4264_v9 }
 0x2bc   :  { %v1652_v6 = vpop.f32.mrf.mxu2 }
 0x2bd   :  { %v1725_v49 = vpop.f32.mrf.mxu3  ;;  %v1653_v51 = vadd.f32 %v1652_v6, %v4130_v46 }
 0x2be   :  { %v1568_v12 = vpop.f32.mrf.mxu0 }
 0x2bf   :  { %v1726_v53 = vadd.f32 %v1725_v49, %v1653_v51  ;;  %v3143_v49 = vld [vmem:[#allocation8 + $0x8] sm:$0xf0] }
 0x2c0   :  { %v1641_v60 = vpop.f32.mrf.mxu1  ;;  %v3207_v51 = vld [vmem:[#allocation8 + $0x88] sm:$0xf0] }
 0x2c1   :  { %v1790_v10 = vmax.f32 %v1726_v53, 0.0  ;;  %v3443_v60 = vld [vmem:[#allocation8 + $0x84] sm:$0xf] }
 0x2c2   :  { %v3210_v53 = vor.u32 %v3443_v60, %v3207_v51  ;;  %v3472_v60 = vld [vmem:[#allocation10 + $0x68] sm:$0xff]  ;;  %v1592_v51 = vadd.f32 %v4161_v44, %v4159_v63 }
 0x2c3   :  { %2638 = vmatpush.bf16.msra.mxu1 %v3472_v60 }
 0x2c4   :  { %v1654_v57 = vpop.f32.mrf.mxu2  ;;  %2289 = vmatpush.bf16.msra.mxu3 %v3210_v53 }
 0x2c5   :  { %v1655_v2 = vadd.f32 %v1654_v57, %v4137_v23  ;;  %v1727_v9 = vpop.f32.mrf.mxu3  ;;  %v1587_v57 = vadd.f32 %v4149_v4, %v4147_v30 }
 0x2c6   :  { %v4271_v33 = vpop.f32.mrf.mxu0 }
 0x2c7   :  { %v1728_v58 = vadd.f32 %v1727_v9, %v1655_v2  ;;  %v3427_v9 = vld [vmem:[#allocation8 + $0x4] sm:$0xf] }
 0x2c8   :  { %v3146_v12 = vor.u32 %v3427_v9, %v3143_v49  ;;  %v4773_v9 = vld [vmem:[#allocation70_spill] sm:$0xff] }
 0x2c9   :  { %v1792_v1 = vmax.f32 %v1728_v58, 0.0  ;;  %1696 = vmatmul.bf16.gmra.mxu2 %v4770_v52  ;;  %2111 = vmatmul.bf16.gmra.mxu0 %v4095_v35 }
 0x2ca   :  { %1769 = vmatmul.bf16.gmra.mxu3 %v4771_v50  ;;  %2216 = vmatpush.bf16.msra.mxu2 %v3146_v12  ;;  %v3464_v12 = vld [vmem:[#allocation10 + $0x28] sm:$0xff] }
 0x2cb   :  { %v4276_v39 = vpack.c.bf16 %v1792_v1, %v1790_v10  ;;  %2565 = vmatpush.bf16.msra.mxu0 %v3464_v12 }
 0x2cc   :  { %v1657_v46 = vpop.f32.mrf.mxu2 }
 0x2cd   :  { %v1730_v23 = vpop.f32.mrf.mxu3  ;;  %2144 = vmatmul.bf16.vlgmr.msrb.gmra.mxu1 %v4276_v39  ;;  %v1658_v58 = vadd.f32 %v1657_v46, %v4140_v54  ;;  %v4772_v46 = vld [vmem:[#allocation69_spill] sm:$0xff] }
 0x2ce   :  { %v4279_v6 = vpop.f32.mrf.mxu0 }
 0x2cf   :  { %v1731_v10 = vadd.f32 %v1730_v23, %v1658_v58 }
 0x2d1   :  { %v1794_v50 = vmax.f32 %v1731_v10, 0.0 }
 0x2d4   :  { %v1659_v2 = vpop.f32.mrf.mxu2 }
 0x2d5   :  { %v1660_v1 = vadd.f32 %v1659_v2, %v1587_v57  ;;  %v1732_v52 = vpop.f32.mrf.mxu3 }
 0x2d6   :  { %v4284_v16 = vpop.f32.mrf.mxu0 }
 0x2d7   :  { %v1733_v41 = vadd.f32 %v1732_v52, %v1660_v1 }
 0x2d9   :  { %v1796_v54 = vmax.f32 %v1733_v41, 0.0  ;;  %1701 = vmatmul.bf16.gmra.mxu2 %v4772_v46  ;;  %2116 = vmatmul.bf16.gmra.mxu0 %v4103_v5 }
 0x2da   :  { %1774 = vmatmul.bf16.gmra.mxu3 %v4773_v9  ;;  %v1597_v9 = vadd.f32 %v4173_v61, %v4171_v20 }
 0x2db   :  { %v4289_v49 = vpack.c.bf16 %v1796_v54, %v1794_v50 }
 0x2dc   :  { %v1662_v30 = vpop.f32.mrf.mxu2 }
 0x2dd   :  { %v1735_v4 = vpop.f32.mrf.mxu3  ;;  %2149 = vmatmul.bf16.gmra.mxu1 %v4289_v49  ;;  %v1663_v58 = vadd.f32 %v1662_v30, %v4152_v48 }
 0x2de   :  { %v4292_v23 = vpop.f32.mrf.mxu0 }
 0x2df   :  { %v1736_v53 = vadd.f32 %v1735_v4, %v1663_v58 }
 0x2e1   :  { %v1798_v41 = vmax.f32 %v1736_v53, 0.0 }
 0x2e4   :  { %v1664_v57 = vpop.f32.mrf.mxu2 }
 0x2e5   :  { %v1665_v2 = vadd.f32 %v1664_v57, %v1592_v51  ;;  %v1737_v10 = vpop.f32.mrf.mxu3  ;;  %v3463_v57 = vld [vmem:[#allocation10 + $0x20] sm:$0xff] }
 0x2e6   :  { %v4297_v1 = vpop.f32.mrf.mxu0  ;;  %2566 = vmatpush.bf16.msra.mxu0 %v3463_v57 }
 0x2e7   :  { %v1738_v52 = vadd.f32 %v1737_v10, %v1665_v2 }
 0x2e9   :  { %v1800_v50 = vmax.f32 %v1738_v52, 0.0  ;;  %1706 = vmatmul.bf16.gmra.mxu2 %v4037_v18  ;;  %2121 = vmatmul.bf16.gmra.mxu0 %v4111_v40  ;;  %v1602_v52 = vadd.f32 %v4185_v59, %v4183_v7 }
 0x2ea   :  { %1779 = vmatmul.bf16.gmra.mxu3 %v4043_v37 }
 0x2eb   :  { %v4302_v48 = vpack.c.bf16 %v1800_v50, %v1798_v41 }
 0x2ec   :  { %v1667_v63 = vpop.f32.mrf.mxu2 }
 0x2ed   :  { %v1740_v44 = vpop.f32.mrf.mxu3  ;;  %2154 = vmatmul.bf16.gmra.mxu1 %v4302_v48  ;;  %v1668_v46 = vadd.f32 %v1667_v63, %v4164_v21  ;;  %v3471_v21 = vld [vmem:[#allocation10 + $0x60] sm:$0xff] }
 0x2ee   :  { %v4305_v54 = vpop.f32.mrf.mxu0  ;;  %2639 = vmatpush.bf16.msra.mxu1 %v3471_v21 }
 0x2ef   :  { %v1741_v4 = vadd.f32 %v1740_v44, %v1668_v46 }
 0x2f1   :  { %v1802_v60 = vmax.f32 %v1741_v4, 0.0 }
 0x2f4   :  { %v1669_v30 = vpop.f32.mrf.mxu2 }
 0x2f5   :  { %v1670_v18 = vadd.f32 %v1669_v30, %v1597_v9  ;;  %v1742_v58 = vpop.f32.mrf.mxu3 }
 0x2f6   :  { %v4310_v12 = vpop.f32.mrf.mxu0 }
 0x2f7   :  { %v1743_v37 = vadd.f32 %v1742_v58, %v1670_v18  ;;  %v1607_v58 = vadd.f32 %v4196_v13, %v4194_v32 }
 0x2f9   :  { %v1804_v51 = vmax.f32 %v1743_v37, 0.0  ;;  %1711 = vmatmul.bf16.gmra.mxu2 %v4051_v24  ;;  %2126 = vmatmul.bf16.gmra.mxu0 %v4118_v55  ;;  %v1837_v24 = vmax.f32 %v4120_v26, 0.0 }
 0x2fa   :  { %1784 = vmatmul.bf16.gmra.mxu3 %v4055_v56 }
 0x2fb   :  { %v4315_v53 = vpack.c.bf16 %v1804_v51, %v1802_v60  ;;  %v4326_v46 = vpack.c.bf16 %v1837_v24, %v1837_v24 }
 0x2fc   :  { %v1672_v20 = vpop.f32.mrf.mxu2 }
 0x2fd   :  { %v1745_v61 = vpop.f32.mrf.mxu3  ;;  %2159 = vmatmul.bf16.gmra.mxu1 %v4315_v53  ;;  %v1673_v10 = vadd.f32 %v1672_v20, %v4176_v42 }
 0x2fe   :  { %v4318_v2 = vpop.f32.mrf.mxu0 }
 0x2ff   :  { %v1746_v41 = vadd.f32 %v1745_v61, %v1673_v10  ;;  %v3462_v61 = vld [vmem:[#allocation10 + $0x18] sm:$0xff] }
 0x300   :  { %v3470_v10 = vld [vmem:[#allocation10 + $0x58] sm:$0xff]  ;;  %2567 = vmatpush.bf16.msra.mxu0 %v3462_v61 }
 0x301   :  { %v1806_v30 = vmax.f32 %v1746_v41, 0.0  ;;  %2640 = vmatpush.bf16.msra.mxu1 %v3470_v10 }
 0x304   :  { %v1674_v56 = vpop.f32.mrf.mxu2 }
 0x305   :  { %v1675_v50 = vadd.f32 %v1674_v56, %v1602_v52  ;;  %v1747_v63 = vpop.f32.mrf.mxu3  ;;  %v1612_v56 = vadd.f32 %v4207_v19, %v4205_v28  ;;  %v3461_v28 = vld [vmem:[#allocation10 + $0x10] sm:$0xff] }
 0x306   :  { %v4324_v44 = vpop.f32.mrf.mxu0  ;;  %2568 = vmatpush.bf16.msra.mxu0 %v3461_v28 }
 0x307   :  { %v1748_v9 = vadd.f32 %v1747_v63, %v1675_v50 }
 0x309   :  { %v1808_v4 = vmax.f32 %v1748_v9, 0.0  ;;  %2131 = vmatmul.bf16.gmra.mxu0 %v4326_v46  ;;  %2217 = vmatmul.bf16.vlgmr.msra.gmra.mxu2 %v4749_v31 }
 0x30a   :  { %2290 = vmatmul.bf16.vlgmr.msra.gmra.mxu3 %v4276_v39 }
 0x30b   :  { %v4331_v26 = vpack.c.bf16 %v1808_v4, %v1806_v30 }
 0x30c   :  { %v1677_v42 = vpop.f32.mrf.mxu2 }
 0x30d   :  { %v1750_v7 = vpop.f32.mrf.mxu3  ;;  %2164 = vmatmul.bf16.gmra.mxu1 %v4331_v26  ;;  %v1678_v18 = vadd.f32 %v1677_v42, %v4188_v17 }
 0x30e   :  { %v4334_v59 = vpop.f32.mrf.mxu0 }
 0x30f   :  { %v1751_v60 = vadd.f32 %v1750_v7, %v1678_v18 }
 0x311   :  { %v1810_v21 = vmax.f32 %v1751_v60, 0.0  ;;  %v1617_v60 = vadd.f32 %v4218_v15, %v4216_v27 }
 0x314   :  { %v1679_v37 = vpop.f32.mrf.mxu2 }
 0x315   :  { %v1680_v51 = vadd.f32 %v1679_v37, %v1607_v58  ;;  %v1752_v57 = vpop.f32.mrf.mxu3  ;;  %v3469_v58 = vld [vmem:[#allocation10 + $0x50] sm:$0xff]  ;;  %v3460_v37 = vld [vmem:[#allocation10 + $0x8] sm:$0xff] }
 0x316   :  { %v4339_v31 = vpop.f32.mrf.mxu0  ;;  %2641 = vmatpush.bf16.msra.mxu1 %v3469_v58  ;;  %2569 = vmatpush.bf16.msra.mxu0 %v3460_v37 }
 0x317   :  { %v1753_v39 = vadd.f32 %v1752_v57, %v1680_v51 }
 0x319   :  { %v1812_v20 = vmax.f32 %v1753_v39, 0.0  ;;  %2222 = vmatmul.bf16.gmra.mxu2 %v4023_v43  ;;  %v3459_v39 = vld [vmem:[#allocation10] sm:$0xff] }
 0x31a   :  { %2295 = vmatmul.bf16.gmra.mxu3 %v4289_v49  ;;  %2570 = vmatpush.bf16.msra.mxu0 %v3459_v39 }
 0x31b   :  { %v4343_v24 = vpack.c.bf16 %v1812_v20, %v1810_v21 }
 0x31c   :  { %v1682_v17 = vpop.f32.mrf.mxu2 }
 0x31d   :  { %v1755_v32 = vpop.f32.mrf.mxu3  ;;  %2169 = vmatmul.bf16.gmra.mxu1 %v4343_v24  ;;  %v1683_v52 = vadd.f32 %v1682_v17, %v4199_v14 }
 0x31e   :  { %v4346_v13 = vpop.f32.mrf.mxu0 }
 0x31f   :  { %v1756_v41 = vadd.f32 %v1755_v32, %v1683_v52  ;;  %v1622_v52 = vadd.f32 %v4229_v62, %v4227_v36  ;;  %v3468_v36 = vld [vmem:[#allocation10 + $0x48] sm:$0xff] }
 0x320   :  { %2642 = vmatpush.bf16.msra.mxu1 %v3468_v36 }
 0x321   :  { %v1814_v30 = vmax.f32 %v1756_v41, 0.0 }
 0x324   :  { %v1684_v43 = vpop.f32.mrf.mxu2 }
 0x325   :  { %v1685_v50 = vadd.f32 %v1684_v43, %v1612_v56  ;;  %v1757_v63 = vpop.f32.mrf.mxu3 }
 0x326   :  { %v4351_v49 = vpop.f32.mrf.mxu0 }
 0x327   :  { %v1758_v9 = vadd.f32 %v1757_v63, %v1685_v50  ;;  %v4380_v63 = vld [vmem:[%s4601_s4] sm:$0x3] }
 0x328   :  { %v4385_v62 = vperm.slane %v4380_v63, 0 }
 0x329   :  { %v1816_v4 = vmax.f32 %v1758_v9, 0.0  ;;  %2227 = vmatmul.bf16.gmra.mxu2 %v4039_v8 }
 0x32a   :  { %2300 = vmatmul.bf16.gmra.mxu3 %v4302_v48 }
 0x32b   :  { %v4355_v42 = vpack.c.bf16 %v1816_v4, %v1814_v30 }
 0x32c   :  { %v1687_v7 = vpop.f32.mrf.mxu2 }
 0x32d   :  { %v1760_v14 = vpop.f32.mrf.mxu3  ;;  %2174 = vmatmul.bf16.gmra.mxu1 %v4355_v42  ;;  %v1688_v18 = vadd.f32 %v1687_v7, %v4210_v11 }
 0x32e   :  { %v4358_v19 = vpop.f32.mrf.mxu0 }
 0x32f   :  { %v1761_v48 = vadd.f32 %v1760_v14, %v1688_v18  ;;  %v2073_v18 = vadd.f32 %v4271_v33, %v4385_v62 }
 0x331   :  { %v1818_v61 = vmax.f32 %v1761_v48, 0.0 }
 0x334   :  { %v1689_v8 = vpop.f32.mrf.mxu2 }
 0x335   :  { %v1690_v51 = vadd.f32 %v1689_v8, %v1617_v60  ;;  %v1762_v57 = vpop.f32.mrf.mxu3  ;;  %v4774_v60 = vld [vmem:[#allocation37_spill] sm:$0xff] }
 0x336   :  { %v4363_v21 = vpop.f32.mrf.mxu0  ;;  %v1627_v8 = vadd.f32 %v4774_v60, %v4238_v45  ;;  %v3467_v60 = vld [vmem:[#allocation10 + $0x40] sm:$0xff] }
 0x337   :  { %v1763_v20 = vadd.f32 %v1762_v57, %v1690_v51  ;;  %2643 = vmatpush.bf16.msra.mxu1 %v3467_v60  ;;  %v2090_v60 = vadd.f32 %v4318_v2, %v4385_v62 }
 0x339   :  { %v1820_v10 = vmax.f32 %v1763_v20, 0.0  ;;  %2232 = vmatmul.bf16.gmra.mxu2 %v4053_v29 }
 0x33a   :  { %2305 = vmatmul.bf16.gmra.mxu3 %v4315_v53 }
 0x33b   :  { %v4367_v11 = vpack.c.bf16 %v1820_v10, %v1818_v61 }
 0x33c   :  { %v1692_v27 = vpop.f32.mrf.mxu2 }
 0x33d   :  { %v1765_v15 = vpop.f32.mrf.mxu3  ;;  %2179 = vmatmul.bf16.gmra.mxu1 %v4367_v11  ;;  %v1693_v32 = vadd.f32 %v1692_v27, %v4221_v47 }
 0x33e   :  { %v4370_v17 = vpop.f32.mrf.mxu0 }
 0x33f   :  { %v1766_v43 = vadd.f32 %v1765_v15, %v1693_v32 }
 0x341   :  { %v1822_v9 = vmax.f32 %v1766_v43, 0.0 }
 0x344   :  { %v1694_v56 = vpop.f32.mrf.mxu2 }
 0x345   :  { %v1695_v41 = vadd.f32 %v1694_v56, %v1622_v52  ;;  %v1767_v50 = vpop.f32.mrf.mxu3  ;;  %v4775_v52 = vld [vmem:[#allocation71_spill] sm:$0xff] }
 0x346   :  { %v4375_v29 = vpop.f32.mrf.mxu0 }
 0x347   :  { %v1768_v53 = vadd.f32 %v1767_v50, %v1695_v41  ;;  %v2078_v50 = vadd.f32 %v4284_v16, %v4385_v62 }
 0x349   :  { %v1824_v30 = vmax.f32 %v1768_v53, 0.0  ;;  %2237 = vmatmul.bf16.gmra.mxu2 %v4063_v25  ;;  %v2075_v25 = vadd.f32 %v4279_v6, %v4385_v62  ;;  %v2080_v53 = vadd.f32 %v4292_v23, %v4385_v62 }
 0x34a   :  { %2310 = vmatmul.bf16.gmra.mxu3 %v4331_v26  ;;  %v2145_v47 = vpop.f32.mrf.mxu1 }
 0x34b   :  { %v4387_v4 = vpack.c.bf16 %v1824_v30, %v1822_v9  ;;  %v2146_v26 = vadd.f32 %v2145_v47, %v2073_v18  ;;  %v4776_v30 = vld [vmem:[#allocation28_spill] sm:$0xff] }
 0x34c   :  { %v1697_v7 = vpop.f32.mrf.mxu2 }
 0x34d   :  { %v1770_v14 = vpop.f32.mrf.mxu3  ;;  %2184 = vmatmul.bf16.gmra.mxu1 %v4387_v4  ;;  %v1698_v58 = vadd.f32 %v1697_v7, %v4232_v3  ;;  %v2355_v57 = vmax.f32 %v2146_v26, 0.0 }
 0x34e   :  { %v4390_v28 = vpop.f32.mrf.mxu0 }
 0x34f   :  { %v1771_v39 = vadd.f32 %v1770_v14, %v1698_v58 }
 0x351   :  { %v1826_v32 = vmax.f32 %v1771_v39, 0.0 }
 0x352   :  { %v2147_v37 = vpop.f32.mrf.mxu1 }
 0x353   :  { %v2148_v48 = vadd.f32 %v2147_v37, %v2075_v25 }
 0x354   :  { %v1699_v51 = vpop.f32.mrf.mxu2 }
 0x355   :  { %v2357_v20 = vmax.f32 %v2148_v48, 0.0  ;;  %v1700_v61 = vadd.f32 %v1699_v51, %v1627_v8  ;;  %v1772_v10 = vpop.f32.mrf.mxu3 }
 0x356   :  { %v4399_v27 = vpop.f32.mrf.mxu0 }
 0x357   :  { %v2405_v33 = vpack.c.bf16 %v2357_v20, %v2355_v57  ;;  %v1773_v15 = vadd.f32 %v1772_v10, %v1700_v61  ;;  %v2083_v61 = vadd.f32 %v4297_v1, %v4385_v62  ;;  %v2085_v10 = vadd.f32 %v4305_v54, %v4385_v62 }
 0x359   :  { %v1828_v6 = vmax.f32 %v1773_v15, 0.0  ;;  %2242 = vmatmul.bf16.gmra.mxu2 %v4775_v52  ;;  %2571 = vmatmul.bf16.vlgmr.msra.gmra.mxu0 %v2405_v33 }
 0x35a   :  { %2315 = vmatmul.bf16.gmra.mxu3 %v4343_v24  ;;  %v2150_v3 = vpop.f32.mrf.mxu1  ;;  %v1632_v24 = vadd.f32 %v4251_v38, %v4249_v0 }
 0x35b   :  { %v4403_v45 = vpack.c.bf16 %v1828_v6, %v1826_v32  ;;  %v2151_v9 = vadd.f32 %v2150_v3, %v2078_v50 }
 0x35c   :  { %v1702_v56 = vpop.f32.mrf.mxu2 }
 0x35d   :  { %v1775_v43 = vpop.f32.mrf.mxu3  ;;  %2189 = vmatmul.bf16.gmra.mxu1 %v4403_v45  ;;  %v1703_v47 = vadd.f32 %v1702_v56, %v4776_v30  ;;  %v2359_v18 = vmax.f32 %v2151_v9, 0.0 }
 0x35e   :  { %v4406_v41 = vpop.f32.mrf.mxu0 }
 0x35f   :  { %v1776_v25 = vadd.f32 %v1775_v43, %v1703_v47 }
 0x361   :  { %v1830_v23 = vmax.f32 %v1776_v25, 0.0 }
 0x362   :  { %v2152_v36 = vpop.f32.mrf.mxu1 }
 0x363   :  { %v2153_v7 = vadd.f32 %v2152_v36, %v2080_v53 }
 0x364   :  { %v1704_v14 = vpop.f32.mrf.mxu2 }
 0x365   :  { %v2361_v26 = vmax.f32 %v2153_v7, 0.0  ;;  %v1705_v58 = vadd.f32 %v1704_v14, %v1632_v24  ;;  %v1777_v37 = vpop.f32.mrf.mxu3  ;;  %v4779_v24 = vld [vmem:[#allocation72_spill] sm:$0xff] }
 0x366   :  { %v4415_v8 = vpop.f32.mrf.mxu0 }
 0x367   :  { %v1778_v16 = vadd.f32 %v1777_v37, %v1705_v58  ;;  %v2407_v48 = vpack.c.bf16 %v2361_v26, %v2359_v18  ;;  %v2088_v26 = vadd.f32 %v4310_v12, %v4385_v62  ;;  %v4780_v58 = vld [vmem:[#allocation50_spill] sm:$0xff] }
 0x369   :  { %v1832_v51 = vmax.f32 %v1778_v16, 0.0  ;;  %2247 = vmatmul.bf16.gmra.mxu2 %v4079_v34  ;;  %2576 = vmatmul.bf16.gmra.mxu0 %v2407_v48  ;;  %v4777_v34 = vld [vmem:[#allocation39_spill] sm:$0xff] }
 0x36a   :  { %2320 = vmatmul.bf16.gmra.mxu3 %v4355_v42  ;;  %v2155_v0 = vpop.f32.mrf.mxu1  ;;  %v4778_v42 = vld [vmem:[#allocation45_spill] sm:$0xff] }
 0x36b   :  { %v4419_v38 = vpack.c.bf16 %v1832_v51, %v1830_v23  ;;  %v2156_v33 = vadd.f32 %v2155_v0, %v2083_v61  ;;  %v1637_v6 = vadd.f32 %v4778_v42, %v4260_v22 }
 0x36c   :  { %v1707_v57 = vpop.f32.mrf.mxu2 }
 0x36d   :  { %v1780_v39 = vpop.f32.mrf.mxu3  ;;  %2194 = vmatmul.bf16.gmra.mxu1 %v4419_v38  ;;  %v1708_v15 = vadd.f32 %v1707_v57, %v4777_v34  ;;  %v2363_v56 = vmax.f32 %v2156_v33, 0.0 }
 0x36e   :  { %v4422_v20 = vpop.f32.mrf.mxu0 }
 0x36f   :  { %v1781_v43 = vadd.f32 %v1780_v39, %v1708_v15  ;;  %v4452_v15 = vperm.slane %v4380_v63, 1 }
 0x371   :  { %v1834_v36 = vmax.f32 %v1781_v43, 0.0 }
 0x372   :  { %v2157_v32 = vpop.f32.mrf.mxu1 }
 0x373   :  { %v2158_v52 = vadd.f32 %v2157_v32, %v2085_v10 }
 0x374   :  { %v1709_v3 = vpop.f32.mrf.mxu2 }
 0x375   :  { %v2365_v50 = vmax.f32 %v2158_v52, 0.0  ;;  %v1710_v53 = vadd.f32 %v1709_v3, %v1637_v6  ;;  %v1782_v9 = vpop.f32.mrf.mxu3  ;;  %v2093_v6 = vadd.f32 %v4324_v44, %v4385_v62 }
 0x376   :  { %v4431_v30 = vpop.f32.mrf.mxu0 }
 0x377   :  { %v1783_v1 = vadd.f32 %v1782_v9, %v1710_v53  ;;  %v2409_v47 = vpack.c.bf16 %v2365_v50, %v2363_v56 }
 0x379   :  { %v1836_v54 = vmax.f32 %v1783_v1, 0.0  ;;  %2252 = vmatmul.bf16.gmra.mxu2 %v4779_v24  ;;  %2581 = vmatmul.bf16.gmra.mxu0 %v2409_v47 }
 0x37a   :  { %2325 = vmatmul.bf16.gmra.mxu3 %v4367_v11  ;;  %v2160_v7 = vpop.f32.mrf.mxu1 }
 0x37b   :  { %v4435_v22 = vpack.c.bf16 %v1836_v54, %v1834_v36  ;;  %v2161_v16 = vadd.f32 %v2160_v7, %v2088_v26  ;;  %v2100_v26 = vadd.f32 %v4346_v13, %v4385_v62 }
 0x37c   :  { %v1712_v14 = vpop.f32.mrf.mxu2 }
 0x37d   :  { %v1785_v18 = vpop.f32.mrf.mxu3  ;;  %2199 = vmatmul.bf16.gmra.mxu1 %v4435_v22  ;;  %v1713_v37 = vadd.f32 %v1712_v14, %v4780_v58  ;;  %v2367_v0 = vmax.f32 %v2161_v16, 0.0 }
 0x37e   :  { %v4438_v25 = vpop.f32.mrf.mxu0 }
 0x37f   :  { %v1786_v11 = vadd.f32 %v1785_v18, %v1713_v37  ;;  %v2098_v18 = vadd.f32 %v4339_v31, %v4385_v62 }
 0x381   :  { %v1838_v10 = vmax.f32 %v1786_v11, 0.0 }
 0x382   :  { %v2162_v48 = vpop.f32.mrf.mxu1 }
 0x383   :  { %v2163_v23 = vadd.f32 %v2162_v48, %v2090_v60  ;;  %v4449_v34 = vpack.c.bf16 %v1838_v10, %v1838_v10 }
 0x384   :  { %v1714_v51 = vpop.f32.mrf.mxu2 }
 0x385   :  { %v2369_v57 = vmax.f32 %v2163_v23, 0.0  ;;  %v1787_v39 = vpop.f32.mrf.mxu3 }
 0x386   :  { %v4445_v61 = vpop.f32.mrf.mxu0 }
 0x387   :  { %v2411_v33 = vpack.c.bf16 %v2369_v57, %v2367_v0 }
 0x389   :  { %2257 = vmatmul.bf16.gmra.mxu2 %v4095_v35  ;;  %2586 = vmatmul.bf16.gmra.mxu0 %v2411_v33  ;;  %v2095_v35 = vadd.f32 %v4334_v59, %v4385_v62 }
 0x38a   :  { %2330 = vmatmul.bf16.gmra.mxu3 %v4387_v4  ;;  %v2165_v12 = vpop.f32.mrf.mxu1 }
 0x38b   :  { %v2166_v52 = vadd.f32 %v2165_v12, %v2093_v6 }
 0x38c   :  { %v2218_v2 = vpop.f32.mrf.mxu2 }
 0x38d   :  { %v2291_v32 = vpop.f32.mrf.mxu3  ;;  %2204 = vmatmul.bf16.gmra.mxu1 %v4449_v34  ;;  %v2219_v4 = vadd.f32 %v2218_v2, %v4452_v15  ;;  %v2371_v50 = vmax.f32 %v2166_v52, 0.0  ;;  %v2103_v2 = vadd.f32 %v4351_v49, %v4385_v62 }
 0x38e   :  { %v2134_v42 = vpop.f32.mrf.mxu0 }
 0x38f   :  { %v2292_v53 = vadd.f32 %v2291_v32, %v2219_v4  ;;  %v2105_v32 = vadd.f32 %v4358_v19, %v4385_v62 }
 0x391   :  { %v2356_v54 = vmax.f32 %v2292_v53, 0.0 }
 0x392   :  { %v2167_v3 = vpop.f32.mrf.mxu1 }
 0x393   :  { %v2168_v56 = vadd.f32 %v2167_v3, %v2095_v35 }
 0x394   :  { %v2220_v43 = vpop.f32.mrf.mxu2 }
 0x395   :  { %v2373_v63 = vmax.f32 %v2168_v56, 0.0  ;;  %v2221_v9 = vadd.f32 %v2220_v43, %v4452_v15  ;;  %v2293_v1 = vpop.f32.mrf.mxu3 }
 0x397   :  { %v2294_v47 = vadd.f32 %v2293_v1, %v2221_v9  ;;  %v2413_v36 = vpack.c.bf16 %v2373_v63, %v2371_v50 }
 0x399   :  { %v2358_v24 = vmax.f32 %v2294_v47, 0.0  ;;  %2262 = vmatmul.bf16.gmra.mxu2 %v4103_v5  ;;  %2591 = vmatmul.bf16.gmra.mxu0 %v2413_v36  ;;  %v2108_v36 = vadd.f32 %v4363_v21, %v4385_v62 }
 0x39a   :  { %2335 = vmatmul.bf16.gmra.mxu3 %v4403_v45  ;;  %v2170_v44 = vpop.f32.mrf.mxu1 }
 0x39b   :  { %v2406_v59 = vpack.c.bf16 %v2358_v24, %v2356_v54  ;;  %v2171_v58 = vadd.f32 %v2170_v44, %v2098_v18  ;;  %v2110_v54 = vadd.f32 %v4370_v17, %v4385_v62 }
 0x39c   :  { %v2223_v7 = vpop.f32.mrf.mxu2 }
 0x39d   :  { %v2296_v14 = vpop.f32.mrf.mxu3  ;;  %2644 = vmatmul.bf16.vlgmr.msra.gmra.mxu1 %v2406_v59  ;;  %v2224_v37 = vadd.f32 %v2223_v7, %v4452_v15  ;;  %v2375_v48 = vmax.f32 %v2171_v58, 0.0 }
 0x39f   :  { %v2297_v11 = vadd.f32 %v2296_v14, %v2224_v37 }
 0x3a1   :  { %v2360_v39 = vmax.f32 %v2297_v11, 0.0 }
 0x3a2   :  { %v2172_v60 = vpop.f32.mrf.mxu1 }
 0x3a3   :  { %v2173_v16 = vadd.f32 %v2172_v60, %v2100_v26 }
 0x3a4   :  { %v2225_v5 = vpop.f32.mrf.mxu2 }
 0x3a5   :  { %v2377_v45 = vmax.f32 %v2173_v16, 0.0  ;;  %v2226_v23 = vadd.f32 %v2225_v5, %v4452_v15  ;;  %v2298_v51 = vpop.f32.mrf.mxu3 }
 0x3a7   :  { %v2299_v0 = vadd.f32 %v2298_v51, %v2226_v23  ;;  %v2415_v57 = vpack.c.bf16 %v2377_v45, %v2375_v48  ;;  %v2113_v45 = vadd.f32 %v4375_v29, %v4385_v62  ;;  %v2115_v23 = vadd.f32 %v4390_v28, %v4385_v62 }
 0x3a9   :  { %v2362_v10 = vmax.f32 %v2299_v0, 0.0  ;;  %2267 = vmatmul.bf16.gmra.mxu2 %v4111_v40  ;;  %2596 = vmatmul.bf16.gmra.mxu0 %v2415_v57 }
 0x3aa   :  { %2340 = vmatmul.bf16.gmra.mxu3 %v4419_v38  ;;  %v2175_v31 = vpop.f32.mrf.mxu1 }
 0x3ab   :  { %v2408_v13 = vpack.c.bf16 %v2362_v10, %v2360_v39  ;;  %v2176_v42 = vadd.f32 %v2175_v31, %v2103_v2 }
 0x3ac   :  { %v2228_v33 = vpop.f32.mrf.mxu2 }
 0x3ad   :  { %v2301_v12 = vpop.f32.mrf.mxu3  ;;  %2649 = vmatmul.bf16.gmra.mxu1 %v2408_v13  ;;  %v2229_v6 = vadd.f32 %v2228_v33, %v4452_v15  ;;  %v2379_v4 = vmax.f32 %v2176_v42, 0.0 }
 0x3af   :  { %v2302_v3 = vadd.f32 %v2301_v12, %v2229_v6 }
 0x3b1   :  { %v2364_v63 = vmax.f32 %v2302_v3, 0.0  ;;  %v2120_v3 = vadd.f32 %v4406_v41, %v4385_v62 }
 0x3b2   :  { %v2177_v35 = vpop.f32.mrf.mxu1 }
 0x3b3   :  { %v2178_v52 = vadd.f32 %v2177_v35, %v2105_v32 }
 0x3b4   :  { %v2230_v40 = vpop.f32.mrf.mxu2 }
 0x3b5   :  { %v2381_v38 = vmax.f32 %v2178_v52, 0.0  ;;  %v2231_v56 = vadd.f32 %v2230_v40, %v4452_v15  ;;  %v2303_v43 = vpop.f32.mrf.mxu3 }
 0x3b7   :  { %v2304_v50 = vadd.f32 %v2303_v43, %v2231_v56  ;;  %v2417_v53 = vpack.c.bf16 %v2381_v38, %v2379_v4  ;;  %v2118_v4 = vadd.f32 %v4399_v27, %v4385_v62 }
 0x3b9   :  { %v2366_v9 = vmax.f32 %v2304_v50, 0.0  ;;  %2272 = vmatmul.bf16.gmra.mxu2 %v4118_v55  ;;  %2601 = vmatmul.bf16.gmra.mxu0 %v2417_v53 }
 0x3ba   :  { %2345 = vmatmul.bf16.gmra.mxu3 %v4435_v22  ;;  %v2180_v49 = vpop.f32.mrf.mxu1 }
 0x3bb   :  { %v2410_v19 = vpack.c.bf16 %v2366_v9, %v2364_v63  ;;  %v2181_v24 = vadd.f32 %v2180_v49, %v2108_v36 }
 0x3bc   :  { %v2233_v1 = vpop.f32.mrf.mxu2 }
 0x3bd   :  { %v2306_v47 = vpop.f32.mrf.mxu3  ;;  %2654 = vmatmul.bf16.gmra.mxu1 %v2410_v19  ;;  %v2234_v44 = vadd.f32 %v2233_v1, %v4452_v15  ;;  %v2383_v14 = vmax.f32 %v2181_v24, 0.0 }
 0x3bf   :  { %v2307_v18 = vadd.f32 %v2306_v47, %v2234_v44 }
 0x3c1   :  { %v2368_v16 = vmax.f32 %v2307_v18, 0.0  ;;  %v2125_v18 = vadd.f32 %v4422_v20, %v4385_v62 }
 0x3c2   :  { %v2182_v59 = vpop.f32.mrf.mxu1 }
 0x3c3   :  { %v2183_v7 = vadd.f32 %v2182_v59, %v2110_v54 }
 0x3c4   :  { %v2235_v55 = vpop.f32.mrf.mxu2 }
 0x3c5   :  { %v2385_v22 = vmax.f32 %v2183_v7, 0.0  ;;  %v2236_v26 = vadd.f32 %v2235_v55, %v4452_v15  ;;  %v2308_v58 = vpop.f32.mrf.mxu3 }
 0x3c7   :  { %v2309_v37 = vadd.f32 %v2308_v58, %v2236_v26  ;;  %v2419_v60 = vpack.c.bf16 %v2385_v22, %v2383_v14  ;;  %v2123_v14 = vadd.f32 %v4415_v8, %v4385_v62 }
 0x3c9   :  { %v2370_v5 = vmax.f32 %v2309_v37, 0.0  ;;  %2277 = vmatmul.bf16.gmra.mxu2 %v4326_v46  ;;  %2606 = vmatmul.bf16.gmra.mxu0 %v2419_v60 }
 0x3ca   :  { %2350 = vmatmul.bf16.gmra.mxu3 %v4449_v34  ;;  %v2185_v21 = vpop.f32.mrf.mxu1 }
 0x3cb   :  { %v2412_v17 = vpack.c.bf16 %v2370_v5, %v2368_v16  ;;  %v2186_v51 = vadd.f32 %v2185_v21, %v2113_v45 }
 0x3cc   :  { %v2238_v48 = vpop.f32.mrf.mxu2 }
 0x3cd   :  { %v2311_v11 = vpop.f32.mrf.mxu3  ;;  %2659 = vmatmul.bf16.gmra.mxu1 %v2412_v17  ;;  %v2239_v0 = vadd.f32 %v2238_v48, %v4452_v15  ;;  %v2387_v10 = vmax.f32 %v2186_v51, 0.0 }
 0x3cf   :  { %v2312_v31 = vadd.f32 %v2311_v11, %v2239_v0 }
 0x3d1   :  { %v2372_v29 = vmax.f32 %v2312_v31, 0.0  ;;  %v2130_v31 = vadd.f32 %v4438_v25, %v4385_v62 }
 0x3d2   :  { %v2187_v57 = vpop.f32.mrf.mxu1 }
 0x3d3   :  { %v2188_v39 = vadd.f32 %v2187_v57, %v2115_v23 }
 0x3d4   :  { %v2240_v46 = vpop.f32.mrf.mxu2 }
 0x3d5   :  { %v2389_v34 = vmax.f32 %v2188_v39, 0.0  ;;  %v2241_v13 = vadd.f32 %v2240_v46, %v4452_v15  ;;  %v2313_v33 = vpop.f32.mrf.mxu3 }
 0x3d6   :  { %v4493_v12 = vpop.f32.mrf.mxu0 }
 0x3d7   :  { %v2314_v2 = vadd.f32 %v2313_v33, %v2241_v13  ;;  %v2421_v32 = vpack.c.bf16 %v2389_v34, %v2387_v10  ;;  %v2128_v10 = vadd.f32 %v4431_v30, %v4385_v62 }
 0x3d9   :  { %v2374_v42 = vmax.f32 %v2314_v2, 0.0  ;;  %2611 = vmatmul.bf16.gmra.mxu0 %v2421_v32 }
 0x3da   :  { %v2190_v28 = vpop.f32.mrf.mxu1 }
 0x3db   :  { %v2414_v6 = vpack.c.bf16 %v2374_v42, %v2372_v29  ;;  %v2191_v38 = vadd.f32 %v2190_v28, %v2118_v4 }
 0x3dc   :  { %v2243_v35 = vpop.f32.mrf.mxu2 }
 0x3dd   :  { %v2316_v52 = vpop.f32.mrf.mxu3  ;;  %2664 = vmatmul.bf16.gmra.mxu1 %v2414_v6  ;;  %v2244_v56 = vadd.f32 %v2243_v35, %v4452_v15  ;;  %v2391_v63 = vmax.f32 %v2191_v38, 0.0 }
 0x3de   :  { %v4495_v40 = vpop.f32.mrf.mxu0 }
 0x3df   :  { %v2317_v9 = vadd.f32 %v2316_v52, %v2244_v56 }
 0x3e1   :  { %v2376_v27 = vmax.f32 %v2317_v9, 0.0 }
 0x3e2   :  { %v2192_v43 = vpop.f32.mrf.mxu1 }
 0x3e3   :  { %v2193_v50 = vadd.f32 %v2192_v43, %v2120_v3 }
 0x3e4   :  { %v2245_v53 = vpop.f32.mrf.mxu2 }
 0x3e5   :  { %v2393_v49 = vmax.f32 %v2193_v50, 0.0  ;;  %v2246_v19 = vadd.f32 %v2245_v53, %v4452_v15  ;;  %v2318_v1 = vpop.f32.mrf.mxu3  ;;  %v2133_v50 = vadd.f32 %v4445_v61, %v4385_v62 }
 0x3e6   :  { %v4503_v47 = vpop.f32.mrf.mxu0 }
 0x3e7   :  { %v2319_v36 = vadd.f32 %v2318_v1, %v2246_v19  ;;  %v2423_v54 = vpack.c.bf16 %v2393_v49, %v2391_v63 }
 0x3e9   :  { %v2378_v24 = vmax.f32 %v2319_v36, 0.0  ;;  %2616 = vmatmul.bf16.gmra.mxu0 %v2423_v54  ;;  %v4533_v54 = vld [vmem:[%s4603_s6] ss:$0 sm:$0xff]  ;;  %s3668_s6 = smov [#allocation11]  }
 0x3ea   :  { %v2195_v41 = vpop.f32.mrf.mxu1  ;;  %s2738_s30 = sshll.u32 %s3668_s6, 4  ;;  %s2739_s30 = int_to_ptr.vmem [resolvable:$true] %s2738_s30 }
 0x3eb   :  { %v2416_v44 = vpack.c.bf16 %v2378_v24, %v2376_v27  ;;  %v2196_v22 = vadd.f32 %v2195_v41, %v2123_v14 }
 0x3ec   :  { %v2248_v59 = vpop.f32.mrf.mxu2 }
 0x3ed   :  { %v2321_v7 = vpop.f32.mrf.mxu3  ;;  %2669 = vmatmul.bf16.gmra.mxu1 %v2416_v44  ;;  %v2249_v26 = vadd.f32 %v2248_v59, %v4452_v15  ;;  %v2395_v16 = vmax.f32 %v2196_v22, 0.0  ;;  %v2573_v59 = vadd.f32 %v4533_v54, %v4493_v12 }
 0x3ee   :  { %v4505_v55 = vpop.f32.mrf.mxu0 }
 0x3ef   :  { %v2322_v5 = vadd.f32 %v2321_v7, %v2249_v26 }
 0x3f1   :  { %v2380_v8 = vmax.f32 %v2322_v5, 0.0 }
 0x3f2   :  { %v2197_v58 = vpop.f32.mrf.mxu1 }
 0x3f3   :  { %v2198_v37 = vadd.f32 %v2197_v58, %v2125_v18 }
 0x3f4   :  { %v2250_v60 = vpop.f32.mrf.mxu2 }
 0x3f5   :  { %v2397_v21 = vmax.f32 %v2198_v37, 0.0  ;;  %v2251_v17 = vadd.f32 %v2250_v60, %v4452_v15  ;;  %v2323_v48 = vpop.f32.mrf.mxu3 }
 0x3f6   :  { %v4513_v11 = vpop.f32.mrf.mxu0 }
 0x3f7   :  { %v2324_v45 = vadd.f32 %v2323_v48, %v2251_v17  ;;  %v2425_v23 = vpack.c.bf16 %v2397_v21, %v2395_v16  ;;  %v2575_v16 = vadd.f32 %v4533_v54, %v4495_v40 }
 0x3f9   :  { %v2382_v51 = vmax.f32 %v2324_v45, 0.0  ;;  %2621 = vmatmul.bf16.gmra.mxu0 %v2425_v23 }
 0x3fa   :  { %v2200_v20 = vpop.f32.mrf.mxu1 }
 0x3fb   :  { %v2418_v0 = vpack.c.bf16 %v2382_v51, %v2380_v8  ;;  %v2201_v34 = vadd.f32 %v2200_v20, %v2128_v10  ;;  %v2578_v20 = vadd.f32 %v4533_v54, %v4503_v47 }
 0x3fc   :  { %v2253_v57 = vpop.f32.mrf.mxu2 }
 0x3fd   :  { %v2326_v39 = vpop.f32.mrf.mxu3  ;;  %2674 = vmatmul.bf16.gmra.mxu1 %v2418_v0  ;;  %v2254_v13 = vadd.f32 %v2253_v57, %v4452_v15  ;;  %v2399_v29 = vmax.f32 %v2201_v34, 0.0 }
 0x3fe   :  { %v4515_v46 = vpop.f32.mrf.mxu0 }
 0x3ff   :  { %v2327_v42 = vadd.f32 %v2326_v39, %v2254_v13 }
 0x401   :  { %v2384_v30 = vmax.f32 %v2327_v42, 0.0 }
 0x402   :  { %v2202_v33 = vpop.f32.mrf.mxu1 }
 0x403   :  { %v2203_v2 = vadd.f32 %v2202_v33, %v2130_v31  ;;  %v2580_v33 = vadd.f32 %v4533_v54, %v4505_v55 }
 0x404   :  { %v2255_v32 = vpop.f32.mrf.mxu2 }
 0x405   :  { %v2401_v28 = vmax.f32 %v2203_v2, 0.0  ;;  %v2256_v6 = vadd.f32 %v2255_v32, %v4452_v15  ;;  %v2328_v35 = vpop.f32.mrf.mxu3 }
 0x406   :  { %v4523_v52 = vpop.f32.mrf.mxu0 }
 0x407   :  { %v2329_v4 = vadd.f32 %v2328_v35, %v2256_v6  ;;  %v2427_v3 = vpack.c.bf16 %v2401_v28, %v2399_v29 }
 0x409   :  { %v2386_v38 = vmax.f32 %v2329_v4, 0.0  ;;  %2626 = vmatmul.bf16.gmra.mxu0 %v2427_v3  ;;  %v2583_v3 = vadd.f32 %v4533_v54, %v4513_v11 }
 0x40a   :  { %v2205_v25 = vpop.f32.mrf.mxu1 }
 0x40b   :  { %v2420_v56 = vpack.c.bf16 %v2386_v38, %v2384_v30  ;;  %v2206_v9 = vadd.f32 %v2205_v25, %v2133_v50 }
 0x40c   :  { %v2258_v43 = vpop.f32.mrf.mxu2 }
 0x40d   :  { %v2331_v53 = vpop.f32.mrf.mxu3  ;;  %2679 = vmatmul.bf16.gmra.mxu1 %v2420_v56  ;;  %v2259_v49 = vadd.f32 %v2258_v43, %v4452_v15  ;;  %v2403_v1 = vmax.f32 %v2206_v9, 0.0  ;;  %v2585_v9 = vadd.f32 %v4533_v54, %v4515_v46 }
 0x40e   :  { %v4527_v63 = vpop.f32.mrf.mxu0 }
 0x40f   :  { %v2332_v27 = vadd.f32 %v2331_v53, %v2259_v49  ;;  %v2429_v61 = vpack.c.bf16 %v2403_v1, %v2403_v1 }
 0x411   :  { %v2388_v7 = vmax.f32 %v2332_v27, 0.0 }
 0x412   :  { %v2207_v19 = vpop.f32.mrf.mxu1 }
 0x414   :  { %v2260_v36 = vpop.f32.mrf.mxu2 }
 0x415   :  { %v2261_v24 = vadd.f32 %v2260_v36, %v4452_v15  ;;  %v2333_v41 = vpop.f32.mrf.mxu3 }
 0x416   :  { %v4536_v62 = vpop.f32.mrf.mxu0 }
 0x417   :  { %v2334_v44 = vadd.f32 %v2333_v41, %v2261_v24 }
 0x419   :  { %v2390_v14 = vmax.f32 %v2334_v44, 0.0  ;;  %2631 = vmatmul.bf16.gmra.mxu0 %v2429_v61  ;;  %v2588_v44 = vadd.f32 %v4533_v54, %v4523_v52 }
 0x41a   :  { %v2645_v18 = vpop.f32.mrf.mxu1 }
 0x41b   :  { %v2422_v22 = vpack.c.bf16 %v2390_v14, %v2388_v7  ;;  %v2646_v26 = vadd.f32 %v2645_v18, %v2573_v59 }
 0x41c   :  { %v2263_v58 = vpop.f32.mrf.mxu2 }
 0x41d   :  { %2709 = vst [vmem:[#allocation11] sm:$0xff] %v2646_v26  ;;  %v2336_v37 = vpop.f32.mrf.mxu3  ;;  %2684 = vmatmul.bf16.gmra.mxu1 %v2422_v22  ;;  %v2264_v5 = vadd.f32 %v2263_v58, %v4452_v15 }
 0x41e   :  { %v4540_v60 = vpop.f32.mrf.mxu0 }
 0x41f   :  { %v2337_v48 = vadd.f32 %v2336_v37, %v2264_v5 }
 0x421   :  { %v2392_v0 = vmax.f32 %v2337_v48, 0.0 }
 0x422   :  { %v2647_v21 = vpop.f32.mrf.mxu1 }
 0x423   :  { %v2648_v17 = vadd.f32 %v2647_v21, %v2575_v16  ;;  %v2590_v16 = vadd.f32 %v4533_v54, %v4527_v63  ;;  %v2595_v63 = vadd.f32 %v4533_v54, %v4540_v60 }
 0x424   :  { %v2265_v12 = vpop.f32.mrf.mxu2 }
 0x425   :  { %2710 = vst [vmem:[#allocation11 + $0x8] sm:$0xff] %v2648_v17  ;;  %v2266_v45 = vadd.f32 %v2265_v12, %v4452_v15  ;;  %v2338_v23 = vpop.f32.mrf.mxu3 }
 0x426   :  { %v4546_v8 = vpop.f32.mrf.mxu0 }
 0x427   :  { %v2339_v51 = vadd.f32 %v2338_v23, %v2266_v45  ;;  %v2593_v23 = vadd.f32 %v4533_v54, %v4536_v62 }
 0x429   :  { %v2394_v57 = vmax.f32 %v2339_v51, 0.0 }
 0x42a   :  { %v2650_v39 = vpop.f32.mrf.mxu1 }
 0x42b   :  { %v2424_v40 = vpack.c.bf16 %v2394_v57, %v2392_v0  ;;  %v2651_v10 = vadd.f32 %v2650_v39, %v2578_v20 }
 0x42c   :  { %v2268_v31 = vpop.f32.mrf.mxu2 }
 0x42d   :  { %2711 = vst [vmem:[#allocation11 + $0x10] sm:$0xff] %v2651_v10  ;;  %v2341_v34 = vpop.f32.mrf.mxu3  ;;  %2689 = vmatmul.bf16.gmra.mxu1 %v2424_v40  ;;  %v2269_v2 = vadd.f32 %v2268_v31, %v4452_v15  ;;  %v2598_v10 = vadd.f32 %v4533_v54, %v4546_v8 }
 0x42e   :  { %v4550_v13 = vpop.f32.mrf.mxu0 }
 0x42f   :  { %v2342_v47 = vadd.f32 %v2341_v34, %v2269_v2 }
 0x431   :  { %v2396_v30 = vmax.f32 %v2342_v47, 0.0 }
 0x432   :  { %v2652_v32 = vpop.f32.mrf.mxu1 }
 0x433   :  { %v2653_v29 = vadd.f32 %v2652_v32, %v2580_v33  ;;  %v2600_v33 = vadd.f32 %v4533_v54, %v4550_v13 }
 0x434   :  { %v2270_v42 = vpop.f32.mrf.mxu2 }
 0x435   :  { %2712 = vst [vmem:[#allocation11 + $0x18] sm:$0xff] %v2653_v29  ;;  %v2271_v28 = vadd.f32 %v2270_v42, %v4452_v15  ;;  %v2343_v6 = vpop.f32.mrf.mxu3 }
 0x436   :  { %v4556_v35 = vpop.f32.mrf.mxu0 }
 0x437   :  { %v2344_v4 = vadd.f32 %v2343_v6, %v2271_v28  ;;  %v2603_v60 = vadd.f32 %v4533_v54, %v4556_v35 }
 0x439   :  { %v2398_v38 = vmax.f32 %v2344_v4, 0.0 }
 0x43a   :  { %v2655_v25 = vpop.f32.mrf.mxu1 }
 0x43b   :  { %v2426_v55 = vpack.c.bf16 %v2398_v38, %v2396_v30  ;;  %v2656_v56 = vadd.f32 %v2655_v25, %v2583_v3 }
 0x43c   :  { %v2273_v43 = vpop.f32.mrf.mxu2 }
 0x43d   :  { %2713 = vst [vmem:[#allocation11 + $0x20] sm:$0xff] %v2656_v56  ;;  %v2346_v50 = vpop.f32.mrf.mxu3  ;;  %2694 = vmatmul.bf16.gmra.mxu1 %v2426_v55  ;;  %v2274_v49 = vadd.f32 %v2273_v43, %v4452_v15 }
 0x43e   :  { %v2604_v53 = vpop.f32.mrf.mxu0 }
 0x43f   :  { %v2347_v27 = vadd.f32 %v2346_v50, %v2274_v49  ;;  %v2605_v8 = vadd.f32 %v4533_v54, %v2604_v53 }
 0x441   :  { %v2400_v59 = vmax.f32 %v2347_v27, 0.0 }
 0x442   :  { %v2657_v19 = vpop.f32.mrf.mxu1 }
 0x443   :  { %v2658_v1 = vadd.f32 %v2657_v19, %v2585_v9 }
 0x444   :  { %v2275_v36 = vpop.f32.mrf.mxu2 }
 0x445   :  { %2714 = vst [vmem:[#allocation11 + $0x28] sm:$0xff] %v2658_v1  ;;  %v2276_v11 = vadd.f32 %v2275_v36, %v4452_v15  ;;  %v2348_v24 = vpop.f32.mrf.mxu3 }
 0x446   :  { %v2607_v41 = vpop.f32.mrf.mxu0 }
 0x447   :  { %v2349_v61 = vadd.f32 %v2348_v24, %v2276_v11  ;;  %v2608_v30 = vadd.f32 %v4533_v54, %v2607_v41 }
 0x449   :  { %v2402_v7 = vmax.f32 %v2349_v61, 0.0 }
 0x44a   :  { %v2660_v14 = vpop.f32.mrf.mxu1 }
 0x44b   :  { %v2428_v18 = vpack.c.bf16 %v2402_v7, %v2400_v59  ;;  %v2661_v46 = vadd.f32 %v2660_v14, %v2588_v44 }
 0x44c   :  { %v2278_v22 = vpop.f32.mrf.mxu2 }
 0x44d   :  { %2715 = vst [vmem:[#allocation11 + $0x30] sm:$0xff] %v2661_v46  ;;  %v2351_v26 = vpop.f32.mrf.mxu3  ;;  %2699 = vmatmul.bf16.gmra.mxu1 %v2428_v18  ;;  %v2279_v37 = vadd.f32 %v2278_v22, %v4452_v15 }
 0x44e   :  { %v2609_v58 = vpop.f32.mrf.mxu0 }
 0x44f   :  { %v2352_v21 = vadd.f32 %v2351_v26, %v2279_v37  ;;  %v2610_v55 = vadd.f32 %v4533_v54, %v2609_v58 }
 0x451   :  { %v2404_v45 = vmax.f32 %v2352_v21, 0.0 }
 0x452   :  { %v2662_v5 = vpop.f32.mrf.mxu1 }
 0x453   :  { %v2663_v17 = vadd.f32 %v2662_v5, %v2590_v16  ;;  %v2430_v20 = vpack.c.bf16 %v2404_v45, %v2404_v45 }
 0x454   :  { %v2280_v12 = vpop.f32.mrf.mxu2 }
 0x455   :  { %2716 = vst [vmem:[#allocation11 + $0x38] sm:$0xff] %v2663_v17  ;;  %v2353_v52 = vpop.f32.mrf.mxu3 }
 0x456   :  { %v2612_v48 = vpop.f32.mrf.mxu0 }
 0x457   :  { %v2613_v50 = vadd.f32 %v4533_v54, %v2612_v48 }
 0x45a   :  { %v2665_v51 = vpop.f32.mrf.mxu1 }
 0x45b   :  { %v2666_v0 = vadd.f32 %v2665_v51, %v2593_v23 }
 0x45d   :  { %2717 = vst [vmem:[#allocation11 + $0x40] sm:$0xff] %v2666_v0  ;;  %2704 = vmatmul.bf16.gmra.mxu1 %v2430_v20 }
 0x45e   :  { %v2614_v15 = vpop.f32.mrf.mxu0 }
 0x45f   :  { %v2615_v19 = vadd.f32 %v4533_v54, %v2614_v15 }
 0x462   :  { %v2667_v57 = vpop.f32.mrf.mxu1 }
 0x463   :  { %v2668_v39 = vadd.f32 %v2667_v57, %v2595_v63 }
 0x465   :  { %2718 = vst [vmem:[#allocation11 + $0x48] sm:$0xff] %v2668_v39 }
 0x466   :  { %v2617_v40 = vpop.f32.mrf.mxu0 }
 0x467   :  { %v2618_v27 = vadd.f32 %v4533_v54, %v2617_v40 }
 0x46a   :  { %v2670_v31 = vpop.f32.mrf.mxu1 }
 0x46b   :  { %v2671_v34 = vadd.f32 %v2670_v31, %v2598_v10 }
 0x46d   :  { %2719 = vst [vmem:[#allocation11 + $0x50] sm:$0xff] %v2671_v34 }
 0x46e   :  { %v2619_v62 = vpop.f32.mrf.mxu0 }
 0x46f   :  { %v2620_v41 = vadd.f32 %v4533_v54, %v2619_v62 }
 0x472   :  { %v2672_v2 = vpop.f32.mrf.mxu1 }
 0x473   :  { %v2673_v32 = vadd.f32 %v2672_v2, %v2600_v33 }
 0x475   :  { %2720 = vst [vmem:[#allocation11 + $0x58] sm:$0xff] %v2673_v32 }
 0x476   :  { %v2622_v29 = vpop.f32.mrf.mxu0 }
 0x477   :  { %v2623_v59 = vadd.f32 %v4533_v54, %v2622_v29 }
 0x47a   :  { %v2675_v42 = vpop.f32.mrf.mxu1 }
 0x47b   :  { %v2676_v47 = vadd.f32 %v2675_v42, %v2603_v60 }
 0x47d   :  { %2721 = vst [vmem:[#allocation11 + $0x60] sm:$0xff] %v2676_v47 }
 0x47e   :  { %v2624_v28 = vpop.f32.mrf.mxu0 }
 0x47f   :  { %v2625_v18 = vadd.f32 %v4533_v54, %v2624_v28 }
 0x482   :  { %v2677_v6 = vpop.f32.mrf.mxu1 }
 0x483   :  { %v2678_v4 = vadd.f32 %v2677_v6, %v2605_v8 }
 0x485   :  { %2722 = vst [vmem:[#allocation11 + $0x68] sm:$0xff] %v2678_v4 }
 0x486   :  { %v2627_v3 = vpop.f32.mrf.mxu0 }
 0x487   :  { %v2628_v26 = vadd.f32 %v4533_v54, %v2627_v3 }
 0x48a   :  { %v2680_v13 = vpop.f32.mrf.mxu1 }
 0x48b   :  { %v2681_v38 = vadd.f32 %v2680_v13, %v2608_v30 }
 0x48d   :  { %2723 = vst [vmem:[#allocation11 + $0x70] sm:$0xff] %v2681_v38 }
 0x48e   :  { %v2629_v25 = vpop.f32.mrf.mxu0 }
 0x48f   :  { %v2630_v16 = vadd.f32 %v4533_v54, %v2629_v25 }
 0x492   :  { %v2682_v56 = vpop.f32.mrf.mxu1 }
 0x493   :  { %v2683_v35 = vadd.f32 %v2682_v56, %v2610_v55 }
 0x495   :  { %2724 = vst [vmem:[#allocation11 + $0x78] sm:$0xff] %v2683_v35 }
 0x496   :  { %v2632_v43 = vpop.f32.mrf.mxu0 }
 0x497   :  { %v2633_v17 = vadd.f32 %v4533_v54, %v2632_v43 }
 0x49a   :  { %v2685_v9 = vpop.f32.mrf.mxu1 }
 0x49b   :  { %v2686_v53 = vadd.f32 %v2685_v9, %v2613_v50 }
 0x49d   :  { %2725 = vst [vmem:[#allocation11 + $0x80] sm:$0xff] %v2686_v53 }
 0x49e   :  { %v2634_v49 = vpop.f32.mrf.mxu0 }
 0x4a2   :  { %v2687_v1 = vpop.f32.mrf.mxu1 }
 0x4a3   :  { %v2688_v36 = vadd.f32 %v2687_v1, %v2615_v19 }
 0x4a5   :  { %2726 = vst [vmem:[#allocation11 + $0x88] sm:$0xff] %v2688_v36 }
 0x4aa   :  { %v2690_v11 = vpop.f32.mrf.mxu1 }
 0x4ab   :  { %v2691_v24 = vadd.f32 %v2690_v11, %v2618_v27 }
 0x4ad   :  { %2727 = vst [vmem:[#allocation11 + $0x90] sm:$0xff] %v2691_v24 }
 0x4b2   :  { %v2692_v61 = vpop.f32.mrf.mxu1 }
 0x4b3   :  { %v2693_v44 = vadd.f32 %v2692_v61, %v2620_v41 }
 0x4b5   :  { %2728 = vst [vmem:[#allocation11 + $0x98] sm:$0xff] %v2693_v44 }
 0x4ba   :  { %v2695_v7 = vpop.f32.mrf.mxu1 }
 0x4bb   :  { %v2696_v14 = vadd.f32 %v2695_v7, %v2623_v59 }
 0x4bd   :  { %2729 = vst [vmem:[#allocation11 + $0xa0] sm:$0xff] %v2696_v14 }
 0x4c2   :  { %v2697_v46 = vpop.f32.mrf.mxu1 }
 0x4c3   :  { %v2698_v22 = vadd.f32 %v2697_v46, %v2625_v18 }
 0x4c5   :  { %2730 = vst [vmem:[#allocation11 + $0xa8] sm:$0xff] %v2698_v22 }
 0x4ca   :  { %v2700_v58 = vpop.f32.mrf.mxu1 }
 0x4cb   :  { %v2701_v37 = vadd.f32 %v2700_v58, %v2628_v26 }
 0x4cd   :  { %2731 = vst [vmem:[#allocation11 + $0xb0] sm:$0xff] %v2701_v37 }
 0x4d2   :  { %v2702_v5 = vpop.f32.mrf.mxu1 }
 0x4d3   :  { %v2703_v21 = vadd.f32 %v2702_v5, %v2630_v16 }
 0x4d5   :  { %2732 = vst [vmem:[#allocation11 + $0xb8] sm:$0xff] %v2703_v21 }
 0x4da   :  { %v2705_v12 = vpop.f32.mrf.mxu1 }
 0x4db   :  { %v2706_v52 = vadd.f32 %v2705_v12, %v2633_v17 }
 0x4dd   :  { %2733 = vst [vmem:[#allocation11 + $0xc0] sm:$0xff] %v2706_v52 }
 0x4de   :  { %2746 = dma.vmem_to_hbm [thread:$0]  %s2739_s30, 3200, %s2741_s12, [#allocation4], %s3658_s9, %s3658_s9, %s3659_s10  }
 0x4e2   :  { %v2707_v48 = vpop.f32.mrf.mxu1 }
 0x4e3   :  { %3655 = dma.done.wait [#allocation4], 3200  }
 0x4e4   :  { %3656 = vsyncadd [#allocation4], 4294964096 }
 0x4e5   :  { %2751 = vsyncpa [#allocation3], 1 }
 0x4e6   :  { %2752 = vsyncpa [#allocation6], 1 }
 0x4e7   :  { %2753 = vsyncpa [#allocation9], 1 }
 0x4e8   :  { %2754 = vsyncpa [#allocation4], 1 }

// kernel: tpu_custom_call.1
= control target key start
LH: loop header
LB: loop body
LE: loop exit
PB: predicated region body
PF: predicated region fallthrough
CT: control target
= control target key end

     0   :  { %12 = vsyncpa [#allocation3], 0  ;;  %s4597_s0 = inlined_call_operand.hbm [shape: f32[200,768], index: 0, kind: input, shape index: {}]   ;;  %s4598_s1 = inlined_call_operand.hbm [shape: bf16[768,256], index: 1, kind: input, shape index: {}]   ;;  %s4599_s2 = inlined_call_operand.hbm [shape: f32[1,256], index: 2, kind: input, shape index: {}]   ;;  %s4600_s3 = inlined_call_operand.hbm [shape: bf16[256,256], index: 3, kind: input, shape index: {}]   ;;  %s4601_s4 = inlined_call_operand.vmem [shape: f32[1,256], index: 4, kind: input, shape index: {}]   ;;  %s4602_s5 = inlined_call_operand.hbm [shape: bf16[256,128], index: 5, kind: input, shape index: {}]   ;;  %s4603_s6 = inlined_call_operand.vmem [shape: f32[1,128], index: 6, kind: input, shape index: {}]   ;;  %s4604_s7 = inlined_call_operand.hbm [shape: f32[200,128], index: 7, kind: output, shape index: {}]  }
   0x1   :  { %13 = vsyncpa [#allocation6], 0 }
   0x2   :  { %14 = vsyncpa [#allocation9], 0  ;;  %s33_s26 = sshll.u32 %s4598_s1, 4  ;;  %s34_s26 = int_to_ptr.hbm [resolvable:$true] %s33_s26 }
   0x3   :  { %15 = vsyncpa [#allocation4], 0  ;;  %s3657_s27 = smov [#allocation5]   ;;  %s57_s8 = sshll.u32 %s4600_s3, 4  ;;  %s58_s8 = int_to_ptr.hbm [resolvable:$true] %s57_s8 }
   0x4   :  { %s35_s28 = sshll.u32 %s3657_s27, 4  ;;  %s3658_s9 = smov 128   ;;  %s36_s28 = int_to_ptr.vmem [resolvable:$true] %s35_s28 }
   0x5   :  { %s3659_s10 = smov 8   ;;  %s3660_s11 = smov [#allocation8]  }
   0x6   :  { %41 = dma.hbm_to_vmem [thread:$0]  %s34_s26, 12288, %s36_s28, [#allocation6], %s3658_s9, %s3658_s9, %s3659_s10  }
   0x7   :  { %s59_s12 = sshll.u32 %s3660_s11, 4  ;;  %s20_s14 = sshll.u32 %s4597_s0, 4  ;;  %s60_s12 = int_to_ptr.vmem [resolvable:$true] %s59_s12  ;;  %s21_s14 = int_to_ptr.hbm [resolvable:$true] %s20_s14 }
   0x8   :  { %65 = dma.hbm_to_vmem [thread:$0]  %s58_s8, 4096, %s60_s12, [#allocation9], %s3658_s9, %s3658_s9, %s3659_s10  }
   0x9   :  { %s3661_s3 = smov [#allocation2]   ;;  %s47_s18 = sshll.u32 %s4599_s2, 4  ;;  %s48_s18 = int_to_ptr.hbm [resolvable:$true] %s47_s18 }
   0xa   :  { %s22_s15 = sshll.u32 %s3661_s3, 4  ;;  %s3662_s19 = smov 768   ;;  %s23_s15 = int_to_ptr.vmem [resolvable:$true] %s22_s15 }
   0xb   :  { %s3663_s20 = smov 48   ;;  %s3664_s21 = smov [#allocation7]  }
   0xc   :  { %28 = dma.hbm_to_vmem [thread:$0]  %s21_s14, 19200, %s23_s15, [#allocation3], %s3662_s19, %s3662_s19, %s3663_s20  }
   0xd   :  { %s49_s22 = sshll.u32 %s3664_s21, 4  ;;  %s72_s24 = sshll.u32 %s4602_s5, 4  ;;  %s50_s22 = int_to_ptr.vmem [resolvable:$true] %s49_s22  ;;  %s73_s24 = int_to_ptr.hbm [resolvable:$true] %s72_s24 }
   0xe   :  { %52 = dma.hbm_to_vmem [thread:$0]  %s48_s18, 32, %s50_s22, [#allocation6]  }
   0xf   :  { %s3665_s25 = smov [#allocation10]   ;;  %s3666_s27 = smov 64  }
  0x10   :  { %s74_s26 = sshll.u32 %s3665_s25, 4  ;;  %s3667_s28 = smov 4   ;;  %s75_s26 = int_to_ptr.vmem [resolvable:$true] %s74_s26 }
  0x11   :  { %80 = dma.hbm_to_vmem [thread:$0]  %s73_s24, 2048, %s75_s26, [#allocation9], %s3666_s27, %s3666_s27, %s3667_s28  }
  0x12   :  { %3649 = dma.done.wait [#allocation3], 19200  }
  0x13   :  { %3650 = vsyncadd [#allocation3], 4294948096 }
  0x14   :  { %3651 = dma.done.wait [#allocation6], 12320  }
  0x15   :  { %3652 = vsyncadd [#allocation6], 4294954976 }
  0x16   :  { %3653 = dma.done.wait [#allocation9], 6144  }
  0x17   :  { %3654 = vsyncadd [#allocation9], 4294961152  ;;  %v2813_v0 = vld [vmem:[#allocation5 + $0x70] sm:$0xf]  ;;  %v3346_v1 = vld [vmem:[#allocation5 + $0x74] sm:$0xf0] }
  0x18   :  { %v2877_v2 = vld [vmem:[#allocation5 + $0xf0] sm:$0xf]  ;;  %v2814_v3 = vor.u32 %v3346_v1, %v2813_v0  ;;  %v3362_v4 = vld [vmem:[#allocation5 + $0xf4] sm:$0xf0]  ;;  %v2805_v5 = vld [vmem:[#allocation5 + $0x60] sm:$0xf] }
  0x19   :  { %v3344_v6 = vld [vmem:[#allocation5 + $0x64] sm:$0xf0]  ;;  %v2878_v7 = vor.u32 %v3362_v4, %v2877_v2  ;;  %v2869_v8 = vld [vmem:[#allocation5 + $0xe0] sm:$0xf]  ;;  %v2797_v12 = vld [vmem:[#allocation5 + $0x50] sm:$0xf] }
  0x1a   :  { %v3360_v9 = vld [vmem:[#allocation5 + $0xe4] sm:$0xf0]  ;;  %913 = vmatpush.bf16.msra.mxu0 %v2814_v3  ;;  %3475 = vmatpush.bf16.msra.mxu2 %v2814_v3  ;;  %v2806_v10 = vor.u32 %v3344_v6, %v2805_v5  ;;  %v3342_v13 = vld [vmem:[#allocation5 + $0x54] sm:$0xf0]  ;;  %v2861_v14 = vld [vmem:[#allocation5 + $0xd0] sm:$0xf] }
  0x1b   :  { %3483 = vmatpush.bf16.msra.mxu3 %v2878_v7  ;;  %986 = vmatpush.bf16.msra.mxu1 %v2878_v7  ;;  %v2870_v11 = vor.u32 %v3360_v9, %v2869_v8  ;;  %v3358_v15 = vld [vmem:[#allocation5 + $0xd4] sm:$0xf0]  ;;  %v2798_v16 = vor.u32 %v3342_v13, %v2797_v12  ;;  %v2789_v18 = vld [vmem:[#allocation5 + $0x40] sm:$0xf]  ;;  %v3340_v19 = vld [vmem:[#allocation5 + $0x44] sm:$0xf0] }
  0x1c   :  { %v2862_v17 = vor.u32 %v3358_v15, %v2861_v14  ;;  %v2853_v20 = vld [vmem:[#allocation5 + $0xc0] sm:$0xf]  ;;  %v3356_v21 = vld [vmem:[#allocation5 + $0xc4] sm:$0xf0]  ;;  %v2790_v22 = vor.u32 %v3340_v19, %v2789_v18  ;;  %v2781_v24 = vld [vmem:[#allocation5 + $0x30] sm:$0xf] }
  0x1d   :  { %v2854_v23 = vor.u32 %v3356_v21, %v2853_v20  ;;  %v3338_v25 = vld [vmem:[#allocation5 + $0x34] sm:$0xf0]  ;;  %v2845_v26 = vld [vmem:[#allocation5 + $0xb0] sm:$0xf]  ;;  %v2773_v30 = vld [vmem:[#allocation5 + $0x20] sm:$0xf] }
  0x1e   :  { %914 = vmatpush.bf16.msra.mxu0 %v2806_v10  ;;  %3476 = vmatpush.bf16.msra.mxu2 %v2806_v10  ;;  %v3354_v27 = vld [vmem:[#allocation5 + $0xb4] sm:$0xf0]  ;;  %v2782_v28 = vor.u32 %v3338_v25, %v2781_v24  ;;  %v3336_v31 = vld [vmem:[#allocation5 + $0x24] sm:$0xf0]  ;;  %v2837_v32 = vld [vmem:[#allocation5 + $0xa0] sm:$0xf] }
  0x1f   :  { %3484 = vmatpush.bf16.msra.mxu3 %v2870_v11  ;;  %987 = vmatpush.bf16.msra.mxu1 %v2870_v11  ;;  %v2846_v29 = vor.u32 %v3354_v27, %v2845_v26  ;;  %v3352_v33 = vld [vmem:[#allocation5 + $0xa4] sm:$0xf0]  ;;  %v2774_v34 = vor.u32 %v3336_v31, %v2773_v30  ;;  %v2765_v36 = vld [vmem:[#allocation5 + $0x10] sm:$0xf]  ;;  %v3334_v37 = vld [vmem:[#allocation5 + $0x14] sm:$0xf0] }
  0x20   :  { %v2838_v35 = vor.u32 %v3352_v33, %v2837_v32  ;;  %v2829_v38 = vld [vmem:[#allocation5 + $0x90] sm:$0xf]  ;;  %v3350_v39 = vld [vmem:[#allocation5 + $0x94] sm:$0xf0]  ;;  %v2766_v40 = vor.u32 %v3334_v37, %v2765_v36  ;;  %v2757_v41 = vld [vmem:[#allocation5] sm:$0xf] }
  0x21   :  { %v2830_v42 = vor.u32 %v3350_v39, %v2829_v38  ;;  %v3332_v43 = vld [vmem:[#allocation5 + $0x4] sm:$0xf0]  ;;  %v2821_v44 = vld [vmem:[#allocation5 + $0x80] sm:$0xf]  ;;  %v103_v46 = vld [vmem:[#allocation2] sm:$0xff]  ;;  %s2740_s12 = sshll.u32 %s4604_s7, 4  ;;  %s2741_s12 = int_to_ptr.hbm [resolvable:$true] %s2740_s12 }
  0x22   :  { %915 = vmatpush.bf16.msra.mxu0 %v2798_v16  ;;  %3477 = vmatpush.bf16.msra.mxu2 %v2798_v16  ;;  %v3348_v45 = vld [vmem:[#allocation5 + $0x84] sm:$0xf0]  ;;  %v109_v47 = vld [vmem:[#allocation2 + $0x30] sm:$0xff]  ;;  %v2941_v48 = vld [vmem:[#allocation5 + $0x170] sm:$0xf]  ;;  %v2758_v52 = vor.u32 %v3332_v43, %v2757_v41 }
  0x23   :  { %3485 = vmatpush.bf16.msra.mxu3 %v2862_v17  ;;  %988 = vmatpush.bf16.msra.mxu1 %v2862_v17  ;;  %v3378_v49 = vld [vmem:[#allocation5 + $0x174] sm:$0xf0]  ;;  %v3005_v50 = vld [vmem:[#allocation5 + $0x1f0] sm:$0xf]  ;;  %v193_v54 = vld [vmem:[#allocation2 + $0x2d0] sm:$0xff]  ;;  %v2822_v56 = vor.u32 %v3348_v45, %v2821_v44  ;;  %v3730_v63 = vpack.c.bf16 %v109_v47, %v103_v46 }
  0x24   :  { %v3394_v51 = vld [vmem:[#allocation5 + $0x1f4] sm:$0xf0]  ;;  %v187_v53 = vld [vmem:[#allocation2 + $0x2a0] sm:$0xff]  ;;  %v194_v57 = vld [vmem:[#allocation2 + $0x2d8] sm:$0xff]  ;;  %v2942_v60 = vor.u32 %v3378_v49, %v2941_v48 }
  0x25   :  { %v188_v55 = vld [vmem:[#allocation2 + $0x2a8] sm:$0xff]  ;;  %v110_v59 = vld [vmem:[#allocation2 + $0x38] sm:$0xff]  ;;  %v3006_v61 = vor.u32 %v3394_v51, %v3005_v50  ;;  %v2933_v62 = vld [vmem:[#allocation5 + $0x160] sm:$0xf]  ;;  %v3732_v0 = vpack.c.bf16 %v193_v54, %v187_v53 }
  0x26   :  { %916 = vmatpush.bf16.msra.mxu0 %v2790_v22  ;;  %3478 = vmatpush.bf16.msra.mxu2 %v2790_v22  ;;  %v104_v58 = vld [vmem:[#allocation2 + $0x8] sm:$0xff]  ;;  %v3376_v1 = vld [vmem:[#allocation5 + $0x164] sm:$0xf0]  ;;  %v2997_v2 = vld [vmem:[#allocation5 + $0x1e0] sm:$0xf]  ;;  %v3734_v4 = vpack.c.bf16 %v194_v57, %v188_v55 }
  0x27   :  { %3486 = vmatpush.bf16.msra.mxu3 %v2854_v23  ;;  %989 = vmatpush.bf16.msra.mxu1 %v2854_v23  ;;  %4657 = vst [vmem:[#allocation16_spill] sm:$0xff] %v3732_v0  ;;  %v3392_v3 = vld [vmem:[#allocation5 + $0x1e4] sm:$0xf0]  ;;  %v3736_v5 = vpack.c.bf16 %v110_v59, %v104_v58  ;;  %v2934_v6 = vor.u32 %v3376_v1, %v2933_v62  ;;  %v2925_v8 = vld [vmem:[#allocation5 + $0x150] sm:$0xf]  ;;  %v121_v21 = vld [vmem:[#allocation2 + $0x90] sm:$0xff] }
  0x28   :  { %4658 = vst [vmem:[#allocation17_spill] sm:$0xff] %v3734_v4  ;;  %v2998_v7 = vor.u32 %v3392_v3, %v2997_v2  ;;  %v3374_v9 = vld [vmem:[#allocation5 + $0x154] sm:$0xf0]  ;;  %v2989_v10 = vld [vmem:[#allocation5 + $0x1d0] sm:$0xf]  ;;  %v205_v23 = vld [vmem:[#allocation2 + $0x330] sm:$0xff] }
  0x29   :  { %v3390_v11 = vld [vmem:[#allocation5 + $0x1d4] sm:$0xf0]  ;;  %v2926_v12 = vor.u32 %v3374_v9, %v2925_v8  ;;  %v2917_v14 = vld [vmem:[#allocation5 + $0x140] sm:$0xf]  ;;  %v3372_v15 = vld [vmem:[#allocation5 + $0x144] sm:$0xf0] }
  0x2a   :  { %917 = vmatpush.bf16.msra.mxu0 %v2782_v28  ;;  %3479 = vmatpush.bf16.msra.mxu2 %v2782_v28  ;;  %v2990_v13 = vor.u32 %v3390_v11, %v2989_v10  ;;  %v2981_v16 = vld [vmem:[#allocation5 + $0x1c0] sm:$0xf]  ;;  %v3388_v17 = vld [vmem:[#allocation5 + $0x1c4] sm:$0xf0]  ;;  %v2918_v18 = vor.u32 %v3372_v15, %v2917_v14  ;;  %v115_v20 = vld [vmem:[#allocation2 + $0x60] sm:$0xff] }
  0x2b   :  { %3487 = vmatpush.bf16.msra.mxu3 %v2846_v29  ;;  %990 = vmatpush.bf16.msra.mxu1 %v2846_v29  ;;  %v2982_v19 = vor.u32 %v3388_v17, %v2981_v16  ;;  %v199_v22 = vld [vmem:[#allocation2 + $0x300] sm:$0xff]  ;;  %v200_v24 = vld [vmem:[#allocation2 + $0x308] sm:$0xff]  ;;  %v206_v25 = vld [vmem:[#allocation2 + $0x338] sm:$0xff]  ;;  %v3742_v28 = vpack.c.bf16 %v121_v21, %v115_v20 }
  0x2c   :  { %v116_v26 = vld [vmem:[#allocation2 + $0x68] sm:$0xff]  ;;  %v122_v27 = vld [vmem:[#allocation2 + $0x98] sm:$0xff]  ;;  %v3744_v29 = vpack.c.bf16 %v205_v23, %v199_v22  ;;  %v3746_v30 = vpack.c.bf16 %v206_v25, %v200_v24  ;;  %v2909_v32 = vld [vmem:[#allocation5 + $0x130] sm:$0xf] }
  0x2d   :  { %v3748_v31 = vpack.c.bf16 %v122_v27, %v116_v26  ;;  %v3370_v33 = vld [vmem:[#allocation5 + $0x134] sm:$0xf0]  ;;  %v2901_v37 = vld [vmem:[#allocation5 + $0x120] sm:$0xf]  ;;  %v3368_v38 = vld [vmem:[#allocation5 + $0x124] sm:$0xf0] }
  0x2e   :  { %918 = vmatpush.bf16.msra.mxu0 %v2774_v34  ;;  %3480 = vmatpush.bf16.msra.mxu2 %v2774_v34  ;;  %4659 = vst [vmem:[#allocation18_spill] sm:$0xff] %v3744_v29  ;;  %v2973_v34 = vld [vmem:[#allocation5 + $0x1b0] sm:$0xf]  ;;  %v3386_v36 = vld [vmem:[#allocation5 + $0x1b4] sm:$0xf0]  ;;  %v133_v45 = vld [vmem:[#allocation2 + $0xf0] sm:$0xff] }
  0x2f   :  { %3488 = vmatpush.bf16.msra.mxu3 %v2838_v35  ;;  %991 = vmatpush.bf16.msra.mxu1 %v2838_v35  ;;  %4660 = vst [vmem:[#allocation19_spill] sm:$0xff] %v3746_v30  ;;  %v2910_v35 = vor.u32 %v3370_v33, %v2909_v32  ;;  %v2974_v39 = vor.u32 %v3386_v36, %v2973_v34  ;;  %v3384_v41 = vld [vmem:[#allocation5 + $0x1a4] sm:$0xf0]  ;;  %v127_v44 = vld [vmem:[#allocation2 + $0xc0] sm:$0xff]  ;;  %v217_v47 = vld [vmem:[#allocation2 + $0x390] sm:$0xff] }
  0x30   :  { %v211_v46 = vld [vmem:[#allocation2 + $0x360] sm:$0xff]  ;;  %v212_v48 = vld [vmem:[#allocation2 + $0x368] sm:$0xff]  ;;  %v218_v49 = vld [vmem:[#allocation2 + $0x398] sm:$0xff] }
  0x31   :  { %v128_v50 = vld [vmem:[#allocation2 + $0xc8] sm:$0xff]  ;;  %v134_v51 = vld [vmem:[#allocation2 + $0xf8] sm:$0xff]  ;;  %v3756_v53 = vpack.c.bf16 %v217_v47, %v211_v46  ;;  %v3758_v54 = vpack.c.bf16 %v218_v49, %v212_v48  ;;  %v2957_v58 = vld [vmem:[#allocation5 + $0x190] sm:$0xf] }
  0x32   :  { %919 = vmatpush.bf16.msra.mxu0 %v2766_v40  ;;  %3481 = vmatpush.bf16.msra.mxu2 %v2766_v40  ;;  %v2965_v40 = vld [vmem:[#allocation5 + $0x1a0] sm:$0xf]  ;;  %v3760_v55 = vpack.c.bf16 %v134_v51, %v128_v50  ;;  %v3366_v57 = vld [vmem:[#allocation5 + $0x114] sm:$0xf0]  ;;  %v139_v62 = vld [vmem:[#allocation2 + $0x120] sm:$0xff] }
  0x33   :  { %3489 = vmatpush.bf16.msra.mxu3 %v2830_v42  ;;  %992 = vmatpush.bf16.msra.mxu1 %v2830_v42  ;;  %v2902_v42 = vor.u32 %v3368_v38, %v2901_v37  ;;  %v2966_v43 = vor.u32 %v3384_v41, %v2965_v40  ;;  %4661 = vst [vmem:[#allocation20_spill] sm:$0xff] %v3756_v53  ;;  %v145_v1 = vld [vmem:[#allocation2 + $0x150] sm:$0xff]  ;;  %v223_v2 = vld [vmem:[#allocation2 + $0x3c0] sm:$0xff]  ;;  %v140_v8 = vld [vmem:[#allocation2 + $0x128] sm:$0xff] }
  0x34   :  { %4662 = vst [vmem:[#allocation21_spill] sm:$0xff] %v3758_v54  ;;  %v229_v3 = vld [vmem:[#allocation2 + $0x3f0] sm:$0xff]  ;;  %v146_v9 = vld [vmem:[#allocation2 + $0x158] sm:$0xff]  ;;  %v3766_v10 = vpack.c.bf16 %v145_v1, %v139_v62  ;;  %v3069_v14 = vld [vmem:[#allocation5 + $0x270] sm:$0xf] }
  0x35   :  { %v3768_v11 = vpack.c.bf16 %v229_v3, %v223_v2  ;;  %v3410_v15 = vld [vmem:[#allocation5 + $0x274] sm:$0xf0]  ;;  %v3133_v17 = vld [vmem:[#allocation5 + $0x2f0] sm:$0xf]  ;;  %v3364_v21 = vld [vmem:[#allocation5 + $0x104] sm:$0xf0] }
  0x36   :  { %920 = vmatpush.bf16.msra.mxu0 %v2758_v52  ;;  %3482 = vmatpush.bf16.msra.mxu2 %v2758_v52  ;;  %v3754_v52 = vpack.c.bf16 %v133_v45, %v127_v44  ;;  %v3070_v16 = vor.u32 %v3410_v15, %v3069_v14  ;;  %v3061_v22 = vld [vmem:[#allocation5 + $0x260] sm:$0xf]  ;;  %v3408_v23 = vld [vmem:[#allocation5 + $0x264] sm:$0xf0]  ;;  %v3406_v36 = vld [vmem:[#allocation5 + $0x254] sm:$0xf0] }
  0x37   :  { %3490 = vmatpush.bf16.msra.mxu3 %v2822_v56  ;;  %993 = vmatpush.bf16.msra.mxu1 %v2822_v56  ;;  %v2893_v56 = vld [vmem:[#allocation5 + $0x110] sm:$0xf]  ;;  %4663 = vst [vmem:[#allocation22_spill] sm:$0xff] %v3768_v11  ;;  %v3062_v25 = vor.u32 %v3408_v23, %v3061_v22  ;;  %v2949_v26 = vld [vmem:[#allocation5 + $0x180] sm:$0xf]  ;;  %v236_v48 = vld [vmem:[#allocation2 + $0x428] sm:$0xff] }
  0x38   :  { %v2894_v59 = vor.u32 %v3366_v57, %v2893_v56  ;;  %v3380_v27 = vld [vmem:[#allocation5 + $0x184] sm:$0xf0]  ;;  %v3125_v32 = vld [vmem:[#allocation5 + $0x2e0] sm:$0xf]  ;;  %v3117_v38 = vld [vmem:[#allocation5 + $0x2d0] sm:$0xf] }
  0x39   :  { %921 = vmatmul.bf16.vlgmr.msra.gmra.mxu0 %v3730_v63  ;;  %956 = vmatmul.bf16.vlgmr.msra.gmra.mxu2 %v3732_v0  ;;  %v2950_v33 = vor.u32 %v3380_v27, %v2949_v26  ;;  %v3424_v34 = vld [vmem:[#allocation5 + $0x2e4] sm:$0xf0]  ;;  %v3045_v41 = vld [vmem:[#allocation5 + $0x240] sm:$0xf]  ;;  %v235_v46 = vld [vmem:[#allocation2 + $0x420] sm:$0xff] }
  0x3a   :  { %1059 = vmatpush.bf16.msrb.mxu2 %v2942_v60  ;;  %1029 = vmatmul.bf16.vlgmr.msra.gmra.mxu3 %v3734_v4  ;;  %v3382_v60 = vld [vmem:[#allocation5 + $0x194] sm:$0xf0]  ;;  %v3126_v37 = vor.u32 %v3424_v34, %v3125_v32  ;;  %v157_v44 = vld [vmem:[#allocation2 + $0x1b0] sm:$0xff]  ;;  %v242_v49 = vld [vmem:[#allocation2 + $0x458] sm:$0xff] }
  0x3b   :  { %1132 = vmatpush.bf16.msrb.mxu3 %v3006_v61  ;;  %994 = vmatmul.bf16.vlgmr.msra.gmra.mxu1 %v3736_v5  ;;  %v2958_v61 = vor.u32 %v3382_v60, %v2957_v58  ;;  %v241_v47 = vld [vmem:[#allocation2 + $0x450] sm:$0xff]  ;;  %v152_v50 = vld [vmem:[#allocation2 + $0x188] sm:$0xff]  ;;  %v158_v51 = vld [vmem:[#allocation2 + $0x1b8] sm:$0xff] }
  0x3c   :  { %1205 = vmatpush.bf16.msrb.mxu0 %v3070_v16  ;;  %v3109_v57 = vld [vmem:[#allocation5 + $0x2c0] sm:$0xf]  ;;  %v3420_v58 = vld [vmem:[#allocation5 + $0x2c4] sm:$0xf0]  ;;  %v3780_v60 = vpack.c.bf16 %v241_v47, %v235_v46  ;;  %v3784_v62 = vpack.c.bf16 %v158_v51, %v152_v50  ;;  %v3037_v2 = vld [vmem:[#allocation5 + $0x230] sm:$0xf] }
  0x3d   :  { %v3110_v1 = vor.u32 %v3420_v58, %v3109_v57  ;;  %v3402_v3 = vld [vmem:[#allocation5 + $0x234] sm:$0xf0]  ;;  %v2879_v15 = vld [vmem:[#allocation5 + $0xf8] sm:$0xf0]  ;;  %v3101_v16 = vld [vmem:[#allocation5 + $0x2b0] sm:$0xf] }
  0x3e   :  { %1060 = vmatpush.bf16.msrb.mxu2 %v2934_v6  ;;  %v224_v6 = vld [vmem:[#allocation2 + $0x3c8] sm:$0xff]  ;;  %4665 = vst [vmem:[#allocation24_spill] sm:$0xff] %v3780_v60  ;;  %v3093_v22 = vld [vmem:[#allocation5 + $0x2a0] sm:$0xf]  ;;  %v3412_v46 = vld [vmem:[#allocation5 + $0x284] sm:$0xf0] }
  0x3f   :  { %1133 = vmatpush.bf16.msrb.mxu3 %v2998_v7  ;;  %v230_v7 = vld [vmem:[#allocation2 + $0x3f8] sm:$0xff]  ;;  %v3398_v26 = vld [vmem:[#allocation5 + $0x214] sm:$0xf0]  ;;  %v3359_v58 = vld [vmem:[#allocation5 + $0xe4] sm:$0xf] }
  0x40   :  { %1206 = vmatpush.bf16.msrb.mxu0 %v3062_v25  ;;  %v3021_v25 = vld [vmem:[#allocation5 + $0x210] sm:$0xf]  ;;  %v3414_v34 = vld [vmem:[#allocation5 + $0x294] sm:$0xf0]  ;;  %v2807_v57 = vld [vmem:[#allocation5 + $0x68] sm:$0xf0] }
  0x41   :  { %v3022_v32 = vor.u32 %v3398_v26, %v3021_v25  ;;  %v107_v25 = vld [vmem:[#allocation2 + $0x20] sm:$0xff]  ;;  %v113_v26 = vld [vmem:[#allocation2 + $0x50] sm:$0xff]  ;;  %v180_v4 = vld [vmem:[#allocation2 + $0x268] sm:$0xff] }
  0x42   :  { %1061 = vmatpush.bf16.msrb.mxu2 %v2926_v12  ;;  %v3770_v12 = vpack.c.bf16 %v230_v7, %v224_v6  ;;  %v3038_v6 = vor.u32 %v3402_v3, %v3037_v2  ;;  %v3345_v7 = vld [vmem:[#allocation5 + $0x74] sm:$0xf]  ;;  %v2871_v2 = vld [vmem:[#allocation5 + $0xe8] sm:$0xf0] }
  0x43   :  { %1134 = vmatpush.bf16.msrb.mxu3 %v2990_v13  ;;  %v3772_v13 = vpack.c.bf16 %v146_v9, %v140_v8  ;;  %v2815_v8 = vld [vmem:[#allocation5 + $0x78] sm:$0xf0]  ;;  %v3361_v9 = vld [vmem:[#allocation5 + $0xf4] sm:$0xf]  ;;  %v2874_v3 = vor.u32 %v3359_v58, %v2871_v2  ;;  %v126_v2 = vld [vmem:[#allocation2 + $0xb8] sm:$0xff] }
  0x44   :  { %4664 = vst [vmem:[#allocation23_spill] sm:$0xff] %v3770_v12  ;;  %v2818_v14 = vor.u32 %v3345_v7, %v2815_v8  ;;  %v181_v7 = vld [vmem:[#allocation2 + $0x270] sm:$0xff]  ;;  %v136_v58 = vld [vmem:[#allocation2 + $0x108] sm:$0xff] }
  0x45   :  { %v105_v8 = vld [vmem:[#allocation2 + $0x10] sm:$0xff] }
  0x46   :  { %1062 = vmatpush.bf16.msrb.mxu2 %v2918_v18  ;;  %v3426_v18 = vld [vmem:[#allocation5 + $0x2f4] sm:$0xf0] }
  0x47   :  { %1135 = vmatpush.bf16.msrb.mxu3 %v2982_v19  ;;  %v2885_v19 = vld [vmem:[#allocation5 + $0x100] sm:$0xf]  ;;  %v3134_v20 = vor.u32 %v3426_v18, %v3133_v17  ;;  %v3418_v17 = vld [vmem:[#allocation5 + $0x2b4] sm:$0xf0]  ;;  %v2882_v18 = vor.u32 %v3361_v9, %v2879_v15  ;;  %v111_v9 = vld [vmem:[#allocation2 + $0x40] sm:$0xff] }
  0x48   :  { %v2886_v24 = vor.u32 %v3364_v21, %v2885_v19  ;;  %v3102_v19 = vor.u32 %v3418_v17, %v3101_v16  ;;  %v3400_v21 = vld [vmem:[#allocation5 + $0x224] sm:$0xf0]  ;;  %v112_v15 = vld [vmem:[#allocation2 + $0x48] sm:$0xff] }
  0x49   :  { %926 = vmatmul.bf16.gmra.mxu0 %v3742_v28  ;;  %961 = vmatmul.bf16.gmra.mxu2 %v3744_v29  ;;  %v176_v16 = vld [vmem:[#allocation2 + $0x248] sm:$0xff]  ;;  %v182_v17 = vld [vmem:[#allocation2 + $0x278] sm:$0xff] }
  0x4a   :  { %1034 = vmatmul.bf16.gmra.mxu3 %v3746_v30  ;;  %1063 = vmatpush.bf16.msrb.mxu2 %v2910_v35  ;;  %v3053_v35 = vld [vmem:[#allocation5 + $0x250] sm:$0xf] }
  0x4b   :  { %999 = vmatmul.bf16.gmra.mxu1 %v3748_v31  ;;  %1136 = vmatpush.bf16.msrb.mxu3 %v2974_v39  ;;  %v3422_v39 = vld [vmem:[#allocation5 + $0x2d4] sm:$0xf0]  ;;  %v3054_v40 = vor.u32 %v3406_v36, %v3053_v35  ;;  %v3013_v35 = vld [vmem:[#allocation5 + $0x200] sm:$0xf]  ;;  %v3396_v36 = vld [vmem:[#allocation5 + $0x204] sm:$0xf0] }
  0x4c   :  { %1278 = vmatpush.bf16.msrb.mxu1 %v3134_v20  ;;  %v3118_v45 = vor.u32 %v3422_v39, %v3117_v38  ;;  %v3029_v20 = vld [vmem:[#allocation5 + $0x220] sm:$0xf]  ;;  %v247_v39 = vld [vmem:[#allocation2 + $0x480] sm:$0xff] }
  0x4d   :  { %1207 = vmatpush.bf16.msrb.mxu0 %v3054_v40  ;;  %v3030_v23 = vor.u32 %v3400_v21, %v3029_v20  ;;  %v169_v38 = vld [vmem:[#allocation2 + $0x210] sm:$0xff]  ;;  %v248_v40 = vld [vmem:[#allocation2 + $0x488] sm:$0xff]  ;;  %v3808_v21 = vpack.c.bf16 %v182_v17, %v176_v16 }
  0x4e   :  { %1064 = vmatpush.bf16.msrb.mxu2 %v2902_v42  ;;  %v3404_v42 = vld [vmem:[#allocation5 + $0x244] sm:$0xf0] }
  0x4f   :  { %1137 = vmatpush.bf16.msrb.mxu3 %v2966_v43  ;;  %v151_v43 = vld [vmem:[#allocation2 + $0x180] sm:$0xff]  ;;  %v3046_v56 = vor.u32 %v3404_v42, %v3045_v41  ;;  %v164_v41 = vld [vmem:[#allocation2 + $0x1e8] sm:$0xff]  ;;  %v170_v42 = vld [vmem:[#allocation2 + $0x218] sm:$0xff]  ;;  %4671 = vst [vmem:[#allocation30_spill] sm:$0xff] %v3808_v21 }
  0x50   :  { %1279 = vmatpush.bf16.msrb.mxu1 %v3126_v37  ;;  %v163_v37 = vld [vmem:[#allocation2 + $0x1e0] sm:$0xff]  ;;  %v3796_v50 = vpack.c.bf16 %v170_v42, %v164_v41  ;;  %v2863_v42 = vld [vmem:[#allocation5 + $0xd8] sm:$0xf0] }
  0x51   :  { %1208 = vmatpush.bf16.msrb.mxu0 %v3046_v56  ;;  %v3790_v47 = vpack.c.bf16 %v169_v38, %v163_v37  ;;  %v3343_v56 = vld [vmem:[#allocation5 + $0x64] sm:$0xf]  ;;  %v3341_v38 = vld [vmem:[#allocation5 + $0x54] sm:$0xf] }
  0x52   :  { %1065 = vmatpush.bf16.msrb.mxu2 %v2894_v59  ;;  %v3778_v59 = vpack.c.bf16 %v157_v44, %v151_v43  ;;  %v3014_v44 = vor.u32 %v3396_v36, %v3013_v35  ;;  %4669 = vst [vmem:[#allocation28_spill] sm:$0xff] %v3796_v50  ;;  %v3816_v35 = vpack.c.bf16 %v113_v26, %v107_v25 }
  0x53   :  { %1138 = vmatpush.bf16.msrb.mxu3 %v2958_v61  ;;  %v3782_v61 = vpack.c.bf16 %v242_v49, %v236_v48  ;;  %v3792_v48 = vpack.c.bf16 %v247_v39, %v247_v39  ;;  %v3794_v49 = vpack.c.bf16 %v248_v40, %v248_v40  ;;  %v2799_v39 = vld [vmem:[#allocation5 + $0x58] sm:$0xf0]  ;;  %v3357_v40 = vld [vmem:[#allocation5 + $0xd4] sm:$0xf] }
  0x54   :  { %1280 = vmatpush.bf16.msrb.mxu1 %v3118_v45  ;;  %v3077_v45 = vld [vmem:[#allocation5 + $0x280] sm:$0xf]  ;;  %4672 = vst [vmem:[#allocation31_spill] sm:$0xff] %v3816_v35  ;;  %v2802_v41 = vor.u32 %v3341_v38, %v2799_v39  ;;  %v147_v39 = vld [vmem:[#allocation2 + $0x160] sm:$0xff] }
  0x55   :  { %4666 = vst [vmem:[#allocation25_spill] sm:$0xff] %v3782_v61  ;;  %1209 = vmatpush.bf16.msrb.mxu0 %v3038_v6  ;;  %v3078_v51 = vor.u32 %v3412_v46, %v3077_v45  ;;  %v175_v6 = vld [vmem:[#allocation2 + $0x240] sm:$0xff]  ;;  %v2866_v46 = vor.u32 %v3357_v40, %v2863_v42  ;;  %v141_v38 = vld [vmem:[#allocation2 + $0x130] sm:$0xff]  ;;  %v142_v40 = vld [vmem:[#allocation2 + $0x138] sm:$0xff] }
  0x56   :  { %1066 = vmatpush.bf16.msrb.mxu2 %v2886_v24  ;;  %v3416_v24 = vld [vmem:[#allocation5 + $0x2a4] sm:$0xf0]  ;;  %4667 = vst [vmem:[#allocation26_spill] sm:$0xff] %v3792_v48  ;;  %v135_v45 = vld [vmem:[#allocation2 + $0x100] sm:$0xff]  ;;  %v137_v42 = vld [vmem:[#allocation2 + $0x110] sm:$0xff] }
  0x57   :  { %1139 = vmatpush.bf16.msrb.mxu3 %v2950_v33  ;;  %v3094_v27 = vor.u32 %v3416_v24, %v3093_v22  ;;  %v3085_v33 = vld [vmem:[#allocation5 + $0x290] sm:$0xf]  ;;  %4668 = vst [vmem:[#allocation27_spill] sm:$0xff] %v3794_v49  ;;  %v117_v22 = vld [vmem:[#allocation2 + $0x70] sm:$0xff]  ;;  %v118_v24 = vld [vmem:[#allocation2 + $0x78] sm:$0xff] }
  0x58   :  { %1281 = vmatpush.bf16.msrb.mxu1 %v3110_v1  ;;  %v3086_v43 = vor.u32 %v3414_v34, %v3085_v33  ;;  %v2810_v1 = vor.u32 %v3343_v56, %v2807_v57  ;;  %v114_v33 = vld [vmem:[#allocation2 + $0x58] sm:$0xff]  ;;  %v119_v56 = vld [vmem:[#allocation2 + $0x80] sm:$0xff]  ;;  %v125_v57 = vld [vmem:[#allocation2 + $0xb0] sm:$0xff] }
  0x59   :  { %931 = vmatmul.bf16.gmra.mxu0 %v3754_v52  ;;  %966 = vmatmul.bf16.gmra.mxu2 %v3756_v53 }
  0x5a   :  { %1039 = vmatmul.bf16.gmra.mxu3 %v3758_v54  ;;  %1351 = vmatpush.bf16.msra.mxu2 %v2818_v14  ;;  %v106_v14 = vld [vmem:[#allocation2 + $0x18] sm:$0xff] }
  0x5b   :  { %1004 = vmatmul.bf16.gmra.mxu1 %v3760_v55  ;;  %1424 = vmatpush.bf16.msra.mxu3 %v2882_v18  ;;  %v3802_v18 = vpack.c.bf16 %v181_v7, %v175_v6  ;;  %v3806_v20 = vpack.c.bf16 %v112_v15, %v106_v14  ;;  %v3830_v7 = vpack.c.bf16 %v125_v57, %v119_v56 }
  0x5c   :  { %1282 = vmatpush.bf16.msrb.mxu1 %v3102_v19  ;;  %1210 = vmatpush.bf16.msrb.mxu0 %v3030_v23  ;;  %v3804_v19 = vpack.c.bf16 %v111_v9, %v105_v8  ;;  %v123_v23 = vld [vmem:[#allocation2 + $0xa0] sm:$0xff]  ;;  %v3850_v57 = vpack.c.bf16 %v147_v39, %v141_v38  ;;  %v2855_v38 = vld [vmem:[#allocation5 + $0xc8] sm:$0xf0] }
  0x5d   :  { %4670 = vst [vmem:[#allocation29_spill] sm:$0xff] %v3802_v18  ;;  %v3814_v34 = vpack.c.bf16 %v123_v23, %v117_v22 }
  0x5e   :  { %1352 = vmatpush.bf16.msra.mxu2 %v2810_v1  ;;  %v120_v1 = vld [vmem:[#allocation2 + $0x88] sm:$0xff]  ;;  %4674 = vst [vmem:[#allocation33_spill] sm:$0xff] %v3830_v7 }
  0x5f   :  { %1425 = vmatpush.bf16.msra.mxu3 %v2874_v3  ;;  %v3834_v14 = vpack.c.bf16 %v126_v2, %v120_v1 }
  0x60   :  { %1283 = vmatpush.bf16.msrb.mxu1 %v3094_v27  ;;  %1211 = vmatpush.bf16.msrb.mxu0 %v3022_v32  ;;  %v124_v27 = vld [vmem:[#allocation2 + $0xa8] sm:$0xff] }
  0x61   :  { %v108_v32 = vld [vmem:[#allocation2 + $0x28] sm:$0xff]  ;;  %v3818_v36 = vpack.c.bf16 %v124_v27, %v118_v24  ;;  %4675 = vst [vmem:[#allocation34_spill] sm:$0xff] %v3834_v14 }
  0x62   :  { %v3820_v37 = vpack.c.bf16 %v114_v33, %v108_v32  ;;  %1353 = vmatpush.bf16.msra.mxu2 %v2802_v41  ;;  %v131_v41 = vld [vmem:[#allocation2 + $0xe0] sm:$0xff] }
  0x63   :  { %1426 = vmatpush.bf16.msra.mxu3 %v2866_v46 }
  0x64   :  { %1284 = vmatpush.bf16.msrb.mxu1 %v3086_v43  ;;  %1212 = vmatpush.bf16.msrb.mxu0 %v3014_v44  ;;  %4673 = vst [vmem:[#allocation32_spill] sm:$0xff] %v3820_v37  ;;  %v427_v43 = vld [vmem:[#allocation7] sm:$0x3] }
  0x65   :  { %v129_v44 = vld [vmem:[#allocation2 + $0xd0] sm:$0xff]  ;;  %v3826_v3 = vperm.slane %v427_v43, 0  ;;  %v148_v43 = vld [vmem:[#allocation2 + $0x168] sm:$0xff] }
  0x66   :  { %v3828_v6 = vpack.c.bf16 %v135_v45, %v129_v44  ;;  %v132_v44 = vld [vmem:[#allocation2 + $0xe8] sm:$0xff]  ;;  %v138_v45 = vld [vmem:[#allocation2 + $0x118] sm:$0xff]  ;;  %v3854_v2 = vpack.c.bf16 %v148_v43, %v142_v40 }
  0x68   :  { %1285 = vmatpush.bf16.msrb.mxu1 %v3078_v51  ;;  %v130_v51 = vld [vmem:[#allocation2 + $0xd8] sm:$0xff] }
  0x69   :  { %936 = vmatmul.bf16.gmra.mxu0 %v3766_v10  ;;  %971 = vmatmul.bf16.gmra.mxu2 %v3768_v11  ;;  %v3832_v9 = vpack.c.bf16 %v136_v58, %v130_v51  ;;  %v3852_v58 = vpack.c.bf16 %v137_v42, %v131_v41 }
  0x6a   :  { %1044 = vmatmul.bf16.gmra.mxu3 %v3770_v12 }
  0x6b   :  { %1009 = vmatmul.bf16.gmra.mxu1 %v3772_v13  ;;  %4676 = vst [vmem:[#allocation35_spill] sm:$0xff] %v3852_v58 }
  0x79   :  { %941 = vmatmul.bf16.gmra.mxu0 %v3778_v59  ;;  %976 = vmatmul.bf16.gmra.mxu2 %v3780_v60 }
  0x7a   :  { %1049 = vmatmul.bf16.gmra.mxu3 %v3782_v61 }
  0x7b   :  { %1014 = vmatmul.bf16.gmra.mxu1 %v3784_v62 }
  0x89   :  { %946 = vmatmul.bf16.gmra.mxu0 %v3790_v47  ;;  %981 = vmatmul.bf16.gmra.mxu2 %v3792_v48  ;;  %v162_v48 = vld [vmem:[#allocation2 + $0x1d8] sm:$0xff] }
  0x8a   :  { %1054 = vmatmul.bf16.gmra.mxu3 %v3794_v49  ;;  %v156_v49 = vld [vmem:[#allocation2 + $0x1a8] sm:$0xff] }
  0x8b   :  { %1019 = vmatmul.bf16.gmra.mxu1 %v3796_v50  ;;  %v3904_v11 = vpack.c.bf16 %v162_v48, %v156_v49  ;;  %v2999_v50 = vld [vmem:[#allocation5 + $0x1e8] sm:$0xf0] }
  0x8d   :  { %4685 = vst [vmem:[#allocation44_spill] sm:$0xff] %v3904_v11 }
  0x99   :  { %951 = vmatmul.bf16.gmra.mxu0 %v3802_v18  ;;  %1067 = vmatmul.bf16.vlgmr.msrb.gmra.mxu2 %v3804_v19  ;;  %v3349_v18 = vld [vmem:[#allocation5 + $0x94] sm:$0xf] }
  0x9a   :  { %1140 = vmatmul.bf16.vlgmr.msrb.gmra.mxu3 %v3806_v20 }
  0x9b   :  { %1024 = vmatmul.bf16.gmra.mxu1 %v3808_v21 }
  0xa9   :  { %1072 = vmatmul.bf16.gmra.mxu2 %v3814_v34  ;;  %1213 = vmatmul.bf16.vlgmr.msrb.gmra.mxu0 %v3816_v35  ;;  %v2847_v35 = vld [vmem:[#allocation5 + $0xb8] sm:$0xf0] }
  0xaa   :  { %1145 = vmatmul.bf16.gmra.mxu3 %v3818_v36 }
  0xab   :  { %1286 = vmatmul.bf16.vlgmr.msrb.gmra.mxu1 %v3820_v37 }
  0xb6   :  { %v922_v8 = vpop.f32.mrf.mxu0 }
  0xb7   :  { %v923_v15 = vadd.f32 %v922_v8, %v3826_v3  ;;  %v3856_v8 = vpack.c.bf16 %v138_v45, %v132_v44 }
  0xb8   :  { %v995_v16 = vpop.f32.mrf.mxu1 }
  0xb9   :  { %v3837_v17 = vadd.f32 %v995_v16, %v923_v15  ;;  %1077 = vmatmul.bf16.gmra.mxu2 %v3828_v6  ;;  %1218 = vmatmul.bf16.gmra.mxu0 %v3830_v7  ;;  %4677 = vst [vmem:[#allocation36_spill] sm:$0xff] %v3856_v8 }
  0xba   :  { %1150 = vmatmul.bf16.gmra.mxu3 %v3832_v9 }
  0xbb   :  { %1291 = vmatmul.bf16.gmra.mxu1 %v3834_v14 }
  0xbc   :  { %v957_v22 = vpop.f32.mrf.mxu2 }
  0xbd   :  { %v958_v23 = vadd.f32 %v957_v22, %v3826_v3  ;;  %v1030_v24 = vpop.f32.mrf.mxu3 }
  0xbe   :  { %v924_v25 = vpop.f32.mrf.mxu0 }
  0xbf   :  { %v3844_v26 = vadd.f32 %v1030_v24, %v958_v23  ;;  %v925_v27 = vadd.f32 %v924_v25, %v3826_v3  ;;  %v3339_v23 = vld [vmem:[#allocation5 + $0x44] sm:$0xf]  ;;  %v2791_v24 = vld [vmem:[#allocation5 + $0x48] sm:$0xf0] }
  0xc0   :  { %v997_v32 = vpop.f32.mrf.mxu1  ;;  %v2794_v25 = vor.u32 %v3339_v23, %v2791_v24  ;;  %v149_v23 = vld [vmem:[#allocation2 + $0x170] sm:$0xff]  ;;  %v160_v24 = vld [vmem:[#allocation2 + $0x1c8] sm:$0xff] }
  0xc1   :  { %v3847_v33 = vadd.f32 %v997_v32, %v925_v27  ;;  %v3355_v32 = vld [vmem:[#allocation5 + $0xc4] sm:$0xf] }
  0xc2   :  { %1354 = vmatpush.bf16.msra.mxu2 %v2794_v25  ;;  %v2858_v39 = vor.u32 %v3355_v32, %v2855_v38  ;;  %v144_v25 = vld [vmem:[#allocation2 + $0x148] sm:$0xff]  ;;  %v150_v32 = vld [vmem:[#allocation2 + $0x178] sm:$0xff] }
  0xc4   :  { %v959_v46 = vpop.f32.mrf.mxu2  ;;  %1427 = vmatpush.bf16.msra.mxu3 %v2858_v39 }
  0xc5   :  { %v960_v51 = vadd.f32 %v959_v46, %v3826_v3  ;;  %v1032_v56 = vpop.f32.mrf.mxu3 }
  0xc6   :  { %v927_v1 = vpop.f32.mrf.mxu0 }
  0xc7   :  { %v3858_v15 = vadd.f32 %v1032_v56, %v960_v51  ;;  %v928_v16 = vadd.f32 %v927_v1, %v3826_v3  ;;  %v153_v56 = vld [vmem:[#allocation2 + $0x190] sm:$0xff]  ;;  %v159_v1 = vld [vmem:[#allocation2 + $0x1c0] sm:$0xff] }
  0xc8   :  { %v1000_v22 = vpop.f32.mrf.mxu1 }
  0xc9   :  { %v3861_v27 = vadd.f32 %v1000_v22, %v928_v16  ;;  %1082 = vmatmul.bf16.gmra.mxu2 %v3850_v57  ;;  %1223 = vmatmul.bf16.gmra.mxu0 %v3852_v58  ;;  %v154_v16 = vld [vmem:[#allocation2 + $0x198] sm:$0xff]  ;;  %v143_v22 = vld [vmem:[#allocation2 + $0x140] sm:$0xff] }
  0xca   :  { %1155 = vmatmul.bf16.gmra.mxu3 %v3854_v2 }
  0xcb   :  { %1296 = vmatmul.bf16.gmra.mxu1 %v3856_v8  ;;  %v3874_v8 = vpack.c.bf16 %v159_v1, %v153_v56 }
  0xcc   :  { %v962_v40 = vpop.f32.mrf.mxu2 }
  0xcd   :  { %v963_v41 = vadd.f32 %v962_v40, %v3826_v3  ;;  %v1035_v42 = vpop.f32.mrf.mxu3  ;;  %4678 = vst [vmem:[#allocation37_spill] sm:$0xff] %v3874_v8 }
  0xce   :  { %v929_v43 = vpop.f32.mrf.mxu0 }
  0xcf   :  { %v3868_v44 = vadd.f32 %v1035_v42, %v963_v41  ;;  %v930_v45 = vadd.f32 %v929_v43, %v3826_v3  ;;  %v3876_v41 = vpack.c.bf16 %v149_v23, %v143_v22  ;;  %v3878_v43 = vpack.c.bf16 %v160_v24, %v154_v16 }
  0xd0   :  { %v1002_v46 = vpop.f32.mrf.mxu1 }
  0xd1   :  { %v3871_v51 = vadd.f32 %v1002_v46, %v930_v45  ;;  %4679 = vst [vmem:[#allocation38_spill] sm:$0xff] %v3876_v41  ;;  %v3880_v45 = vpack.c.bf16 %v150_v32, %v144_v25 }
  0xd2   :  { %4680 = vst [vmem:[#allocation39_spill] sm:$0xff] %v3878_v43 }
  0xd3   :  { %4681 = vst [vmem:[#allocation40_spill] sm:$0xff] %v3880_v45 }
  0xd4   :  { %v964_v38 = vpop.f32.mrf.mxu2 }
  0xd5   :  { %v965_v40 = vadd.f32 %v964_v38, %v3826_v3  ;;  %v1037_v39 = vpop.f32.mrf.mxu3  ;;  %v166_v38 = vld [vmem:[#allocation2 + $0x1f8] sm:$0xff] }
  0xd6   :  { %v932_v42 = vpop.f32.mrf.mxu0 }
  0xd7   :  { %v3882_v46 = vadd.f32 %v1037_v39, %v965_v40  ;;  %v933_v58 = vadd.f32 %v932_v42, %v3826_v3  ;;  %v3337_v40 = vld [vmem:[#allocation5 + $0x34] sm:$0xf]  ;;  %v2783_v39 = vld [vmem:[#allocation5 + $0x38] sm:$0xf0] }
  0xd8   :  { %v1005_v14 = vpop.f32.mrf.mxu1  ;;  %v3353_v42 = vld [vmem:[#allocation5 + $0xb4] sm:$0xf]  ;;  %v2786_v37 = vor.u32 %v3337_v40, %v2783_v39 }
  0xd9   :  { %v3885_v7 = vadd.f32 %v1005_v14, %v933_v58  ;;  %1087 = vmatmul.bf16.gmra.mxu2 %v3874_v8  ;;  %1228 = vmatmul.bf16.gmra.mxu0 %v3876_v41  ;;  %v165_v14 = vld [vmem:[#allocation2 + $0x1f0] sm:$0xff]  ;;  %v171_v58 = vld [vmem:[#allocation2 + $0x220] sm:$0xff] }
  0xda   :  { %1160 = vmatmul.bf16.gmra.mxu3 %v3878_v43  ;;  %v155_v41 = vld [vmem:[#allocation2 + $0x1a0] sm:$0xff]  ;;  %1355 = vmatpush.bf16.msra.mxu2 %v2786_v37  ;;  %v3898_v60 = vpack.c.bf16 %v171_v58, %v165_v14 }
  0xdb   :  { %1301 = vmatmul.bf16.gmra.mxu1 %v3880_v45  ;;  %v161_v45 = vld [vmem:[#allocation2 + $0x1d0] sm:$0xff] }
  0xdc   :  { %v967_v56 = vpop.f32.mrf.mxu2  ;;  %4682 = vst [vmem:[#allocation41_spill] sm:$0xff] %v3898_v60 }
  0xdd   :  { %v968_v1 = vadd.f32 %v967_v56, %v3826_v3  ;;  %v1040_v16 = vpop.f32.mrf.mxu3  ;;  %v172_v56 = vld [vmem:[#allocation2 + $0x228] sm:$0xff] }
  0xde   :  { %v934_v22 = vpop.f32.mrf.mxu0  ;;  %v3902_v12 = vpack.c.bf16 %v172_v56, %v166_v38  ;;  %v177_v38 = vld [vmem:[#allocation2 + $0x250] sm:$0xff]  ;;  %v183_v56 = vld [vmem:[#allocation2 + $0x280] sm:$0xff] }
  0xdf   :  { %v3892_v23 = vadd.f32 %v1040_v16, %v968_v1  ;;  %v935_v24 = vadd.f32 %v934_v22, %v3826_v3  ;;  %v2850_v1 = vor.u32 %v3353_v42, %v2847_v35  ;;  %v3922_v54 = vpack.c.bf16 %v183_v56, %v177_v38  ;;  %v2775_v38 = vld [vmem:[#allocation5 + $0x28] sm:$0xf0] }
  0xe0   :  { %v1007_v25 = vpop.f32.mrf.mxu1  ;;  %4684 = vst [vmem:[#allocation43_spill] sm:$0xff] %v3902_v12 }
  0xe1   :  { %v3895_v32 = vadd.f32 %v1007_v25, %v935_v24  ;;  %v3900_v24 = vpack.c.bf16 %v161_v45, %v155_v41  ;;  %1428 = vmatpush.bf16.msra.mxu3 %v2850_v1  ;;  %v178_v1 = vld [vmem:[#allocation2 + $0x258] sm:$0xff]  ;;  %4687 = vst [vmem:[#allocation46_spill] sm:$0xff] %v3922_v54 }
  0xe3   :  { %4683 = vst [vmem:[#allocation42_spill] sm:$0xff] %v3900_v24 }
  0xe4   :  { %v969_v16 = vpop.f32.mrf.mxu2 }
  0xe5   :  { %v970_v22 = vadd.f32 %v969_v16, %v3826_v3  ;;  %v1042_v61 = vpop.f32.mrf.mxu3  ;;  %v167_v16 = vld [vmem:[#allocation2 + $0x200] sm:$0xff] }
  0xe6   :  { %v937_v25 = vpop.f32.mrf.mxu0 }
  0xe7   :  { %v3906_v40 = vadd.f32 %v1042_v61, %v970_v22  ;;  %v938_v39 = vadd.f32 %v937_v25, %v3826_v3  ;;  %v173_v22 = vld [vmem:[#allocation2 + $0x230] sm:$0xff]  ;;  %v184_v25 = vld [vmem:[#allocation2 + $0x288] sm:$0xff] }
  0xe8   :  { %v1010_v35 = vpop.f32.mrf.mxu1 }
  0xe9   :  { %v3909_v42 = vadd.f32 %v1010_v35, %v938_v39  ;;  %1092 = vmatmul.bf16.gmra.mxu2 %v3898_v60  ;;  %1233 = vmatmul.bf16.gmra.mxu0 %v3900_v24  ;;  %v168_v39 = vld [vmem:[#allocation2 + $0x208] sm:$0xff]  ;;  %v174_v35 = vld [vmem:[#allocation2 + $0x238] sm:$0xff] }
  0xea   :  { %1165 = vmatmul.bf16.gmra.mxu3 %v3902_v12 }
  0xeb   :  { %1306 = vmatmul.bf16.gmra.mxu1 %v3904_v11 }
  0xec   :  { %v972_v37 = vpop.f32.mrf.mxu2 }
  0xed   :  { %v973_v41 = vadd.f32 %v972_v37, %v3826_v3  ;;  %v1045_v48 = vpop.f32.mrf.mxu3 }
  0xee   :  { %v939_v49 = vpop.f32.mrf.mxu0 }
  0xef   :  { %v3916_v61 = vadd.f32 %v1045_v48, %v973_v41  ;;  %v940_v45 = vadd.f32 %v939_v49, %v3826_v3  ;;  %v3924_v41 = vpack.c.bf16 %v173_v22, %v167_v16  ;;  %v3926_v49 = vpack.c.bf16 %v184_v25, %v178_v1 }
  0xf0   :  { %v1012_v14 = vpop.f32.mrf.mxu1 }
  0xf1   :  { %4686 = vst [vmem:[#allocation45_spill] sm:$0xff] %v3916_v61  ;;  %v3919_v58 = vadd.f32 %v1012_v14, %v940_v45  ;;  %v3928_v45 = vpack.c.bf16 %v174_v35, %v168_v39  ;;  %v3351_v39 = vld [vmem:[#allocation5 + $0xa4] sm:$0xf]  ;;  %v2839_v35 = vld [vmem:[#allocation5 + $0xa8] sm:$0xf0] }
  0xf2   :  { %4688 = vst [vmem:[#allocation47_spill] sm:$0xff] %v3924_v41  ;;  %v2831_v61 = vld [vmem:[#allocation5 + $0x98] sm:$0xf0] }
  0xf3   :  { %4689 = vst [vmem:[#allocation48_spill] sm:$0xff] %v3926_v49 }
  0xf4   :  { %v974_v11 = vpop.f32.mrf.mxu2  ;;  %4690 = vst [vmem:[#allocation49_spill] sm:$0xff] %v3928_v45 }
  0xf5   :  { %v975_v37 = vadd.f32 %v974_v11, %v3826_v3  ;;  %v1047_v24 = vpop.f32.mrf.mxu3  ;;  %v3335_v11 = vld [vmem:[#allocation5 + $0x24] sm:$0xf] }
  0xf6   :  { %v942_v48 = vpop.f32.mrf.mxu0  ;;  %v2778_v56 = vor.u32 %v3335_v11, %v2775_v38  ;;  %v179_v11 = vld [vmem:[#allocation2 + $0x260] sm:$0xff]  ;;  %v185_v38 = vld [vmem:[#allocation2 + $0x290] sm:$0xff] }
  0xf7   :  { %v3930_v14 = vadd.f32 %v1047_v24, %v975_v37  ;;  %v943_v53 = vadd.f32 %v942_v48, %v3826_v3  ;;  %v2842_v37 = vor.u32 %v3351_v39, %v2839_v35  ;;  %v3948_v0 = vpack.c.bf16 %v185_v38, %v179_v11 }
  0xf8   :  { %v1015_v30 = vpop.f32.mrf.mxu1  ;;  %1356 = vmatpush.bf16.msra.mxu2 %v2778_v56  ;;  %v186_v56 = vld [vmem:[#allocation2 + $0x298] sm:$0xff] }
  0xf9   :  { %4691 = vst [vmem:[#allocation50_spill] sm:$0xff] %v3930_v14  ;;  %v3933_v29 = vadd.f32 %v1015_v30, %v943_v53  ;;  %1097 = vmatmul.bf16.gmra.mxu2 %v3922_v54  ;;  %1238 = vmatmul.bf16.gmra.mxu0 %v3924_v41  ;;  %v195_v41 = vld [vmem:[#allocation2 + $0x2e0] sm:$0xff] }
  0xfa   :  { %1170 = vmatmul.bf16.gmra.mxu3 %v3926_v49  ;;  %v190_v49 = vld [vmem:[#allocation2 + $0x2b8] sm:$0xff]  ;;  %4694 = vst [vmem:[#allocation53_spill] sm:$0xff] %v3948_v0 }
  0xfb   :  { %1311 = vmatmul.bf16.gmra.mxu1 %v3928_v45  ;;  %v189_v45 = vld [vmem:[#allocation2 + $0x2b0] sm:$0xff]  ;;  %1429 = vmatpush.bf16.msra.mxu3 %v2842_v37 }
  0xfc   :  { %v977_v1 = vpop.f32.mrf.mxu2 }
  0xfd   :  { %v978_v24 = vadd.f32 %v977_v1, %v3826_v3  ;;  %v1050_v16 = vpop.f32.mrf.mxu3  ;;  %v196_v1 = vld [vmem:[#allocation2 + $0x2e8] sm:$0xff] }
  0xfe   :  { %v944_v22 = vpop.f32.mrf.mxu0 }
  0xff   :  { %v3940_v25 = vadd.f32 %v1050_v16, %v978_v24  ;;  %v945_v30 = vadd.f32 %v944_v22, %v3826_v3  ;;  %v3946_v22 = vpack.c.bf16 %v195_v41, %v189_v45 }
 0x100   :  { %v1017_v53 = vpop.f32.mrf.mxu1 }
 0x101   :  { %4692 = vst [vmem:[#allocation51_spill] sm:$0xff] %v3940_v25  ;;  %v3943_v48 = vadd.f32 %v1017_v53, %v945_v30  ;;  %v3950_v30 = vpack.c.bf16 %v196_v1, %v190_v49  ;;  %v3952_v53 = vpack.c.bf16 %v186_v56, %v180_v4  ;;  %v2943_v1 = vld [vmem:[#allocation5 + $0x178] sm:$0xf0]  ;;  %v3393_v56 = vld [vmem:[#allocation5 + $0x1f4] sm:$0xf] }
 0x102   :  { %4693 = vst [vmem:[#allocation52_spill] sm:$0xff] %v3946_v22 }
 0x103   :  { %4695 = vst [vmem:[#allocation54_spill] sm:$0xff] %v3950_v30 }
 0x104   :  { %v979_v54 = vpop.f32.mrf.mxu2  ;;  %4696 = vst [vmem:[#allocation55_spill] sm:$0xff] %v3952_v53 }
 0x105   :  { %v980_v24 = vadd.f32 %v979_v54, %v3826_v3  ;;  %v1052_v16 = vpop.f32.mrf.mxu3 }
 0x106   :  { %v947_v39 = vpop.f32.mrf.mxu0 }
 0x107   :  { %v3954_v35 = vadd.f32 %v1052_v16, %v980_v24  ;;  %v948_v37 = vadd.f32 %v947_v39, %v3826_v3  ;;  %v3007_v16 = vld [vmem:[#allocation5 + $0x1f8] sm:$0xf0] }
 0x108   :  { %v1020_v25 = vpop.f32.mrf.mxu1 }
 0x109   :  { %4697 = vst [vmem:[#allocation56_spill] sm:$0xff] %v3954_v35  ;;  %v3957_v12 = vadd.f32 %v1020_v25, %v948_v37  ;;  %1102 = vmatmul.bf16.gmra.mxu2 %v3946_v22  ;;  %1243 = vmatmul.bf16.gmra.mxu0 %v3948_v0  ;;  %v3377_v25 = vld [vmem:[#allocation5 + $0x174] sm:$0xf]  ;;  %v201_v37 = vld [vmem:[#allocation2 + $0x310] sm:$0xff]  ;;  %v208_v35 = vld [vmem:[#allocation2 + $0x348] sm:$0xff] }
 0x10a   :  { %1175 = vmatmul.bf16.gmra.mxu3 %v3950_v30  ;;  %v2946_v24 = vor.u32 %v3377_v25, %v2943_v1  ;;  %v207_v0 = vld [vmem:[#allocation2 + $0x340] sm:$0xff]  ;;  %v202_v30 = vld [vmem:[#allocation2 + $0x318] sm:$0xff] }
 0x10b   :  { %1316 = vmatmul.bf16.gmra.mxu1 %v3952_v53  ;;  %v3010_v53 = vor.u32 %v3393_v56, %v3007_v16  ;;  %v191_v22 = vld [vmem:[#allocation2 + $0x2c0] sm:$0xff]  ;;  %v3969_v21 = vpack.c.bf16 %v207_v0, %v201_v37  ;;  %v2834_v0 = vor.u32 %v3349_v18, %v2831_v61  ;;  %v214_v18 = vld [vmem:[#allocation2 + $0x378] sm:$0xff] }
 0x10c   :  { %v982_v54 = vpop.f32.mrf.mxu2  ;;  %1497 = vmatpush.bf16.msra.mxu0 %v2946_v24  ;;  %v3333_v16 = vld [vmem:[#allocation5 + $0x14] sm:$0xf]  ;;  %v2767_v24 = vld [vmem:[#allocation5 + $0x18] sm:$0xf0] }
 0x10d   :  { %v983_v41 = vadd.f32 %v982_v54, %v3826_v3  ;;  %v1055_v4 = vpop.f32.mrf.mxu3  ;;  %v197_v54 = vld [vmem:[#allocation2 + $0x2f0] sm:$0xff]  ;;  %1570 = vmatpush.bf16.msra.mxu1 %v3010_v53  ;;  %4699 = vst [vmem:[#allocation58_spill] sm:$0xff] %v3969_v21  ;;  %v2770_v14 = vor.u32 %v3333_v16, %v2767_v24  ;;  %1430 = vmatpush.bf16.msra.mxu3 %v2834_v0  ;;  %v203_v61 = vld [vmem:[#allocation2 + $0x320] sm:$0xff]  ;;  %v204_v16 = vld [vmem:[#allocation2 + $0x328] sm:$0xff] }
 0x10e   :  { %v949_v49 = vpop.f32.mrf.mxu0  ;;  %v3971_v60 = vpack.c.bf16 %v197_v54, %v191_v22 }
 0x10f   :  { %v3964_v45 = vadd.f32 %v1055_v4, %v983_v41  ;;  %v950_v11 = vadd.f32 %v949_v49, %v3826_v3  ;;  %v192_v41 = vld [vmem:[#allocation2 + $0x2c8] sm:$0xff]  ;;  %v198_v4 = vld [vmem:[#allocation2 + $0x2f8] sm:$0xff]  ;;  %1357 = vmatpush.bf16.msra.mxu2 %v2770_v14 }
 0x110   :  { %v1022_v38 = vpop.f32.mrf.mxu1  ;;  %4700 = vst [vmem:[#allocation59_spill] sm:$0xff] %v3971_v60  ;;  %v210_v14 = vld [vmem:[#allocation2 + $0x358] sm:$0xff] }
 0x111   :  { %4698 = vst [vmem:[#allocation57_spill] sm:$0xff] %v3964_v45  ;;  %v3967_v39 = vadd.f32 %v1022_v38, %v950_v11  ;;  %v3973_v11 = vpack.c.bf16 %v208_v35, %v202_v30  ;;  %v3975_v38 = vpack.c.bf16 %v198_v4, %v192_v41 }
 0x113   :  { %4701 = vst [vmem:[#allocation60_spill] sm:$0xff] %v3973_v11 }
 0x114   :  { %v984_v49 = vpop.f32.mrf.mxu2  ;;  %4702 = vst [vmem:[#allocation61_spill] sm:$0xff] %v3975_v38 }
 0x115   :  { %v1057_v45 = vpop.f32.mrf.mxu3  ;;  %v213_v49 = vld [vmem:[#allocation2 + $0x370] sm:$0xff] }
 0x116   :  { %v952_v25 = vpop.f32.mrf.mxu0 }
 0x117   :  { %v953_v1 = vadd.f32 %v952_v25, %v3826_v3  ;;  %v219_v25 = vld [vmem:[#allocation2 + $0x3a0] sm:$0xff] }
 0x118   :  { %v1025_v56 = vpop.f32.mrf.mxu1 }
 0x119   :  { %v3978_v53 = vadd.f32 %v1025_v56, %v953_v1  ;;  %1107 = vmatmul.bf16.gmra.mxu2 %v3969_v21  ;;  %1248 = vmatmul.bf16.gmra.mxu0 %v3971_v60  ;;  %v209_v1 = vld [vmem:[#allocation2 + $0x350] sm:$0xff]  ;;  %v220_v56 = vld [vmem:[#allocation2 + $0x3a8] sm:$0xff] }
 0x11a   :  { %1180 = vmatmul.bf16.gmra.mxu3 %v3973_v11  ;;  %v3375_v60 = vld [vmem:[#allocation5 + $0x164] sm:$0xf]  ;;  %v2935_v11 = vld [vmem:[#allocation5 + $0x168] sm:$0xf0] }
 0x11b   :  { %1321 = vmatmul.bf16.gmra.mxu1 %v3975_v38  ;;  %v3391_v21 = vld [vmem:[#allocation5 + $0x1e4] sm:$0xf]  ;;  %v2938_v43 = vor.u32 %v3375_v60, %v2935_v11 }
 0x11c   :  { %v1068_v22 = vpop.f32.mrf.mxu2 }
 0x11d   :  { %v1069_v30 = vadd.f32 %v1068_v22, %v3837_v17  ;;  %v1141_v35 = vpop.f32.mrf.mxu3  ;;  %v3989_v22 = vpack.c.bf16 %v219_v25, %v213_v49  ;;  %1498 = vmatpush.bf16.msra.mxu0 %v2938_v43  ;;  %v216_v43 = vld [vmem:[#allocation2 + $0x388] sm:$0xff] }
 0x11e   :  { %v954_v45 = vpop.f32.mrf.mxu0 }
 0x11f   :  { %v1142_v37 = vadd.f32 %v1141_v35, %v1069_v30  ;;  %v955_v54 = vadd.f32 %v954_v45, %v3826_v3  ;;  %v3991_v30 = vpack.c.bf16 %v209_v1, %v203_v61  ;;  %v3993_v35 = vpack.c.bf16 %v220_v56, %v214_v18  ;;  %v2759_v1 = vld [vmem:[#allocation5 + $0x8] sm:$0xf0]  ;;  %v225_v56 = vld [vmem:[#allocation2 + $0x3d0] sm:$0xff] }
 0x120   :  { %v1027_v41 = vpop.f32.mrf.mxu1  ;;  %v3995_v45 = vpack.c.bf16 %v210_v14, %v204_v16  ;;  %v231_v16 = vld [vmem:[#allocation2 + $0x400] sm:$0xff] }
 0x121   :  { %v3986_v4 = vadd.f32 %v1027_v41, %v955_v54  ;;  %4703 = vst [vmem:[#allocation62_spill] sm:$0xff] %v3991_v30 }
 0x122   :  { %4704 = vst [vmem:[#allocation63_spill] sm:$0xff] %v3993_v35 }
 0x123   :  { %4705 = vst [vmem:[#allocation64_spill] sm:$0xff] %v3995_v45 }
 0x124   :  { %v1070_v24 = vpop.f32.mrf.mxu2 }
 0x125   :  { %v1071_v0 = vadd.f32 %v1070_v24, %v3847_v33  ;;  %v1143_v17 = vpop.f32.mrf.mxu3  ;;  %v3002_v33 = vor.u32 %v3391_v21, %v2999_v50  ;;  %v226_v21 = vld [vmem:[#allocation2 + $0x3d8] sm:$0xff]  ;;  %v232_v24 = vld [vmem:[#allocation2 + $0x408] sm:$0xff] }
 0x126   :  { %v1214_v3 = vpop.f32.mrf.mxu0 }
 0x127   :  { %v1144_v54 = vadd.f32 %v1143_v17, %v1071_v0  ;;  %v1215_v41 = vadd.f32 %v1214_v3, %v1142_v37  ;;  %1571 = vmatpush.bf16.msra.mxu1 %v3002_v33  ;;  %v215_v0 = vld [vmem:[#allocation2 + $0x380] sm:$0xff]  ;;  %v221_v17 = vld [vmem:[#allocation2 + $0x3b0] sm:$0xff]  ;;  %v222_v3 = vld [vmem:[#allocation2 + $0x3b8] sm:$0xff] }
 0x128   :  { %v1287_v38 = vpop.f32.mrf.mxu1  ;;  %v3347_v33 = vld [vmem:[#allocation5 + $0x84] sm:$0xf] }
 0x129   :  { %v1288_v8 = vadd.f32 %v1287_v38, %v1215_v41  ;;  %1112 = vmatmul.bf16.gmra.mxu2 %v3989_v22  ;;  %1253 = vmatmul.bf16.gmra.mxu0 %v3991_v30  ;;  %v3331_v38 = vld [vmem:[#allocation5 + $0x4] sm:$0xf]  ;;  %v4011_v30 = vpack.c.bf16 %v222_v3, %v216_v43  ;;  %v2927_v43 = vld [vmem:[#allocation5 + $0x158] sm:$0xf0] }
 0x12a   :  { %1185 = vmatmul.bf16.gmra.mxu3 %v3993_v35  ;;  %v2762_v14 = vor.u32 %v3331_v38, %v2759_v1  ;;  %v4005_v38 = vpack.c.bf16 %v231_v16, %v225_v56  ;;  %v4009_v1 = vpack.c.bf16 %v232_v24, %v226_v21 }
 0x12b   :  { %1326 = vmatmul.bf16.gmra.mxu1 %v3995_v45  ;;  %v1789_v41 = vmax.f32 %v1288_v8, 0.0  ;;  %4709 = vst [vmem:[#allocation68_spill] sm:$0xff] %v4011_v30 }
 0x12c   :  { %v1073_v49 = vpop.f32.mrf.mxu2  ;;  %1358 = vmatpush.bf16.msra.mxu2 %v2762_v14  ;;  %4708 = vst [vmem:[#allocation67_spill] sm:$0xff] %v4009_v1 }
 0x12d   :  { %v1074_v37 = vadd.f32 %v1073_v49, %v3861_v27  ;;  %v1146_v25 = vpop.f32.mrf.mxu3  ;;  %v2823_v49 = vld [vmem:[#allocation5 + $0x88] sm:$0xf0] }
 0x12e   :  { %v1216_v18 = vpop.f32.mrf.mxu0 }
 0x12f   :  { %v1147_v61 = vadd.f32 %v1146_v25, %v1074_v37  ;;  %v1217_v60 = vadd.f32 %v1216_v18, %v1144_v54  ;;  %v2826_v54 = vor.u32 %v3347_v33, %v2823_v49  ;;  %v227_v33 = vld [vmem:[#allocation2 + $0x3e0] sm:$0xff] }
 0x130   :  { %v1289_v11 = vpop.f32.mrf.mxu1 }
 0x131   :  { %v1290_v50 = vadd.f32 %v1289_v11, %v1217_v60  ;;  %v4007_v60 = vpack.c.bf16 %v221_v17, %v215_v0  ;;  %1431 = vmatpush.bf16.msra.mxu3 %v2826_v54  ;;  %v3389_v54 = vld [vmem:[#allocation5 + $0x1d4] sm:$0xf] }
 0x133   :  { %v1791_v27 = vmax.f32 %v1290_v50, 0.0  ;;  %4707 = vst [vmem:[#allocation66_spill] sm:$0xff] %v4007_v60 }
 0x134   :  { %v1075_v37 = vpop.f32.mrf.mxu2 }
 0x135   :  { %v4002_v25 = vpack.c.bf16 %v1791_v27, %v1789_v41  ;;  %v1076_v18 = vadd.f32 %v1075_v37, %v3871_v51  ;;  %v1148_v45 = vpop.f32.mrf.mxu3  ;;  %v243_v41 = vld [vmem:[#allocation2 + $0x460] sm:$0xff]  ;;  %v238_v27 = vld [vmem:[#allocation2 + $0x438] sm:$0xff]  ;;  %v233_v37 = vld [vmem:[#allocation2 + $0x410] sm:$0xff] }
 0x136   :  { %v1219_v11 = vpop.f32.mrf.mxu0 }
 0x137   :  { %4706 = vst [vmem:[#allocation65_spill] sm:$0xff] %v4002_v25  ;;  %v1149_v8 = vadd.f32 %v1148_v45, %v1076_v18  ;;  %v1220_v14 = vadd.f32 %v1219_v11, %v1147_v61  ;;  %v237_v45 = vld [vmem:[#allocation2 + $0x430] sm:$0xff]  ;;  %v3373_v61 = vld [vmem:[#allocation5 + $0x154] sm:$0xf]  ;;  %v2991_v18 = vld [vmem:[#allocation5 + $0x1d8] sm:$0xf0] }
 0x138   :  { %v1292_v50 = vpop.f32.mrf.mxu1  ;;  %v2930_v49 = vor.u32 %v3373_v61, %v2927_v43 }
 0x139   :  { %v1293_v35 = vadd.f32 %v1292_v50, %v1220_v14  ;;  %1117 = vmatmul.bf16.gmra.mxu2 %v4005_v38  ;;  %1258 = vmatmul.bf16.gmra.mxu0 %v4007_v60  ;;  %v244_v50 = vld [vmem:[#allocation2 + $0x468] sm:$0xff]  ;;  %v4021_v60 = vpack.c.bf16 %v233_v37, %v227_v33 }
 0x13a   :  { %1190 = vmatmul.bf16.gmra.mxu3 %v4009_v1  ;;  %1499 = vmatpush.bf16.msra.mxu0 %v2930_v49  ;;  %v3387_v49 = vld [vmem:[#allocation5 + $0x1c4] sm:$0xf]  ;;  %v2975_v37 = vld [vmem:[#allocation5 + $0x1b8] sm:$0xf0] }
 0x13b   :  { %1331 = vmatmul.bf16.gmra.mxu1 %v4011_v30  ;;  %v1793_v11 = vmax.f32 %v1293_v35, 0.0  ;;  %v2919_v30 = vld [vmem:[#allocation5 + $0x148] sm:$0xf0]  ;;  %4710 = vst [vmem:[#allocation69_spill] sm:$0xff] %v4021_v60 }
 0x13c   :  { %v1078_v51 = vpop.f32.mrf.mxu2 }
 0x13d   :  { %v1079_v56 = vadd.f32 %v1078_v51, %v3885_v7  ;;  %v1151_v16 = vpop.f32.mrf.mxu3  ;;  %v228_v7 = vld [vmem:[#allocation2 + $0x3e8] sm:$0xff]  ;;  %v234_v51 = vld [vmem:[#allocation2 + $0x418] sm:$0xff] }
 0x13e   :  { %v1221_v21 = vpop.f32.mrf.mxu0  ;;  %v4027_v25 = vpack.c.bf16 %v234_v51, %v228_v7  ;;  %v3425_v51 = vld [vmem:[#allocation5 + $0x2f4] sm:$0xf] }
 0x13f   :  { %v1152_v24 = vadd.f32 %v1151_v16, %v1079_v56  ;;  %v1222_v0 = vadd.f32 %v1221_v21, %v1149_v8  ;;  %v2994_v56 = vor.u32 %v3389_v54, %v2991_v18  ;;  %v4018_v16 = vpack.c.bf16 %v243_v41, %v237_v45  ;;  %v3371_v21 = vld [vmem:[#allocation5 + $0x144] sm:$0xf]  ;;  %v2983_v54 = vld [vmem:[#allocation5 + $0x1c8] sm:$0xf0] }
 0x140   :  { %v1294_v17 = vpop.f32.mrf.mxu1  ;;  %v2922_v61 = vor.u32 %v3371_v21, %v2919_v30  ;;  %4711 = vst [vmem:[#allocation70_spill] sm:$0xff] %v4027_v25  ;;  %v2986_v1 = vor.u32 %v3387_v49, %v2983_v54  ;;  %v3367_v21 = vld [vmem:[#allocation5 + $0x124] sm:$0xf] }
 0x141   :  { %v1295_v3 = vadd.f32 %v1294_v17, %v1222_v0  ;;  %1572 = vmatpush.bf16.msra.mxu1 %v2994_v56  ;;  %v3135_v56 = vld [vmem:[#allocation5 + $0x2f8] sm:$0xf0] }
 0x142   :  { %1500 = vmatpush.bf16.msra.mxu0 %v2922_v61  ;;  %v3138_v61 = vor.u32 %v3425_v51, %v3135_v56  ;;  %v245_v51 = vld [vmem:[#allocation2 + $0x470] sm:$0xff]  ;;  %v3381_v56 = vld [vmem:[#allocation5 + $0x194] sm:$0xf] }
 0x143   :  { %v1795_v14 = vmax.f32 %v1295_v3, 0.0  ;;  %v4025_v3 = vpack.c.bf16 %v244_v50, %v238_v27  ;;  %v3385_v27 = vld [vmem:[#allocation5 + $0x1b4] sm:$0xf] }
 0x144   :  { %v1080_v8 = vpop.f32.mrf.mxu2  ;;  %1716 = vmatpush.bf16.msrb.mxu3 %v3138_v61  ;;  %v3363_v61 = vld [vmem:[#allocation5 + $0x104] sm:$0xf] }
 0x145   :  { %v1081_v0 = vadd.f32 %v1080_v8, %v3895_v32  ;;  %v1153_v17 = vpop.f32.mrf.mxu3  ;;  %v4023_v43 = vpack.c.bf16 %v1795_v14, %v1793_v11  ;;  %v3369_v32 = vld [vmem:[#allocation5 + $0x134] sm:$0xf]  ;;  %v2911_v8 = vld [vmem:[#allocation5 + $0x138] sm:$0xf0]  ;;  %1573 = vmatpush.bf16.msra.mxu1 %v2986_v1  ;;  %v2978_v14 = vor.u32 %v3385_v27, %v2975_v37 }
 0x146   :  { %v1224_v35 = vpop.f32.mrf.mxu0  ;;  %v2914_v30 = vor.u32 %v3369_v32, %v2911_v8  ;;  %v3409_v11 = vld [vmem:[#allocation5 + $0x274] sm:$0xf]  ;;  %v2895_v37 = vld [vmem:[#allocation5 + $0x118] sm:$0xf0] }
 0x147   :  { %v1154_v45 = vadd.f32 %v1153_v17, %v1081_v0  ;;  %v1225_v41 = vadd.f32 %v1224_v35, %v1152_v24  ;;  %v3071_v24 = vld [vmem:[#allocation5 + $0x278] sm:$0xf0]  ;;  %v2903_v35 = vld [vmem:[#allocation5 + $0x128] sm:$0xf0]  ;;  %v3365_v27 = vld [vmem:[#allocation5 + $0x114] sm:$0xf] }
 0x148   :  { %v1297_v18 = vpop.f32.mrf.mxu1  ;;  %1501 = vmatpush.bf16.msra.mxu0 %v2914_v30  ;;  %v3074_v7 = vor.u32 %v3409_v11, %v3071_v24  ;;  %v2906_v54 = vor.u32 %v3367_v21, %v2903_v35  ;;  %v249_v24 = vld [vmem:[#allocation2 + $0x490] sm:$0xff]  ;;  %v250_v35 = vld [vmem:[#allocation2 + $0x498] sm:$0xff] }
 0x149   :  { %v1298_v33 = vadd.f32 %v1297_v18, %v1225_v41  ;;  %1122 = vmatmul.bf16.gmra.mxu2 %v4018_v16  ;;  %1263 = vmatmul.bf16.gmra.mxu0 %v4021_v60  ;;  %v3383_v41 = vld [vmem:[#allocation5 + $0x1a4] sm:$0xf]  ;;  %v2967_v18 = vld [vmem:[#allocation5 + $0x1a8] sm:$0xf0]  ;;  %v240_v60 = vld [vmem:[#allocation2 + $0x448] sm:$0xff] }
 0x14a   :  { %1195 = vmatmul.bf16.gmra.mxu3 %v4025_v3  ;;  %1643 = vmatpush.bf16.msrb.mxu2 %v3074_v7  ;;  %v2970_v30 = vor.u32 %v3383_v41, %v2967_v18 }
 0x14b   :  { %1336 = vmatmul.bf16.gmra.mxu1 %v4027_v25  ;;  %v2959_v25 = vld [vmem:[#allocation5 + $0x198] sm:$0xf0]  ;;  %v1797_v7 = vmax.f32 %v1298_v33, 0.0 }
 0x14c   :  { %v1083_v50 = vpop.f32.mrf.mxu2  ;;  %1574 = vmatpush.bf16.msra.mxu1 %v2978_v14  ;;  %1502 = vmatpush.bf16.msra.mxu0 %v2906_v54  ;;  %v4034_v14 = vpack.c.bf16 %v249_v24, %v249_v24 }
 0x14d   :  { %v1084_v0 = vadd.f32 %v1083_v50, %v3909_v42  ;;  %v1156_v17 = vpop.f32.mrf.mxu3  ;;  %v239_v42 = vld [vmem:[#allocation2 + $0x440] sm:$0xff]  ;;  %v2898_v50 = vor.u32 %v3365_v27, %v2895_v37  ;;  %v4041_v27 = vpack.c.bf16 %v250_v35, %v250_v35 }
 0x14e   :  { %v1226_v49 = vpop.f32.mrf.mxu0  ;;  %v4037_v18 = vpack.c.bf16 %v245_v51, %v239_v42 }
 0x14f   :  { %v1157_v1 = vadd.f32 %v1156_v17, %v1084_v0  ;;  %v1227_v32 = vadd.f32 %v1226_v49, %v1154_v45  ;;  %v246_v0 = vld [vmem:[#allocation2 + $0x478] sm:$0xff]  ;;  %v2962_v45 = vor.u32 %v3381_v56, %v2959_v25  ;;  %v3379_v25 = vld [vmem:[#allocation5 + $0x184] sm:$0xf] }
 0x150   :  { %v1299_v8 = vpop.f32.mrf.mxu1  ;;  %1575 = vmatpush.bf16.msra.mxu1 %v2970_v30  ;;  %1503 = vmatpush.bf16.msra.mxu0 %v2898_v50  ;;  %v2887_v49 = vld [vmem:[#allocation5 + $0x108] sm:$0xf0]  ;;  %v4043_v37 = vpack.c.bf16 %v246_v0, %v240_v60 }
 0x151   :  { %v1300_v11 = vadd.f32 %v1299_v8, %v1227_v32  ;;  %v2890_v32 = vor.u32 %v3363_v61, %v2887_v49  ;;  %v2951_v30 = vld [vmem:[#allocation5 + $0x188] sm:$0xf0] }
 0x152   :  { %v2954_v56 = vor.u32 %v3379_v25, %v2951_v30 }
 0x153   :  { %v1799_v21 = vmax.f32 %v1300_v11, 0.0 }
 0x154   :  { %v1085_v17 = vpop.f32.mrf.mxu2  ;;  %1576 = vmatpush.bf16.msra.mxu1 %v2962_v45  ;;  %1504 = vmatpush.bf16.msra.mxu0 %v2890_v32  ;;  %v251_v45 = vld [vmem:[#allocation2 + $0x4a0] sm:$0xff] }
 0x155   :  { %v1086_v54 = vadd.f32 %v1085_v17, %v3919_v58  ;;  %v1158_v41 = vpop.f32.mrf.mxu3  ;;  %v4039_v8 = vpack.c.bf16 %v1799_v21, %v1797_v7  ;;  %v252_v17 = vld [vmem:[#allocation2 + $0x4a8] sm:$0xff] }
 0x156   :  { %v1229_v33 = vpop.f32.mrf.mxu0 }
 0x157   :  { %v1159_v11 = vadd.f32 %v1158_v41, %v1086_v54  ;;  %v1230_v24 = vadd.f32 %v1229_v33, %v1157_v1  ;;  %v3407_v54 = vld [vmem:[#allocation5 + $0x264] sm:$0xf]  ;;  %v3063_v41 = vld [vmem:[#allocation5 + $0x268] sm:$0xf0] }
 0x158   :  { %v1302_v50 = vpop.f32.mrf.mxu1  ;;  %1577 = vmatpush.bf16.msra.mxu1 %v2954_v56  ;;  %v3066_v33 = vor.u32 %v3407_v54, %v3063_v41  ;;  %v4055_v56 = vpack.c.bf16 %v252_v17, %v252_v17 }
 0x159   :  { %v1303_v58 = vadd.f32 %v1302_v50, %v1230_v24  ;;  %1127 = vmatmul.bf16.gmra.mxu2 %v4034_v14  ;;  %1268 = vmatmul.bf16.gmra.mxu0 %v4037_v18  ;;  %v4051_v24 = vpack.c.bf16 %v251_v45, %v251_v45 }
 0x15a   :  { %1200 = vmatmul.bf16.gmra.mxu3 %v4041_v27  ;;  %1644 = vmatpush.bf16.msrb.mxu2 %v3066_v33 }
 0x15b   :  { %1341 = vmatmul.bf16.gmra.mxu1 %v4043_v37  ;;  %v1801_v61 = vmax.f32 %v1303_v58, 0.0  ;;  %v3423_v58 = vld [vmem:[#allocation5 + $0x2e4] sm:$0xf] }
 0x15c   :  { %v1088_v60 = vpop.f32.mrf.mxu2 }
 0x15d   :  { %v1089_v42 = vadd.f32 %v1088_v60, %v3933_v29  ;;  %v1161_v51 = vpop.f32.mrf.mxu3 }
 0x15e   :  { %v1231_v7 = vpop.f32.mrf.mxu0 }
 0x15f   :  { %v1162_v1 = vadd.f32 %v1161_v51, %v1089_v42  ;;  %v1232_v21 = vadd.f32 %v1231_v7, %v1159_v11  ;;  %v3127_v51 = vld [vmem:[#allocation5 + $0x2e8] sm:$0xf0] }
 0x160   :  { %v1304_v35 = vpop.f32.mrf.mxu1  ;;  %v3130_v7 = vor.u32 %v3423_v58, %v3127_v51 }
 0x161   :  { %v1305_v0 = vadd.f32 %v1304_v35, %v1232_v21 }
 0x162   :  { %1717 = vmatpush.bf16.msrb.mxu3 %v3130_v7 }
 0x163   :  { %v1803_v49 = vmax.f32 %v1305_v0, 0.0 }
 0x164   :  { %v1090_v32 = vpop.f32.mrf.mxu2 }
 0x165   :  { %v1091_v25 = vadd.f32 %v1090_v32, %v3943_v48  ;;  %v1163_v30 = vpop.f32.mrf.mxu3  ;;  %v4053_v29 = vpack.c.bf16 %v1803_v49, %v1801_v61 }
 0x166   :  { %v1234_v50 = vpop.f32.mrf.mxu0 }
 0x167   :  { %v1164_v11 = vadd.f32 %v1163_v30, %v1091_v25  ;;  %v1235_v60 = vadd.f32 %v1234_v50, %v1162_v1 }
 0x168   :  { %v1307_v42 = vpop.f32.mrf.mxu1 }
 0x169   :  { %v1308_v21 = vadd.f32 %v1307_v42, %v1235_v60  ;;  %1273 = vmatmul.bf16.gmra.mxu0 %v4051_v24  ;;  %1359 = vmatmul.bf16.vlgmr.msra.gmra.mxu2 %v3730_v63 }
 0x16a   :  { %1432 = vmatmul.bf16.vlgmr.msra.gmra.mxu3 %v3736_v5 }
 0x16b   :  { %1346 = vmatmul.bf16.gmra.mxu1 %v4055_v56  ;;  %v1805_v54 = vmax.f32 %v1308_v21, 0.0 }
 0x16c   :  { %v1093_v48 = vpop.f32.mrf.mxu2 }
 0x16d   :  { %v1094_v35 = vadd.f32 %v1093_v48, %v3957_v12  ;;  %v1166_v0 = vpop.f32.mrf.mxu3  ;;  %v3405_v48 = vld [vmem:[#allocation5 + $0x254] sm:$0xf] }
 0x16e   :  { %v1236_v45 = vpop.f32.mrf.mxu0 }
 0x16f   :  { %v1167_v1 = vadd.f32 %v1166_v0, %v1094_v35  ;;  %v1237_v17 = vadd.f32 %v1236_v45, %v1164_v11  ;;  %v3055_v35 = vld [vmem:[#allocation5 + $0x258] sm:$0xf0]  ;;  %v3421_v0 = vld [vmem:[#allocation5 + $0x2d4] sm:$0xf] }
 0x170   :  { %v1309_v61 = vpop.f32.mrf.mxu1  ;;  %v3058_v45 = vor.u32 %v3405_v48, %v3055_v35  ;;  %v3403_v35 = vld [vmem:[#allocation5 + $0x244] sm:$0xf] }
 0x171   :  { %v1310_v49 = vadd.f32 %v1309_v61, %v1237_v17 }
 0x172   :  { %1645 = vmatpush.bf16.msrb.mxu2 %v3058_v45 }
 0x173   :  { %v1807_v41 = vmax.f32 %v1310_v49, 0.0 }
 0x174   :  { %v1095_v32 = vpop.f32.mrf.mxu2 }
 0x175   :  { %v1096_v33 = vadd.f32 %v1095_v32, %v3967_v39  ;;  %v1168_v63 = vpop.f32.mrf.mxu3  ;;  %v4063_v25 = vpack.c.bf16 %v1807_v41, %v1805_v54 }
 0x176   :  { %v1239_v5 = vpop.f32.mrf.mxu0 }
 0x177   :  { %v1169_v30 = vadd.f32 %v1168_v63, %v1096_v33  ;;  %v1240_v50 = vadd.f32 %v1239_v5, %v1167_v1  ;;  %v3119_v1 = vld [vmem:[#allocation5 + $0x2d8] sm:$0xf0] }
 0x178   :  { %v1312_v60 = vpop.f32.mrf.mxu1  ;;  %v3122_v17 = vor.u32 %v3421_v0, %v3119_v1  ;;  %v3111_v1 = vld [vmem:[#allocation5 + $0x2c8] sm:$0xf0] }
 0x179   :  { %v1313_v42 = vadd.f32 %v1312_v60, %v1240_v50  ;;  %1364 = vmatmul.bf16.gmra.mxu2 %v3742_v28  ;;  %1505 = vmatmul.bf16.vlgmr.msra.gmra.mxu0 %v3804_v19 }
 0x17a   :  { %1437 = vmatmul.bf16.gmra.mxu3 %v3748_v31 }
 0x17b   :  { %1578 = vmatmul.bf16.vlgmr.msra.gmra.mxu1 %v3806_v20  ;;  %v1809_v19 = vmax.f32 %v1313_v42, 0.0  ;;  %1718 = vmatpush.bf16.msrb.mxu3 %v3122_v17 }
 0x17c   :  { %v1098_v12 = vpop.f32.mrf.mxu2 }
 0x17d   :  { %v1099_v11 = vadd.f32 %v1098_v12, %v3978_v53  ;;  %v1171_v39 = vpop.f32.mrf.mxu3 }
 0x17e   :  { %v1241_v58 = vpop.f32.mrf.mxu0 }
 0x17f   :  { %v1172_v51 = vadd.f32 %v1171_v39, %v1099_v11  ;;  %v1242_v7 = vadd.f32 %v1241_v58, %v1169_v30 }
 0x180   :  { %v1314_v21 = vpop.f32.mrf.mxu1 }
 0x181   :  { %v1315_v28 = vadd.f32 %v1314_v21, %v1242_v7 }
 0x183   :  { %v1811_v31 = vmax.f32 %v1315_v28, 0.0 }
 0x184   :  { %v1100_v20 = vpop.f32.mrf.mxu2 }
 0x185   :  { %v1101_v61 = vadd.f32 %v1100_v20, %v3986_v4  ;;  %v1173_v53 = vpop.f32.mrf.mxu3  ;;  %v4071_v49 = vpack.c.bf16 %v1811_v31, %v1809_v19 }
 0x186   :  { %v1244_v54 = vpop.f32.mrf.mxu0 }
 0x187   :  { %4712 = vst [vmem:[#allocation71_spill] sm:$0xff] %v4071_v49  ;;  %v1174_v41 = vadd.f32 %v1173_v53, %v1101_v61  ;;  %v1245_v32 = vadd.f32 %v1244_v54, %v1172_v51 }
 0x188   :  { %v1317_v33 = vpop.f32.mrf.mxu1 }
 0x189   :  { %v1318_v63 = vadd.f32 %v1317_v33, %v1245_v32  ;;  %1369 = vmatmul.bf16.gmra.mxu2 %v3754_v52  ;;  %1510 = vmatmul.bf16.gmra.mxu0 %v3814_v34 }
 0x18a   :  { %1442 = vmatmul.bf16.gmra.mxu3 %v3760_v55 }
 0x18b   :  { %1583 = vmatmul.bf16.gmra.mxu1 %v3818_v36  ;;  %v1813_v39 = vmax.f32 %v1318_v63, 0.0 }
 0x18c   :  { %v1103_v5 = vpop.f32.mrf.mxu2 }
 0x18d   :  { %v1104_v30 = vadd.f32 %v1103_v5, %v3844_v26  ;;  %v1176_v4 = vpop.f32.mrf.mxu3  ;;  %v3047_v26 = vld [vmem:[#allocation5 + $0x248] sm:$0xf0] }
 0x18e   :  { %v1246_v50 = vpop.f32.mrf.mxu0  ;;  %v3050_v0 = vor.u32 %v3403_v35, %v3047_v26 }
 0x18f   :  { %v1177_v60 = vadd.f32 %v1176_v4, %v1104_v30  ;;  %v1247_v42 = vadd.f32 %v1246_v50, %v1174_v41 }
 0x190   :  { %v1319_v12 = vpop.f32.mrf.mxu1  ;;  %1646 = vmatpush.bf16.msrb.mxu2 %v3050_v0 }
 0x191   :  { %v1320_v11 = vadd.f32 %v1319_v12, %v1247_v42 }
 0x193   :  { %v1815_v58 = vmax.f32 %v1320_v11, 0.0 }
 0x194   :  { %v1105_v51 = vpop.f32.mrf.mxu2 }
 0x195   :  { %v1106_v52 = vadd.f32 %v1105_v51, %v3858_v15  ;;  %v1178_v7 = vpop.f32.mrf.mxu3  ;;  %v4079_v34 = vpack.c.bf16 %v1815_v58, %v1813_v39  ;;  %v3419_v15 = vld [vmem:[#allocation5 + $0x2c4] sm:$0xf] }
 0x196   :  { %v1249_v55 = vpop.f32.mrf.mxu0  ;;  %v3114_v17 = vor.u32 %v3419_v15, %v3111_v1  ;;  %v4714_v1 = vld [vmem:[#allocation37_spill] sm:$0xff] }
 0x197   :  { %v1179_v21 = vadd.f32 %v1178_v7, %v1106_v52  ;;  %v1250_v36 = vadd.f32 %v1249_v55, %v1177_v60  ;;  %v3401_v7 = vld [vmem:[#allocation5 + $0x234] sm:$0xf]  ;;  %v3039_v55 = vld [vmem:[#allocation5 + $0x238] sm:$0xf0] }
 0x198   :  { %v1322_v48 = vpop.f32.mrf.mxu1  ;;  %1719 = vmatpush.bf16.msrb.mxu3 %v3114_v17  ;;  %v4716_v17 = vld [vmem:[#allocation39_spill] sm:$0xff] }
 0x199   :  { %v1323_v45 = vadd.f32 %v1322_v48, %v1250_v36  ;;  %1374 = vmatmul.bf16.gmra.mxu2 %v3766_v10  ;;  %1515 = vmatmul.bf16.gmra.mxu0 %v3828_v6  ;;  %v3103_v36 = vld [vmem:[#allocation5 + $0x2b8] sm:$0xf0] }
 0x19a   :  { %1447 = vmatmul.bf16.gmra.mxu3 %v3772_v13 }
 0x19b   :  { %1588 = vmatmul.bf16.gmra.mxu1 %v3832_v9  ;;  %v1817_v41 = vmax.f32 %v1323_v45, 0.0 }
 0x19c   :  { %v1108_v28 = vpop.f32.mrf.mxu2 }
 0x19d   :  { %v1109_v19 = vadd.f32 %v1108_v28, %v3868_v44  ;;  %v1181_v31 = vpop.f32.mrf.mxu3  ;;  %v4715_v28 = vld [vmem:[#allocation28_spill] sm:$0xff] }
 0x19e   :  { %v1251_v20 = vpop.f32.mrf.mxu0 }
 0x19f   :  { %v1182_v61 = vadd.f32 %v1181_v31, %v1109_v19  ;;  %v1252_v53 = vadd.f32 %v1251_v20, %v1179_v21  ;;  %v3042_v21 = vor.u32 %v3401_v7, %v3039_v55  ;;  %v4717_v19 = vld [vmem:[#allocation45_spill] sm:$0xff]  ;;  %v3399_v7 = vld [vmem:[#allocation5 + $0x224] sm:$0xf]  ;;  %v3031_v55 = vld [vmem:[#allocation5 + $0x228] sm:$0xf0] }
 0x1a0   :  { %v1324_v54 = vpop.f32.mrf.mxu1 }
 0x1a1   :  { %v1325_v10 = vadd.f32 %v1324_v54, %v1252_v53  ;;  %1647 = vmatpush.bf16.msrb.mxu2 %v3042_v21  ;;  %v3034_v21 = vor.u32 %v3399_v7, %v3031_v55 }
 0x1a3   :  { %v1819_v6 = vmax.f32 %v1325_v10, 0.0 }
 0x1a4   :  { %v1110_v32 = vpop.f32.mrf.mxu2 }
 0x1a5   :  { %v1111_v13 = vadd.f32 %v1110_v32, %v3882_v46  ;;  %v1183_v9 = vpop.f32.mrf.mxu3  ;;  %v4087_v33 = vpack.c.bf16 %v1819_v6, %v1817_v41  ;;  %1648 = vmatpush.bf16.msrb.mxu2 %v3034_v21 }
 0x1a6   :  { %v1254_v63 = vpop.f32.mrf.mxu0 }
 0x1a7   :  { %4713 = vst [vmem:[#allocation72_spill] sm:$0xff] %v4087_v33  ;;  %v1184_v5 = vadd.f32 %v1183_v9, %v1111_v13  ;;  %v1255_v30 = vadd.f32 %v1254_v63, %v1182_v61  ;;  %v4718_v9 = vld [vmem:[#allocation50_spill] sm:$0xff] }
 0x1a8   :  { %v1327_v4 = vpop.f32.mrf.mxu1 }
 0x1a9   :  { %v1328_v44 = vadd.f32 %v1327_v4, %v1255_v30  ;;  %1379 = vmatmul.bf16.gmra.mxu2 %v3778_v59  ;;  %1520 = vmatmul.bf16.gmra.mxu0 %v3850_v57  ;;  %v3417_v57 = vld [vmem:[#allocation5 + $0x2b4] sm:$0xf] }
 0x1aa   :  { %1452 = vmatmul.bf16.gmra.mxu3 %v3784_v62  ;;  %v3106_v48 = vor.u32 %v3417_v57, %v3103_v36 }
 0x1ab   :  { %1593 = vmatmul.bf16.gmra.mxu1 %v3854_v2  ;;  %v1821_v51 = vmax.f32 %v1328_v44, 0.0 }
 0x1ac   :  { %v1113_v50 = vpop.f32.mrf.mxu2  ;;  %1720 = vmatpush.bf16.msrb.mxu3 %v3106_v48  ;;  %v3095_v48 = vld [vmem:[#allocation5 + $0x2a8] sm:$0xf0] }
 0x1ad   :  { %v1114_v60 = vadd.f32 %v1113_v50, %v3892_v23  ;;  %v1186_v46 = vpop.f32.mrf.mxu3 }
 0x1ae   :  { %v1256_v42 = vpop.f32.mrf.mxu0 }
 0x1af   :  { %v1187_v12 = vadd.f32 %v1186_v46, %v1114_v60  ;;  %v1257_v11 = vadd.f32 %v1256_v42, %v1184_v5  ;;  %v4719_v46 = vld [vmem:[#allocation29_spill] sm:$0xff] }
 0x1b0   :  { %v1329_v39 = vpop.f32.mrf.mxu1  ;;  %v4720_v42 = vld [vmem:[#allocation41_spill] sm:$0xff] }
 0x1b1   :  { %v1330_v58 = vadd.f32 %v1329_v39, %v1257_v11  ;;  %v4722_v11 = vld [vmem:[#allocation43_spill] sm:$0xff] }
 0x1b3   :  { %v1823_v52 = vmax.f32 %v1330_v58, 0.0  ;;  %v4723_v58 = vld [vmem:[#allocation51_spill] sm:$0xff] }
 0x1b4   :  { %v1115_v59 = vpop.f32.mrf.mxu2 }
 0x1b5   :  { %v1116_v62 = vadd.f32 %v1115_v59, %v3906_v40  ;;  %v1188_v2 = vpop.f32.mrf.mxu3  ;;  %v4095_v35 = vpack.c.bf16 %v1823_v52, %v1821_v51 }
 0x1b6   :  { %v1259_v23 = vpop.f32.mrf.mxu0 }
 0x1b7   :  { %v1189_v26 = vadd.f32 %v1188_v2, %v1116_v62  ;;  %v1260_v0 = vadd.f32 %v1259_v23, %v1187_v12  ;;  %v4721_v12 = vld [vmem:[#allocation30_spill] sm:$0xff]  ;;  %v3415_v2 = vld [vmem:[#allocation5 + $0x2a4] sm:$0xf] }
 0x1b8   :  { %v1332_v45 = vpop.f32.mrf.mxu1  ;;  %v3098_v23 = vor.u32 %v3415_v2, %v3095_v48  ;;  %v3413_v2 = vld [vmem:[#allocation5 + $0x294] sm:$0xf] }
 0x1b9   :  { %v1333_v15 = vadd.f32 %v1332_v45, %v1260_v0  ;;  %1384 = vmatmul.bf16.gmra.mxu2 %v3790_v47  ;;  %1525 = vmatmul.bf16.gmra.mxu0 %v4714_v1  ;;  %v4724_v1 = vld [vmem:[#allocation56_spill] sm:$0xff] }
 0x1ba   :  { %1457 = vmatmul.bf16.gmra.mxu3 %v4715_v28 }
 0x1bb   :  { %1598 = vmatmul.bf16.gmra.mxu1 %v4716_v17  ;;  %v1825_v6 = vmax.f32 %v1333_v15, 0.0  ;;  %1721 = vmatpush.bf16.msrb.mxu3 %v3098_v23  ;;  %v3087_v23 = vld [vmem:[#allocation5 + $0x298] sm:$0xf0] }
 0x1bc   :  { %v1118_v40 = vpop.f32.mrf.mxu2 }
 0x1bd   :  { %v1119_v31 = vadd.f32 %v1118_v40, %v4717_v19  ;;  %v1191_v20 = vpop.f32.mrf.mxu3 }
 0x1be   :  { %v1261_v61 = vpop.f32.mrf.mxu0 }
 0x1bf   :  { %v1192_v53 = vadd.f32 %v1191_v20, %v1119_v31  ;;  %v1262_v54 = vadd.f32 %v1261_v61, %v1189_v26 }
 0x1c0   :  { %v1334_v10 = vpop.f32.mrf.mxu1 }
 0x1c1   :  { %v1335_v41 = vadd.f32 %v1334_v10, %v1262_v54  ;;  %v4725_v54 = vld [vmem:[#allocation16_spill] sm:$0xff]  ;;  %v4726_v10 = vld [vmem:[#allocation46_spill] sm:$0xff] }
 0x1c3   :  { %v1827_v32 = vmax.f32 %v1335_v41, 0.0  ;;  %v4727_v41 = vld [vmem:[#allocation17_spill] sm:$0xff] }
 0x1c4   :  { %v1120_v13 = vpop.f32.mrf.mxu2 }
 0x1c5   :  { %v1121_v47 = vadd.f32 %v1120_v13, %v4718_v9  ;;  %v1193_v63 = vpop.f32.mrf.mxu3  ;;  %v4103_v5 = vpack.c.bf16 %v1827_v32, %v1825_v6  ;;  %v4728_v6 = vld [vmem:[#allocation48_spill] sm:$0xff]  ;;  %v4729_v13 = vld [vmem:[#allocation57_spill] sm:$0xff] }
 0x1c6   :  { %v1264_v30 = vpop.f32.mrf.mxu0 }
 0x1c7   :  { %v1194_v4 = vadd.f32 %v1193_v63, %v1121_v47  ;;  %v1265_v44 = vadd.f32 %v1264_v30, %v1192_v53 }
 0x1c8   :  { %v1337_v50 = vpop.f32.mrf.mxu1 }
 0x1c9   :  { %v1338_v60 = vadd.f32 %v1337_v50, %v1265_v44  ;;  %1389 = vmatmul.bf16.gmra.mxu2 %v4719_v46  ;;  %1530 = vmatmul.bf16.gmra.mxu0 %v4720_v42  ;;  %v3197_v50 = vld [vmem:[#allocation8 + $0x70] sm:$0xf] }
 0x1ca   :  { %1462 = vmatmul.bf16.gmra.mxu3 %v4721_v12  ;;  %v3261_v46 = vld [vmem:[#allocation8 + $0xf0] sm:$0xf]  ;;  %v3458_v12 = vld [vmem:[#allocation8 + $0xf4] sm:$0xf0] }
 0x1cb   :  { %1603 = vmatmul.bf16.gmra.mxu1 %v4722_v11  ;;  %v1829_v0 = vmax.f32 %v1338_v60, 0.0  ;;  %v3442_v60 = vld [vmem:[#allocation8 + $0x74] sm:$0xf0] }
 0x1cc   :  { %v1123_v39 = vpop.f32.mrf.mxu2  ;;  %v3198_v42 = vor.u32 %v3442_v60, %v3197_v50  ;;  %v3456_v60 = vld [vmem:[#allocation8 + $0xe4] sm:$0xf0] }
 0x1cd   :  { %v1124_v51 = vadd.f32 %v1123_v39, %v4723_v58  ;;  %v1196_v52 = vpop.f32.mrf.mxu3  ;;  %v3262_v39 = vor.u32 %v3458_v12, %v3261_v46  ;;  %v4735_v12 = vld [vmem:[#allocation58_spill] sm:$0xff] }
 0x1ce   :  { %v1266_v59 = vpop.f32.mrf.mxu0  ;;  %2063 = vmatpush.bf16.msrb.mxu0 %v3198_v42  ;;  %v4734_v42 = vld [vmem:[#allocation20_spill] sm:$0xff] }
 0x1cf   :  { %v1197_v57 = vadd.f32 %v1196_v52, %v1124_v51  ;;  %v1267_v36 = vadd.f32 %v1266_v59, %v1194_v4  ;;  %2136 = vmatpush.bf16.msrb.mxu1 %v3262_v39  ;;  %v4736_v39 = vld [vmem:[#allocation21_spill] sm:$0xff] }
 0x1d0   :  { %v1339_v62 = vpop.f32.mrf.mxu1 }
 0x1d1   :  { %v1340_v26 = vadd.f32 %v1339_v62, %v1267_v36  ;;  %v3397_v36 = vld [vmem:[#allocation5 + $0x214] sm:$0xf]  ;;  %v3023_v62 = vld [vmem:[#allocation5 + $0x218] sm:$0xf0] }
 0x1d2   :  { %v3026_v48 = vor.u32 %v3397_v36, %v3023_v62  ;;  %v3395_v62 = vld [vmem:[#allocation5 + $0x204] sm:$0xf] }
 0x1d3   :  { %v1831_v45 = vmax.f32 %v1340_v26, 0.0 }
 0x1d4   :  { %v1125_v15 = vpop.f32.mrf.mxu2  ;;  %1649 = vmatpush.bf16.msrb.mxu2 %v3026_v48 }
 0x1d5   :  { %v1126_v28 = vadd.f32 %v1125_v15, %v4724_v1  ;;  %v1198_v17 = vpop.f32.mrf.mxu3  ;;  %v4111_v40 = vpack.c.bf16 %v1831_v45, %v1829_v0  ;;  %v4730_v0 = vld [vmem:[#allocation18_spill] sm:$0xff]  ;;  %v4731_v45 = vld [vmem:[#allocation52_spill] sm:$0xff] }
 0x1d6   :  { %v1269_v19 = vpop.f32.mrf.mxu0  ;;  %v3504_v15 = vld [vmem:[#allocation7] sm:$0x3] }
 0x1d7   :  { %v1199_v31 = vadd.f32 %v1198_v17, %v1126_v28  ;;  %v1270_v20 = vadd.f32 %v1269_v19, %v1197_v57  ;;  %v4124_v1 = vperm.slane %v3504_v15, 1  ;;  %v3090_v28 = vor.u32 %v3413_v2, %v3087_v23  ;;  %v4732_v17 = vld [vmem:[#allocation19_spill] sm:$0xff]  ;;  %v4733_v19 = vld [vmem:[#allocation54_spill] sm:$0xff]  ;;  %v3015_v2 = vld [vmem:[#allocation5 + $0x208] sm:$0xf0] }
 0x1d8   :  { %v1342_v61 = vpop.f32.mrf.mxu1  ;;  %v3018_v48 = vor.u32 %v3395_v62, %v3015_v2  ;;  %v3165_v62 = vld [vmem:[#allocation8 + $0x30] sm:$0xf]  ;;  %v3434_v2 = vld [vmem:[#allocation8 + $0x34] sm:$0xf0] }
 0x1d9   :  { %v1343_v53 = vadd.f32 %v1342_v61, %v1270_v20  ;;  %1394 = vmatmul.bf16.gmra.mxu2 %v4725_v54  ;;  %1535 = vmatmul.bf16.gmra.mxu0 %v4726_v10 }
 0x1da   :  { %1467 = vmatmul.bf16.gmra.mxu3 %v4727_v41  ;;  %1650 = vmatpush.bf16.msrb.mxu2 %v3018_v48 }
 0x1db   :  { %1608 = vmatmul.bf16.gmra.mxu1 %v4728_v6  ;;  %v1833_v58 = vmax.f32 %v1343_v53, 0.0  ;;  %1722 = vmatpush.bf16.msrb.mxu3 %v3090_v28 }
 0x1dc   :  { %v1128_v32 = vpop.f32.mrf.mxu2 }
 0x1dd   :  { %v1129_v9 = vadd.f32 %v1128_v32, %v4729_v13  ;;  %v1201_v47 = vpop.f32.mrf.mxu3 }
 0x1de   :  { %v1271_v63 = vpop.f32.mrf.mxu0 }
 0x1df   :  { %v1202_v30 = vadd.f32 %v1201_v47, %v1129_v9  ;;  %v1272_v4 = vadd.f32 %v1271_v63, %v1199_v31 }
 0x1e0   :  { %v1344_v44 = vpop.f32.mrf.mxu1 }
 0x1e1   :  { %v1345_v11 = vadd.f32 %v1344_v44, %v1272_v4  ;;  %v3440_v4 = vld [vmem:[#allocation8 + $0x64] sm:$0xf0]  ;;  %v3253_v44 = vld [vmem:[#allocation8 + $0xe0] sm:$0xf] }
 0x1e3   :  { %v1835_v51 = vmax.f32 %v1345_v11, 0.0  ;;  %v3254_v11 = vor.u32 %v3456_v60, %v3253_v44  ;;  %v3181_v44 = vld [vmem:[#allocation8 + $0x50] sm:$0xf] }
 0x1e4   :  { %v1130_v52 = vpop.f32.mrf.mxu2 }
 0x1e5   :  { %v1203_v7 = vpop.f32.mrf.mxu3  ;;  %v4118_v55 = vpack.c.bf16 %v1835_v51, %v1833_v58  ;;  %v4737_v58 = vld [vmem:[#allocation60_spill] sm:$0xff]  ;;  %2137 = vmatpush.bf16.msrb.mxu1 %v3254_v11 }
 0x1e6   :  { %v1274_v59 = vpop.f32.mrf.mxu0 }
 0x1e7   :  { %v1275_v21 = vadd.f32 %v1274_v59, %v1202_v30  ;;  %v3189_v30 = vld [vmem:[#allocation8 + $0x60] sm:$0xf] }
 0x1e8   :  { %v1347_v57 = vpop.f32.mrf.mxu1  ;;  %v3190_v50 = vor.u32 %v3440_v4, %v3189_v30 }
 0x1e9   :  { %v4120_v26 = vadd.f32 %v1347_v57, %v1275_v21  ;;  %1399 = vmatmul.bf16.gmra.mxu2 %v4730_v0  ;;  %1540 = vmatmul.bf16.gmra.mxu0 %v4731_v45  ;;  %v3411_v0 = vld [vmem:[#allocation5 + $0x284] sm:$0xf]  ;;  %v3079_v45 = vld [vmem:[#allocation5 + $0x288] sm:$0xf0] }
 0x1ea   :  { %1472 = vmatmul.bf16.gmra.mxu3 %v4732_v17  ;;  %2064 = vmatpush.bf16.msrb.mxu0 %v3190_v50  ;;  %v3082_v15 = vor.u32 %v3411_v0, %v3079_v45  ;;  %v3438_v50 = vld [vmem:[#allocation8 + $0x54] sm:$0xf0]  ;;  %v4741_v0 = vld [vmem:[#allocation24_spill] sm:$0xff]  ;;  %v3166_v45 = vor.u32 %v3434_v2, %v3165_v62  ;;  %v4745_v62 = vld [vmem:[#allocation27_spill] sm:$0xff] }
 0x1eb   :  { %1613 = vmatmul.bf16.gmra.mxu1 %v4733_v19  ;;  %v3182_v60 = vor.u32 %v3438_v50, %v3181_v44  ;;  %v3149_v50 = vld [vmem:[#allocation8 + $0x10] sm:$0xf]  ;;  %v3237_v2 = vld [vmem:[#allocation8 + $0xc0] sm:$0xf] }
 0x1ec   :  { %v1360_v31 = vpop.f32.mrf.mxu2  ;;  %1723 = vmatpush.bf16.msrb.mxu3 %v3082_v15  ;;  %v4742_v15 = vld [vmem:[#allocation25_spill] sm:$0xff] }
 0x1ed   :  { %v1361_v20 = vadd.f32 %v1360_v31, %v4124_v1  ;;  %v1433_v61 = vpop.f32.mrf.mxu3 }
 0x1ee   :  { %v1276_v53 = vpop.f32.mrf.mxu0  ;;  %2065 = vmatpush.bf16.msrb.mxu0 %v3182_v60  ;;  %v3430_v60 = vld [vmem:[#allocation8 + $0x14] sm:$0xf0] }
 0x1ef   :  { %v1434_v54 = vadd.f32 %v1433_v61, %v1361_v20 }
 0x1f0   :  { %v1349_v10 = vpop.f32.mrf.mxu1 }
 0x1f1   :  { %v4738_v10 = vld [vmem:[#allocation22_spill] sm:$0xff] }
 0x1f4   :  { %v1362_v41 = vpop.f32.mrf.mxu2 }
 0x1f5   :  { %v1363_v6 = vadd.f32 %v1362_v41, %v4124_v1  ;;  %v1435_v32 = vpop.f32.mrf.mxu3  ;;  %v4739_v41 = vld [vmem:[#allocation23_spill] sm:$0xff] }
 0x1f6   :  { %v1506_v13 = vpop.f32.mrf.mxu0 }
 0x1f7   :  { %v1436_v9 = vadd.f32 %v1435_v32, %v1363_v6  ;;  %v1507_v47 = vadd.f32 %v1506_v13, %v1434_v54  ;;  %v4740_v6 = vld [vmem:[#allocation63_spill] sm:$0xff] }
 0x1f8   :  { %v1579_v63 = vpop.f32.mrf.mxu1 }
 0x1f9   :  { %v4130_v46 = vadd.f32 %v1579_v63, %v1507_v47  ;;  %1404 = vmatmul.bf16.gmra.mxu2 %v4734_v42  ;;  %1545 = vmatmul.bf16.gmra.mxu0 %v4735_v12  ;;  %v3245_v42 = vld [vmem:[#allocation8 + $0xd0] sm:$0xf]  ;;  %v3454_v12 = vld [vmem:[#allocation8 + $0xd4] sm:$0xf0] }
 0x1fa   :  { %1477 = vmatmul.bf16.gmra.mxu3 %v4736_v39  ;;  %v3173_v39 = vld [vmem:[#allocation8 + $0x40] sm:$0xf] }
 0x1fb   :  { %1618 = vmatmul.bf16.gmra.mxu1 %v4737_v58  ;;  %v3436_v58 = vld [vmem:[#allocation8 + $0x44] sm:$0xf0] }
 0x1fc   :  { %v1365_v51 = vpop.f32.mrf.mxu2 }
 0x1fd   :  { %v1366_v52 = vadd.f32 %v1365_v51, %v4124_v1  ;;  %v1438_v7 = vpop.f32.mrf.mxu3 }
 0x1fe   :  { %v1508_v59 = vpop.f32.mrf.mxu0 }
 0x1ff   :  { %v1439_v21 = vadd.f32 %v1438_v7, %v1366_v52  ;;  %v1509_v57 = vadd.f32 %v1508_v59, %v1436_v9  ;;  %v3174_v7 = vor.u32 %v3436_v58, %v3173_v39 }
 0x200   :  { %v1581_v36 = vpop.f32.mrf.mxu1 }
 0x201   :  { %v4137_v23 = vadd.f32 %v1581_v36, %v1509_v57  ;;  %2066 = vmatpush.bf16.msrb.mxu0 %v3174_v7 }
 0x204   :  { %v1367_v28 = vpop.f32.mrf.mxu2 }
 0x205   :  { %v1368_v17 = vadd.f32 %v1367_v28, %v4124_v1  ;;  %v1440_v19 = vpop.f32.mrf.mxu3  ;;  %v4743_v28 = vld [vmem:[#allocation67_spill] sm:$0xff]  ;;  %2067 = vmatpush.bf16.msrb.mxu0 %v3166_v45 }
 0x206   :  { %v1511_v31 = vpop.f32.mrf.mxu0 }
 0x207   :  { %v1441_v20 = vadd.f32 %v1440_v19, %v1368_v17  ;;  %v1512_v61 = vadd.f32 %v1511_v31, %v1439_v21  ;;  %v3441_v17 = vld [vmem:[#allocation8 + $0x74] sm:$0xf]  ;;  %v3199_v19 = vld [vmem:[#allocation8 + $0x78] sm:$0xf0] }
 0x208   :  { %v1584_v53 = vpop.f32.mrf.mxu1  ;;  %v3457_v31 = vld [vmem:[#allocation8 + $0xf4] sm:$0xf] }
 0x209   :  { %v4140_v54 = vadd.f32 %v1584_v53, %v1512_v61  ;;  %1409 = vmatmul.bf16.gmra.mxu2 %v4738_v10  ;;  %1550 = vmatmul.bf16.gmra.mxu0 %v3989_v22  ;;  %v3246_v22 = vor.u32 %v3454_v12, %v3245_v42  ;;  %v3263_v61 = vld [vmem:[#allocation8 + $0xf8] sm:$0xf0]  ;;  %v3150_v42 = vor.u32 %v3430_v60, %v3149_v50  ;;  %v3255_v50 = vld [vmem:[#allocation8 + $0xe8] sm:$0xf0] }
 0x20a   :  { %1482 = vmatmul.bf16.gmra.mxu3 %v4739_v41  ;;  %v3266_v10 = vor.u32 %v3457_v31, %v3263_v61  ;;  %v3157_v41 = vld [vmem:[#allocation8 + $0x20] sm:$0xf] }
 0x20b   :  { %1623 = vmatmul.bf16.gmra.mxu1 %v4740_v6  ;;  %v3432_v6 = vld [vmem:[#allocation8 + $0x24] sm:$0xf0] }
 0x20c   :  { %v1370_v32 = vpop.f32.mrf.mxu2  ;;  %2138 = vmatpush.bf16.msrb.mxu1 %v3246_v22  ;;  %2282 = vmatpush.bf16.msra.mxu3 %v3266_v10  ;;  %v3141_v22 = vld [vmem:[#allocation8] sm:$0xf] }
 0x20d   :  { %v1371_v13 = vadd.f32 %v1370_v32, %v4124_v1  ;;  %v1443_v9 = vpop.f32.mrf.mxu3 }
 0x20e   :  { %v1513_v47 = vpop.f32.mrf.mxu0 }
 0x20f   :  { %v1444_v63 = vadd.f32 %v1443_v9, %v1371_v13  ;;  %v4147_v30 = vadd.f32 %v1513_v47, %v1441_v20  ;;  %v3202_v20 = vor.u32 %v3441_v17, %v3199_v19 }
 0x210   :  { %v4149_v4 = vpop.f32.mrf.mxu1 }
 0x211   :  { %2209 = vmatpush.bf16.msra.mxu2 %v3202_v20 }
 0x214   :  { %v1372_v11 = vpop.f32.mrf.mxu2 }
 0x215   :  { %v1373_v51 = vadd.f32 %v1372_v11, %v4124_v1  ;;  %v1445_v52 = vpop.f32.mrf.mxu3  ;;  %v3428_v11 = vld [vmem:[#allocation8 + $0x4] sm:$0xf0] }
 0x216   :  { %v1516_v59 = vpop.f32.mrf.mxu0 }
 0x217   :  { %v1446_v21 = vadd.f32 %v1445_v52, %v1373_v51  ;;  %v1517_v57 = vadd.f32 %v1516_v59, %v1444_v63  ;;  %v3142_v51 = vor.u32 %v3428_v11, %v3141_v22  ;;  %v4747_v22 = vld [vmem:[#allocation32_spill] sm:$0xff] }
 0x218   :  { %v1589_v36 = vpop.f32.mrf.mxu1 }
 0x219   :  { %v4152_v48 = vadd.f32 %v1589_v36, %v1517_v57  ;;  %1414 = vmatmul.bf16.gmra.mxu2 %v4741_v0  ;;  %1555 = vmatmul.bf16.gmra.mxu0 %v4005_v38  ;;  %v3158_v38 = vor.u32 %v3432_v6, %v3157_v41  ;;  %v4744_v36 = vld [vmem:[#allocation26_spill] sm:$0xff]  ;;  %v3452_v0 = vld [vmem:[#allocation8 + $0xc4] sm:$0xf0] }
 0x21a   :  { %1487 = vmatmul.bf16.gmra.mxu3 %v4742_v15  ;;  %v3238_v45 = vor.u32 %v3452_v0, %v3237_v2 }
 0x21b   :  { %1628 = vmatmul.bf16.gmra.mxu1 %v4743_v28  ;;  %2068 = vmatpush.bf16.msrb.mxu0 %v3158_v38 }
 0x21c   :  { %v1375_v53 = vpop.f32.mrf.mxu2  ;;  %2139 = vmatpush.bf16.msrb.mxu1 %v3238_v45 }
 0x21d   :  { %v1376_v32 = vadd.f32 %v1375_v53, %v4124_v1  ;;  %v1448_v13 = vpop.f32.mrf.mxu3  ;;  %v3439_v53 = vld [vmem:[#allocation8 + $0x64] sm:$0xf] }
 0x21e   :  { %v1518_v9 = vpop.f32.mrf.mxu0 }
 0x21f   :  { %v1449_v47 = vadd.f32 %v1448_v13, %v1376_v32  ;;  %v4159_v63 = vadd.f32 %v1518_v9, %v1446_v21  ;;  %2069 = vmatpush.bf16.msrb.mxu0 %v3150_v42 }
 0x220   :  { %v4161_v44 = vpop.f32.mrf.mxu1 }
 0x223   :  { %2070 = vmatpush.bf16.msrb.mxu0 %v3142_v51 }
 0x224   :  { %v1377_v12 = vpop.f32.mrf.mxu2 }
 0x225   :  { %v1378_v39 = vadd.f32 %v1377_v12, %v4124_v1  ;;  %v1450_v58 = vpop.f32.mrf.mxu3  ;;  %v4746_v12 = vld [vmem:[#allocation31_spill] sm:$0xff] }
 0x226   :  { %v1521_v52 = vpop.f32.mrf.mxu0 }
 0x227   :  { %v1451_v7 = vadd.f32 %v1450_v58, %v1378_v39  ;;  %v1522_v59 = vadd.f32 %v1521_v52, %v1449_v47  ;;  %v3455_v47 = vld [vmem:[#allocation8 + $0xe4] sm:$0xf] }
 0x228   :  { %v1594_v57 = vpop.f32.mrf.mxu1  ;;  %v3258_v60 = vor.u32 %v3455_v47, %v3255_v50  ;;  %v3453_v47 = vld [vmem:[#allocation8 + $0xd4] sm:$0xf] }
 0x229   :  { %v4164_v21 = vadd.f32 %v1594_v57, %v1522_v59  ;;  %1419 = vmatmul.bf16.gmra.mxu2 %v4744_v36  ;;  %1560 = vmatmul.bf16.gmra.mxu0 %v4018_v16  ;;  %v3191_v16 = vld [vmem:[#allocation8 + $0x68] sm:$0xf0] }
 0x22a   :  { %1492 = vmatmul.bf16.gmra.mxu3 %v4745_v62  ;;  %v3194_v10 = vor.u32 %v3439_v53, %v3191_v16  ;;  %v4750_v53 = vld [vmem:[#allocation34_spill] sm:$0xff] }
 0x22b   :  { %1633 = vmatmul.bf16.gmra.mxu1 %v4025_v3  ;;  %2283 = vmatpush.bf16.msra.mxu3 %v3258_v60  ;;  %v3247_v60 = vld [vmem:[#allocation8 + $0xd8] sm:$0xf0] }
 0x22c   :  { %v1380_v15 = vpop.f32.mrf.mxu2  ;;  %2210 = vmatpush.bf16.msra.mxu2 %v3194_v10 }
 0x22d   :  { %v1381_v28 = vadd.f32 %v1380_v15, %v4124_v1  ;;  %v1453_v17 = vpop.f32.mrf.mxu3  ;;  %v3450_v15 = vld [vmem:[#allocation8 + $0xb4] sm:$0xf0] }
 0x22e   :  { %v1523_v19 = vpop.f32.mrf.mxu0 }
 0x22f   :  { %v1454_v31 = vadd.f32 %v1453_v17, %v1381_v28  ;;  %v4171_v20 = vadd.f32 %v1523_v19, %v1451_v7  ;;  %v4748_v19 = vld [vmem:[#allocation33_spill] sm:$0xff] }
 0x230   :  { %v4173_v61 = vpop.f32.mrf.mxu1 }
 0x234   :  { %v1382_v41 = vpop.f32.mrf.mxu2 }
 0x235   :  { %v1383_v3 = vadd.f32 %v1382_v41, %v4124_v1  ;;  %v1455_v6 = vpop.f32.mrf.mxu3 }
 0x236   :  { %v1526_v32 = vpop.f32.mrf.mxu0 }
 0x237   :  { %v1456_v13 = vadd.f32 %v1455_v6, %v1383_v3  ;;  %v1527_v38 = vadd.f32 %v1526_v32, %v1454_v31  ;;  %v4749_v31 = vld [vmem:[#allocation65_spill] sm:$0xff] }
 0x238   :  { %v1599_v9 = vpop.f32.mrf.mxu1 }
 0x239   :  { %v4176_v42 = vadd.f32 %v1599_v9, %v1527_v38  ;;  %1565 = vmatmul.bf16.gmra.mxu0 %v4034_v14  ;;  %1651 = vmatmul.bf16.vlgmr.msrb.gmra.mxu2 %v4746_v12  ;;  %v3437_v38 = vld [vmem:[#allocation8 + $0x54] sm:$0xf]  ;;  %v3183_v9 = vld [vmem:[#allocation8 + $0x58] sm:$0xf0]  ;;  %v3250_v12 = vor.u32 %v3453_v47, %v3247_v60  ;;  %v3435_v60 = vld [vmem:[#allocation8 + $0x44] sm:$0xf] }
 0x23a   :  { %1724 = vmatmul.bf16.vlgmr.msrb.gmra.mxu3 %v4747_v22  ;;  %v3186_v50 = vor.u32 %v3437_v38, %v3183_v9 }
 0x23b   :  { %1638 = vmatmul.bf16.gmra.mxu1 %v4041_v27  ;;  %v3229_v27 = vld [vmem:[#allocation8 + $0xb0] sm:$0xf]  ;;  %2284 = vmatpush.bf16.msra.mxu3 %v3250_v12  ;;  %v3175_v12 = vld [vmem:[#allocation8 + $0x48] sm:$0xf0] }
 0x23c   :  { %v1385_v11 = vpop.f32.mrf.mxu2  ;;  %v3230_v28 = vor.u32 %v3450_v15, %v3229_v27  ;;  %2211 = vmatpush.bf16.msra.mxu2 %v3186_v50 }
 0x23d   :  { %v1386_v39 = vadd.f32 %v1385_v11, %v4124_v1  ;;  %v1458_v58 = vpop.f32.mrf.mxu3 }
 0x23e   :  { %v1528_v51 = vpop.f32.mrf.mxu0  ;;  %2140 = vmatpush.bf16.msrb.mxu1 %v3230_v28 }
 0x23f   :  { %v1459_v52 = vadd.f32 %v1458_v58, %v1386_v39  ;;  %v4183_v7 = vadd.f32 %v1528_v51, %v1456_v13 }
 0x240   :  { %v4185_v59 = vpop.f32.mrf.mxu1 }
 0x244   :  { %v1387_v57 = vpop.f32.mrf.mxu2 }
 0x245   :  { %v1388_v14 = vadd.f32 %v1387_v57, %v4124_v1  ;;  %v1460_v36 = vpop.f32.mrf.mxu3 }
 0x246   :  { %v1531_v62 = vpop.f32.mrf.mxu0 }
 0x247   :  { %v1461_v2 = vadd.f32 %v1460_v36, %v1388_v14  ;;  %v1532_v0 = vadd.f32 %v1531_v62, %v1459_v52  ;;  %v4751_v36 = vld [vmem:[#allocation35_spill] sm:$0xff]  ;;  %v4752_v62 = vld [vmem:[#allocation36_spill] sm:$0xff] }
 0x248   :  { %v1604_v45 = vpop.f32.mrf.mxu1 }
 0x249   :  { %v4188_v17 = vadd.f32 %v1604_v45, %v1532_v0  ;;  %1656 = vmatmul.bf16.gmra.mxu2 %v4748_v19  ;;  %2071 = vmatmul.bf16.vlgmr.msrb.gmra.mxu0 %v4749_v31 }
 0x24a   :  { %1729 = vmatmul.bf16.gmra.mxu3 %v4750_v53  ;;  %v3221_v53 = vld [vmem:[#allocation8 + $0xa0] sm:$0xf] }
 0x24c   :  { %v1390_v16 = vpop.f32.mrf.mxu2 }
 0x24d   :  { %v1391_v10 = vadd.f32 %v1390_v16, %v4124_v1  ;;  %v1463_v41 = vpop.f32.mrf.mxu3  ;;  %v3448_v16 = vld [vmem:[#allocation8 + $0xa4] sm:$0xf0] }
 0x24e   :  { %v1533_v3 = vpop.f32.mrf.mxu0 }
 0x24f   :  { %v1464_v6 = vadd.f32 %v1463_v41, %v1391_v10  ;;  %v4194_v32 = vadd.f32 %v1533_v3, %v1461_v2  ;;  %v3222_v10 = vor.u32 %v3448_v16, %v3221_v53 }
 0x250   :  { %v4196_v13 = vpop.f32.mrf.mxu1 }
 0x251   :  { %2141 = vmatpush.bf16.msrb.mxu1 %v3222_v10 }
 0x254   :  { %v1392_v22 = vpop.f32.mrf.mxu2 }
 0x255   :  { %v1393_v11 = vadd.f32 %v1392_v22, %v4124_v1  ;;  %v1465_v39 = vpop.f32.mrf.mxu3  ;;  %v3178_v22 = vor.u32 %v3435_v60, %v3175_v12  ;;  %v4756_v60 = vld [vmem:[#allocation44_spill] sm:$0xff]  ;;  %v3446_v12 = vld [vmem:[#allocation8 + $0x94] sm:$0xf0] }
 0x256   :  { %v1536_v58 = vpop.f32.mrf.mxu0 }
 0x257   :  { %v1466_v51 = vadd.f32 %v1465_v39, %v1393_v11  ;;  %v1537_v52 = vadd.f32 %v1536_v58, %v1464_v6  ;;  %v4753_v39 = vld [vmem:[#allocation38_spill] sm:$0xff]  ;;  %v4754_v58 = vld [vmem:[#allocation40_spill] sm:$0xff]  ;;  %2212 = vmatpush.bf16.msra.mxu2 %v3178_v22 }
 0x258   :  { %v1609_v57 = vpop.f32.mrf.mxu1 }
 0x259   :  { %v4199_v14 = vadd.f32 %v1609_v57, %v1537_v52  ;;  %1661 = vmatmul.bf16.gmra.mxu2 %v4751_v36  ;;  %2076 = vmatmul.bf16.gmra.mxu0 %v4023_v43  ;;  %v3239_v52 = vld [vmem:[#allocation8 + $0xc8] sm:$0xf0] }
 0x25a   :  { %1734 = vmatmul.bf16.gmra.mxu3 %v4752_v62 }
 0x25c   :  { %v1395_v2 = vpop.f32.mrf.mxu2 }
 0x25d   :  { %v1396_v0 = vadd.f32 %v1395_v2, %v4124_v1  ;;  %v1468_v45 = vpop.f32.mrf.mxu3 }
 0x25e   :  { %v1538_v27 = vpop.f32.mrf.mxu0 }
 0x25f   :  { %v1469_v15 = vadd.f32 %v1468_v45, %v1396_v0  ;;  %v4205_v28 = vadd.f32 %v1538_v27, %v1466_v51  ;;  %v3451_v51 = vld [vmem:[#allocation8 + $0xc4] sm:$0xf] }
 0x260   :  { %v4207_v19 = vpop.f32.mrf.mxu1  ;;  %v3242_v57 = vor.u32 %v3451_v51, %v3239_v52 }
 0x262   :  { %2285 = vmatpush.bf16.msra.mxu3 %v3242_v57 }
 0x264   :  { %v1397_v41 = vpop.f32.mrf.mxu2 }
 0x265   :  { %v1398_v3 = vadd.f32 %v1397_v41, %v4124_v1  ;;  %v1470_v6 = vpop.f32.mrf.mxu3 }
 0x266   :  { %v1541_v38 = vpop.f32.mrf.mxu0 }
 0x267   :  { %v1471_v9 = vadd.f32 %v1470_v6, %v1398_v3  ;;  %v1542_v47 = vadd.f32 %v1541_v38, %v1469_v15 }
 0x268   :  { %v1614_v50 = vpop.f32.mrf.mxu1 }
 0x269   :  { %v4210_v11 = vadd.f32 %v1614_v50, %v1542_v47  ;;  %1666 = vmatmul.bf16.gmra.mxu2 %v4753_v39  ;;  %2081 = vmatmul.bf16.gmra.mxu0 %v4039_v8  ;;  %v4755_v50 = vld [vmem:[#allocation42_spill] sm:$0xff] }
 0x26a   :  { %1739 = vmatmul.bf16.gmra.mxu3 %v4754_v58 }
 0x26c   :  { %v1400_v36 = vpop.f32.mrf.mxu2 }
 0x26d   :  { %v1401_v62 = vadd.f32 %v1400_v36, %v4124_v1  ;;  %v1473_v2 = vpop.f32.mrf.mxu3 }
 0x26e   :  { %v1543_v0 = vpop.f32.mrf.mxu0 }
 0x26f   :  { %v1474_v45 = vadd.f32 %v1473_v2, %v1401_v62  ;;  %v4216_v27 = vadd.f32 %v1543_v0, %v1471_v9  ;;  %v3213_v9 = vld [vmem:[#allocation8 + $0x90] sm:$0xf]  ;;  %v3433_v2 = vld [vmem:[#allocation8 + $0x34] sm:$0xf]  ;;  %v3167_v0 = vld [vmem:[#allocation8 + $0x38] sm:$0xf0] }
 0x270   :  { %v4218_v15 = vpop.f32.mrf.mxu1  ;;  %v3214_v22 = vor.u32 %v3446_v12, %v3213_v9 }
 0x272   :  { %2142 = vmatpush.bf16.msrb.mxu1 %v3214_v22  ;;  %v4757_v22 = vld [vmem:[#allocation47_spill] sm:$0xff] }
 0x274   :  { %v1402_v53 = vpop.f32.mrf.mxu2 }
 0x275   :  { %v1403_v16 = vadd.f32 %v1402_v53, %v4124_v1  ;;  %v1475_v10 = vpop.f32.mrf.mxu3  ;;  %v3170_v53 = vor.u32 %v3433_v2, %v3167_v0 }
 0x276   :  { %v1546_v41 = vpop.f32.mrf.mxu0 }
 0x277   :  { %v1476_v3 = vadd.f32 %v1475_v10, %v1403_v16  ;;  %v1547_v6 = vadd.f32 %v1546_v41, %v1474_v45  ;;  %v3449_v45 = vld [vmem:[#allocation8 + $0xb4] sm:$0xf]  ;;  %v3231_v16 = vld [vmem:[#allocation8 + $0xb8] sm:$0xf0]  ;;  %2213 = vmatpush.bf16.msra.mxu2 %v3170_v53 }
 0x278   :  { %v1619_v38 = vpop.f32.mrf.mxu1  ;;  %v3234_v10 = vor.u32 %v3449_v45, %v3231_v16  ;;  %v3444_v16 = vld [vmem:[#allocation8 + $0x84] sm:$0xf0] }
 0x279   :  { %v4221_v47 = vadd.f32 %v1619_v38, %v1547_v6  ;;  %1671 = vmatmul.bf16.gmra.mxu2 %v4755_v50  ;;  %2086 = vmatmul.bf16.gmra.mxu0 %v4053_v29 }
 0x27a   :  { %1744 = vmatmul.bf16.gmra.mxu3 %v4756_v60 }
 0x27b   :  { %2286 = vmatpush.bf16.msra.mxu3 %v3234_v10 }
 0x27c   :  { %v1405_v39 = vpop.f32.mrf.mxu2 }
 0x27d   :  { %v1406_v58 = vadd.f32 %v1405_v39, %v4124_v1  ;;  %v1478_v51 = vpop.f32.mrf.mxu3  ;;  %v4758_v39 = vld [vmem:[#allocation49_spill] sm:$0xff] }
 0x27e   :  { %v1548_v52 = vpop.f32.mrf.mxu0 }
 0x27f   :  { %v1479_v57 = vadd.f32 %v1478_v51, %v1406_v58  ;;  %v4227_v36 = vadd.f32 %v1548_v52, %v1476_v3 }
 0x280   :  { %v4229_v62 = vpop.f32.mrf.mxu1 }
 0x284   :  { %v1407_v41 = vpop.f32.mrf.mxu2 }
 0x285   :  { %v1408_v6 = vadd.f32 %v1407_v41, %v4124_v1  ;;  %v1480_v38 = vpop.f32.mrf.mxu3 }
 0x286   :  { %v1551_v50 = vpop.f32.mrf.mxu0 }
 0x287   :  { %v1481_v60 = vadd.f32 %v1480_v38, %v1408_v6  ;;  %v1552_v9 = vadd.f32 %v1551_v50, %v1479_v57  ;;  %v3205_v57 = vld [vmem:[#allocation8 + $0x80] sm:$0xf] }
 0x288   :  { %v1624_v12 = vpop.f32.mrf.mxu1  ;;  %v3206_v10 = vor.u32 %v3444_v16, %v3205_v57 }
 0x289   :  { %v4232_v3 = vadd.f32 %v1624_v12, %v1552_v9  ;;  %1676 = vmatmul.bf16.gmra.mxu2 %v4757_v22  ;;  %2091 = vmatmul.bf16.gmra.mxu0 %v4063_v25 }
 0x28a   :  { %1749 = vmatmul.bf16.gmra.mxu3 %v4758_v39  ;;  %2143 = vmatpush.bf16.msrb.mxu1 %v3206_v10 }
 0x28c   :  { %v1410_v58 = vpop.f32.mrf.mxu2 }
 0x28d   :  { %v1411_v51 = vadd.f32 %v1410_v58, %v4124_v1  ;;  %v1483_v52 = vpop.f32.mrf.mxu3  ;;  %v4761_v58 = vld [vmem:[#allocation53_spill] sm:$0xff] }
 0x28e   :  { %v1553_v2 = vpop.f32.mrf.mxu0 }
 0x28f   :  { %v1484_v0 = vadd.f32 %v1483_v52, %v1411_v51  ;;  %v4238_v45 = vadd.f32 %v1553_v2, %v1481_v60  ;;  %v4762_v60 = vld [vmem:[#allocation55_spill] sm:$0xff]  ;;  %v3159_v52 = vld [vmem:[#allocation8 + $0x28] sm:$0xf0] }
 0x290   :  { %v4240_v53 = vpop.f32.mrf.mxu1  ;;  %v3431_v51 = vld [vmem:[#allocation8 + $0x24] sm:$0xf] }
 0x291   :  { %4759 = vst [vmem:[#allocation37_spill] sm:$0xff] %v4240_v53  ;;  %v3162_v2 = vor.u32 %v3431_v51, %v3159_v52 }
 0x293   :  { %2214 = vmatpush.bf16.msra.mxu2 %v3162_v2  ;;  %v4764_v2 = vld [vmem:[#allocation59_spill] sm:$0xff] }
 0x294   :  { %v1412_v41 = vpop.f32.mrf.mxu2 }
 0x295   :  { %v1413_v6 = vadd.f32 %v1412_v41, %v4124_v1  ;;  %v1485_v38 = vpop.f32.mrf.mxu3 }
 0x296   :  { %v1556_v50 = vpop.f32.mrf.mxu0 }
 0x297   :  { %v1486_v9 = vadd.f32 %v1485_v38, %v1413_v6  ;;  %v1557_v12 = vadd.f32 %v1556_v50, %v1484_v0  ;;  %v3447_v50 = vld [vmem:[#allocation8 + $0xa4] sm:$0xf] }
 0x298   :  { %v1629_v22 = vpop.f32.mrf.mxu1 }
 0x299   :  { %v4243_v39 = vadd.f32 %v1629_v22, %v1557_v12  ;;  %1681 = vmatmul.bf16.gmra.mxu2 %v4761_v58  ;;  %2096 = vmatmul.bf16.gmra.mxu0 %v4071_v49  ;;  %v3223_v12 = vld [vmem:[#allocation8 + $0xa8] sm:$0xf0] }
 0x29a   :  { %1754 = vmatmul.bf16.gmra.mxu3 %v4762_v60  ;;  %v3226_v22 = vor.u32 %v3447_v50, %v3223_v12 }
 0x29b   :  { %4760 = vst [vmem:[#allocation28_spill] sm:$0xff] %v4243_v39 }
 0x29c   :  { %v1415_v57 = vpop.f32.mrf.mxu2  ;;  %2287 = vmatpush.bf16.msra.mxu3 %v3226_v22 }
 0x29d   :  { %v1416_v16 = vadd.f32 %v1415_v57, %v4124_v1  ;;  %v1488_v10 = vpop.f32.mrf.mxu3 }
 0x29e   :  { %v1558_v41 = vpop.f32.mrf.mxu0 }
 0x29f   :  { %v1489_v6 = vadd.f32 %v1488_v10, %v1416_v16  ;;  %v4249_v0 = vadd.f32 %v1558_v41, %v1486_v9  ;;  %v4765_v9 = vld [vmem:[#allocation61_spill] sm:$0xff] }
 0x2a0   :  { %v4251_v38 = vpop.f32.mrf.mxu1 }
 0x2a4   :  { %v1417_v58 = vpop.f32.mrf.mxu2 }
 0x2a5   :  { %v1418_v60 = vadd.f32 %v1417_v58, %v4124_v1  ;;  %v1490_v39 = vpop.f32.mrf.mxu3 }
 0x2a6   :  { %v1561_v51 = vpop.f32.mrf.mxu0 }
 0x2a7   :  { %v1491_v52 = vadd.f32 %v1490_v39, %v1418_v60  ;;  %v1562_v49 = vadd.f32 %v1561_v51, %v1489_v6  ;;  %v3466_v39 = vld [vmem:[#allocation10 + $0x38] sm:$0xff] }
 0x2a8   :  { %v1634_v57 = vpop.f32.mrf.mxu1  ;;  %v3474_v6 = vld [vmem:[#allocation10 + $0x78] sm:$0xff]  ;;  %2563 = vmatpush.bf16.msra.mxu0 %v3466_v39 }
 0x2a9   :  { %v4254_v53 = vadd.f32 %v1634_v57, %v1562_v49  ;;  %1686 = vmatmul.bf16.gmra.mxu2 %v4764_v2  ;;  %2101 = vmatmul.bf16.gmra.mxu0 %v4079_v34 }
 0x2aa   :  { %1759 = vmatmul.bf16.gmra.mxu3 %v4765_v9  ;;  %2636 = vmatpush.bf16.msra.mxu1 %v3474_v6 }
 0x2ab   :  { %4763 = vst [vmem:[#allocation39_spill] sm:$0xff] %v4254_v53  ;;  %v4768_v53 = vld [vmem:[#allocation62_spill] sm:$0xff] }
 0x2ac   :  { %v1420_v16 = vpop.f32.mrf.mxu2 }
 0x2ad   :  { %v1421_v10 = vadd.f32 %v1420_v16, %v4124_v1  ;;  %v1493_v41 = vpop.f32.mrf.mxu3  ;;  %v3429_v1 = vld [vmem:[#allocation8 + $0x14] sm:$0xf] }
 0x2ae   :  { %v1563_v50 = vpop.f32.mrf.mxu0  ;;  %v3445_v16 = vld [vmem:[#allocation8 + $0x94] sm:$0xf] }
 0x2af   :  { %v1494_v12 = vadd.f32 %v1493_v41, %v1421_v10  ;;  %v4260_v22 = vadd.f32 %v1563_v50, %v1491_v52  ;;  %v3151_v52 = vld [vmem:[#allocation8 + $0x18] sm:$0xf0]  ;;  %v4769_v10 = vld [vmem:[#allocation64_spill] sm:$0xff] }
 0x2b0   :  { %v4262_v58 = vpop.f32.mrf.mxu1  ;;  %v3154_v41 = vor.u32 %v3429_v1, %v3151_v52  ;;  %v3215_v50 = vld [vmem:[#allocation8 + $0x98] sm:$0xf0] }
 0x2b1   :  { %4766 = vst [vmem:[#allocation45_spill] sm:$0xff] %v4262_v58  ;;  %v3218_v39 = vor.u32 %v3445_v16, %v3215_v50  ;;  %v4770_v52 = vld [vmem:[#allocation66_spill] sm:$0xff]  ;;  %v3465_v16 = vld [vmem:[#allocation10 + $0x30] sm:$0xff]  ;;  %v4771_v50 = vld [vmem:[#allocation68_spill] sm:$0xff] }
 0x2b2   :  { %2215 = vmatpush.bf16.msra.mxu2 %v3154_v41  ;;  %v3473_v41 = vld [vmem:[#allocation10 + $0x70] sm:$0xff]  ;;  %2564 = vmatpush.bf16.msra.mxu0 %v3465_v16 }
 0x2b3   :  { %2288 = vmatpush.bf16.msra.mxu3 %v3218_v39  ;;  %2637 = vmatpush.bf16.msra.mxu1 %v3473_v41 }
 0x2b4   :  { %v1422_v49 = vpop.f32.mrf.mxu2 }
 0x2b5   :  { %v1495_v60 = vpop.f32.mrf.mxu3 }
 0x2b6   :  { %v1566_v51 = vpop.f32.mrf.mxu0 }
 0x2b7   :  { %v1567_v57 = vadd.f32 %v1566_v51, %v1494_v12 }
 0x2b8   :  { %v1639_v2 = vpop.f32.mrf.mxu1 }
 0x2b9   :  { %v4264_v9 = vadd.f32 %v1639_v2, %v1567_v57  ;;  %1691 = vmatmul.bf16.gmra.mxu2 %v4768_v53  ;;  %2106 = vmatmul.bf16.gmra.mxu0 %v4087_v33 }
 0x2ba   :  { %1764 = vmatmul.bf16.gmra.mxu3 %v4769_v10 }
 0x2bb   :  { %4767 = vst [vmem:[#allocation50_spill] sm:$0xff] %v4264_v9 }
 0x2bc   :  { %v1652_v6 = vpop.f32.mrf.mxu2 }
 0x2bd   :  { %v1725_v49 = vpop.f32.mrf.mxu3  ;;  %v1653_v51 = vadd.f32 %v1652_v6, %v4130_v46 }
 0x2be   :  { %v1568_v12 = vpop.f32.mrf.mxu0 }
 0x2bf   :  { %v1726_v53 = vadd.f32 %v1725_v49, %v1653_v51  ;;  %v3143_v49 = vld [vmem:[#allocation8 + $0x8] sm:$0xf0] }
 0x2c0   :  { %v1641_v60 = vpop.f32.mrf.mxu1  ;;  %v3207_v51 = vld [vmem:[#allocation8 + $0x88] sm:$0xf0] }
 0x2c1   :  { %v1790_v10 = vmax.f32 %v1726_v53, 0.0  ;;  %v3443_v60 = vld [vmem:[#allocation8 + $0x84] sm:$0xf] }
 0x2c2   :  { %v3210_v53 = vor.u32 %v3443_v60, %v3207_v51  ;;  %v3472_v60 = vld [vmem:[#allocation10 + $0x68] sm:$0xff]  ;;  %v1592_v51 = vadd.f32 %v4161_v44, %v4159_v63 }
 0x2c3   :  { %2638 = vmatpush.bf16.msra.mxu1 %v3472_v60 }
 0x2c4   :  { %v1654_v57 = vpop.f32.mrf.mxu2  ;;  %2289 = vmatpush.bf16.msra.mxu3 %v3210_v53 }
 0x2c5   :  { %v1655_v2 = vadd.f32 %v1654_v57, %v4137_v23  ;;  %v1727_v9 = vpop.f32.mrf.mxu3  ;;  %v1587_v57 = vadd.f32 %v4149_v4, %v4147_v30 }
 0x2c6   :  { %v4271_v33 = vpop.f32.mrf.mxu0 }
 0x2c7   :  { %v1728_v58 = vadd.f32 %v1727_v9, %v1655_v2  ;;  %v3427_v9 = vld [vmem:[#allocation8 + $0x4] sm:$0xf] }
 0x2c8   :  { %v3146_v12 = vor.u32 %v3427_v9, %v3143_v49  ;;  %v4773_v9 = vld [vmem:[#allocation70_spill] sm:$0xff] }
 0x2c9   :  { %v1792_v1 = vmax.f32 %v1728_v58, 0.0  ;;  %1696 = vmatmul.bf16.gmra.mxu2 %v4770_v52  ;;  %2111 = vmatmul.bf16.gmra.mxu0 %v4095_v35 }
 0x2ca   :  { %1769 = vmatmul.bf16.gmra.mxu3 %v4771_v50  ;;  %2216 = vmatpush.bf16.msra.mxu2 %v3146_v12  ;;  %v3464_v12 = vld [vmem:[#allocation10 + $0x28] sm:$0xff] }
 0x2cb   :  { %v4276_v39 = vpack.c.bf16 %v1792_v1, %v1790_v10  ;;  %2565 = vmatpush.bf16.msra.mxu0 %v3464_v12 }
 0x2cc   :  { %v1657_v46 = vpop.f32.mrf.mxu2 }
 0x2cd   :  { %v1730_v23 = vpop.f32.mrf.mxu3  ;;  %2144 = vmatmul.bf16.vlgmr.msrb.gmra.mxu1 %v4276_v39  ;;  %v1658_v58 = vadd.f32 %v1657_v46, %v4140_v54  ;;  %v4772_v46 = vld [vmem:[#allocation69_spill] sm:$0xff] }
 0x2ce   :  { %v4279_v6 = vpop.f32.mrf.mxu0 }
 0x2cf   :  { %v1731_v10 = vadd.f32 %v1730_v23, %v1658_v58 }
 0x2d1   :  { %v1794_v50 = vmax.f32 %v1731_v10, 0.0 }
 0x2d4   :  { %v1659_v2 = vpop.f32.mrf.mxu2 }
 0x2d5   :  { %v1660_v1 = vadd.f32 %v1659_v2, %v1587_v57  ;;  %v1732_v52 = vpop.f32.mrf.mxu3 }
 0x2d6   :  { %v4284_v16 = vpop.f32.mrf.mxu0 }
 0x2d7   :  { %v1733_v41 = vadd.f32 %v1732_v52, %v1660_v1 }
 0x2d9   :  { %v1796_v54 = vmax.f32 %v1733_v41, 0.0  ;;  %1701 = vmatmul.bf16.gmra.mxu2 %v4772_v46  ;;  %2116 = vmatmul.bf16.gmra.mxu0 %v4103_v5 }
 0x2da   :  { %1774 = vmatmul.bf16.gmra.mxu3 %v4773_v9  ;;  %v1597_v9 = vadd.f32 %v4173_v61, %v4171_v20 }
 0x2db   :  { %v4289_v49 = vpack.c.bf16 %v1796_v54, %v1794_v50 }
 0x2dc   :  { %v1662_v30 = vpop.f32.mrf.mxu2 }
 0x2dd   :  { %v1735_v4 = vpop.f32.mrf.mxu3  ;;  %2149 = vmatmul.bf16.gmra.mxu1 %v4289_v49  ;;  %v1663_v58 = vadd.f32 %v1662_v30, %v4152_v48 }
 0x2de   :  { %v4292_v23 = vpop.f32.mrf.mxu0 }
 0x2df   :  { %v1736_v53 = vadd.f32 %v1735_v4, %v1663_v58 }
 0x2e1   :  { %v1798_v41 = vmax.f32 %v1736_v53, 0.0 }
 0x2e4   :  { %v1664_v57 = vpop.f32.mrf.mxu2 }
 0x2e5   :  { %v1665_v2 = vadd.f32 %v1664_v57, %v1592_v51  ;;  %v1737_v10 = vpop.f32.mrf.mxu3  ;;  %v3463_v57 = vld [vmem:[#allocation10 + $0x20] sm:$0xff] }
 0x2e6   :  { %v4297_v1 = vpop.f32.mrf.mxu0  ;;  %2566 = vmatpush.bf16.msra.mxu0 %v3463_v57 }
 0x2e7   :  { %v1738_v52 = vadd.f32 %v1737_v10, %v1665_v2 }
 0x2e9   :  { %v1800_v50 = vmax.f32 %v1738_v52, 0.0  ;;  %1706 = vmatmul.bf16.gmra.mxu2 %v4037_v18  ;;  %2121 = vmatmul.bf16.gmra.mxu0 %v4111_v40  ;;  %v1602_v52 = vadd.f32 %v4185_v59, %v4183_v7 }
 0x2ea   :  { %1779 = vmatmul.bf16.gmra.mxu3 %v4043_v37 }
 0x2eb   :  { %v4302_v48 = vpack.c.bf16 %v1800_v50, %v1798_v41 }
 0x2ec   :  { %v1667_v63 = vpop.f32.mrf.mxu2 }
 0x2ed   :  { %v1740_v44 = vpop.f32.mrf.mxu3  ;;  %2154 = vmatmul.bf16.gmra.mxu1 %v4302_v48  ;;  %v1668_v46 = vadd.f32 %v1667_v63, %v4164_v21  ;;  %v3471_v21 = vld [vmem:[#allocation10 + $0x60] sm:$0xff] }
 0x2ee   :  { %v4305_v54 = vpop.f32.mrf.mxu0  ;;  %2639 = vmatpush.bf16.msra.mxu1 %v3471_v21 }
 0x2ef   :  { %v1741_v4 = vadd.f32 %v1740_v44, %v1668_v46 }
 0x2f1   :  { %v1802_v60 = vmax.f32 %v1741_v4, 0.0 }
 0x2f4   :  { %v1669_v30 = vpop.f32.mrf.mxu2 }
 0x2f5   :  { %v1670_v18 = vadd.f32 %v1669_v30, %v1597_v9  ;;  %v1742_v58 = vpop.f32.mrf.mxu3 }
 0x2f6   :  { %v4310_v12 = vpop.f32.mrf.mxu0 }
 0x2f7   :  { %v1743_v37 = vadd.f32 %v1742_v58, %v1670_v18  ;;  %v1607_v58 = vadd.f32 %v4196_v13, %v4194_v32 }
 0x2f9   :  { %v1804_v51 = vmax.f32 %v1743_v37, 0.0  ;;  %1711 = vmatmul.bf16.gmra.mxu2 %v4051_v24  ;;  %2126 = vmatmul.bf16.gmra.mxu0 %v4118_v55  ;;  %v1837_v24 = vmax.f32 %v4120_v26, 0.0 }
 0x2fa   :  { %1784 = vmatmul.bf16.gmra.mxu3 %v4055_v56 }
 0x2fb   :  { %v4315_v53 = vpack.c.bf16 %v1804_v51, %v1802_v60  ;;  %v4326_v46 = vpack.c.bf16 %v1837_v24, %v1837_v24 }
 0x2fc   :  { %v1672_v20 = vpop.f32.mrf.mxu2 }
 0x2fd   :  { %v1745_v61 = vpop.f32.mrf.mxu3  ;;  %2159 = vmatmul.bf16.gmra.mxu1 %v4315_v53  ;;  %v1673_v10 = vadd.f32 %v1672_v20, %v4176_v42 }
 0x2fe   :  { %v4318_v2 = vpop.f32.mrf.mxu0 }
 0x2ff   :  { %v1746_v41 = vadd.f32 %v1745_v61, %v1673_v10  ;;  %v3462_v61 = vld [vmem:[#allocation10 + $0x18] sm:$0xff] }
 0x300   :  { %v3470_v10 = vld [vmem:[#allocation10 + $0x58] sm:$0xff]  ;;  %2567 = vmatpush.bf16.msra.mxu0 %v3462_v61 }
 0x301   :  { %v1806_v30 = vmax.f32 %v1746_v41, 0.0  ;;  %2640 = vmatpush.bf16.msra.mxu1 %v3470_v10 }
 0x304   :  { %v1674_v56 = vpop.f32.mrf.mxu2 }
 0x305   :  { %v1675_v50 = vadd.f32 %v1674_v56, %v1602_v52  ;;  %v1747_v63 = vpop.f32.mrf.mxu3  ;;  %v1612_v56 = vadd.f32 %v4207_v19, %v4205_v28  ;;  %v3461_v28 = vld [vmem:[#allocation10 + $0x10] sm:$0xff] }
 0x306   :  { %v4324_v44 = vpop.f32.mrf.mxu0  ;;  %2568 = vmatpush.bf16.msra.mxu0 %v3461_v28 }
 0x307   :  { %v1748_v9 = vadd.f32 %v1747_v63, %v1675_v50 }
 0x309   :  { %v1808_v4 = vmax.f32 %v1748_v9, 0.0  ;;  %2131 = vmatmul.bf16.gmra.mxu0 %v4326_v46  ;;  %2217 = vmatmul.bf16.vlgmr.msra.gmra.mxu2 %v4749_v31 }
 0x30a   :  { %2290 = vmatmul.bf16.vlgmr.msra.gmra.mxu3 %v4276_v39 }
 0x30b   :  { %v4331_v26 = vpack.c.bf16 %v1808_v4, %v1806_v30 }
 0x30c   :  { %v1677_v42 = vpop.f32.mrf.mxu2 }
 0x30d   :  { %v1750_v7 = vpop.f32.mrf.mxu3  ;;  %2164 = vmatmul.bf16.gmra.mxu1 %v4331_v26  ;;  %v1678_v18 = vadd.f32 %v1677_v42, %v4188_v17 }
 0x30e   :  { %v4334_v59 = vpop.f32.mrf.mxu0 }
 0x30f   :  { %v1751_v60 = vadd.f32 %v1750_v7, %v1678_v18 }
 0x311   :  { %v1810_v21 = vmax.f32 %v1751_v60, 0.0  ;;  %v1617_v60 = vadd.f32 %v4218_v15, %v4216_v27 }
 0x314   :  { %v1679_v37 = vpop.f32.mrf.mxu2 }
 0x315   :  { %v1680_v51 = vadd.f32 %v1679_v37, %v1607_v58  ;;  %v1752_v57 = vpop.f32.mrf.mxu3  ;;  %v3469_v58 = vld [vmem:[#allocation10 + $0x50] sm:$0xff]  ;;  %v3460_v37 = vld [vmem:[#allocation10 + $0x8] sm:$0xff] }
 0x316   :  { %v4339_v31 = vpop.f32.mrf.mxu0  ;;  %2641 = vmatpush.bf16.msra.mxu1 %v3469_v58  ;;  %2569 = vmatpush.bf16.msra.mxu0 %v3460_v37 }
 0x317   :  { %v1753_v39 = vadd.f32 %v1752_v57, %v1680_v51 }
 0x319   :  { %v1812_v20 = vmax.f32 %v1753_v39, 0.0  ;;  %2222 = vmatmul.bf16.gmra.mxu2 %v4023_v43  ;;  %v3459_v39 = vld [vmem:[#allocation10] sm:$0xff] }
 0x31a   :  { %2295 = vmatmul.bf16.gmra.mxu3 %v4289_v49  ;;  %2570 = vmatpush.bf16.msra.mxu0 %v3459_v39 }
 0x31b   :  { %v4343_v24 = vpack.c.bf16 %v1812_v20, %v1810_v21 }
 0x31c   :  { %v1682_v17 = vpop.f32.mrf.mxu2 }
 0x31d   :  { %v1755_v32 = vpop.f32.mrf.mxu3  ;;  %2169 = vmatmul.bf16.gmra.mxu1 %v4343_v24  ;;  %v1683_v52 = vadd.f32 %v1682_v17, %v4199_v14 }
 0x31e   :  { %v4346_v13 = vpop.f32.mrf.mxu0 }
 0x31f   :  { %v1756_v41 = vadd.f32 %v1755_v32, %v1683_v52  ;;  %v1622_v52 = vadd.f32 %v4229_v62, %v4227_v36  ;;  %v3468_v36 = vld [vmem:[#allocation10 + $0x48] sm:$0xff] }
 0x320   :  { %2642 = vmatpush.bf16.msra.mxu1 %v3468_v36 }
 0x321   :  { %v1814_v30 = vmax.f32 %v1756_v41, 0.0 }
 0x324   :  { %v1684_v43 = vpop.f32.mrf.mxu2 }
 0x325   :  { %v1685_v50 = vadd.f32 %v1684_v43, %v1612_v56  ;;  %v1757_v63 = vpop.f32.mrf.mxu3 }
 0x326   :  { %v4351_v49 = vpop.f32.mrf.mxu0 }
 0x327   :  { %v1758_v9 = vadd.f32 %v1757_v63, %v1685_v50  ;;  %v4380_v63 = vld [vmem:[%s4601_s4] sm:$0x3] }
 0x328   :  { %v4385_v62 = vperm.slane %v4380_v63, 0 }
 0x329   :  { %v1816_v4 = vmax.f32 %v1758_v9, 0.0  ;;  %2227 = vmatmul.bf16.gmra.mxu2 %v4039_v8 }
 0x32a   :  { %2300 = vmatmul.bf16.gmra.mxu3 %v4302_v48 }
 0x32b   :  { %v4355_v42 = vpack.c.bf16 %v1816_v4, %v1814_v30 }
 0x32c   :  { %v1687_v7 = vpop.f32.mrf.mxu2 }
 0x32d   :  { %v1760_v14 = vpop.f32.mrf.mxu3  ;;  %2174 = vmatmul.bf16.gmra.mxu1 %v4355_v42  ;;  %v1688_v18 = vadd.f32 %v1687_v7, %v4210_v11 }
 0x32e   :  { %v4358_v19 = vpop.f32.mrf.mxu0 }
 0x32f   :  { %v1761_v48 = vadd.f32 %v1760_v14, %v1688_v18  ;;  %v2073_v18 = vadd.f32 %v4271_v33, %v4385_v62 }
 0x331   :  { %v1818_v61 = vmax.f32 %v1761_v48, 0.0 }
 0x334   :  { %v1689_v8 = vpop.f32.mrf.mxu2 }
 0x335   :  { %v1690_v51 = vadd.f32 %v1689_v8, %v1617_v60  ;;  %v1762_v57 = vpop.f32.mrf.mxu3  ;;  %v4774_v60 = vld [vmem:[#allocation37_spill] sm:$0xff] }
 0x336   :  { %v4363_v21 = vpop.f32.mrf.mxu0  ;;  %v1627_v8 = vadd.f32 %v4774_v60, %v4238_v45  ;;  %v3467_v60 = vld [vmem:[#allocation10 + $0x40] sm:$0xff] }
 0x337   :  { %v1763_v20 = vadd.f32 %v1762_v57, %v1690_v51  ;;  %2643 = vmatpush.bf16.msra.mxu1 %v3467_v60  ;;  %v2090_v60 = vadd.f32 %v4318_v2, %v4385_v62 }
 0x339   :  { %v1820_v10 = vmax.f32 %v1763_v20, 0.0  ;;  %2232 = vmatmul.bf16.gmra.mxu2 %v4053_v29 }
 0x33a   :  { %2305 = vmatmul.bf16.gmra.mxu3 %v4315_v53 }
 0x33b   :  { %v4367_v11 = vpack.c.bf16 %v1820_v10, %v1818_v61 }
 0x33c   :  { %v1692_v27 = vpop.f32.mrf.mxu2 }
 0x33d   :  { %v1765_v15 = vpop.f32.mrf.mxu3  ;;  %2179 = vmatmul.bf16.gmra.mxu1 %v4367_v11  ;;  %v1693_v32 = vadd.f32 %v1692_v27, %v4221_v47 }
 0x33e   :  { %v4370_v17 = vpop.f32.mrf.mxu0 }
 0x33f   :  { %v1766_v43 = vadd.f32 %v1765_v15, %v1693_v32 }
 0x341   :  { %v1822_v9 = vmax.f32 %v1766_v43, 0.0 }
 0x344   :  { %v1694_v56 = vpop.f32.mrf.mxu2 }
 0x345   :  { %v1695_v41 = vadd.f32 %v1694_v56, %v1622_v52  ;;  %v1767_v50 = vpop.f32.mrf.mxu3  ;;  %v4775_v52 = vld [vmem:[#allocation71_spill] sm:$0xff] }
 0x346   :  { %v4375_v29 = vpop.f32.mrf.mxu0 }
 0x347   :  { %v1768_v53 = vadd.f32 %v1767_v50, %v1695_v41  ;;  %v2078_v50 = vadd.f32 %v4284_v16, %v4385_v62 }
 0x349   :  { %v1824_v30 = vmax.f32 %v1768_v53, 0.0  ;;  %2237 = vmatmul.bf16.gmra.mxu2 %v4063_v25  ;;  %v2075_v25 = vadd.f32 %v4279_v6, %v4385_v62  ;;  %v2080_v53 = vadd.f32 %v4292_v23, %v4385_v62 }
 0x34a   :  { %2310 = vmatmul.bf16.gmra.mxu3 %v4331_v26  ;;  %v2145_v47 = vpop.f32.mrf.mxu1 }
 0x34b   :  { %v4387_v4 = vpack.c.bf16 %v1824_v30, %v1822_v9  ;;  %v2146_v26 = vadd.f32 %v2145_v47, %v2073_v18  ;;  %v4776_v30 = vld [vmem:[#allocation28_spill] sm:$0xff] }
 0x34c   :  { %v1697_v7 = vpop.f32.mrf.mxu2 }
 0x34d   :  { %v1770_v14 = vpop.f32.mrf.mxu3  ;;  %2184 = vmatmul.bf16.gmra.mxu1 %v4387_v4  ;;  %v1698_v58 = vadd.f32 %v1697_v7, %v4232_v3  ;;  %v2355_v57 = vmax.f32 %v2146_v26, 0.0 }
 0x34e   :  { %v4390_v28 = vpop.f32.mrf.mxu0 }
 0x34f   :  { %v1771_v39 = vadd.f32 %v1770_v14, %v1698_v58 }
 0x351   :  { %v1826_v32 = vmax.f32 %v1771_v39, 0.0 }
 0x352   :  { %v2147_v37 = vpop.f32.mrf.mxu1 }
 0x353   :  { %v2148_v48 = vadd.f32 %v2147_v37, %v2075_v25 }
 0x354   :  { %v1699_v51 = vpop.f32.mrf.mxu2 }
 0x355   :  { %v2357_v20 = vmax.f32 %v2148_v48, 0.0  ;;  %v1700_v61 = vadd.f32 %v1699_v51, %v1627_v8  ;;  %v1772_v10 = vpop.f32.mrf.mxu3 }
 0x356   :  { %v4399_v27 = vpop.f32.mrf.mxu0 }
 0x357   :  { %v2405_v33 = vpack.c.bf16 %v2357_v20, %v2355_v57  ;;  %v1773_v15 = vadd.f32 %v1772_v10, %v1700_v61  ;;  %v2083_v61 = vadd.f32 %v4297_v1, %v4385_v62  ;;  %v2085_v10 = vadd.f32 %v4305_v54, %v4385_v62 }
 0x359   :  { %v1828_v6 = vmax.f32 %v1773_v15, 0.0  ;;  %2242 = vmatmul.bf16.gmra.mxu2 %v4775_v52  ;;  %2571 = vmatmul.bf16.vlgmr.msra.gmra.mxu0 %v2405_v33 }
 0x35a   :  { %2315 = vmatmul.bf16.gmra.mxu3 %v4343_v24  ;;  %v2150_v3 = vpop.f32.mrf.mxu1  ;;  %v1632_v24 = vadd.f32 %v4251_v38, %v4249_v0 }
 0x35b   :  { %v4403_v45 = vpack.c.bf16 %v1828_v6, %v1826_v32  ;;  %v2151_v9 = vadd.f32 %v2150_v3, %v2078_v50 }
 0x35c   :  { %v1702_v56 = vpop.f32.mrf.mxu2 }
 0x35d   :  { %v1775_v43 = vpop.f32.mrf.mxu3  ;;  %2189 = vmatmul.bf16.gmra.mxu1 %v4403_v45  ;;  %v1703_v47 = vadd.f32 %v1702_v56, %v4776_v30  ;;  %v2359_v18 = vmax.f32 %v2151_v9, 0.0 }
 0x35e   :  { %v4406_v41 = vpop.f32.mrf.mxu0 }
 0x35f   :  { %v1776_v25 = vadd.f32 %v1775_v43, %v1703_v47 }
 0x361   :  { %v1830_v23 = vmax.f32 %v1776_v25, 0.0 }
 0x362   :  { %v2152_v36 = vpop.f32.mrf.mxu1 }
 0x363   :  { %v2153_v7 = vadd.f32 %v2152_v36, %v2080_v53 }
 0x364   :  { %v1704_v14 = vpop.f32.mrf.mxu2 }
 0x365   :  { %v2361_v26 = vmax.f32 %v2153_v7, 0.0  ;;  %v1705_v58 = vadd.f32 %v1704_v14, %v1632_v24  ;;  %v1777_v37 = vpop.f32.mrf.mxu3  ;;  %v4779_v24 = vld [vmem:[#allocation72_spill] sm:$0xff] }
 0x366   :  { %v4415_v8 = vpop.f32.mrf.mxu0 }
 0x367   :  { %v1778_v16 = vadd.f32 %v1777_v37, %v1705_v58  ;;  %v2407_v48 = vpack.c.bf16 %v2361_v26, %v2359_v18  ;;  %v2088_v26 = vadd.f32 %v4310_v12, %v4385_v62  ;;  %v4780_v58 = vld [vmem:[#allocation50_spill] sm:$0xff] }
 0x369   :  { %v1832_v51 = vmax.f32 %v1778_v16, 0.0  ;;  %2247 = vmatmul.bf16.gmra.mxu2 %v4079_v34  ;;  %2576 = vmatmul.bf16.gmra.mxu0 %v2407_v48  ;;  %v4777_v34 = vld [vmem:[#allocation39_spill] sm:$0xff] }
 0x36a   :  { %2320 = vmatmul.bf16.gmra.mxu3 %v4355_v42  ;;  %v2155_v0 = vpop.f32.mrf.mxu1  ;;  %v4778_v42 = vld [vmem:[#allocation45_spill] sm:$0xff] }
 0x36b   :  { %v4419_v38 = vpack.c.bf16 %v1832_v51, %v1830_v23  ;;  %v2156_v33 = vadd.f32 %v2155_v0, %v2083_v61  ;;  %v1637_v6 = vadd.f32 %v4778_v42, %v4260_v22 }
 0x36c   :  { %v1707_v57 = vpop.f32.mrf.mxu2 }
 0x36d   :  { %v1780_v39 = vpop.f32.mrf.mxu3  ;;  %2194 = vmatmul.bf16.gmra.mxu1 %v4419_v38  ;;  %v1708_v15 = vadd.f32 %v1707_v57, %v4777_v34  ;;  %v2363_v56 = vmax.f32 %v2156_v33, 0.0 }
 0x36e   :  { %v4422_v20 = vpop.f32.mrf.mxu0 }
 0x36f   :  { %v1781_v43 = vadd.f32 %v1780_v39, %v1708_v15  ;;  %v4452_v15 = vperm.slane %v4380_v63, 1 }
 0x371   :  { %v1834_v36 = vmax.f32 %v1781_v43, 0.0 }
 0x372   :  { %v2157_v32 = vpop.f32.mrf.mxu1 }
 0x373   :  { %v2158_v52 = vadd.f32 %v2157_v32, %v2085_v10 }
 0x374   :  { %v1709_v3 = vpop.f32.mrf.mxu2 }
 0x375   :  { %v2365_v50 = vmax.f32 %v2158_v52, 0.0  ;;  %v1710_v53 = vadd.f32 %v1709_v3, %v1637_v6  ;;  %v1782_v9 = vpop.f32.mrf.mxu3  ;;  %v2093_v6 = vadd.f32 %v4324_v44, %v4385_v62 }
 0x376   :  { %v4431_v30 = vpop.f32.mrf.mxu0 }
 0x377   :  { %v1783_v1 = vadd.f32 %v1782_v9, %v1710_v53  ;;  %v2409_v47 = vpack.c.bf16 %v2365_v50, %v2363_v56 }
 0x379   :  { %v1836_v54 = vmax.f32 %v1783_v1, 0.0  ;;  %2252 = vmatmul.bf16.gmra.mxu2 %v4779_v24  ;;  %2581 = vmatmul.bf16.gmra.mxu0 %v2409_v47 }
 0x37a   :  { %2325 = vmatmul.bf16.gmra.mxu3 %v4367_v11  ;;  %v2160_v7 = vpop.f32.mrf.mxu1 }
 0x37b   :  { %v4435_v22 = vpack.c.bf16 %v1836_v54, %v1834_v36  ;;  %v2161_v16 = vadd.f32 %v2160_v7, %v2088_v26  ;;  %v2100_v26 = vadd.f32 %v4346_v13, %v4385_v62 }
 0x37c   :  { %v1712_v14 = vpop.f32.mrf.mxu2 }
 0x37d   :  { %v1785_v18 = vpop.f32.mrf.mxu3  ;;  %2199 = vmatmul.bf16.gmra.mxu1 %v4435_v22  ;;  %v1713_v37 = vadd.f32 %v1712_v14, %v4780_v58  ;;  %v2367_v0 = vmax.f32 %v2161_v16, 0.0 }
 0x37e   :  { %v4438_v25 = vpop.f32.mrf.mxu0 }
 0x37f   :  { %v1786_v11 = vadd.f32 %v1785_v18, %v1713_v37  ;;  %v2098_v18 = vadd.f32 %v4339_v31, %v4385_v62 }
 0x381   :  { %v1838_v10 = vmax.f32 %v1786_v11, 0.0 }
 0x382   :  { %v2162_v48 = vpop.f32.mrf.mxu1 }
 0x383   :  { %v2163_v23 = vadd.f32 %v2162_v48, %v2090_v60  ;;  %v4449_v34 = vpack.c.bf16 %v1838_v10, %v1838_v10 }
 0x384   :  { %v1714_v51 = vpop.f32.mrf.mxu2 }
 0x385   :  { %v2369_v57 = vmax.f32 %v2163_v23, 0.0  ;;  %v1787_v39 = vpop.f32.mrf.mxu3 }
 0x386   :  { %v4445_v61 = vpop.f32.mrf.mxu0 }
 0x387   :  { %v2411_v33 = vpack.c.bf16 %v2369_v57, %v2367_v0 }
 0x389   :  { %2257 = vmatmul.bf16.gmra.mxu2 %v4095_v35  ;;  %2586 = vmatmul.bf16.gmra.mxu0 %v2411_v33  ;;  %v2095_v35 = vadd.f32 %v4334_v59, %v4385_v62 }
 0x38a   :  { %2330 = vmatmul.bf16.gmra.mxu3 %v4387_v4  ;;  %v2165_v12 = vpop.f32.mrf.mxu1 }
 0x38b   :  { %v2166_v52 = vadd.f32 %v2165_v12, %v2093_v6 }
 0x38c   :  { %v2218_v2 = vpop.f32.mrf.mxu2 }
 0x38d   :  { %v2291_v32 = vpop.f32.mrf.mxu3  ;;  %2204 = vmatmul.bf16.gmra.mxu1 %v4449_v34  ;;  %v2219_v4 = vadd.f32 %v2218_v2, %v4452_v15  ;;  %v2371_v50 = vmax.f32 %v2166_v52, 0.0  ;;  %v2103_v2 = vadd.f32 %v4351_v49, %v4385_v62 }
 0x38e   :  { %v2134_v42 = vpop.f32.mrf.mxu0 }
 0x38f   :  { %v2292_v53 = vadd.f32 %v2291_v32, %v2219_v4  ;;  %v2105_v32 = vadd.f32 %v4358_v19, %v4385_v62 }
 0x391   :  { %v2356_v54 = vmax.f32 %v2292_v53, 0.0 }
 0x392   :  { %v2167_v3 = vpop.f32.mrf.mxu1 }
 0x393   :  { %v2168_v56 = vadd.f32 %v2167_v3, %v2095_v35 }
 0x394   :  { %v2220_v43 = vpop.f32.mrf.mxu2 }
 0x395   :  { %v2373_v63 = vmax.f32 %v2168_v56, 0.0  ;;  %v2221_v9 = vadd.f32 %v2220_v43, %v4452_v15  ;;  %v2293_v1 = vpop.f32.mrf.mxu3 }
 0x397   :  { %v2294_v47 = vadd.f32 %v2293_v1, %v2221_v9  ;;  %v2413_v36 = vpack.c.bf16 %v2373_v63, %v2371_v50 }
 0x399   :  { %v2358_v24 = vmax.f32 %v2294_v47, 0.0  ;;  %2262 = vmatmul.bf16.gmra.mxu2 %v4103_v5  ;;  %2591 = vmatmul.bf16.gmra.mxu0 %v2413_v36  ;;  %v2108_v36 = vadd.f32 %v4363_v21, %v4385_v62 }
 0x39a   :  { %2335 = vmatmul.bf16.gmra.mxu3 %v4403_v45  ;;  %v2170_v44 = vpop.f32.mrf.mxu1 }
 0x39b   :  { %v2406_v59 = vpack.c.bf16 %v2358_v24, %v2356_v54  ;;  %v2171_v58 = vadd.f32 %v2170_v44, %v2098_v18  ;;  %v2110_v54 = vadd.f32 %v4370_v17, %v4385_v62 }
 0x39c   :  { %v2223_v7 = vpop.f32.mrf.mxu2 }
 0x39d   :  { %v2296_v14 = vpop.f32.mrf.mxu3  ;;  %2644 = vmatmul.bf16.vlgmr.msra.gmra.mxu1 %v2406_v59  ;;  %v2224_v37 = vadd.f32 %v2223_v7, %v4452_v15  ;;  %v2375_v48 = vmax.f32 %v2171_v58, 0.0 }
 0x39f   :  { %v2297_v11 = vadd.f32 %v2296_v14, %v2224_v37 }
 0x3a1   :  { %v2360_v39 = vmax.f32 %v2297_v11, 0.0 }
 0x3a2   :  { %v2172_v60 = vpop.f32.mrf.mxu1 }
 0x3a3   :  { %v2173_v16 = vadd.f32 %v2172_v60, %v2100_v26 }
 0x3a4   :  { %v2225_v5 = vpop.f32.mrf.mxu2 }
 0x3a5   :  { %v2377_v45 = vmax.f32 %v2173_v16, 0.0  ;;  %v2226_v23 = vadd.f32 %v2225_v5, %v4452_v15  ;;  %v2298_v51 = vpop.f32.mrf.mxu3 }
 0x3a7   :  { %v2299_v0 = vadd.f32 %v2298_v51, %v2226_v23  ;;  %v2415_v57 = vpack.c.bf16 %v2377_v45, %v2375_v48  ;;  %v2113_v45 = vadd.f32 %v4375_v29, %v4385_v62  ;;  %v2115_v23 = vadd.f32 %v4390_v28, %v4385_v62 }
 0x3a9   :  { %v2362_v10 = vmax.f32 %v2299_v0, 0.0  ;;  %2267 = vmatmul.bf16.gmra.mxu2 %v4111_v40  ;;  %2596 = vmatmul.bf16.gmra.mxu0 %v2415_v57 }
 0x3aa   :  { %2340 = vmatmul.bf16.gmra.mxu3 %v4419_v38  ;;  %v2175_v31 = vpop.f32.mrf.mxu1 }
 0x3ab   :  { %v2408_v13 = vpack.c.bf16 %v2362_v10, %v2360_v39  ;;  %v2176_v42 = vadd.f32 %v2175_v31, %v2103_v2 }
 0x3ac   :  { %v2228_v33 = vpop.f32.mrf.mxu2 }
 0x3ad   :  { %v2301_v12 = vpop.f32.mrf.mxu3  ;;  %2649 = vmatmul.bf16.gmra.mxu1 %v2408_v13  ;;  %v2229_v6 = vadd.f32 %v2228_v33, %v4452_v15  ;;  %v2379_v4 = vmax.f32 %v2176_v42, 0.0 }
 0x3af   :  { %v2302_v3 = vadd.f32 %v2301_v12, %v2229_v6 }
 0x3b1   :  { %v2364_v63 = vmax.f32 %v2302_v3, 0.0  ;;  %v2120_v3 = vadd.f32 %v4406_v41, %v4385_v62 }
 0x3b2   :  { %v2177_v35 = vpop.f32.mrf.mxu1 }
 0x3b3   :  { %v2178_v52 = vadd.f32 %v2177_v35, %v2105_v32 }
 0x3b4   :  { %v2230_v40 = vpop.f32.mrf.mxu2 }
 0x3b5   :  { %v2381_v38 = vmax.f32 %v2178_v52, 0.0  ;;  %v2231_v56 = vadd.f32 %v2230_v40, %v4452_v15  ;;  %v2303_v43 = vpop.f32.mrf.mxu3 }
 0x3b7   :  { %v2304_v50 = vadd.f32 %v2303_v43, %v2231_v56  ;;  %v2417_v53 = vpack.c.bf16 %v2381_v38, %v2379_v4  ;;  %v2118_v4 = vadd.f32 %v4399_v27, %v4385_v62 }
 0x3b9   :  { %v2366_v9 = vmax.f32 %v2304_v50, 0.0  ;;  %2272 = vmatmul.bf16.gmra.mxu2 %v4118_v55  ;;  %2601 = vmatmul.bf16.gmra.mxu0 %v2417_v53 }
 0x3ba   :  { %2345 = vmatmul.bf16.gmra.mxu3 %v4435_v22  ;;  %v2180_v49 = vpop.f32.mrf.mxu1 }
 0x3bb   :  { %v2410_v19 = vpack.c.bf16 %v2366_v9, %v2364_v63  ;;  %v2181_v24 = vadd.f32 %v2180_v49, %v2108_v36 }
 0x3bc   :  { %v2233_v1 = vpop.f32.mrf.mxu2 }
 0x3bd   :  { %v2306_v47 = vpop.f32.mrf.mxu3  ;;  %2654 = vmatmul.bf16.gmra.mxu1 %v2410_v19  ;;  %v2234_v44 = vadd.f32 %v2233_v1, %v4452_v15  ;;  %v2383_v14 = vmax.f32 %v2181_v24, 0.0 }
 0x3bf   :  { %v2307_v18 = vadd.f32 %v2306_v47, %v2234_v44 }
 0x3c1   :  { %v2368_v16 = vmax.f32 %v2307_v18, 0.0  ;;  %v2125_v18 = vadd.f32 %v4422_v20, %v4385_v62 }
 0x3c2   :  { %v2182_v59 = vpop.f32.mrf.mxu1 }
 0x3c3   :  { %v2183_v7 = vadd.f32 %v2182_v59, %v2110_v54 }
 0x3c4   :  { %v2235_v55 = vpop.f32.mrf.mxu2 }
 0x3c5   :  { %v2385_v22 = vmax.f32 %v2183_v7, 0.0  ;;  %v2236_v26 = vadd.f32 %v2235_v55, %v4452_v15  ;;  %v2308_v58 = vpop.f32.mrf.mxu3 }
 0x3c7   :  { %v2309_v37 = vadd.f32 %v2308_v58, %v2236_v26  ;;  %v2419_v60 = vpack.c.bf16 %v2385_v22, %v2383_v14  ;;  %v2123_v14 = vadd.f32 %v4415_v8, %v4385_v62 }
 0x3c9   :  { %v2370_v5 = vmax.f32 %v2309_v37, 0.0  ;;  %2277 = vmatmul.bf16.gmra.mxu2 %v4326_v46  ;;  %2606 = vmatmul.bf16.gmra.mxu0 %v2419_v60 }
 0x3ca   :  { %2350 = vmatmul.bf16.gmra.mxu3 %v4449_v34  ;;  %v2185_v21 = vpop.f32.mrf.mxu1 }
 0x3cb   :  { %v2412_v17 = vpack.c.bf16 %v2370_v5, %v2368_v16  ;;  %v2186_v51 = vadd.f32 %v2185_v21, %v2113_v45 }
 0x3cc   :  { %v2238_v48 = vpop.f32.mrf.mxu2 }
 0x3cd   :  { %v2311_v11 = vpop.f32.mrf.mxu3  ;;  %2659 = vmatmul.bf16.gmra.mxu1 %v2412_v17  ;;  %v2239_v0 = vadd.f32 %v2238_v48, %v4452_v15  ;;  %v2387_v10 = vmax.f32 %v2186_v51, 0.0 }
 0x3cf   :  { %v2312_v31 = vadd.f32 %v2311_v11, %v2239_v0 }
 0x3d1   :  { %v2372_v29 = vmax.f32 %v2312_v31, 0.0  ;;  %v2130_v31 = vadd.f32 %v4438_v25, %v4385_v62 }
 0x3d2   :  { %v2187_v57 = vpop.f32.mrf.mxu1 }
 0x3d3   :  { %v2188_v39 = vadd.f32 %v2187_v57, %v2115_v23 }
 0x3d4   :  { %v2240_v46 = vpop.f32.mrf.mxu2 }
 0x3d5   :  { %v2389_v34 = vmax.f32 %v2188_v39, 0.0  ;;  %v2241_v13 = vadd.f32 %v2240_v46, %v4452_v15  ;;  %v2313_v33 = vpop.f32.mrf.mxu3 }
 0x3d6   :  { %v4493_v12 = vpop.f32.mrf.mxu0 }
 0x3d7   :  { %v2314_v2 = vadd.f32 %v2313_v33, %v2241_v13  ;;  %v2421_v32 = vpack.c.bf16 %v2389_v34, %v2387_v10  ;;  %v2128_v10 = vadd.f32 %v4431_v30, %v4385_v62 }
 0x3d9   :  { %v2374_v42 = vmax.f32 %v2314_v2, 0.0  ;;  %2611 = vmatmul.bf16.gmra.mxu0 %v2421_v32 }
 0x3da   :  { %v2190_v28 = vpop.f32.mrf.mxu1 }
 0x3db   :  { %v2414_v6 = vpack.c.bf16 %v2374_v42, %v2372_v29  ;;  %v2191_v38 = vadd.f32 %v2190_v28, %v2118_v4 }
 0x3dc   :  { %v2243_v35 = vpop.f32.mrf.mxu2 }
 0x3dd   :  { %v2316_v52 = vpop.f32.mrf.mxu3  ;;  %2664 = vmatmul.bf16.gmra.mxu1 %v2414_v6  ;;  %v2244_v56 = vadd.f32 %v2243_v35, %v4452_v15  ;;  %v2391_v63 = vmax.f32 %v2191_v38, 0.0 }
 0x3de   :  { %v4495_v40 = vpop.f32.mrf.mxu0 }
 0x3df   :  { %v2317_v9 = vadd.f32 %v2316_v52, %v2244_v56 }
 0x3e1   :  { %v2376_v27 = vmax.f32 %v2317_v9, 0.0 }
 0x3e2   :  { %v2192_v43 = vpop.f32.mrf.mxu1 }
 0x3e3   :  { %v2193_v50 = vadd.f32 %v2192_v43, %v2120_v3 }
 0x3e4   :  { %v2245_v53 = vpop.f32.mrf.mxu2 }
 0x3e5   :  { %v2393_v49 = vmax.f32 %v2193_v50, 0.0  ;;  %v2246_v19 = vadd.f32 %v2245_v53, %v4452_v15  ;;  %v2318_v1 = vpop.f32.mrf.mxu3  ;;  %v2133_v50 = vadd.f32 %v4445_v61, %v4385_v62 }
 0x3e6   :  { %v4503_v47 = vpop.f32.mrf.mxu0 }
 0x3e7   :  { %v2319_v36 = vadd.f32 %v2318_v1, %v2246_v19  ;;  %v2423_v54 = vpack.c.bf16 %v2393_v49, %v2391_v63 }
 0x3e9   :  { %v2378_v24 = vmax.f32 %v2319_v36, 0.0  ;;  %2616 = vmatmul.bf16.gmra.mxu0 %v2423_v54  ;;  %v4533_v54 = vld [vmem:[%s4603_s6] ss:$0 sm:$0xff]  ;;  %s3668_s6 = smov [#allocation11]  }
 0x3ea   :  { %v2195_v41 = vpop.f32.mrf.mxu1  ;;  %s2738_s30 = sshll.u32 %s3668_s6, 4  ;;  %s2739_s30 = int_to_ptr.vmem [resolvable:$true] %s2738_s30 }
 0x3eb   :  { %v2416_v44 = vpack.c.bf16 %v2378_v24, %v2376_v27  ;;  %v2196_v22 = vadd.f32 %v2195_v41, %v2123_v14 }
 0x3ec   :  { %v2248_v59 = vpop.f32.mrf.mxu2 }
 0x3ed   :  { %v2321_v7 = vpop.f32.mrf.mxu3  ;;  %2669 = vmatmul.bf16.gmra.mxu1 %v2416_v44  ;;  %v2249_v26 = vadd.f32 %v2248_v59, %v4452_v15  ;;  %v2395_v16 = vmax.f32 %v2196_v22, 0.0  ;;  %v2573_v59 = vadd.f32 %v4533_v54, %v4493_v12 }
 0x3ee   :  { %v4505_v55 = vpop.f32.mrf.mxu0 }
 0x3ef   :  { %v2322_v5 = vadd.f32 %v2321_v7, %v2249_v26 }
 0x3f1   :  { %v2380_v8 = vmax.f32 %v2322_v5, 0.0 }
 0x3f2   :  { %v2197_v58 = vpop.f32.mrf.mxu1 }
 0x3f3   :  { %v2198_v37 = vadd.f32 %v2197_v58, %v2125_v18 }
 0x3f4   :  { %v2250_v60 = vpop.f32.mrf.mxu2 }
 0x3f5   :  { %v2397_v21 = vmax.f32 %v2198_v37, 0.0  ;;  %v2251_v17 = vadd.f32 %v2250_v60, %v4452_v15  ;;  %v2323_v48 = vpop.f32.mrf.mxu3 }
 0x3f6   :  { %v4513_v11 = vpop.f32.mrf.mxu0 }
 0x3f7   :  { %v2324_v45 = vadd.f32 %v2323_v48, %v2251_v17  ;;  %v2425_v23 = vpack.c.bf16 %v2397_v21, %v2395_v16  ;;  %v2575_v16 = vadd.f32 %v4533_v54, %v4495_v40 }
 0x3f9   :  { %v2382_v51 = vmax.f32 %v2324_v45, 0.0  ;;  %2621 = vmatmul.bf16.gmra.mxu0 %v2425_v23 }
 0x3fa   :  { %v2200_v20 = vpop.f32.mrf.mxu1 }
 0x3fb   :  { %v2418_v0 = vpack.c.bf16 %v2382_v51, %v2380_v8  ;;  %v2201_v34 = vadd.f32 %v2200_v20, %v2128_v10  ;;  %v2578_v20 = vadd.f32 %v4533_v54, %v4503_v47 }
 0x3fc   :  { %v2253_v57 = vpop.f32.mrf.mxu2 }
 0x3fd   :  { %v2326_v39 = vpop.f32.mrf.mxu3  ;;  %2674 = vmatmul.bf16.gmra.mxu1 %v2418_v0  ;;  %v2254_v13 = vadd.f32 %v2253_v57, %v4452_v15  ;;  %v2399_v29 = vmax.f32 %v2201_v34, 0.0 }
 0x3fe   :  { %v4515_v46 = vpop.f32.mrf.mxu0 }
 0x3ff   :  { %v2327_v42 = vadd.f32 %v2326_v39, %v2254_v13 }
 0x401   :  { %v2384_v30 = vmax.f32 %v2327_v42, 0.0 }
 0x402   :  { %v2202_v33 = vpop.f32.mrf.mxu1 }
 0x403   :  { %v2203_v2 = vadd.f32 %v2202_v33, %v2130_v31  ;;  %v2580_v33 = vadd.f32 %v4533_v54, %v4505_v55 }
 0x404   :  { %v2255_v32 = vpop.f32.mrf.mxu2 }
 0x405   :  { %v2401_v28 = vmax.f32 %v2203_v2, 0.0  ;;  %v2256_v6 = vadd.f32 %v2255_v32, %v4452_v15  ;;  %v2328_v35 = vpop.f32.mrf.mxu3 }
 0x406   :  { %v4523_v52 = vpop.f32.mrf.mxu0 }
 0x407   :  { %v2329_v4 = vadd.f32 %v2328_v35, %v2256_v6  ;;  %v2427_v3 = vpack.c.bf16 %v2401_v28, %v2399_v29 }
 0x409   :  { %v2386_v38 = vmax.f32 %v2329_v4, 0.0  ;;  %2626 = vmatmul.bf16.gmra.mxu0 %v2427_v3  ;;  %v2583_v3 = vadd.f32 %v4533_v54, %v4513_v11 }
 0x40a   :  { %v2205_v25 = vpop.f32.mrf.mxu1 }
 0x40b   :  { %v2420_v56 = vpack.c.bf16 %v2386_v38, %v2384_v30  ;;  %v2206_v9 = vadd.f32 %v2205_v25, %v2133_v50 }
 0x40c   :  { %v2258_v43 = vpop.f32.mrf.mxu2 }
 0x40d   :  { %v2331_v53 = vpop.f32.mrf.mxu3  ;;  %2679 = vmatmul.bf16.gmra.mxu1 %v2420_v56  ;;  %v2259_v49 = vadd.f32 %v2258_v43, %v4452_v15  ;;  %v2403_v1 = vmax.f32 %v2206_v9, 0.0  ;;  %v2585_v9 = vadd.f32 %v4533_v54, %v4515_v46 }
 0x40e   :  { %v4527_v63 = vpop.f32.mrf.mxu0 }
 0x40f   :  { %v2332_v27 = vadd.f32 %v2331_v53, %v2259_v49  ;;  %v2429_v61 = vpack.c.bf16 %v2403_v1, %v2403_v1 }
 0x411   :  { %v2388_v7 = vmax.f32 %v2332_v27, 0.0 }
 0x412   :  { %v2207_v19 = vpop.f32.mrf.mxu1 }
 0x414   :  { %v2260_v36 = vpop.f32.mrf.mxu2 }
 0x415   :  { %v2261_v24 = vadd.f32 %v2260_v36, %v4452_v15  ;;  %v2333_v41 = vpop.f32.mrf.mxu3 }
 0x416   :  { %v4536_v62 = vpop.f32.mrf.mxu0 }
 0x417   :  { %v2334_v44 = vadd.f32 %v2333_v41, %v2261_v24 }
 0x419   :  { %v2390_v14 = vmax.f32 %v2334_v44, 0.0  ;;  %2631 = vmatmul.bf16.gmra.mxu0 %v2429_v61  ;;  %v2588_v44 = vadd.f32 %v4533_v54, %v4523_v52 }
 0x41a   :  { %v2645_v18 = vpop.f32.mrf.mxu1 }
 0x41b   :  { %v2422_v22 = vpack.c.bf16 %v2390_v14, %v2388_v7  ;;  %v2646_v26 = vadd.f32 %v2645_v18, %v2573_v59 }
 0x41c   :  { %v2263_v58 = vpop.f32.mrf.mxu2 }
 0x41d   :  { %2709 = vst [vmem:[#allocation11] sm:$0xff] %v2646_v26  ;;  %v2336_v37 = vpop.f32.mrf.mxu3  ;;  %2684 = vmatmul.bf16.gmra.mxu1 %v2422_v22  ;;  %v2264_v5 = vadd.f32 %v2263_v58, %v4452_v15 }
 0x41e   :  { %v4540_v60 = vpop.f32.mrf.mxu0 }
 0x41f   :  { %v2337_v48 = vadd.f32 %v2336_v37, %v2264_v5 }
 0x421   :  { %v2392_v0 = vmax.f32 %v2337_v48, 0.0 }
 0x422   :  { %v2647_v21 = vpop.f32.mrf.mxu1 }
 0x423   :  { %v2648_v17 = vadd.f32 %v2647_v21, %v2575_v16  ;;  %v2590_v16 = vadd.f32 %v4533_v54, %v4527_v63  ;;  %v2595_v63 = vadd.f32 %v4533_v54, %v4540_v60 }
 0x424   :  { %v2265_v12 = vpop.f32.mrf.mxu2 }
 0x425   :  { %2710 = vst [vmem:[#allocation11 + $0x8] sm:$0xff] %v2648_v17  ;;  %v2266_v45 = vadd.f32 %v2265_v12, %v4452_v15  ;;  %v2338_v23 = vpop.f32.mrf.mxu3 }
 0x426   :  { %v4546_v8 = vpop.f32.mrf.mxu0 }
 0x427   :  { %v2339_v51 = vadd.f32 %v2338_v23, %v2266_v45  ;;  %v2593_v23 = vadd.f32 %v4533_v54, %v4536_v62 }
 0x429   :  { %v2394_v57 = vmax.f32 %v2339_v51, 0.0 }
 0x42a   :  { %v2650_v39 = vpop.f32.mrf.mxu1 }
 0x42b   :  { %v2424_v40 = vpack.c.bf16 %v2394_v57, %v2392_v0  ;;  %v2651_v10 = vadd.f32 %v2650_v39, %v2578_v20 }
 0x42c   :  { %v2268_v31 = vpop.f32.mrf.mxu2 }
 0x42d   :  { %2711 = vst [vmem:[#allocation11 + $0x10] sm:$0xff] %v2651_v10  ;;  %v2341_v34 = vpop.f32.mrf.mxu3  ;;  %2689 = vmatmul.bf16.gmra.mxu1 %v2424_v40  ;;  %v2269_v2 = vadd.f32 %v2268_v31, %v4452_v15  ;;  %v2598_v10 = vadd.f32 %v4533_v54, %v4546_v8 }
 0x42e   :  { %v4550_v13 = vpop.f32.mrf.mxu0 }
 0x42f   :  { %v2342_v47 = vadd.f32 %v2341_v34, %v2269_v2 }
 0x431   :  { %v2396_v30 = vmax.f32 %v2342_v47, 0.0 }
 0x432   :  { %v2652_v32 = vpop.f32.mrf.mxu1 }
 0x433   :  { %v2653_v29 = vadd.f32 %v2652_v32, %v2580_v33  ;;  %v2600_v33 = vadd.f32 %v4533_v54, %v4550_v13 }
 0x434   :  { %v2270_v42 = vpop.f32.mrf.mxu2 }
 0x435   :  { %2712 = vst [vmem:[#allocation11 + $0x18] sm:$0xff] %v2653_v29  ;;  %v2271_v28 = vadd.f32 %v2270_v42, %v4452_v15  ;;  %v2343_v6 = vpop.f32.mrf.mxu3 }
 0x436   :  { %v4556_v35 = vpop.f32.mrf.mxu0 }
 0x437   :  { %v2344_v4 = vadd.f32 %v2343_v6, %v2271_v28  ;;  %v2603_v60 = vadd.f32 %v4533_v54, %v4556_v35 }
 0x439   :  { %v2398_v38 = vmax.f32 %v2344_v4, 0.0 }
 0x43a   :  { %v2655_v25 = vpop.f32.mrf.mxu1 }
 0x43b   :  { %v2426_v55 = vpack.c.bf16 %v2398_v38, %v2396_v30  ;;  %v2656_v56 = vadd.f32 %v2655_v25, %v2583_v3 }
 0x43c   :  { %v2273_v43 = vpop.f32.mrf.mxu2 }
 0x43d   :  { %2713 = vst [vmem:[#allocation11 + $0x20] sm:$0xff] %v2656_v56  ;;  %v2346_v50 = vpop.f32.mrf.mxu3  ;;  %2694 = vmatmul.bf16.gmra.mxu1 %v2426_v55  ;;  %v2274_v49 = vadd.f32 %v2273_v43, %v4452_v15 }
 0x43e   :  { %v2604_v53 = vpop.f32.mrf.mxu0 }
 0x43f   :  { %v2347_v27 = vadd.f32 %v2346_v50, %v2274_v49  ;;  %v2605_v8 = vadd.f32 %v4533_v54, %v2604_v53 }
 0x441   :  { %v2400_v59 = vmax.f32 %v2347_v27, 0.0 }
 0x442   :  { %v2657_v19 = vpop.f32.mrf.mxu1 }
 0x443   :  { %v2658_v1 = vadd.f32 %v2657_v19, %v2585_v9 }
 0x444   :  { %v2275_v36 = vpop.f32.mrf.mxu2 }
 0x445   :  { %2714 = vst [vmem:[#allocation11 + $0x28] sm:$0xff] %v2658_v1  ;;  %v2276_v11 = vadd.f32 %v2275_v36, %v4452_v15  ;;  %v2348_v24 = vpop.f32.mrf.mxu3 }
 0x446   :  { %v2607_v41 = vpop.f32.mrf.mxu0 }
 0x447   :  { %v2349_v61 = vadd.f32 %v2348_v24, %v2276_v11  ;;  %v2608_v30 = vadd.f32 %v4533_v54, %v2607_v41 }
 0x449   :  { %v2402_v7 = vmax.f32 %v2349_v61, 0.0 }
 0x44a   :  { %v2660_v14 = vpop.f32.mrf.mxu1 }
 0x44b   :  { %v2428_v18 = vpack.c.bf16 %v2402_v7, %v2400_v59  ;;  %v2661_v46 = vadd.f32 %v2660_v14, %v2588_v44 }
 0x44c   :  { %v2278_v22 = vpop.f32.mrf.mxu2 }
 0x44d   :  { %2715 = vst [vmem:[#allocation11 + $0x30] sm:$0xff] %v2661_v46  ;;  %v2351_v26 = vpop.f32.mrf.mxu3  ;;  %2699 = vmatmul.bf16.gmra.mxu1 %v2428_v18  ;;  %v2279_v37 = vadd.f32 %v2278_v22, %v4452_v15 }
 0x44e   :  { %v2609_v58 = vpop.f32.mrf.mxu0 }
 0x44f   :  { %v2352_v21 = vadd.f32 %v2351_v26, %v2279_v37  ;;  %v2610_v55 = vadd.f32 %v4533_v54, %v2609_v58 }
 0x451   :  { %v2404_v45 = vmax.f32 %v2352_v21, 0.0 }
 0x452   :  { %v2662_v5 = vpop.f32.mrf.mxu1 }
 0x453   :  { %v2663_v17 = vadd.f32 %v2662_v5, %v2590_v16  ;;  %v2430_v20 = vpack.c.bf16 %v2404_v45, %v2404_v45 }
 0x454   :  { %v2280_v12 = vpop.f32.mrf.mxu2 }
 0x455   :  { %2716 = vst [vmem:[#allocation11 + $0x38] sm:$0xff] %v2663_v17  ;;  %v2353_v52 = vpop.f32.mrf.mxu3 }
 0x456   :  { %v2612_v48 = vpop.f32.mrf.mxu0 }
 0x457   :  { %v2613_v50 = vadd.f32 %v4533_v54, %v2612_v48 }
 0x45a   :  { %v2665_v51 = vpop.f32.mrf.mxu1 }
 0x45b   :  { %v2666_v0 = vadd.f32 %v2665_v51, %v2593_v23 }
 0x45d   :  { %2717 = vst [vmem:[#allocation11 + $0x40] sm:$0xff] %v2666_v0  ;;  %2704 = vmatmul.bf16.gmra.mxu1 %v2430_v20 }
 0x45e   :  { %v2614_v15 = vpop.f32.mrf.mxu0 }
 0x45f   :  { %v2615_v19 = vadd.f32 %v4533_v54, %v2614_v15 }
 0x462   :  { %v2667_v57 = vpop.f32.mrf.mxu1 }
 0x463   :  { %v2668_v39 = vadd.f32 %v2667_v57, %v2595_v63 }
 0x465   :  { %2718 = vst [vmem:[#allocation11 + $0x48] sm:$0xff] %v2668_v39 }
 0x466   :  { %v2617_v40 = vpop.f32.mrf.mxu0 }
 0x467   :  { %v2618_v27 = vadd.f32 %v4533_v54, %v2617_v40 }
 0x46a   :  { %v2670_v31 = vpop.f32.mrf.mxu1 }
 0x46b   :  { %v2671_v34 = vadd.f32 %v2670_v31, %v2598_v10 }
 0x46d   :  { %2719 = vst [vmem:[#allocation11 + $0x50] sm:$0xff] %v2671_v34 }
 0x46e   :  { %v2619_v62 = vpop.f32.mrf.mxu0 }
 0x46f   :  { %v2620_v41 = vadd.f32 %v4533_v54, %v2619_v62 }
 0x472   :  { %v2672_v2 = vpop.f32.mrf.mxu1 }
 0x473   :  { %v2673_v32 = vadd.f32 %v2672_v2, %v2600_v33 }
 0x475   :  { %2720 = vst [vmem:[#allocation11 + $0x58] sm:$0xff] %v2673_v32 }
 0x476   :  { %v2622_v29 = vpop.f32.mrf.mxu0 }
 0x477   :  { %v2623_v59 = vadd.f32 %v4533_v54, %v2622_v29 }
 0x47a   :  { %v2675_v42 = vpop.f32.mrf.mxu1 }
 0x47b   :  { %v2676_v47 = vadd.f32 %v2675_v42, %v2603_v60 }
 0x47d   :  { %2721 = vst [vmem:[#allocation11 + $0x60] sm:$0xff] %v2676_v47 }
 0x47e   :  { %v2624_v28 = vpop.f32.mrf.mxu0 }
 0x47f   :  { %v2625_v18 = vadd.f32 %v4533_v54, %v2624_v28 }
 0x482   :  { %v2677_v6 = vpop.f32.mrf.mxu1 }
 0x483   :  { %v2678_v4 = vadd.f32 %v2677_v6, %v2605_v8 }
 0x485   :  { %2722 = vst [vmem:[#allocation11 + $0x68] sm:$0xff] %v2678_v4 }
 0x486   :  { %v2627_v3 = vpop.f32.mrf.mxu0 }
 0x487   :  { %v2628_v26 = vadd.f32 %v4533_v54, %v2627_v3 }
 0x48a   :  { %v2680_v13 = vpop.f32.mrf.mxu1 }
 0x48b   :  { %v2681_v38 = vadd.f32 %v2680_v13, %v2608_v30 }
 0x48d   :  { %2723 = vst [vmem:[#allocation11 + $0x70] sm:$0xff] %v2681_v38 }
 0x48e   :  { %v2629_v25 = vpop.f32.mrf.mxu0 }
 0x48f   :  { %v2630_v16 = vadd.f32 %v4533_v54, %v2629_v25 }
 0x492   :  { %v2682_v56 = vpop.f32.mrf.mxu1 }
 0x493   :  { %v2683_v35 = vadd.f32 %v2682_v56, %v2610_v55 }
 0x495   :  { %2724 = vst [vmem:[#allocation11 + $0x78] sm:$0xff] %v2683_v35 }
 0x496   :  { %v2632_v43 = vpop.f32.mrf.mxu0 }
 0x497   :  { %v2633_v17 = vadd.f32 %v4533_v54, %v2632_v43 }
 0x49a   :  { %v2685_v9 = vpop.f32.mrf.mxu1 }
 0x49b   :  { %v2686_v53 = vadd.f32 %v2685_v9, %v2613_v50 }
 0x49d   :  { %2725 = vst [vmem:[#allocation11 + $0x80] sm:$0xff] %v2686_v53 }
 0x49e   :  { %v2634_v49 = vpop.f32.mrf.mxu0 }
 0x4a2   :  { %v2687_v1 = vpop.f32.mrf.mxu1 }
 0x4a3   :  { %v2688_v36 = vadd.f32 %v2687_v1, %v2615_v19 }
 0x4a5   :  { %2726 = vst [vmem:[#allocation11 + $0x88] sm:$0xff] %v2688_v36 }
 0x4aa   :  { %v2690_v11 = vpop.f32.mrf.mxu1 }
 0x4ab   :  { %v2691_v24 = vadd.f32 %v2690_v11, %v2618_v27 }
 0x4ad   :  { %2727 = vst [vmem:[#allocation11 + $0x90] sm:$0xff] %v2691_v24 }
 0x4b2   :  { %v2692_v61 = vpop.f32.mrf.mxu1 }
 0x4b3   :  { %v2693_v44 = vadd.f32 %v2692_v61, %v2620_v41 }
 0x4b5   :  { %2728 = vst [vmem:[#allocation11 + $0x98] sm:$0xff] %v2693_v44 }
 0x4ba   :  { %v2695_v7 = vpop.f32.mrf.mxu1 }
 0x4bb   :  { %v2696_v14 = vadd.f32 %v2695_v7, %v2623_v59 }
 0x4bd   :  { %2729 = vst [vmem:[#allocation11 + $0xa0] sm:$0xff] %v2696_v14 }
 0x4c2   :  { %v2697_v46 = vpop.f32.mrf.mxu1 }
 0x4c3   :  { %v2698_v22 = vadd.f32 %v2697_v46, %v2625_v18 }
 0x4c5   :  { %2730 = vst [vmem:[#allocation11 + $0xa8] sm:$0xff] %v2698_v22 }
 0x4ca   :  { %v2700_v58 = vpop.f32.mrf.mxu1 }
 0x4cb   :  { %v2701_v37 = vadd.f32 %v2700_v58, %v2628_v26 }
 0x4cd   :  { %2731 = vst [vmem:[#allocation11 + $0xb0] sm:$0xff] %v2701_v37 }
 0x4d2   :  { %v2702_v5 = vpop.f32.mrf.mxu1 }
 0x4d3   :  { %v2703_v21 = vadd.f32 %v2702_v5, %v2630_v16 }
 0x4d5   :  { %2732 = vst [vmem:[#allocation11 + $0xb8] sm:$0xff] %v2703_v21 }
 0x4da   :  { %v2705_v12 = vpop.f32.mrf.mxu1 }
 0x4db   :  { %v2706_v52 = vadd.f32 %v2705_v12, %v2633_v17 }
 0x4dd   :  { %2733 = vst [vmem:[#allocation11 + $0xc0] sm:$0xff] %v2706_v52 }
 0x4de   :  { %2746 = dma.vmem_to_hbm [thread:$0]  %s2739_s30, 3200, %s2741_s12, [#allocation4], %s3658_s9, %s3658_s9, %s3659_s10  }
 0x4e2   :  { %v2707_v48 = vpop.f32.mrf.mxu1 }
 0x4e3   :  { %3655 = dma.done.wait [#allocation4], 3200  }
 0x4e4   :  { %3656 = vsyncadd [#allocation4], 4294964096 }
 0x4e5   :  { %2751 = vsyncpa [#allocation3], 1 }
 0x4e6   :  { %2752 = vsyncpa [#allocation6], 1 }
 0x4e7   :  { %2753 = vsyncpa [#allocation9], 1 }
 0x4e8   :  { %2754 = vsyncpa [#allocation4], 1 }

</bundles_post_ra>
